<compile_context>
chip_gen: v7x
topology: tpu7x:2x2x1
jax: 0.10.0
libtpu: 0.0.40
codegen_flags: <defaults>
</compile_context>

<pallas_src>
import jax
import jax.numpy as jnp
from jax.experimental import pallas as pl
from jax.experimental.pallas import tpu as pltpu

EPS = 1e-5
C_PAD = 128  # lane-dense padded channel count


# ------------------------------ Pallas kernel --------------------------------

def _fused_resnet1_kernel(x_ref, w1_ref, w2_ref, g1_ref, b1_ref, g2_ref,
                          b2_ref, o_ref, hp_ref, patch_ref):
    """Whole Resnet1 forward on a VMEM-resident batch.

    x_ref     : (N, H, W, C)      f32   input, channel-padded to C = C_PAD
    w1/w2_ref : (9*C, C)          bf16  im2col conv weights
    g*/b*_ref : (1, C)            f32   BN gamma / beta (zero-padded)
    o_ref     : (N, H, W, C)      f32   output
    hp_ref    : (N, H+2, W+2, C)  f32   zero-haloed activation scratch
    patch_ref : (N*H*W, 9*C)      bf16  im2col patch scratch
    """
    N, H, W, C = x_ref.shape
    M = N * H * W
    inv_m = 1.0 / M

    # Zero only the halo border strips, once.  The interior is fully
    # overwritten before each conv and the border stays zero for both.
    zrow = jnp.zeros((N, 1, W + 2, C), jnp.float32)
    zcol = jnp.zeros((N, H + 2, 1, C), jnp.float32)
    hp_ref[:, pl.ds(0, 1), :, :] = zrow
    hp_ref[:, pl.ds(H + 1, 1), :, :] = zrow
    hp_ref[:, :, pl.ds(0, 1), :] = zcol
    hp_ref[:, :, pl.ds(W + 1, 1), :] = zcol

    def conv3x3(w_ref):
        # Explicit in-VMEM im2col: 9 shifted bf16 copies, then ONE MXU matmul
        # with K = 9*C (f32 accumulation).
        for dy in range(3):
            for dx in range(3):
                k = dy * 3 + dx
                tap = hp_ref[:, pl.ds(dy, H), pl.ds(dx, W), :]
                patch_ref[:, pl.ds(k * C, C)] = (
                    tap.astype(jnp.bfloat16).reshape(M, C))
        return jnp.dot(patch_ref[...], w_ref[...],
                       preferred_element_type=jnp.float32)         # (M, C) f32

    def bn_fold(acc, gamma, beta):
        # Training-mode BatchNorm folded to a per-channel affine:
        #   scale = gamma * rsqrt(var + eps), shift = beta - mean * scale
        s = jnp.sum(acc, axis=0, keepdims=True)                     # (1, C)
        q = jnp.sum(acc * acc, axis=0, keepdims=True)
        mean = s * inv_m
        var = q * inv_m - mean * mean          # biased batch variance
        scale = gamma * jax.lax.rsqrt(var + EPS)
        return scale, beta - mean * scale

    # conv1 -> BN1 (folded) -> ReLU; result goes straight back into the halo.
    hp_ref[:, pl.ds(1, H), pl.ds(1, W), :] = x_ref[...]
    acc1 = conv3x3(w1_ref)
    sc1, sh1 = bn_fold(acc1, g1_ref[...], b1_ref[...])
    h = jnp.maximum(acc1 * sc1 + sh1, 0.0)
    hp_ref[:, pl.ds(1, H), pl.ds(1, W), :] = h.reshape(N, H, W, C)

    # conv2 -> BN2 (folded) -> + identity -> ReLU
    acc2 = conv3x3(w2_ref)
    sc2, sh2 = bn_fold(acc2, g2_ref[...], b2_ref[...])
    out = jnp.maximum(acc2 * sc2 + sh2 + x_ref[...].reshape(M, C), 0.0)
    o_ref[...] = out.reshape(N, H, W, C)


# ------------------------------ JAX-side glue ---------------------------------

def _pad_vec(v):
    return jnp.pad(v.astype(jnp.float32),
                   (0, C_PAD - v.shape[0])).reshape(1, C_PAD)


def _weight_to_im2col(w_oihw):
    """PyTorch (Cout, Cin, 3, 3) -> bf16 im2col matrix (9*C_PAD, C_PAD)."""
    cout, cin = w_oihw.shape[0], w_oihw.shape[1]
    w = jnp.transpose(w_oihw, (2, 3, 1, 0)).astype(jnp.float32)     # (3,3,Ci,Co)
    w = jnp.pad(w, ((0, 0), (0, 0), (0, C_PAD - cin), (0, C_PAD - cout)))
    return w.reshape(9 * C_PAD, C_PAD).astype(jnp.bfloat16)


@jax.jit
def resnet1_forward(x_nchw, params):
    """Pallas forward matching Resnet1.forward on an NCHW float32 input."""
    w1, b1, g1, be1, w2, b2, g2, be2 = params
    # Conv biases are cancelled exactly by the training-mode BN mean
    # subtraction -> intentionally unused (saves DMAs + VPU work).
    del b1, b2
    N, C, H, W = x_nchw.shape
    assert w1.shape[0] == C, "residual add requires in_channel == out_channel"

    x = jnp.transpose(x_nchw, (0, 2, 3, 1)).astype(jnp.float32)     # NHWC
    x = jnp.pad(x, ((0, 0), (0, 0), (0, 0), (0, C_PAD - C)))        # lane-dense

    w1m = _weight_to_im2col(w1)
    w2m = _weight_to_im2col(w2)

    M = N * H * W
    out = pl.pallas_call(
        _fused_resnet1_kernel,
        out_shape=jax.ShapeDtypeStruct((N, H, W, C_PAD), jnp.float32),
        scratch_shapes=[
            pltpu.VMEM((N, H + 2, W + 2, C_PAD), jnp.float32),  # halo buffer
            pltpu.VMEM((M, 9 * C_PAD), jnp.bfloat16),           # im2col patches
        ],
        cost_estimate=pl.CostEstimate(
            flops=2 * 2 * M * 9 * C_PAD * C_PAD,
            transcendentals=0,
            bytes_accessed=2 * M * C_PAD * 4 + 2 * 9 * C_PAD * C_PAD * 2),
    )(x, w1m, w2m, _pad_vec(g1), _pad_vec(be1), _pad_vec(g2), _pad_vec(be2))

    # Tiny (8 KiB) final slice + layout change; cheaper than emitting
    # lane-sparse (C=4) stores from the kernel.
    return jnp.transpose(out[..., :C], (0, 3, 1, 2))


# --------------------------- pure-JAX reference -------------------------------

def _ref_forward(x, w1, b1, g1, be1, w2, b2, g2, be2):
    def conv(x_, w_, b_):
        y = jax.lax.conv_general_dilated(
            x_, w_, window_strides=(1, 1), padding=((1, 1), (1, 1)),
            dimension_numbers=("NCHW", "OIHW", "NCHW"))
        return y + b_.reshape(1, -1, 1, 1)

    def bn(y, g, b):  # training-mode BatchNorm2d
        mean = y.mean(axis=(0, 2, 3), keepdims=True)
        var = ((y - mean) ** 2).mean(axis=(0, 2, 3), keepdims=True)
        yhat = (y - mean) * jax.lax.rsqrt(var + EPS)
        return yhat * g.reshape(1, -1, 1, 1) + b.reshape(1, -1, 1, 1)

    h = jnp.maximum(bn(conv(x, w1, b1), g1, be1), 0.0)
    out = bn(conv(h, w2, b2), g2, be2) + x
    return jnp.maximum(out, 0.0)


# ----------------------------------- main --------------------------------------

if __name__ == "__main__":
    N, C, H, W = 2, 4, 16, 16   # in_channel == out_channel for the residual add

    key = jax.random.PRNGKey(0)
    kx, kw1, kw2, kb1, kb2 = jax.random.split(key, 5)

    x = jax.random.normal(kx, (N, C, H, W), jnp.float32)

    # PyTorch layouts: conv OIHW (+bias), BN per-channel (weight=1, bias=0 init)
    w1 = jax.random.normal(kw1, (C, C, 3, 3), jnp.float32) * 0.1
    b1 = jax.random.normal(kb1, (C,), jnp.float32) * 0.1
    w2 = jax.random.normal(kw2, (C, C, 3, 3), jnp.float32) * 0.1
    b2 = jax.random.normal(kb2, (C,), jnp.float32) * 0.1
    g1 = jnp.ones((C,), jnp.float32)
    be1 = jnp.zeros((C,), jnp.float32)
    g2 = jnp.ones((C,), jnp.float32)
    be2 = jnp.zeros((C,), jnp.float32)

    params = (w1, b1, g1, be1, w2, b2, g2, be2)

    out = jax.block_until_ready(resnet1_forward(x, params))
    ref = _ref_forward(x, w1, b1, g1, be1, w2, b2, g2, be2)

    assert out.shape == (N, C, H, W)
    # bf16 MXU operands (per perf review) -> looser tolerance vs f32 reference.
    assert jnp.allclose(out, ref, atol=5e-2, rtol=5e-2), "mismatch vs JAX reference"

    print("KERNEL_OK")
</pallas_src>

<mosaic_0001>
module attributes {stable_mosaic.version = 11 : i64} {
  func.func @_fused_resnet1_kernel(%arg0: memref<2x16x16x128xf32, #tpu.memory_space<vmem>>, %arg1: memref<1152x128xbf16, #tpu.memory_space<vmem>>, %arg2: memref<1152x128xbf16, #tpu.memory_space<vmem>>, %arg3: memref<1x128xf32, #tpu.memory_space<vmem>>, %arg4: memref<1x128xf32, #tpu.memory_space<vmem>>, %arg5: memref<1x128xf32, #tpu.memory_space<vmem>>, %arg6: memref<1x128xf32, #tpu.memory_space<vmem>>, %arg7: memref<2x16x16x128xf32, #tpu.memory_space<vmem>>, %arg8: memref<2x18x18x128xf32, #tpu.memory_space<vmem>>, %arg9: memref<512x1152xbf16, #tpu.memory_space<vmem>>) attributes {dimension_semantics = [], scalar_prefetch = 0 : i64, scratch_operands = 2 : i64, tpu.core_type = #tpu.core_type<tc>} {
    %cst = arith.constant 0.000000e+00 : f32
    %0 = vector.broadcast %cst : f32 to vector<2x1x18x128xf32>
    %cst_0 = arith.constant 0.000000e+00 : f32
    %1 = vector.broadcast %cst_0 : f32 to vector<2x18x1x128xf32>
    %c0 = arith.constant 0 : index
    %c0_1 = arith.constant 0 : index
    %c0_2 = arith.constant 0 : index
    %c0_3 = arith.constant 0 : index
    %2 = vector.load %arg8[%c0, %c0_1, %c0_2, %c0_3] : memref<2x18x18x128xf32, #tpu.memory_space<vmem>>, vector<2x1x18x128xf32>
    tpu.vector_store %arg8[%c0, %c0_1, %c0_2, %c0_3], %0 {strides = array<i32>} : memref<2x18x18x128xf32, #tpu.memory_space<vmem>>, vector<2x1x18x128xf32>,
    %c0_4 = arith.constant 0 : index
    %c17 = arith.constant 17 : index
    %c0_5 = arith.constant 0 : index
    %c0_6 = arith.constant 0 : index
    %3 = vector.load %arg8[%c0_4, %c17, %c0_5, %c0_6] : memref<2x18x18x128xf32, #tpu.memory_space<vmem>>, vector<2x1x18x128xf32>
    tpu.vector_store %arg8[%c0_4, %c17, %c0_5, %c0_6], %0 {strides = array<i32>} : memref<2x18x18x128xf32, #tpu.memory_space<vmem>>, vector<2x1x18x128xf32>,
    %c0_7 = arith.constant 0 : index
    %c0_8 = arith.constant 0 : index
    %c0_9 = arith.constant 0 : index
    %c0_10 = arith.constant 0 : index
    %4 = vector.load %arg8[%c0_7, %c0_8, %c0_9, %c0_10] : memref<2x18x18x128xf32, #tpu.memory_space<vmem>>, vector<2x18x1x128xf32>
    tpu.vector_store %arg8[%c0_7, %c0_8, %c0_9, %c0_10], %1 {strides = array<i32>} : memref<2x18x18x128xf32, #tpu.memory_space<vmem>>, vector<2x18x1x128xf32>,
    %c0_11 = arith.constant 0 : index
    %c0_12 = arith.constant 0 : index
    %c17_13 = arith.constant 17 : index
    %c0_14 = arith.constant 0 : index
    %5 = vector.load %arg8[%c0_11, %c0_12, %c17_13, %c0_14] : memref<2x18x18x128xf32, #tpu.memory_space<vmem>>, vector<2x18x1x128xf32>
    tpu.vector_store %arg8[%c0_11, %c0_12, %c17_13, %c0_14], %1 {strides = array<i32>} : memref<2x18x18x128xf32, #tpu.memory_space<vmem>>, vector<2x18x1x128xf32>,
    %c0_15 = arith.constant 0 : index
    %c0_16 = arith.constant 0 : index
    %c0_17 = arith.constant 0 : index
    %c0_18 = arith.constant 0 : index
    %6 = vector.load %arg0[%c0_15, %c0_16, %c0_17, %c0_18] : memref<2x16x16x128xf32, #tpu.memory_space<vmem>>, vector<2x16x16x128xf32>
    %c0_19 = arith.constant 0 : index
    %c1 = arith.constant 1 : index
    %c1_20 = arith.constant 1 : index
    %c0_21 = arith.constant 0 : index
    %7 = vector.load %arg8[%c0_19, %c1, %c1_20, %c0_21] : memref<2x18x18x128xf32, #tpu.memory_space<vmem>>, vector<2x16x16x128xf32>
    tpu.vector_store %arg8[%c0_19, %c1, %c1_20, %c0_21], %6 {strides = array<i32>} : memref<2x18x18x128xf32, #tpu.memory_space<vmem>>, vector<2x16x16x128xf32>,
    %c0_22 = arith.constant 0 : index
    %c0_23 = arith.constant 0 : index
    %c0_24 = arith.constant 0 : index
    %c0_25 = arith.constant 0 : index
    %8 = vector.load %arg8[%c0_22, %c0_23, %c0_24, %c0_25] : memref<2x18x18x128xf32, #tpu.memory_space<vmem>>, vector<2x16x16x128xf32>
    %9 = arith.truncf %8 : vector<2x16x16x128xf32> to vector<2x16x16x128xbf16>
    %10 = vector.shape_cast %9 : vector<2x16x16x128xbf16> to vector<512x128xbf16>
    %c0_26 = arith.constant 0 : index
    %c0_27 = arith.constant 0 : index
    %11 = vector.load %arg9[%c0_26, %c0_27] : memref<512x1152xbf16, #tpu.memory_space<vmem>>, vector<512x128xbf16>
    tpu.vector_store %arg9[%c0_26, %c0_27], %10 {strides = array<i32>} : memref<512x1152xbf16, #tpu.memory_space<vmem>>, vector<512x128xbf16>,
    %c0_28 = arith.constant 0 : index
    %c0_29 = arith.constant 0 : index
    %c1_30 = arith.constant 1 : index
    %c0_31 = arith.constant 0 : index
    %12 = vector.load %arg8[%c0_28, %c0_29, %c1_30, %c0_31] : memref<2x18x18x128xf32, #tpu.memory_space<vmem>>, vector<2x16x16x128xf32>
    %13 = arith.truncf %12 : vector<2x16x16x128xf32> to vector<2x16x16x128xbf16>
    %14 = vector.shape_cast %13 : vector<2x16x16x128xbf16> to vector<512x128xbf16>
    %c0_32 = arith.constant 0 : index
    %c128 = arith.constant 128 : index
    %15 = vector.load %arg9[%c0_32, %c128] : memref<512x1152xbf16, #tpu.memory_space<vmem>>, vector<512x128xbf16>
    tpu.vector_store %arg9[%c0_32, %c128], %14 {strides = array<i32>} : memref<512x1152xbf16, #tpu.memory_space<vmem>>, vector<512x128xbf16>,
    %c0_33 = arith.constant 0 : index
    %c0_34 = arith.constant 0 : index
    %c2 = arith.constant 2 : index
    %c0_35 = arith.constant 0 : index
    %16 = vector.load %arg8[%c0_33, %c0_34, %c2, %c0_35] : memref<2x18x18x128xf32, #tpu.memory_space<vmem>>, vector<2x16x16x128xf32>
    %17 = arith.truncf %16 : vector<2x16x16x128xf32> to vector<2x16x16x128xbf16>
    %18 = vector.shape_cast %17 : vector<2x16x16x128xbf16> to vector<512x128xbf16>
    %c0_36 = arith.constant 0 : index
    %c256 = arith.constant 256 : index
    %19 = vector.load %arg9[%c0_36, %c256] : memref<512x1152xbf16, #tpu.memory_space<vmem>>, vector<512x128xbf16>
    tpu.vector_store %arg9[%c0_36, %c256], %18 {strides = array<i32>} : memref<512x1152xbf16, #tpu.memory_space<vmem>>, vector<512x128xbf16>,
    %c0_37 = arith.constant 0 : index
    %c1_38 = arith.constant 1 : index
    %c0_39 = arith.constant 0 : index
    %c0_40 = arith.constant 0 : index
    %20 = vector.load %arg8[%c0_37, %c1_38, %c0_39, %c0_40] : memref<2x18x18x128xf32, #tpu.memory_space<vmem>>, vector<2x16x16x128xf32>
    %21 = arith.truncf %20 : vector<2x16x16x128xf32> to vector<2x16x16x128xbf16>
    %22 = vector.shape_cast %21 : vector<2x16x16x128xbf16> to vector<512x128xbf16>
    %c0_41 = arith.constant 0 : index
    %c384 = arith.constant 384 : index
    %23 = vector.load %arg9[%c0_41, %c384] : memref<512x1152xbf16, #tpu.memory_space<vmem>>, vector<512x128xbf16>
    tpu.vector_store %arg9[%c0_41, %c384], %22 {strides = array<i32>} : memref<512x1152xbf16, #tpu.memory_space<vmem>>, vector<512x128xbf16>,
    %c0_42 = arith.constant 0 : index
    %c1_43 = arith.constant 1 : index
    %c1_44 = arith.constant 1 : index
    %c0_45 = arith.constant 0 : index
    %24 = vector.load %arg8[%c0_42, %c1_43, %c1_44, %c0_45] : memref<2x18x18x128xf32, #tpu.memory_space<vmem>>, vector<2x16x16x128xf32>
    %25 = arith.truncf %24 : vector<2x16x16x128xf32> to vector<2x16x16x128xbf16>
    %26 = vector.shape_cast %25 : vector<2x16x16x128xbf16> to vector<512x128xbf16>
    %c0_46 = arith.constant 0 : index
    %c512 = arith.constant 512 : index
    %27 = vector.load %arg9[%c0_46, %c512] : memref<512x1152xbf16, #tpu.memory_space<vmem>>, vector<512x128xbf16>
    tpu.vector_store %arg9[%c0_46, %c512], %26 {strides = array<i32>} : memref<512x1152xbf16, #tpu.memory_space<vmem>>, vector<512x128xbf16>,
    %c0_47 = arith.constant 0 : index
    %c1_48 = arith.constant 1 : index
    %c2_49 = arith.constant 2 : index
    %c0_50 = arith.constant 0 : index
    %28 = vector.load %arg8[%c0_47, %c1_48, %c2_49, %c0_50] : memref<2x18x18x128xf32, #tpu.memory_space<vmem>>, vector<2x16x16x128xf32>
    %29 = arith.truncf %28 : vector<2x16x16x128xf32> to vector<2x16x16x128xbf16>
    %30 = vector.shape_cast %29 : vector<2x16x16x128xbf16> to vector<512x128xbf16>
    %c0_51 = arith.constant 0 : index
    %c640 = arith.constant 640 : index
    %31 = vector.load %arg9[%c0_51, %c640] : memref<512x1152xbf16, #tpu.memory_space<vmem>>, vector<512x128xbf16>
    tpu.vector_store %arg9[%c0_51, %c640], %30 {strides = array<i32>} : memref<512x1152xbf16, #tpu.memory_space<vmem>>, vector<512x128xbf16>,
    %c0_52 = arith.constant 0 : index
    %c2_53 = arith.constant 2 : index
    %c0_54 = arith.constant 0 : index
    %c0_55 = arith.constant 0 : index
    %32 = vector.load %arg8[%c0_52, %c2_53, %c0_54, %c0_55] : memref<2x18x18x128xf32, #tpu.memory_space<vmem>>, vector<2x16x16x128xf32>
    %33 = arith.truncf %32 : vector<2x16x16x128xf32> to vector<2x16x16x128xbf16>
    %34 = vector.shape_cast %33 : vector<2x16x16x128xbf16> to vector<512x128xbf16>
    %c0_56 = arith.constant 0 : index
    %c768 = arith.constant 768 : index
    %35 = vector.load %arg9[%c0_56, %c768] : memref<512x1152xbf16, #tpu.memory_space<vmem>>, vector<512x128xbf16>
    tpu.vector_store %arg9[%c0_56, %c768], %34 {strides = array<i32>} : memref<512x1152xbf16, #tpu.memory_space<vmem>>, vector<512x128xbf16>,
    %c0_57 = arith.constant 0 : index
    %c2_58 = arith.constant 2 : index
    %c1_59 = arith.constant 1 : index
    %c0_60 = arith.constant 0 : index
    %36 = vector.load %arg8[%c0_57, %c2_58, %c1_59, %c0_60] : memref<2x18x18x128xf32, #tpu.memory_space<vmem>>, vector<2x16x16x128xf32>
    %37 = arith.truncf %36 : vector<2x16x16x128xf32> to vector<2x16x16x128xbf16>
    %38 = vector.shape_cast %37 : vector<2x16x16x128xbf16> to vector<512x128xbf16>
    %c0_61 = arith.constant 0 : index
    %c896 = arith.constant 896 : index
    %39 = vector.load %arg9[%c0_61, %c896] : memref<512x1152xbf16, #tpu.memory_space<vmem>>, vector<512x128xbf16>
    tpu.vector_store %arg9[%c0_61, %c896], %38 {strides = array<i32>} : memref<512x1152xbf16, #tpu.memory_space<vmem>>, vector<512x128xbf16>,
    %c0_62 = arith.constant 0 : index
    %c2_63 = arith.constant 2 : index
    %c2_64 = arith.constant 2 : index
    %c0_65 = arith.constant 0 : index
    %40 = vector.load %arg8[%c0_62, %c2_63, %c2_64, %c0_65] : memref<2x18x18x128xf32, #tpu.memory_space<vmem>>, vector<2x16x16x128xf32>
    %41 = arith.truncf %40 : vector<2x16x16x128xf32> to vector<2x16x16x128xbf16>
    %42 = vector.shape_cast %41 : vector<2x16x16x128xbf16> to vector<512x128xbf16>
    %c0_66 = arith.constant 0 : index
    %c1024 = arith.constant 1024 : index
    %43 = vector.load %arg9[%c0_66, %c1024] : memref<512x1152xbf16, #tpu.memory_space<vmem>>, vector<512x128xbf16>
    tpu.vector_store %arg9[%c0_66, %c1024], %42 {strides = array<i32>} : memref<512x1152xbf16, #tpu.memory_space<vmem>>, vector<512x128xbf16>,
    %c0_67 = arith.constant 0 : index
    %c0_68 = arith.constant 0 : index
    %44 = vector.load %arg9[%c0_67, %c0_68] : memref<512x1152xbf16, #tpu.memory_space<vmem>>, vector<512x1152xbf16>
    %c0_69 = arith.constant 0 : index
    %c0_70 = arith.constant 0 : index
    %45 = vector.load %arg1[%c0_69, %c0_70] : memref<1152x128xbf16, #tpu.memory_space<vmem>>, vector<1152x128xbf16>
    %cst_71 = arith.constant dense<0.000000e+00> : vector<512x128xf32>
    %46 = tpu.matmul %44, %45, %cst_71 {dimension_numbers = #tpu.dot_dimension_numbers<[1], [0], [0], [1], [0, 0, 1, 1], [], []>} : vector<512x1152xbf16>, vector<1152x128xbf16>, vector<512x128xf32> -> vector<512x128xf32>
    %c0_72 = arith.constant 0 : index
    %c0_73 = arith.constant 0 : index
    %47 = vector.load %arg3[%c0_72, %c0_73] : memref<1x128xf32, #tpu.memory_space<vmem>>, vector<1x128xf32>
    %c0_74 = arith.constant 0 : index
    %c0_75 = arith.constant 0 : index
    %48 = vector.load %arg4[%c0_74, %c0_75] : memref<1x128xf32, #tpu.memory_space<vmem>>, vector<1x128xf32>
    %cst_76 = arith.constant dense<0.000000e+00> : vector<128xf32>
    %49 = vector.multi_reduction <add>, %46, %cst_76 [0] : vector<512x128xf32> to vector<128xf32>
    %50 = vector.shape_cast %49 : vector<128xf32> to vector<1x128xf32>
    %51 = arith.mulf %46, %46 : vector<512x128xf32>
    %cst_77 = arith.constant dense<0.000000e+00> : vector<128xf32>
    %52 = vector.multi_reduction <add>, %51, %cst_77 [0] : vector<512x128xf32> to vector<128xf32>
    %53 = vector.shape_cast %52 : vector<128xf32> to vector<1x128xf32>
    %cst_78 = arith.constant 0.001953125 : f32
    %54 = vector.broadcast %cst_78 : f32 to vector<1x128xf32>
    %55 = arith.mulf %50, %54 : vector<1x128xf32>
    %cst_79 = arith.constant 0.001953125 : f32
    %56 = vector.broadcast %cst_79 : f32 to vector<1x128xf32>
    %57 = arith.mulf %53, %56 : vector<1x128xf32>
    %58 = arith.mulf %55, %55 : vector<1x128xf32>
    %59 = arith.subf %57, %58 : vector<1x128xf32>
    %cst_80 = arith.constant 9.99999974E-6 : f32
    %60 = vector.broadcast %cst_80 : f32 to vector<1x128xf32>
    %61 = arith.addf %59, %60 : vector<1x128xf32>
    %62 = math.rsqrt %61 : vector<1x128xf32>
    %63 = arith.mulf %47, %62 : vector<1x128xf32>
    %64 = arith.mulf %55, %63 : vector<1x128xf32>
    %65 = arith.subf %48, %64 : vector<1x128xf32>
    %66 = vector.broadcast %63 : vector<1x128xf32> to vector<512x128xf32>
    %67 = arith.mulf %46, %66 : vector<512x128xf32>
    %68 = vector.broadcast %65 : vector<1x128xf32> to vector<512x128xf32>
    %69 = arith.addf %67, %68 : vector<512x128xf32>
    %cst_81 = arith.constant 0.000000e+00 : f32
    %70 = vector.broadcast %cst_81 : f32 to vector<512x128xf32>
    %71 = arith.maximumf %69, %70 : vector<512x128xf32>
    %72 = vector.shape_cast %71 : vector<512x128xf32> to vector<2x16x16x128xf32>
    %c0_82 = arith.constant 0 : index
    %c1_83 = arith.constant 1 : index
    %c1_84 = arith.constant 1 : index
    %c0_85 = arith.constant 0 : index
    %73 = vector.load %arg8[%c0_82, %c1_83, %c1_84, %c0_85] : memref<2x18x18x128xf32, #tpu.memory_space<vmem>>, vector<2x16x16x128xf32>
    tpu.vector_store %arg8[%c0_82, %c1_83, %c1_84, %c0_85], %72 {strides = array<i32>} : memref<2x18x18x128xf32, #tpu.memory_space<vmem>>, vector<2x16x16x128xf32>,
    %c0_86 = arith.constant 0 : index
    %c0_87 = arith.constant 0 : index
    %c0_88 = arith.constant 0 : index
    %c0_89 = arith.constant 0 : index
    %74 = vector.load %arg8[%c0_86, %c0_87, %c0_88, %c0_89] : memref<2x18x18x128xf32, #tpu.memory_space<vmem>>, vector<2x16x16x128xf32>
    %75 = arith.truncf %74 : vector<2x16x16x128xf32> to vector<2x16x16x128xbf16>
    %76 = vector.shape_cast %75 : vector<2x16x16x128xbf16> to vector<512x128xbf16>
    %c0_90 = arith.constant 0 : index
    %c0_91 = arith.constant 0 : index
    %77 = vector.load %arg9[%c0_90, %c0_91] : memref<512x1152xbf16, #tpu.memory_space<vmem>>, vector<512x128xbf16>
    tpu.vector_store %arg9[%c0_90, %c0_91], %76 {strides = array<i32>} : memref<512x1152xbf16, #tpu.memory_space<vmem>>, vector<512x128xbf16>,
    %c0_92 = arith.constant 0 : index
    %c0_93 = arith.constant 0 : index
    %c1_94 = arith.constant 1 : index
    %c0_95 = arith.constant 0 : index
    %78 = vector.load %arg8[%c0_92, %c0_93, %c1_94, %c0_95] : memref<2x18x18x128xf32, #tpu.memory_space<vmem>>, vector<2x16x16x128xf32>
    %79 = arith.truncf %78 : vector<2x16x16x128xf32> to vector<2x16x16x128xbf16>
    %80 = vector.shape_cast %79 : vector<2x16x16x128xbf16> to vector<512x128xbf16>
    %c0_96 = arith.constant 0 : index
    %c128_97 = arith.constant 128 : index
    %81 = vector.load %arg9[%c0_96, %c128_97] : memref<512x1152xbf16, #tpu.memory_space<vmem>>, vector<512x128xbf16>
    tpu.vector_store %arg9[%c0_96, %c128_97], %80 {strides = array<i32>} : memref<512x1152xbf16, #tpu.memory_space<vmem>>, vector<512x128xbf16>,
    %c0_98 = arith.constant 0 : index
    %c0_99 = arith.constant 0 : index
    %c2_100 = arith.constant 2 : index
    %c0_101 = arith.constant 0 : index
    %82 = vector.load %arg8[%c0_98, %c0_99, %c2_100, %c0_101] : memref<2x18x18x128xf32, #tpu.memory_space<vmem>>, vector<2x16x16x128xf32>
    %83 = arith.truncf %82 : vector<2x16x16x128xf32> to vector<2x16x16x128xbf16>
    %84 = vector.shape_cast %83 : vector<2x16x16x128xbf16> to vector<512x128xbf16>
    %c0_102 = arith.constant 0 : index
    %c256_103 = arith.constant 256 : index
    %85 = vector.load %arg9[%c0_102, %c256_103] : memref<512x1152xbf16, #tpu.memory_space<vmem>>, vector<512x128xbf16>
    tpu.vector_store %arg9[%c0_102, %c256_103], %84 {strides = array<i32>} : memref<512x1152xbf16, #tpu.memory_space<vmem>>, vector<512x128xbf16>,
    %c0_104 = arith.constant 0 : index
    %c1_105 = arith.constant 1 : index
    %c0_106 = arith.constant 0 : index
    %c0_107 = arith.constant 0 : index
    %86 = vector.load %arg8[%c0_104, %c1_105, %c0_106, %c0_107] : memref<2x18x18x128xf32, #tpu.memory_space<vmem>>, vector<2x16x16x128xf32>
    %87 = arith.truncf %86 : vector<2x16x16x128xf32> to vector<2x16x16x128xbf16>
    %88 = vector.shape_cast %87 : vector<2x16x16x128xbf16> to vector<512x128xbf16>
    %c0_108 = arith.constant 0 : index
    %c384_109 = arith.constant 384 : index
    %89 = vector.load %arg9[%c0_108, %c384_109] : memref<512x1152xbf16, #tpu.memory_space<vmem>>, vector<512x128xbf16>
    tpu.vector_store %arg9[%c0_108, %c384_109], %88 {strides = array<i32>} : memref<512x1152xbf16, #tpu.memory_space<vmem>>, vector<512x128xbf16>,
    %c0_110 = arith.constant 0 : index
    %c1_111 = arith.constant 1 : index
    %c1_112 = arith.constant 1 : index
    %c0_113 = arith.constant 0 : index
    %90 = vector.load %arg8[%c0_110, %c1_111, %c1_112, %c0_113] : memref<2x18x18x128xf32, #tpu.memory_space<vmem>>, vector<2x16x16x128xf32>
    %91 = arith.truncf %90 : vector<2x16x16x128xf32> to vector<2x16x16x128xbf16>
    %92 = vector.shape_cast %91 : vector<2x16x16x128xbf16> to vector<512x128xbf16>
    %c0_114 = arith.constant 0 : index
    %c512_115 = arith.constant 512 : index
    %93 = vector.load %arg9[%c0_114, %c512_115] : memref<512x1152xbf16, #tpu.memory_space<vmem>>, vector<512x128xbf16>
    tpu.vector_store %arg9[%c0_114, %c512_115], %92 {strides = array<i32>} : memref<512x1152xbf16, #tpu.memory_space<vmem>>, vector<512x128xbf16>,
    %c0_116 = arith.constant 0 : index
    %c1_117 = arith.constant 1 : index
    %c2_118 = arith.constant 2 : index
    %c0_119 = arith.constant 0 : index
    %94 = vector.load %arg8[%c0_116, %c1_117, %c2_118, %c0_119] : memref<2x18x18x128xf32, #tpu.memory_space<vmem>>, vector<2x16x16x128xf32>
    %95 = arith.truncf %94 : vector<2x16x16x128xf32> to vector<2x16x16x128xbf16>
    %96 = vector.shape_cast %95 : vector<2x16x16x128xbf16> to vector<512x128xbf16>
    %c0_120 = arith.constant 0 : index
    %c640_121 = arith.constant 640 : index
    %97 = vector.load %arg9[%c0_120, %c640_121] : memref<512x1152xbf16, #tpu.memory_space<vmem>>, vector<512x128xbf16>
    tpu.vector_store %arg9[%c0_120, %c640_121], %96 {strides = array<i32>} : memref<512x1152xbf16, #tpu.memory_space<vmem>>, vector<512x128xbf16>,
    %c0_122 = arith.constant 0 : index
    %c2_123 = arith.constant 2 : index
    %c0_124 = arith.constant 0 : index
    %c0_125 = arith.constant 0 : index
    %98 = vector.load %arg8[%c0_122, %c2_123, %c0_124, %c0_125] : memref<2x18x18x128xf32, #tpu.memory_space<vmem>>, vector<2x16x16x128xf32>
    %99 = arith.truncf %98 : vector<2x16x16x128xf32> to vector<2x16x16x128xbf16>
    %100 = vector.shape_cast %99 : vector<2x16x16x128xbf16> to vector<512x128xbf16>
    %c0_126 = arith.constant 0 : index
    %c768_127 = arith.constant 768 : index
    %101 = vector.load %arg9[%c0_126, %c768_127] : memref<512x1152xbf16, #tpu.memory_space<vmem>>, vector<512x128xbf16>
    tpu.vector_store %arg9[%c0_126, %c768_127], %100 {strides = array<i32>} : memref<512x1152xbf16, #tpu.memory_space<vmem>>, vector<512x128xbf16>,
    %c0_128 = arith.constant 0 : index
    %c2_129 = arith.constant 2 : index
    %c1_130 = arith.constant 1 : index
    %c0_131 = arith.constant 0 : index
    %102 = vector.load %arg8[%c0_128, %c2_129, %c1_130, %c0_131] : memref<2x18x18x128xf32, #tpu.memory_space<vmem>>, vector<2x16x16x128xf32>
    %103 = arith.truncf %102 : vector<2x16x16x128xf32> to vector<2x16x16x128xbf16>
    %104 = vector.shape_cast %103 : vector<2x16x16x128xbf16> to vector<512x128xbf16>
    %c0_132 = arith.constant 0 : index
    %c896_133 = arith.constant 896 : index
    %105 = vector.load %arg9[%c0_132, %c896_133] : memref<512x1152xbf16, #tpu.memory_space<vmem>>, vector<512x128xbf16>
    tpu.vector_store %arg9[%c0_132, %c896_133], %104 {strides = array<i32>} : memref<512x1152xbf16, #tpu.memory_space<vmem>>, vector<512x128xbf16>,
    %c0_134 = arith.constant 0 : index
    %c2_135 = arith.constant 2 : index
    %c2_136 = arith.constant 2 : index
    %c0_137 = arith.constant 0 : index
    %106 = vector.load %arg8[%c0_134, %c2_135, %c2_136, %c0_137] : memref<2x18x18x128xf32, #tpu.memory_space<vmem>>, vector<2x16x16x128xf32>
    %107 = arith.truncf %106 : vector<2x16x16x128xf32> to vector<2x16x16x128xbf16>
    %108 = vector.shape_cast %107 : vector<2x16x16x128xbf16> to vector<512x128xbf16>
    %c0_138 = arith.constant 0 : index
    %c1024_139 = arith.constant 1024 : index
    %109 = vector.load %arg9[%c0_138, %c1024_139] : memref<512x1152xbf16, #tpu.memory_space<vmem>>, vector<512x128xbf16>
    tpu.vector_store %arg9[%c0_138, %c1024_139], %108 {strides = array<i32>} : memref<512x1152xbf16, #tpu.memory_space<vmem>>, vector<512x128xbf16>,
    %c0_140 = arith.constant 0 : index
    %c0_141 = arith.constant 0 : index
    %110 = vector.load %arg9[%c0_140, %c0_141] : memref<512x1152xbf16, #tpu.memory_space<vmem>>, vector<512x1152xbf16>
    %c0_142 = arith.constant 0 : index
    %c0_143 = arith.constant 0 : index
    %111 = vector.load %arg2[%c0_142, %c0_143] : memref<1152x128xbf16, #tpu.memory_space<vmem>>, vector<1152x128xbf16>
    %cst_144 = arith.constant dense<0.000000e+00> : vector<512x128xf32>
    %112 = tpu.matmul %110, %111, %cst_144 {dimension_numbers = #tpu.dot_dimension_numbers<[1], [0], [0], [1], [0, 0, 1, 1], [], []>} : vector<512x1152xbf16>, vector<1152x128xbf16>, vector<512x128xf32> -> vector<512x128xf32>
    %c0_145 = arith.constant 0 : index
    %c0_146 = arith.constant 0 : index
    %113 = vector.load %arg5[%c0_145, %c0_146] : memref<1x128xf32, #tpu.memory_space<vmem>>, vector<1x128xf32>
    %c0_147 = arith.constant 0 : index
    %c0_148 = arith.constant 0 : index
    %114 = vector.load %arg6[%c0_147, %c0_148] : memref<1x128xf32, #tpu.memory_space<vmem>>, vector<1x128xf32>
    %cst_149 = arith.constant dense<0.000000e+00> : vector<128xf32>
    %115 = vector.multi_reduction <add>, %112, %cst_149 [0] : vector<512x128xf32> to vector<128xf32>
    %116 = vector.shape_cast %115 : vector<128xf32> to vector<1x128xf32>
    %117 = arith.mulf %112, %112 : vector<512x128xf32>
    %cst_150 = arith.constant dense<0.000000e+00> : vector<128xf32>
    %118 = vector.multi_reduction <add>, %117, %cst_150 [0] : vector<512x128xf32> to vector<128xf32>
    %119 = vector.shape_cast %118 : vector<128xf32> to vector<1x128xf32>
    %cst_151 = arith.constant 0.001953125 : f32
    %120 = vector.broadcast %cst_151 : f32 to vector<1x128xf32>
    %121 = arith.mulf %116, %120 : vector<1x128xf32>
    %cst_152 = arith.constant 0.001953125 : f32
    %122 = vector.broadcast %cst_152 : f32 to vector<1x128xf32>
    %123 = arith.mulf %119, %122 : vector<1x128xf32>
    %124 = arith.mulf %121, %121 : vector<1x128xf32>
    %125 = arith.subf %123, %124 : vector<1x128xf32>
    %cst_153 = arith.constant 9.99999974E-6 : f32
    %126 = vector.broadcast %cst_153 : f32 to vector<1x128xf32>
    %127 = arith.addf %125, %126 : vector<1x128xf32>
    %128 = math.rsqrt %127 : vector<1x128xf32>
    %129 = arith.mulf %113, %128 : vector<1x128xf32>
    %130 = arith.mulf %121, %129 : vector<1x128xf32>
    %131 = arith.subf %114, %130 : vector<1x128xf32>
    %132 = vector.broadcast %129 : vector<1x128xf32> to vector<512x128xf32>
    %133 = arith.mulf %112, %132 : vector<512x128xf32>
    %134 = vector.broadcast %131 : vector<1x128xf32> to vector<512x128xf32>
    %135 = arith.addf %133, %134 : vector<512x128xf32>
    %c0_154 = arith.constant 0 : index
    %c0_155 = arith.constant 0 : index
    %c0_156 = arith.constant 0 : index
    %c0_157 = arith.constant 0 : index
    %136 = vector.load %arg0[%c0_154, %c0_155, %c0_156, %c0_157] : memref<2x16x16x128xf32, #tpu.memory_space<vmem>>, vector<2x16x16x128xf32>
    %137 = vector.shape_cast %136 : vector<2x16x16x128xf32> to vector<512x128xf32>
    %138 = arith.addf %135, %137 : vector<512x128xf32>
    %cst_158 = arith.constant 0.000000e+00 : f32
    %139 = vector.broadcast %cst_158 : f32 to vector<512x128xf32>
    %140 = arith.maximumf %138, %139 : vector<512x128xf32>
    %141 = vector.shape_cast %140 : vector<512x128xf32> to vector<2x16x16x128xf32>
    %c0_159 = arith.constant 0 : index
    %c0_160 = arith.constant 0 : index
    %c0_161 = arith.constant 0 : index
    %c0_162 = arith.constant 0 : index
    %142 = vector.load %arg7[%c0_159, %c0_160, %c0_161, %c0_162] : memref<2x16x16x128xf32, #tpu.memory_space<vmem>>, vector<2x16x16x128xf32>
    tpu.vector_store %arg7[%c0_159, %c0_160, %c0_161, %c0_162], %141 {strides = array<i32>} : memref<2x16x16x128xf32, #tpu.memory_space<vmem>>, vector<2x16x16x128xf32>,
    return
  }
}

</mosaic_0001>

<bundles_post_ra>
// kernel: resnet1_forward.1
= control target key start
LH: loop header
LB: loop body
LE: loop exit
PB: predicated region body
PF: predicated region fallthrough
CT: control target
= control target key end

     0   :  { %v14631_v0 = vmov 0   ;;  %v9590_v2 = vmov 0.0   ;;  %s14623_s1 = inlined_call_operand.vmem [shape: bf16[1152,128], index: 1, kind: input, shape index: {}]   ;;  %s14624_s0 = inlined_call_operand.vmem [shape: f32[2,16,16,128], index: 0, kind: input, shape index: {}]   ;;  %s14625_s2 = inlined_call_operand.vmem [shape: bf16[1152,128], index: 2, kind: input, shape index: {}]   ;;  %s14626_s3 = inlined_call_operand.vmem [shape: f32[1,128], index: 3, kind: input, shape index: {}]   ;;  %s14627_s4 = inlined_call_operand.vmem [shape: f32[1,128], index: 4, kind: input, shape index: {}]   ;;  %s14628_s5 = inlined_call_operand.vmem [shape: f32[1,128], index: 5, kind: input, shape index: {}]   ;;  %s14629_s6 = inlined_call_operand.vmem [shape: f32[1,128], index: 6, kind: input, shape index: {}]   ;;  %s14630_s7 = inlined_call_operand.vmem [shape: f32[2,16,16,128], index: 7, kind: output, shape index: {}]  }
   0x1   :  { %2258 = vmatprep.subr.bf16.mxu0 %v14631_v0  ;;  %v9635_v1 = vld [vmem:[%s14623_s1] sm:$0xff]   ;;  %27 = vst [vmem:[#allocation2] sm:$0xff] %v9590_v2  ;;  %28 = vst [vmem:[#allocation2 + $0x8] sm:$0xff] %v9590_v2  ;;  %v9429_v3 = vld [vmem:[%s14623_s1 + $0x8] sm:$0xff]  }
   0x2   :  { %29 = vst [vmem:[#allocation2 + $0x10] sm:$0x3] %v9590_v2  ;;  %30 = vst [vmem:[#allocation2 + $0x1b0] sm:$0xff] %v9590_v2  ;;  %2259 = vmatpush1.bf16.msra.mxu0 %v9635_v1  ;;  %v9430_v4 = vld [vmem:[%s14623_s1 + $0x10] sm:$0xff]   ;;  %v9431_v5 = vld [vmem:[%s14623_s1 + $0x18] sm:$0xff]  }
   0x3   :  { %31 = vst [vmem:[#allocation2 + $0x1b8] sm:$0xff] %v9590_v2  ;;  %32 = vst [vmem:[#allocation2 + $0x1c0] sm:$0x3] %v9590_v2  ;;  %2260 = vmatprep.subr.bf16.mxu0 %v14631_v0  ;;  %v9432_v6 = vld [vmem:[%s14623_s1 + $0x20] sm:$0xff]   ;;  %v9433_v9 = vld [vmem:[%s14623_s1 + $0x28] sm:$0xff]  }
   0x4   :  { %34 = vst [vmem:[#allocation2 + $0x198] sm:$0xff] %v9590_v2  ;;  %35 = vst [vmem:[#allocation2 + $0x1a0] sm:$0xff] %v9590_v2  ;;  %v9744_v11 = vld [vmem:[%s14624_s0] sm:$0xff]  ;;  %v9749_v12 = vld [vmem:[%s14624_s0 + $0x8] sm:$0xff] }
   0x5   :  { %36 = vst [vmem:[#allocation2 + $0x1a8] sm:$0x3] %v9590_v2  ;;  %37 = vst [vmem:[#allocation2 + $0x348] sm:$0xff] %v9590_v2  ;;  %v9754_v13 = vld [vmem:[%s14624_s0 + $0x10] sm:$0xff]  ;;  %v9762_v14 = vld [vmem:[%s14624_s0 + $0x18] sm:$0xff] }
   0x6   :  { %38 = vst [vmem:[#allocation2 + $0x350] sm:$0xff] %v9590_v2  ;;  %39 = vst [vmem:[#allocation2 + $0x358] sm:$0x3] %v9590_v2  ;;  %2261 = vmatpush1.bf16.msra.mxu0 %v9429_v3  ;;  %v9769_v15 = vld [vmem:[%s14624_s0 + $0x20] sm:$0xff]  ;;  %v9774_v16 = vld [vmem:[%s14624_s0 + $0x28] sm:$0xff] }
   0x7   :  { %41 = vst [vmem:[#allocation2 + $0x18] sm:$0x1] %v9590_v2  ;;  %42 = vst [vmem:[#allocation2 + $0x30] sm:$0x1] %v9590_v2  ;;  %2262 = vmatprep.subr.bf16.mxu0 %v14631_v0  ;;  %v9781_v17 = vld [vmem:[%s14624_s0 + $0x30] sm:$0xff]  ;;  %v9786_v18 = vld [vmem:[%s14624_s0 + $0x38] sm:$0xff] }
   0x8   :  { %43 = vst [vmem:[#allocation2 + $0x48] sm:$0x1] %v9590_v2  ;;  %44 = vst [vmem:[#allocation2 + $0x60] sm:$0x1] %v9590_v2  ;;  %v369_v7 = vld [vmem:[#allocation2 + $0x1] sm:$0xff]  ;;  %v9434_v19 = vld [vmem:[%s14623_s1 + $0x30] sm:$0xff]   ;;  %v437_v20 = vpack.c.bf16 %v9786_v18, %v9781_v17 }
   0x9   :  { %45 = vst [vmem:[#allocation2 + $0x78] sm:$0x1] %v9590_v2  ;;  %46 = vst [vmem:[#allocation2 + $0x90] sm:$0x1] %v9590_v2  ;;  %v370_v8 = vld [vmem:[#allocation2 + $0x9] sm:$0xff]  ;;  %v9798_v21 = vld [vmem:[%s14624_s0 + $0x40] sm:$0xff] }
   0xa   :  { %47 = vst [vmem:[#allocation2 + $0xa8] sm:$0x1] %v9590_v2  ;;  %48 = vst [vmem:[#allocation2 + $0xc0] sm:$0x1] %v9590_v2  ;;  %2263 = vmatpush1.bf16.msra.mxu0 %v9430_v4  ;;  %v433_v10 = vpack.c.bf16 %v370_v8, %v369_v7  ;;  %v9804_v22 = vld [vmem:[%s14624_s0 + $0x48] sm:$0xff]  ;;  %v9810_v23 = vld [vmem:[%s14624_s0 + $0x50] sm:$0xff]  ;;  %v434_v4 = vpack.c.bf16 %v9749_v12, %v9744_v11 }
   0xb   :  { %49 = vst [vmem:[#allocation2 + $0xd8] sm:$0x1] %v9590_v2  ;;  %50 = vst [vmem:[#allocation2 + $0xf0] sm:$0x1] %v9590_v2  ;;  %2264 = vmatprep.subr.bf16.mxu0 %v14631_v0  ;;  %v9815_v24 = vld [vmem:[%s14624_s0 + $0x58] sm:$0xff]  ;;  %v438_v25 = vpack.c.bf16 %v9804_v22, %v9798_v21  ;;  %v9827_v27 = vld [vmem:[%s14624_s0 + $0x60] sm:$0xff] }
   0xc   :  { %51 = vst [vmem:[#allocation2 + $0x108] sm:$0x1] %v9590_v2  ;;  %52 = vst [vmem:[#allocation2 + $0x120] sm:$0x1] %v9590_v2  ;;  %2290 = vmatprep.mubr.bf16.mxu0 %v433_v10  ;;  %v439_v26 = vpack.c.bf16 %v9815_v24, %v9810_v23  ;;  %v9832_v28 = vld [vmem:[%s14624_s0 + $0x68] sm:$0xff]  ;;  %v9837_v29 = vld [vmem:[%s14624_s0 + $0x70] sm:$0xff] }
   0xd   :  { %53 = vst [vmem:[#allocation2 + $0x138] sm:$0x1] %v9590_v2  ;;  %54 = vst [vmem:[#allocation2 + $0x150] sm:$0x1] %v9590_v2  ;;  %v9435_v30 = vld [vmem:[%s14623_s1 + $0x38] sm:$0xff]   ;;  %v440_v31 = vpack.c.bf16 %v9832_v28, %v9827_v27  ;;  %v9436_v34 = vld [vmem:[%s14623_s1 + $0x40] sm:$0xff]  }
   0xe   :  { %55 = vst [vmem:[#allocation2 + $0x168] sm:$0x1] %v9590_v2  ;;  %56 = vst [vmem:[#allocation2 + $0x180] sm:$0x1] %v9590_v2  ;;  %2265 = vmatpush1.bf16.msra.mxu0 %v9431_v5  ;;  %v9851_v32 = vld [vmem:[%s14624_s0 + $0x78] sm:$0xff]  ;;  %v9862_v35 = vld [vmem:[%s14624_s0 + $0x80] sm:$0xff] }
   0xf   :  { %59 = vst [vmem:[#allocation2 + $0x1c8] sm:$0x1] %v9590_v2  ;;  %60 = vst [vmem:[#allocation2 + $0x1e0] sm:$0x1] %v9590_v2  ;;  %2266 = vmatprep.subr.bf16.mxu0 %v14631_v0  ;;  %v441_v33 = vpack.c.bf16 %v9851_v32, %v9837_v29  ;;  %v9867_v36 = vld [vmem:[%s14624_s0 + $0x88] sm:$0xff]  ;;  %v9877_v38 = vld [vmem:[%s14624_s0 + $0x90] sm:$0xff] }
  0x10   :  { %61 = vst [vmem:[#allocation2 + $0x1f8] sm:$0x1] %v9590_v2  ;;  %62 = vst [vmem:[#allocation2 + $0x210] sm:$0x1] %v9590_v2  ;;  %v442_v37 = vpack.c.bf16 %v9867_v36, %v9862_v35  ;;  %v9882_v39 = vld [vmem:[%s14624_s0 + $0x98] sm:$0xff]  ;;  %v9437_v41 = vld [vmem:[%s14623_s1 + $0x48] sm:$0xff]  }
  0x11   :  { %63 = vst [vmem:[#allocation2 + $0x228] sm:$0x1] %v9590_v2  ;;  %64 = vst [vmem:[#allocation2 + $0x240] sm:$0x1] %v9590_v2  ;;  %v443_v40 = vpack.c.bf16 %v9882_v39, %v9877_v38  ;;  %v9894_v42 = vld [vmem:[%s14624_s0 + $0xa0] sm:$0xff]  ;;  %v9900_v43 = vld [vmem:[%s14624_s0 + $0xa8] sm:$0xff] }
  0x12   :  { %65 = vst [vmem:[#allocation2 + $0x258] sm:$0x1] %v9590_v2  ;;  %66 = vst [vmem:[#allocation2 + $0x270] sm:$0x1] %v9590_v2  ;;  %2267 = vmatpush1.bf16.msra.mxu0 %v9432_v6  ;;  %v9906_v44 = vld [vmem:[%s14624_s0 + $0xb0] sm:$0xff]  ;;  %v444_v45 = vpack.c.bf16 %v9900_v43, %v9894_v42  ;;  %v9914_v46 = vld [vmem:[%s14624_s0 + $0xb8] sm:$0xff] }
  0x13   :  { %67 = vst [vmem:[#allocation2 + $0x288] sm:$0x1] %v9590_v2  ;;  %68 = vst [vmem:[#allocation2 + $0x2a0] sm:$0x1] %v9590_v2  ;;  %2268 = vmatprep.subr.bf16.mxu0 %v14631_v0  ;;  %v445_v47 = vpack.c.bf16 %v9914_v46, %v9906_v44  ;;  %v9923_v48 = vld [vmem:[%s14624_s0 + $0xc0] sm:$0xff]  ;;  %v9928_v49 = vld [vmem:[%s14624_s0 + $0xc8] sm:$0xff] }
  0x14   :  { %69 = vst [vmem:[#allocation2 + $0x2b8] sm:$0x1] %v9590_v2  ;;  %70 = vst [vmem:[#allocation2 + $0x2d0] sm:$0x1] %v9590_v2  ;;  %v9438_v50 = vld [vmem:[%s14623_s1 + $0x50] sm:$0xff]   ;;  %v446_v51 = vpack.c.bf16 %v9928_v49, %v9923_v48  ;;  %v9946_v53 = vld [vmem:[%s14624_s0 + $0xd8] sm:$0xff] }
  0x15   :  { %71 = vst [vmem:[#allocation2 + $0x2e8] sm:$0x1] %v9590_v2  ;;  %72 = vst [vmem:[#allocation2 + $0x300] sm:$0x1] %v9590_v2  ;;  %v9940_v52 = vld [vmem:[%s14624_s0 + $0xd0] sm:$0xff]  ;;  %v9439_v55 = vld [vmem:[%s14623_s1 + $0x58] sm:$0xff]  }
  0x16   :  { %73 = vst [vmem:[#allocation2 + $0x318] sm:$0x1] %v9590_v2  ;;  %74 = vst [vmem:[#allocation2 + $0x330] sm:$0x1] %v9590_v2  ;;  %2269 = vmatpush1.bf16.msra.mxu0 %v9433_v9  ;;  %v447_v54 = vpack.c.bf16 %v9946_v53, %v9940_v52  ;;  %v9440_v56 = vld [vmem:[%s14623_s1 + $0x60] sm:$0xff]   ;;  %v9967_v58 = vld [vmem:[%s14624_s0 + $0xe8] sm:$0xff] }
  0x17   :  { %77 = vst [vmem:[#allocation2 + $0x29] sm:$0x1] %v9590_v2  ;;  %78 = vst [vmem:[#allocation2 + $0x41] sm:$0x1] %v9590_v2  ;;  %2270 = vmatprep.subr.bf16.mxu0 %v14631_v0  ;;  %v9962_v57 = vld [vmem:[%s14624_s0 + $0xe0] sm:$0xff]  ;;  %v9441_v59 = vld [vmem:[%s14623_s1 + $0x68] sm:$0xff]  }
  0x18   :  { %79 = vst [vmem:[#allocation2 + $0x59] sm:$0x1] %v9590_v2  ;;  %80 = vst [vmem:[#allocation2 + $0x71] sm:$0x1] %v9590_v2  ;;  %v448_v60 = vpack.c.bf16 %v9967_v58, %v9962_v57  ;;  %v9442_v61 = vld [vmem:[%s14623_s1 + $0x70] sm:$0xff]   ;;  %v9443_v62 = vld [vmem:[%s14623_s1 + $0x78] sm:$0xff]  }
  0x19   :  { %81 = vst [vmem:[#allocation2 + $0x89] sm:$0x1] %v9590_v2  ;;  %82 = vst [vmem:[#allocation2 + $0xa1] sm:$0x1] %v9590_v2  ;;  %v9444_v1 = vld [vmem:[%s14623_s1 + $0x80] sm:$0xff]   ;;  %v10000_v6 = vld [vmem:[%s14624_s0 + $0x108] sm:$0xff] }
  0x1a   :  { %83 = vst [vmem:[#allocation2 + $0xb9] sm:$0x1] %v9590_v2  ;;  %84 = vst [vmem:[#allocation2 + $0xd1] sm:$0x1] %v9590_v2  ;;  %2271 = vmatpush1.bf16.msra.mxu0 %v9434_v19  ;;  %v9995_v5 = vld [vmem:[%s14624_s0 + $0x100] sm:$0xff]  ;;  %v9445_v7 = vld [vmem:[%s14623_s1 + $0x88] sm:$0xff]  }
  0x1b   :  { %85 = vst [vmem:[#allocation2 + $0xe9] sm:$0x1] %v9590_v2  ;;  %86 = vst [vmem:[#allocation2 + $0x101] sm:$0x1] %v9590_v2  ;;  %2272 = vmatprep.subr.bf16.mxu0 %v14631_v0  ;;  %v450_v9 = vpack.c.bf16 %v10000_v6, %v9995_v5  ;;  %v10021_v19 = vld [vmem:[%s14624_s0 + $0x110] sm:$0xff] }
  0x1c   :  { %87 = vst [vmem:[#allocation2 + $0x119] sm:$0x1] %v9590_v2  ;;  %88 = vst [vmem:[#allocation2 + $0x131] sm:$0x1] %v9590_v2 }
  0x1d   :  { %89 = vst [vmem:[#allocation2 + $0x149] sm:$0x1] %v9590_v2  ;;  %90 = vst [vmem:[#allocation2 + $0x161] sm:$0x1] %v9590_v2 }
  0x1e   :  { %91 = vst [vmem:[#allocation2 + $0x179] sm:$0x1] %v9590_v2  ;;  %92 = vst [vmem:[#allocation2 + $0x191] sm:$0x1] %v9590_v2  ;;  %2273 = vmatpush1.bf16.msra.mxu0 %v9435_v30  ;;  %v10027_v30 = vld [vmem:[%s14624_s0 + $0x118] sm:$0xff] }
  0x1f   :  { %95 = vst [vmem:[#allocation2 + $0x1d9] sm:$0x1] %v9590_v2  ;;  %96 = vst [vmem:[#allocation2 + $0x1f1] sm:$0x1] %v9590_v2  ;;  %2274 = vmatprep.subr.bf16.mxu0 %v14631_v0 }
  0x20   :  { %97 = vst [vmem:[#allocation2 + $0x209] sm:$0x1] %v9590_v2  ;;  %98 = vst [vmem:[#allocation2 + $0x221] sm:$0x1] %v9590_v2 }
  0x21   :  { %99 = vst [vmem:[#allocation2 + $0x239] sm:$0x1] %v9590_v2  ;;  %100 = vst [vmem:[#allocation2 + $0x251] sm:$0x1] %v9590_v2 }
  0x22   :  { %101 = vst [vmem:[#allocation2 + $0x269] sm:$0x1] %v9590_v2  ;;  %102 = vst [vmem:[#allocation2 + $0x281] sm:$0x1] %v9590_v2  ;;  %2275 = vmatpush1.bf16.msra.mxu0 %v9436_v34  ;;  %v9447_v34 = vld [vmem:[%s14623_s1 + $0x98] sm:$0xff]  }
  0x23   :  { %103 = vst [vmem:[#allocation2 + $0x299] sm:$0x1] %v9590_v2  ;;  %104 = vst [vmem:[#allocation2 + $0x2b1] sm:$0x1] %v9590_v2  ;;  %2276 = vmatprep.subr.bf16.mxu0 %v14631_v0 }
  0x24   :  { %105 = vst [vmem:[#allocation2 + $0x2c9] sm:$0x1] %v9590_v2  ;;  %106 = vst [vmem:[#allocation2 + $0x2e1] sm:$0x1] %v9590_v2 }
  0x25   :  { %107 = vst [vmem:[#allocation2 + $0x2f9] sm:$0x1] %v9590_v2  ;;  %108 = vst [vmem:[#allocation2 + $0x311] sm:$0x1] %v9590_v2 }
  0x26   :  { %109 = vst [vmem:[#allocation2 + $0x329] sm:$0x1] %v9590_v2  ;;  %110 = vst [vmem:[#allocation2 + $0x341] sm:$0x1] %v9590_v2  ;;  %2277 = vmatpush1.bf16.msra.mxu0 %v9437_v41  ;;  %v451_v41 = vpack.c.bf16 %v10027_v30, %v10021_v19 }
  0x27   :  { %76 = vst [vmem:[#allocation2 + $0x11] sm:$0x1] %v9590_v2  ;;  %40 = vst [vmem:[#allocation2] sm:$0x1] %v9590_v2  ;;  %2278 = vmatprep.subr.bf16.mxu0 %v14631_v0 }
  0x28   :  { %57 = vst [vmem:[#allocation2 + $0x198] sm:$0x1] %v9590_v2  ;;  %58 = vst [vmem:[#allocation2 + $0x1b0] sm:$0x1] %v9590_v2 }
  0x29   :  { %75 = vst [vmem:[#allocation2 + $0x348] sm:$0x1] %v9590_v2  ;;  %93 = vst [vmem:[#allocation2 + $0x1a9] sm:$0x1] %v9590_v2 }
  0x2a   :  { %94 = vst [vmem:[#allocation2 + $0x1c1] sm:$0x1] %v9590_v2  ;;  %111 = vst [vmem:[#allocation2 + $0x359] sm:$0x1] %v9590_v2  ;;  %2279 = vmatpush1.bf16.msra.mxu0 %v9438_v50 }
  0x2b   :  { %177 = vst [vmem:[#allocation2 + $0x19] sm:$0xff] %v9744_v11  ;;  %178 = vst [vmem:[#allocation2 + $0x21] sm:$0xff] %v9749_v12  ;;  %2280 = vmatprep.subr.bf16.mxu0 %v14631_v0  ;;  %v435_v11 = vpack.c.bf16 %v9762_v14, %v9754_v13  ;;  %v9446_v12 = vld [vmem:[%s14623_s1 + $0x90] sm:$0xff]  }
  0x2c   :  { %179 = vst [vmem:[#allocation2 + $0x31] sm:$0xff] %v9754_v13  ;;  %180 = vst [vmem:[#allocation2 + $0x39] sm:$0xff] %v9762_v14 }
  0x2d   :  { %181 = vst [vmem:[#allocation2 + $0x49] sm:$0xff] %v9769_v15  ;;  %182 = vst [vmem:[#allocation2 + $0x51] sm:$0xff] %v9774_v16 }
  0x2e   :  { %183 = vst [vmem:[#allocation2 + $0x61] sm:$0xff] %v9781_v17  ;;  %184 = vst [vmem:[#allocation2 + $0x69] sm:$0xff] %v9786_v18  ;;  %2281 = vmatpush1.bf16.msra.mxu0 %v9439_v55  ;;  %v241_v63 = vld [vmem:[#allocation2] sm:$0xff]  ;;  %v436_v55 = vpack.c.bf16 %v9774_v16, %v9769_v15  ;;  %v10106_v18 = vld [vmem:[%s14624_s0 + $0x148] sm:$0xff] }
  0x2f   :  { %185 = vst [vmem:[#allocation2 + $0x79] sm:$0xff] %v9798_v21  ;;  %186 = vst [vmem:[#allocation2 + $0x81] sm:$0xff] %v9804_v22  ;;  %2282 = vmatprep.subr.bf16.mxu0 %v14631_v0  ;;  %v305_v3 = vpack.c.bf16 %v9590_v2, %v241_v63  ;;  %v9449_v63 = vld [vmem:[%s14623_s1 + $0xa8] sm:$0xff]   ;;  %v10101_v17 = vld [vmem:[%s14624_s0 + $0x140] sm:$0xff] }
  0x30   :  { %187 = vst [vmem:[#allocation2 + $0x91] sm:$0xff] %v9810_v23  ;;  %188 = vst [vmem:[#allocation2 + $0x99] sm:$0xff] %v9815_v24  ;;  %v10129_v21 = vld [vmem:[%s14624_s0 + $0x150] sm:$0xff]  ;;  %v10135_v22 = vld [vmem:[%s14624_s0 + $0x158] sm:$0xff] }
  0x31   :  { %189 = vst [vmem:[#allocation2 + $0xa9] sm:$0xff] %v9827_v27  ;;  %190 = vst [vmem:[#allocation2 + $0xb1] sm:$0xff] %v9832_v28  ;;  %v9455_v23 = vld [vmem:[%s14623_s1 + $0xd8] sm:$0xff]   ;;  %v273_v27 = vld [vmem:[#allocation2 + $0x1b0] sm:$0xff] }
  0x32   :  { %191 = vst [vmem:[#allocation2 + $0xc1] sm:$0xff] %v9837_v29  ;;  %192 = vst [vmem:[#allocation2 + $0xc9] sm:$0xff] %v9851_v32  ;;  %2283 = vmatpush1.bf16.msra.mxu0 %v9440_v56  ;;  %v243_v2 = vld [vmem:[#allocation2 + $0x18] sm:$0xff]  ;;  %v244_v8 = vld [vmem:[#allocation2 + $0x20] sm:$0xff] }
  0x33   :  { %193 = vst [vmem:[#allocation2 + $0xd9] sm:$0xff] %v9862_v35  ;;  %194 = vst [vmem:[#allocation2 + $0xe1] sm:$0xff] %v9867_v36  ;;  %2284 = vmatprep.subr.bf16.mxu0 %v14631_v0  ;;  %v10011_v10 = vpack.c.bf16 %v244_v8, %v243_v2  ;;  %v245_v13 = vld [vmem:[#allocation2 + $0x30] sm:$0xff]  ;;  %v246_v14 = vld [vmem:[#allocation2 + $0x38] sm:$0xff] }
  0x34   :  { %195 = vst [vmem:[#allocation2 + $0xf1] sm:$0xff] %v9877_v38  ;;  %196 = vst [vmem:[#allocation2 + $0xf9] sm:$0xff] %v9882_v39  ;;  %v10038_v50 = vpack.c.bf16 %v246_v14, %v245_v13  ;;  %v9448_v56 = vld [vmem:[%s14623_s1 + $0xa0] sm:$0xff]   ;;  %v247_v16 = vld [vmem:[#allocation2 + $0x48] sm:$0xff] }
  0x35   :  { %197 = vst [vmem:[#allocation2 + $0x109] sm:$0xff] %v9894_v42  ;;  %198 = vst [vmem:[#allocation2 + $0x111] sm:$0xff] %v9900_v43  ;;  %v10079_v2 = vld [vmem:[%s14624_s0 + $0x138] sm:$0xff]  ;;  %v249_v8 = vld [vmem:[#allocation2 + $0x60] sm:$0xff] }
  0x36   :  { %199 = vst [vmem:[#allocation2 + $0x121] sm:$0xff] %v9906_v44  ;;  %200 = vst [vmem:[#allocation2 + $0x129] sm:$0xff] %v9914_v46  ;;  %2285 = vmatpush1.bf16.msra.mxu0 %v9441_v59  ;;  %v10048_v59 = vld [vmem:[%s14624_s0 + $0x120] sm:$0xff]  ;;  %v9457_v38 = vld [vmem:[%s14623_s1 + $0xe8] sm:$0xff]  }
  0x37   :  { %201 = vst [vmem:[#allocation2 + $0x139] sm:$0xff] %v9923_v48  ;;  %202 = vst [vmem:[#allocation2 + $0x141] sm:$0xff] %v9928_v49  ;;  %2286 = vmatprep.subr.bf16.mxu0 %v14631_v0  ;;  %v9452_v14 = vld [vmem:[%s14623_s1 + $0xc0] sm:$0xff]   ;;  %v10268_v39 = vld [vmem:[%s14624_s0 + $0x1b8] sm:$0xff] }
  0x38   :  { %203 = vst [vmem:[#allocation2 + $0x151] sm:$0xff] %v9940_v52  ;;  %204 = vst [vmem:[#allocation2 + $0x159] sm:$0xff] %v9946_v53  ;;  %v9456_v29 = vld [vmem:[%s14623_s1 + $0xe0] sm:$0xff]   ;;  %v9458_v44 = vld [vmem:[%s14623_s1 + $0xf0] sm:$0xff]  }
  0x39   :  { %205 = vst [vmem:[#allocation2 + $0x169] sm:$0xff] %v9962_v57  ;;  %206 = vst [vmem:[#allocation2 + $0x171] sm:$0xff] %v9967_v58  ;;  %v257_v28 = vld [vmem:[#allocation2 + $0xc0] sm:$0xff]  ;;  %v10307_v42 = vld [vmem:[%s14624_s0 + $0x1d0] sm:$0xff] }
  0x3a   :  { %2287 = vmatpush1.bf16.msra.mxu0 %v9442_v61  ;;  %209 = vst [vmem:[#allocation2 + $0x1c9] sm:$0xff] %v9995_v5  ;;  %210 = vst [vmem:[#allocation2 + $0x1d1] sm:$0xff] %v10000_v6  ;;  %v10053_v61 = vld [vmem:[%s14624_s0 + $0x128] sm:$0xff]  ;;  %v10312_v46 = vld [vmem:[%s14624_s0 + $0x1d8] sm:$0xff] }
  0x3b   :  { %2288 = vmatprep.subr.bf16.mxu0 %v14631_v0  ;;  %211 = vst [vmem:[#allocation2 + $0x1e1] sm:$0xff] %v10021_v19  ;;  %212 = vst [vmem:[#allocation2 + $0x1e9] sm:$0xff] %v10027_v30  ;;  %v452_v15 = vpack.c.bf16 %v10053_v61, %v10048_v59  ;;  %v261_v36 = vld [vmem:[#allocation2 + $0xf0] sm:$0xff]  ;;  %v9459_v52 = vld [vmem:[%s14623_s1 + $0xf8] sm:$0xff]  }
  0x3c   :  { %213 = vst [vmem:[#allocation2 + $0x1f9] sm:$0xff] %v10048_v59  ;;  %214 = vst [vmem:[#allocation2 + $0x201] sm:$0xff] %v10053_v61  ;;  %v402_v48 = vld [vmem:[#allocation2 + $0x1b9] sm:$0xff]  ;;  %v9576_v24 = vld [vmem:[#allocation2 + $0x8] sm:$0xff] }
  0x3d   :  { %216 = vst [vmem:[#allocation2 + $0x219] sm:$0xff] %v10079_v2  ;;  %217 = vst [vmem:[#allocation2 + $0x229] sm:$0xff] %v10101_v17  ;;  %v265_v43 = vld [vmem:[#allocation2 + $0x120] sm:$0xff]  ;;  %v321_v53 = vpack.c.bf16 %v9576_v24, %v273_v27 }
  0x3e   :  { %2289 = vmatpush1.bf16.msra.mxu0 %v9443_v62  ;;  %v248_v62 = vld [vmem:[#allocation2 + $0x50] sm:$0xff]  ;;  %218 = vst [vmem:[#allocation2 + $0x231] sm:$0xff] %v10106_v18  ;;  %219 = vst [vmem:[#allocation2 + $0x241] sm:$0xff] %v10129_v21 }
  0x3f   :  { %2547 = vmatprep.subr.bf16.mxu0 %v14631_v0  ;;  %220 = vst [vmem:[#allocation2 + $0x249] sm:$0xff] %v10135_v22  ;;  %232 = vst [vmem:[#allocation2 + $0x2d9] sm:$0xff] %v10268_v39  ;;  %v269_v49 = vld [vmem:[#allocation2 + $0x150] sm:$0xff] }
  0x40   :  { %235 = vst [vmem:[#allocation2 + $0x301] sm:$0xff] %v10307_v42  ;;  %236 = vst [vmem:[#allocation2 + $0x309] sm:$0xff] %v10312_v46 }
  0x41   :  { %2291 = vmatmul.mubr.bf16.vlgmr.msra.gmra.mrb[0].mxu0 %v305_v3  ;;  %v9450_v3 = vld [vmem:[%s14623_s1 + $0xb0] sm:$0xff]   ;;  %v275_v57 = vld [vmem:[#allocation2 + $0x1c8] sm:$0xff] }
  0x42   :  { %2548 = vmatpush1.bf16.msra.mxu0 %v9444_v1  ;;  %2298 = vmatprep.mubr.bf16.mxu0 %v434_v4  ;;  %v10065_v1 = vpack.c.bf16 %v248_v62, %v247_v16  ;;  %v10073_v4 = vld [vmem:[%s14624_s0 + $0x130] sm:$0xff] }
  0x43   :  { %2549 = vmatprep.subr.bf16.mxu0 %v14631_v0  ;;  %215 = vst [vmem:[#allocation2 + $0x211] sm:$0xff] %v10073_v4  ;;  %v9454_v62 = vld [vmem:[%s14623_s1 + $0xd0] sm:$0xff]   ;;  %v279_v5 = vld [vmem:[#allocation2 + $0x1f8] sm:$0xff]  ;;  %v280_v6 = vld [vmem:[#allocation2 + $0x200] sm:$0xff] }
  0x44   :  { %v276_v58 = vld [vmem:[#allocation2 + $0x1d0] sm:$0xff]  ;;  %v283_v59 = vld [vmem:[#allocation2 + $0x228] sm:$0xff] }
  0x45   :  { %v284_v61 = vld [vmem:[#allocation2 + $0x230] sm:$0xff] }
  0x46   :  { %2550 = vmatpush1.bf16.msra.mxu0 %v9445_v7  ;;  %v453_v7 = vpack.c.bf16 %v10079_v2, %v10073_v4  ;;  %v285_v4 = vld [vmem:[#allocation2 + $0x240] sm:$0xff]  ;;  %v286_v2 = vld [vmem:[#allocation2 + $0x248] sm:$0xff] }
  0x47   :  { %2551 = vmatprep.subr.bf16.mxu0 %v14631_v0 }
  0x49   :  { %2299 = vmatmul.mubr.bf16.gmra.mrb[4].mxu0 %v10011_v10 }
  0x4a   :  { %2306 = vmatprep.mubr.bf16.mxu0 %v435_v11  ;;  %2552 = vmatpush1.bf16.msra.mxu0 %v9446_v12  ;;  %v250_v11 = vld [vmem:[#allocation2 + $0x68] sm:$0xff]  ;;  %v9451_v12 = vld [vmem:[%s14623_s1 + $0xb8] sm:$0xff]   ;;  %v281_v19 = vld [vmem:[#allocation2 + $0x210] sm:$0xff] }
  0x4b   :  { %2553 = vmatprep.subr.bf16.mxu0 %v14631_v0  ;;  %v10093_v13 = vpack.c.bf16 %v250_v11, %v249_v8  ;;  %v10151_v11 = vld [vmem:[%s14624_s0 + $0x160] sm:$0xff]  ;;  %v282_v30 = vld [vmem:[#allocation2 + $0x218] sm:$0xff] }
  0x4c   :  { %221 = vst [vmem:[#allocation2 + $0x259] sm:$0xff] %v10151_v11 }
  0x4e   :  { %2554 = vmatpush1.bf16.msra.mxu0 %v9447_v34  ;;  %v251_v34 = vld [vmem:[#allocation2 + $0x78] sm:$0xff] }
  0x4f   :  { %2555 = vmatprep.subr.bf16.mxu0 %v14631_v0 }
  0x51   :  { %2307 = vmatmul.mubr.bf16.gmra.mrb[8].mxu0 %v10038_v50 }
  0x52   :  { %2314 = vmatprep.mubr.bf16.mxu0 %v436_v55  ;;  %2556 = vmatpush1.bf16.msra.mxu0 %v9448_v56  ;;  %v252_v55 = vld [vmem:[#allocation2 + $0x80] sm:$0xff]  ;;  %v9453_v56 = vld [vmem:[%s14623_s1 + $0xc8] sm:$0xff]  }
  0x53   :  { %2557 = vmatprep.subr.bf16.mxu0 %v14631_v0  ;;  %v10121_v16 = vpack.c.bf16 %v252_v55, %v251_v34  ;;  %v10175_v55 = vld [vmem:[%s14624_s0 + $0x170] sm:$0xff] }
  0x54   :  { %223 = vst [vmem:[#allocation2 + $0x271] sm:$0xff] %v10175_v55 }
  0x56   :  { %2558 = vmatpush1.bf16.msra.mxu0 %v9449_v63  ;;  %v253_v63 = vld [vmem:[#allocation2 + $0x90] sm:$0xff] }
  0x57   :  { %2559 = vmatprep.subr.bf16.mxu0 %v14631_v0 }
  0x59   :  { %2315 = vmatmul.mubr.bf16.gmra.mrb[12].mxu0 %v10065_v1 }
  0x5a   :  { %2322 = vmatprep.mubr.bf16.mxu0 %v437_v20  ;;  %2560 = vmatpush1.bf16.msra.mxu0 %v9450_v3  ;;  %v454_v20 = vpack.c.bf16 %v10106_v18, %v10101_v17  ;;  %v254_v3 = vld [vmem:[#allocation2 + $0x98] sm:$0xff] }
  0x5b   :  { %2561 = vmatprep.subr.bf16.mxu0 %v14631_v0  ;;  %v10146_v8 = vpack.c.bf16 %v254_v3, %v253_v63  ;;  %v10195_v63 = vld [vmem:[%s14624_s0 + $0x180] sm:$0xff]  ;;  %v10200_v3 = vld [vmem:[%s14624_s0 + $0x188] sm:$0xff]  ;;  %v287_v18 = vld [vmem:[#allocation2 + $0x258] sm:$0xff] }
  0x5c   :  { %225 = vst [vmem:[#allocation2 + $0x289] sm:$0xff] %v10195_v63  ;;  %226 = vst [vmem:[#allocation2 + $0x291] sm:$0xff] %v10200_v3 }
  0x5e   :  { %2562 = vmatpush1.bf16.msra.mxu0 %v9451_v12  ;;  %v10156_v12 = vld [vmem:[%s14624_s0 + $0x168] sm:$0xff] }
  0x5f   :  { %2563 = vmatprep.subr.bf16.mxu0 %v14631_v0  ;;  %222 = vst [vmem:[#allocation2 + $0x261] sm:$0xff] %v10156_v12  ;;  %v14724_v17 = vpack.c.bf16 %v10156_v12, %v10151_v11  ;;  %v14726_v11 = vpack.c.bf16 %v10200_v3, %v10195_v63 }
  0x61   :  { %2323 = vmatmul.mubr.bf16.gmra.mrb[16].mxu0 %v10093_v13 }
  0x62   :  { %2330 = vmatprep.mubr.bf16.mxu0 %v438_v25  ;;  %2564 = vmatpush1.bf16.msra.mxu0 %v9452_v14  ;;  %v455_v25 = vpack.c.bf16 %v10135_v22, %v10129_v21  ;;  %v256_v14 = vld [vmem:[#allocation2 + $0xb0] sm:$0xff] }
  0x63   :  { %2565 = vmatprep.subr.bf16.mxu0 %v14631_v0  ;;  %v289_v22 = vld [vmem:[#allocation2 + $0x270] sm:$0xff]  ;;  %v291_v12 = vld [vmem:[#allocation2 + $0x288] sm:$0xff] }
  0x66   :  { %2566 = vmatpush1.bf16.msra.mxu0 %v9453_v56  ;;  %v10180_v56 = vld [vmem:[%s14624_s0 + $0x178] sm:$0xff] }
  0x67   :  { %2567 = vmatprep.subr.bf16.mxu0 %v14631_v0  ;;  %224 = vst [vmem:[#allocation2 + $0x279] sm:$0xff] %v10180_v56  ;;  %v14725_v21 = vpack.c.bf16 %v10180_v56, %v10175_v55 }
  0x69   :  { %2331 = vmatmul.mubr.bf16.gmra.mrb[20].mxu0 %v10121_v16 }
  0x6a   :  { %2338 = vmatprep.mubr.bf16.mxu0 %v439_v26  ;;  %2568 = vmatpush1.bf16.msra.mxu0 %v9454_v62  ;;  %v255_v26 = vld [vmem:[#allocation2 + $0xa8] sm:$0xff] }
  0x6b   :  { %2569 = vmatprep.subr.bf16.mxu0 %v14631_v0  ;;  %v10170_v34 = vpack.c.bf16 %v256_v14, %v255_v26  ;;  %v10219_v14 = vld [vmem:[%s14624_s0 + $0x190] sm:$0xff] }
  0x6c   :  { %227 = vst [vmem:[#allocation2 + $0x2a1] sm:$0xff] %v10219_v14 }
  0x6e   :  { %2570 = vmatpush1.bf16.msra.mxu0 %v9455_v23  ;;  %v260_v23 = vld [vmem:[#allocation2 + $0xe0] sm:$0xff] }
  0x6f   :  { %2571 = vmatprep.subr.bf16.mxu0 %v14631_v0 }
  0x71   :  { %2339 = vmatmul.mubr.bf16.gmra.mrb[24].mxu0 %v10146_v8 }
  0x72   :  { %2346 = vmatprep.mubr.bf16.mxu0 %v440_v31  ;;  %v258_v31 = vld [vmem:[#allocation2 + $0xc8] sm:$0xff]  ;;  %2572 = vmatpush1.bf16.msra.mxu0 %v9456_v29  ;;  %v10239_v29 = vld [vmem:[%s14624_s0 + $0x1a0] sm:$0xff] }
  0x73   :  { %v10190_v62 = vpack.c.bf16 %v258_v31, %v257_v28  ;;  %2573 = vmatprep.subr.bf16.mxu0 %v14631_v0  ;;  %v10224_v28 = vld [vmem:[%s14624_s0 + $0x198] sm:$0xff]  ;;  %229 = vst [vmem:[#allocation2 + $0x2b9] sm:$0xff] %v10239_v29  ;;  %v293_v56 = vld [vmem:[#allocation2 + $0x2a0] sm:$0xff] }
  0x74   :  { %228 = vst [vmem:[#allocation2 + $0x2a9] sm:$0xff] %v10224_v28  ;;  %v14727_v55 = vpack.c.bf16 %v10224_v28, %v10219_v14 }
  0x76   :  { %2574 = vmatpush1.bf16.msra.mxu0 %v9457_v38 }
  0x77   :  { %2575 = vmatprep.subr.bf16.mxu0 %v14631_v0 }
  0x79   :  { %2347 = vmatmul.mubr.bf16.gmra.mrb[28].mxu0 %v10170_v34 }
  0x7a   :  { %2354 = vmatprep.mubr.bf16.mxu0 %v441_v33  ;;  %v259_v33 = vld [vmem:[#allocation2 + $0xd8] sm:$0xff]  ;;  %2576 = vmatpush1.bf16.msra.mxu0 %v9458_v44 }
  0x7b   :  { %v10214_v26 = vpack.c.bf16 %v260_v23, %v259_v33  ;;  %v10244_v33 = vld [vmem:[%s14624_s0 + $0x1a8] sm:$0xff]  ;;  %v264_v23 = vld [vmem:[#allocation2 + $0x110] sm:$0xff]  ;;  %2577 = vmatprep.subr.bf16.mxu0 %v14631_v0  ;;  %v295_v3 = vld [vmem:[#allocation2 + $0x2b8] sm:$0xff] }
  0x7c   :  { %230 = vst [vmem:[#allocation2 + $0x2c1] sm:$0xff] %v10244_v33  ;;  %v14728_v63 = vpack.c.bf16 %v10244_v33, %v10239_v29 }
  0x7e   :  { %2578 = vmatpush1.bf16.msra.mxu0 %v9459_v52 }
  0x7f   :  { %2836 = vmatprep.subr.bf16.mxu0 %v14631_v0 }
  0x81   :  { %2355 = vmatmul.mubr.bf16.gmra.mrb[32].mxu0 %v10190_v62 }
  0x82   :  { %2362 = vmatprep.mubr.bf16.mxu0 %v442_v37  ;;  %v262_v37 = vld [vmem:[#allocation2 + $0xf8] sm:$0xff] }
  0x83   :  { %v10234_v31 = vpack.c.bf16 %v262_v37, %v261_v36  ;;  %v10263_v37 = vld [vmem:[%s14624_s0 + $0x1b0] sm:$0xff] }
  0x84   :  { %231 = vst [vmem:[#allocation2 + $0x2d1] sm:$0xff] %v10263_v37  ;;  %v14729_v14 = vpack.c.bf16 %v10268_v39, %v10263_v37  ;;  %v14731_v39 = vpack.c.bf16 %v10312_v46, %v10307_v42  ;;  %v301_v37 = vld [vmem:[#allocation2 + $0x300] sm:$0xff] }
  0x89   :  { %2363 = vmatmul.mubr.bf16.gmra.mrb[36].mxu0 %v10214_v26 }
  0x8a   :  { %2370 = vmatprep.mubr.bf16.mxu0 %v443_v40  ;;  %v263_v40 = vld [vmem:[#allocation2 + $0x108] sm:$0xff] }
  0x8b   :  { %v10258_v36 = vpack.c.bf16 %v264_v23, %v263_v40  ;;  %v10283_v40 = vld [vmem:[%s14624_s0 + $0x1c0] sm:$0xff]  ;;  %v10288_v23 = vld [vmem:[%s14624_s0 + $0x1c8] sm:$0xff]  ;;  %v297_v28 = vld [vmem:[#allocation2 + $0x2d0] sm:$0xff] }
  0x8c   :  { %233 = vst [vmem:[#allocation2 + $0x2e9] sm:$0xff] %v10283_v40  ;;  %234 = vst [vmem:[#allocation2 + $0x2f1] sm:$0xff] %v10288_v23  ;;  %v14730_v29 = vpack.c.bf16 %v10288_v23, %v10283_v40  ;;  %v10440_v40 = vld [vmem:[%s14624_s0 + $0xf8] sm:$0xff] }
  0x8d   :  { %208 = vst [vmem:[#allocation2 + $0x189] sm:$0xff] %v10440_v40 }
  0x91   :  { %2371 = vmatmul.mubr.bf16.gmra.mrb[40].mxu0 %v10234_v31 }
  0x92   :  { %2378 = vmatprep.mubr.bf16.mxu0 %v444_v45  ;;  %v266_v45 = vld [vmem:[#allocation2 + $0x128] sm:$0xff] }
  0x93   :  { %v10278_v38 = vpack.c.bf16 %v266_v45, %v265_v43  ;;  %v268_v43 = vld [vmem:[#allocation2 + $0x140] sm:$0xff]  ;;  %v299_v33 = vld [vmem:[#allocation2 + $0x2e8] sm:$0xff] }
  0x99   :  { %2379 = vmatmul.mubr.bf16.gmra.mrb[44].mxu0 %v10258_v36 }
  0x9a   :  { %2386 = vmatprep.mubr.bf16.mxu0 %v445_v47  ;;  %v267_v47 = vld [vmem:[#allocation2 + $0x138] sm:$0xff] }
  0x9b   :  { %v10302_v45 = vpack.c.bf16 %v268_v43, %v267_v47  ;;  %v10327_v47 = vld [vmem:[%s14624_s0 + $0x1e0] sm:$0xff]  ;;  %v10332_v43 = vld [vmem:[%s14624_s0 + $0x1e8] sm:$0xff] }
  0x9c   :  { %237 = vst [vmem:[#allocation2 + $0x319] sm:$0xff] %v10327_v47  ;;  %238 = vst [vmem:[#allocation2 + $0x321] sm:$0xff] %v10332_v43  ;;  %v14732_v42 = vpack.c.bf16 %v10332_v43, %v10327_v47  ;;  %v499_v47 = vld [vmem:[#allocation2 + $0x1a] sm:$0xff]  ;;  %v500_v43 = vld [vmem:[#allocation2 + $0x22] sm:$0xff] }
  0xa1   :  { %2387 = vmatmul.mubr.bf16.gmra.mrb[48].mxu0 %v10278_v38 }
  0xa2   :  { %2394 = vmatprep.mubr.bf16.mxu0 %v446_v51  ;;  %v270_v51 = vld [vmem:[#allocation2 + $0x158] sm:$0xff] }
  0xa3   :  { %v10322_v44 = vpack.c.bf16 %v270_v51, %v269_v49  ;;  %v272_v49 = vld [vmem:[#allocation2 + $0x170] sm:$0xff]  ;;  %v303_v23 = vld [vmem:[#allocation2 + $0x318] sm:$0xff]  ;;  %v304_v46 = vld [vmem:[#allocation2 + $0x320] sm:$0xff] }
  0xa4   :  { %v401_v51 = vld [vmem:[#allocation2 + $0x1b1] sm:$0xff] }
  0xa5   :  { %v449_v32 = vpack.c.bf16 %v402_v48, %v401_v51  ;;  %v277_v48 = vld [vmem:[#allocation2 + $0x1e0] sm:$0xff] }
  0xa9   :  { %2395 = vmatmul.mubr.bf16.gmra.mrb[52].mxu0 %v10302_v45 }
  0xaa   :  { %2402 = vmatprep.mubr.bf16.mxu0 %v447_v54  ;;  %v271_v54 = vld [vmem:[#allocation2 + $0x168] sm:$0xff] }
  0xab   :  { %v10346_v35 = vpack.c.bf16 %v272_v49, %v271_v54  ;;  %v294_v49 = vld [vmem:[#allocation2 + $0x2a8] sm:$0xff] }
  0xac   :  { %v10406_v51 = vpack.c.bf16 %v294_v49, %v293_v56  ;;  %v9466_v49 = vld [vmem:[%s14623_s1 + $0x130] sm:$0xff]  }
  0xb1   :  { %2403 = vmatmul.mubr.bf16.gmra.mrb[56].mxu0 %v10322_v44 }
  0xb2   :  { %2410 = vmatprep.mubr.bf16.mxu0 %v448_v60  ;;  %v10352_v60 = vpack.c.bf16 %v276_v58, %v275_v57  ;;  %v296_v57 = vld [vmem:[#allocation2 + $0x2c0] sm:$0xff] }
  0xb3   :  { %v10412_v58 = vpack.c.bf16 %v296_v57, %v295_v3  ;;  %v9467_v3 = vld [vmem:[%s14623_s1 + $0x138] sm:$0xff]  }
  0xb9   :  { %2411 = vmatmul.mubr.bf16.gmra.mrb[60].mxu0 %v10346_v35 }
  0xba   :  { %2418 = vmatprep.mubr.bf16.mxu0 %v449_v32  ;;  %v278_v32 = vld [vmem:[#allocation2 + $0x1e8] sm:$0xff] }
  0xbb   :  { %v10358_v52 = vpack.c.bf16 %v278_v32, %v277_v48  ;;  %v298_v48 = vld [vmem:[#allocation2 + $0x2d8] sm:$0xff] }
  0xbc   :  { %v10418_v32 = vpack.c.bf16 %v298_v48, %v297_v28  ;;  %v508_v28 = vld [vmem:[#allocation2 + $0x82] sm:$0xff] }
  0xbd   :  { %v9469_v48 = vld [vmem:[%s14623_s1 + $0x148] sm:$0xff]  }
  0xc1   :  { %2419 = vmatmul.mubr.bf16.gmra.mrb[64].mxu0 %v321_v53  ;;  %v292_v53 = vld [vmem:[#allocation2 + $0x290] sm:$0xff] }
  0xc2   :  { %2426 = vmatprep.mubr.bf16.mxu0 %v450_v9  ;;  %v10364_v9 = vpack.c.bf16 %v280_v6, %v279_v5  ;;  %v10400_v54 = vpack.c.bf16 %v292_v53, %v291_v12  ;;  %v300_v5 = vld [vmem:[#allocation2 + $0x2f0] sm:$0xff]  ;;  %v9464_v12 = vld [vmem:[%s14623_s1 + $0x120] sm:$0xff]  }
  0xc3   :  { %v10424_v6 = vpack.c.bf16 %v300_v5, %v299_v33  ;;  %v504_v53 = vld [vmem:[#allocation2 + $0x52] sm:$0xff]  ;;  %v510_v5 = vld [vmem:[#allocation2 + $0x9a] sm:$0xff] }
  0xc4   :  { %v9470_v33 = vld [vmem:[%s14623_s1 + $0x150] sm:$0xff]  }
  0xc9   :  { %2427 = vmatmul.mubr.bf16.gmra.mrb[68].mxu0 %v10352_v60 }
  0xca   :  { %2434 = vmatprep.mubr.bf16.mxu0 %v451_v41  ;;  %v10370_v41 = vpack.c.bf16 %v282_v30, %v281_v19  ;;  %v302_v19 = vld [vmem:[#allocation2 + $0x308] sm:$0xff] }
  0xcb   :  { %v10430_v30 = vpack.c.bf16 %v302_v19, %v301_v37  ;;  %v9471_v37 = vld [vmem:[%s14623_s1 + $0x158] sm:$0xff]   ;;  %v511_v19 = vld [vmem:[#allocation2 + $0xaa] sm:$0xff] }
  0xd1   :  { %2435 = vmatmul.mubr.bf16.gmra.mrb[72].mxu0 %v10358_v52 }
  0xd2   :  { %2442 = vmatprep.mubr.bf16.mxu0 %v452_v15  ;;  %v10376_v15 = vpack.c.bf16 %v284_v61, %v283_v59  ;;  %v10435_v59 = vld [vmem:[%s14624_s0 + $0xf0] sm:$0xff]  ;;  %v10448_v61 = vpack.c.bf16 %v304_v46, %v303_v23  ;;  %v513_v23 = vld [vmem:[#allocation2 + $0xc2] sm:$0xff] }
  0xd3   :  { %207 = vst [vmem:[#allocation2 + $0x181] sm:$0xff] %v10435_v59  ;;  %v514_v46 = vld [vmem:[#allocation2 + $0xca] sm:$0xff] }
  0xd9   :  { %2443 = vmatmul.mubr.bf16.gmra.mrb[76].mxu0 %v10364_v9 }
  0xda   :  { %2450 = vmatprep.mubr.bf16.mxu0 %v453_v7  ;;  %v10382_v7 = vpack.c.bf16 %v286_v2, %v285_v4  ;;  %v497_v4 = vld [vmem:[#allocation2 + $0x2] sm:$0xff]  ;;  %v498_v2 = vld [vmem:[#allocation2 + $0xa] sm:$0xff] }
  0xe1   :  { %2451 = vmatmul.mubr.bf16.gmra.mrb[80].mxu0 %v10370_v41 }
  0xe2   :  { %2458 = vmatprep.mubr.bf16.mxu0 %v454_v20  ;;  %v288_v20 = vld [vmem:[#allocation2 + $0x260] sm:$0xff] }
  0xe3   :  { %v10388_v24 = vpack.c.bf16 %v288_v20, %v287_v18  ;;  %v9460_v18 = vld [vmem:[%s14623_s1 + $0x100] sm:$0xff]   ;;  %v9461_v20 = vld [vmem:[%s14623_s1 + $0x108] sm:$0xff]  }
  0xe9   :  { %2459 = vmatmul.mubr.bf16.gmra.mrb[84].mxu0 %v10376_v15 }
  0xea   :  { %2466 = vmatprep.mubr.bf16.mxu0 %v455_v25  ;;  %v290_v25 = vld [vmem:[#allocation2 + $0x278] sm:$0xff] }
  0xeb   :  { %v10394_v27 = vpack.c.bf16 %v290_v25, %v289_v22  ;;  %v502_v22 = vld [vmem:[#allocation2 + $0x3a] sm:$0xff] }
  0xec   :  { %v9463_v25 = vld [vmem:[%s14623_s1 + $0x118] sm:$0xff]  }
  0xf1   :  { %2467 = vmatmul.mubr.bf16.gmra.mrb[88].mxu0 %v10382_v7 }
  0xf2   :  { %2474 = vmatprep.mubr.bf16.mxu0 %v14724_v17  ;;  %v561_v17 = vpack.c.bf16 %v498_v2, %v497_v4  ;;  %v10529_v4 = vpack.c.bf16 %v514_v46, %v513_v23  ;;  %v515_v2 = vld [vmem:[#allocation2 + $0xda] sm:$0xff]  ;;  %v533_v23 = vld [vmem:[#allocation2 + $0x1e2] sm:$0xff]  ;;  %v534_v46 = vld [vmem:[#allocation2 + $0x1ea] sm:$0xff] }
  0xf9   :  { %2475 = vmatmul.mubr.bf16.gmra.mrb[92].mxu0 %v10388_v24 }
  0xfa   :  { %2482 = vmatprep.mubr.bf16.mxu0 %v14725_v21  ;;  %v9462_v21 = vld [vmem:[%s14623_s1 + $0x110] sm:$0xff]  }
 0x101   :  { %2483 = vmatmul.mubr.bf16.gmra.mrb[96].mxu0 %v10394_v27 }
 0x102   :  { %2490 = vmatprep.mubr.bf16.mxu0 %v14726_v11 }
 0x109   :  { %2491 = vmatmul.mubr.bf16.gmra.mrb[100].mxu0 %v10400_v54 }
 0x10a   :  { %2498 = vmatprep.mubr.bf16.mxu0 %v14727_v55  ;;  %v9465_v55 = vld [vmem:[%s14623_s1 + $0x128] sm:$0xff]  }
 0x111   :  { %2499 = vmatmul.mubr.bf16.gmra.mrb[104].mxu0 %v10406_v51 }
 0x112   :  { %2506 = vmatprep.mubr.bf16.mxu0 %v14728_v63  ;;  %v506_v63 = vld [vmem:[#allocation2 + $0x6a] sm:$0xff] }
 0x119   :  { %2507 = vmatmul.mubr.bf16.gmra.mrb[108].mxu0 %v10412_v58 }
 0x11a   :  { %2514 = vmatprep.mubr.bf16.mxu0 %v14729_v14  ;;  %v9468_v14 = vld [vmem:[%s14623_s1 + $0x140] sm:$0xff]  }
 0x121   :  { %2515 = vmatmul.mubr.bf16.gmra.mrb[112].mxu0 %v10418_v32 }
 0x122   :  { %2522 = vmatprep.mubr.bf16.mxu0 %v14730_v29 }
 0x129   :  { %2523 = vmatmul.mubr.bf16.gmra.mrb[116].mxu0 %v10424_v6 }
 0x12a   :  { %2530 = vmatprep.mubr.bf16.mxu0 %v14731_v39 }
 0x131   :  { %2531 = vmatmul.mubr.bf16.gmra.mrb[120].mxu0 %v10430_v30 }
 0x132   :  { %2538 = vmatprep.mubr.bf16.mxu0 %v14732_v42  ;;  %v512_v42 = vld [vmem:[#allocation2 + $0xb2] sm:$0xff] }
 0x139   :  { %2539 = vmatmul.mubr.bf16.gmra.mrb[124].mxu0 %v10448_v61 }
 0x13a   :  { %2579 = vmatprep.mubr.bf16.mxu0 %v10011_v10  ;;  %v10460_v10 = vpack.c.bf16 %v500_v43, %v499_v47  ;;  %v518_v47 = vld [vmem:[#allocation2 + $0xfa] sm:$0xff] }
 0x141   :  { %2580 = vmatmul.mubr.bf16.vlgmr.msra.gmra.mrb[0].mxu0 %v561_v17  ;;  %v516_v17 = vld [vmem:[#allocation2 + $0xe2] sm:$0xff] }
 0x142   :  { %2837 = vmatpush1.bf16.msra.mxu0 %v9460_v18  ;;  %2587 = vmatprep.mubr.bf16.mxu0 %v10038_v50  ;;  %v501_v50 = vld [vmem:[#allocation2 + $0x32] sm:$0xff]  ;;  %v10537_v18 = vpack.c.bf16 %v516_v17, %v515_v2  ;;  %v536_v2 = vld [vmem:[#allocation2 + $0x202] sm:$0xff] }
 0x143   :  { %2838 = vmatprep.subr.bf16.mxu0 %v14631_v0  ;;  %v10472_v11 = vpack.c.bf16 %v502_v22, %v501_v50  ;;  %v522_v22 = vld [vmem:[#allocation2 + $0x12a] sm:$0xff] }
 0x146   :  { %2839 = vmatpush1.bf16.msra.mxu0 %v9461_v20  ;;  %v519_v20 = vld [vmem:[#allocation2 + $0x10a] sm:$0xff] }
 0x147   :  { %2840 = vmatprep.subr.bf16.mxu0 %v14631_v0 }
 0x149   :  { %2588 = vmatmul.mubr.bf16.gmra.mrb[4].mxu0 %v10460_v10 }
 0x14a   :  { %2595 = vmatprep.mubr.bf16.mxu0 %v10065_v1  ;;  %2841 = vmatpush1.bf16.msra.mxu0 %v9462_v21  ;;  %v503_v1 = vld [vmem:[#allocation2 + $0x4a] sm:$0xff]  ;;  %v520_v21 = vld [vmem:[#allocation2 + $0x112] sm:$0xff] }
 0x14b   :  { %2842 = vmatprep.subr.bf16.mxu0 %v14631_v0  ;;  %v10484_v56 = vpack.c.bf16 %v504_v53, %v503_v1  ;;  %v10549_v50 = vpack.c.bf16 %v520_v21, %v519_v20  ;;  %v524_v1 = vld [vmem:[#allocation2 + $0x142] sm:$0xff]  ;;  %v542_v21 = vld [vmem:[#allocation2 + $0x24a] sm:$0xff] }
 0x14e   :  { %2843 = vmatpush1.bf16.msra.mxu0 %v9463_v25 }
 0x14f   :  { %2844 = vmatprep.subr.bf16.mxu0 %v14631_v0 }
 0x151   :  { %2596 = vmatmul.mubr.bf16.gmra.mrb[8].mxu0 %v10472_v11 }
 0x152   :  { %2603 = vmatprep.mubr.bf16.mxu0 %v10093_v13  ;;  %2845 = vmatpush1.bf16.msra.mxu0 %v9464_v12  ;;  %v505_v13 = vld [vmem:[#allocation2 + $0x62] sm:$0xff]  ;;  %v523_v12 = vld [vmem:[#allocation2 + $0x13a] sm:$0xff] }
 0x153   :  { %2846 = vmatprep.subr.bf16.mxu0 %v14631_v0  ;;  %v10496_v57 = vpack.c.bf16 %v506_v63, %v505_v13  ;;  %v10561_v53 = vpack.c.bf16 %v524_v1, %v523_v12  ;;  %v656_v13 = vld [vmem:[#allocation2 + $0x188] sm:$0xff]  ;;  %v546_v12 = vld [vmem:[#allocation2 + $0x27a] sm:$0xff] }
 0x156   :  { %2847 = vmatpush1.bf16.msra.mxu0 %v9465_v55  ;;  %v526_v55 = vld [vmem:[#allocation2 + $0x15a] sm:$0xff] }
 0x157   :  { %2848 = vmatprep.subr.bf16.mxu0 %v14631_v0 }
 0x159   :  { %2604 = vmatmul.mubr.bf16.gmra.mrb[12].mxu0 %v10484_v56 }
 0x15a   :  { %2611 = vmatprep.mubr.bf16.mxu0 %v10121_v16  ;;  %2849 = vmatpush1.bf16.msra.mxu0 %v9466_v49  ;;  %v507_v16 = vld [vmem:[#allocation2 + $0x7a] sm:$0xff] }
 0x15b   :  { %2850 = vmatprep.subr.bf16.mxu0 %v14631_v0  ;;  %v10508_v29 = vpack.c.bf16 %v508_v28, %v507_v16  ;;  %v655_v49 = vld [vmem:[#allocation2 + $0x180] sm:$0xff]  ;;  %v527_v16 = vld [vmem:[#allocation2 + $0x16a] sm:$0xff]  ;;  %v528_v28 = vld [vmem:[#allocation2 + $0x172] sm:$0xff] }
 0x15e   :  { %2851 = vmatpush1.bf16.msra.mxu0 %v9467_v3  ;;  %v10575_v3 = vld [vmem:[%s14624_s0 + $0x1f8] sm:$0xff] }
 0x15f   :  { %2852 = vmatprep.subr.bf16.mxu0 %v14631_v0  ;;  %240 = vst [vmem:[#allocation2 + $0x339] sm:$0xff] %v10575_v3 }
 0x161   :  { %2612 = vmatmul.mubr.bf16.gmra.mrb[16].mxu0 %v10496_v57 }
 0x162   :  { %2619 = vmatprep.mubr.bf16.mxu0 %v10146_v8  ;;  %2853 = vmatpush1.bf16.msra.mxu0 %v9468_v14  ;;  %v509_v8 = vld [vmem:[#allocation2 + $0x92] sm:$0xff]  ;;  %v704_v14 = vpack.c.bf16 %v656_v13, %v655_v49  ;;  %v550_v49 = vld [vmem:[#allocation2 + $0x2aa] sm:$0xff] }
 0x163   :  { %2854 = vmatprep.subr.bf16.mxu0 %v14631_v0  ;;  %v10517_v39 = vpack.c.bf16 %v510_v5, %v509_v8  ;;  %v530_v8 = vld [vmem:[#allocation2 + $0x1ba] sm:$0xff] }
 0x166   :  { %2855 = vmatpush1.bf16.msra.mxu0 %v9469_v48  ;;  %v10584_v48 = vpack.c.bf16 %v528_v28, %v527_v16  ;;  %v554_v16 = vld [vmem:[#allocation2 + $0x2da] sm:$0xff] }
 0x167   :  { %2856 = vmatprep.subr.bf16.mxu0 %v14631_v0 }
 0x169   :  { %2620 = vmatmul.mubr.bf16.gmra.mrb[20].mxu0 %v10508_v29 }
 0x16a   :  { %2627 = vmatprep.mubr.bf16.mxu0 %v10170_v34  ;;  %2857 = vmatpush1.bf16.msra.mxu0 %v9470_v33  ;;  %v10525_v34 = vpack.c.bf16 %v512_v42, %v511_v19  ;;  %v529_v33 = vld [vmem:[#allocation2 + $0x1b2] sm:$0xff] }
 0x16b   :  { %2858 = vmatprep.subr.bf16.mxu0 %v14631_v0  ;;  %v577_v5 = vpack.c.bf16 %v530_v8, %v529_v33  ;;  %v532_v19 = vld [vmem:[#allocation2 + $0x1d2] sm:$0xff] }
 0x16c   :  { %v556_v33 = vld [vmem:[#allocation2 + $0x2f2] sm:$0xff] }
 0x16e   :  { %2859 = vmatpush1.bf16.msra.mxu0 %v9471_v37  ;;  %v531_v37 = vld [vmem:[#allocation2 + $0x1ca] sm:$0xff] }
 0x16f   :  { %2860 = vmatprep.subr.bf16.mxu0 %v14631_v0  ;;  %v10589_v42 = vpack.c.bf16 %v532_v19, %v531_v37 }
 0x171   :  { %2628 = vmatmul.mubr.bf16.gmra.mrb[24].mxu0 %v10517_v39 }
 0x172   :  { %2635 = vmatprep.mubr.bf16.mxu0 %v10190_v62  ;;  %v9472_v62 = vld [vmem:[%s14623_s1 + $0x160] sm:$0xff]  }
 0x173   :  { %2861 = vmatpush1.bf16.msra.mxu0 %v9472_v62  ;;  %v10593_v62 = vpack.c.bf16 %v534_v46, %v533_v23  ;;  %v559_v46 = vld [vmem:[#allocation2 + $0x31a] sm:$0xff] }
 0x174   :  { %2862 = vmatprep.subr.bf16.mxu0 %v14631_v0 }
 0x179   :  { %2636 = vmatmul.mubr.bf16.gmra.mrb[28].mxu0 %v10525_v34 }
 0x17a   :  { %2643 = vmatprep.mubr.bf16.mxu0 %v10214_v26  ;;  %v517_v26 = vld [vmem:[#allocation2 + $0xf2] sm:$0xff] }
 0x17b   :  { %v10541_v43 = vpack.c.bf16 %v518_v47, %v517_v26  ;;  %v538_v26 = vld [vmem:[#allocation2 + $0x21a] sm:$0xff] }
 0x181   :  { %2644 = vmatmul.mubr.bf16.gmra.mrb[32].mxu0 %v10529_v4 }
 0x182   :  { %2651 = vmatprep.mubr.bf16.mxu0 %v10234_v31  ;;  %v9473_v31 = vld [vmem:[%s14623_s1 + $0x168] sm:$0xff]  }
 0x183   :  { %2863 = vmatpush1.bf16.msra.mxu0 %v9473_v31  ;;  %v540_v31 = vld [vmem:[#allocation2 + $0x232] sm:$0xff] }
 0x184   :  { %2864 = vmatprep.subr.bf16.mxu0 %v14631_v0 }
 0x189   :  { %2652 = vmatmul.mubr.bf16.gmra.mrb[36].mxu0 %v10537_v18 }
 0x18a   :  { %2659 = vmatprep.mubr.bf16.mxu0 %v10258_v36  ;;  %v521_v36 = vld [vmem:[#allocation2 + $0x122] sm:$0xff] }
 0x18b   :  { %v10553_v25 = vpack.c.bf16 %v522_v22, %v521_v36  ;;  %v544_v22 = vld [vmem:[#allocation2 + $0x262] sm:$0xff] }
 0x191   :  { %2660 = vmatmul.mubr.bf16.gmra.mrb[40].mxu0 %v10541_v43 }
 0x192   :  { %2667 = vmatprep.mubr.bf16.mxu0 %v10278_v38  ;;  %v9474_v38 = vld [vmem:[%s14623_s1 + $0x170] sm:$0xff]  }
 0x193   :  { %2865 = vmatpush1.bf16.msra.mxu0 %v9474_v38 }
 0x194   :  { %2866 = vmatprep.subr.bf16.mxu0 %v14631_v0 }
 0x199   :  { %2668 = vmatmul.mubr.bf16.gmra.mrb[44].mxu0 %v10549_v50 }
 0x19a   :  { %2675 = vmatprep.mubr.bf16.mxu0 %v10302_v45  ;;  %v525_v45 = vld [vmem:[#allocation2 + $0x152] sm:$0xff] }
 0x19b   :  { %v10565_v63 = vpack.c.bf16 %v526_v55, %v525_v45  ;;  %v548_v45 = vld [vmem:[#allocation2 + $0x292] sm:$0xff] }
 0x1a1   :  { %2676 = vmatmul.mubr.bf16.gmra.mrb[48].mxu0 %v10553_v25 }
 0x1a2   :  { %2683 = vmatprep.mubr.bf16.mxu0 %v10322_v44  ;;  %v10570_v44 = vld [vmem:[%s14624_s0 + $0x1f0] sm:$0xff] }
 0x1a3   :  { %239 = vst [vmem:[#allocation2 + $0x331] sm:$0xff] %v10570_v44 }
 0x1a9   :  { %2684 = vmatmul.mubr.bf16.gmra.mrb[52].mxu0 %v10561_v53 }
 0x1aa   :  { %2691 = vmatprep.mubr.bf16.mxu0 %v10346_v35  ;;  %v9475_v35 = vld [vmem:[%s14623_s1 + $0x178] sm:$0xff]   ;;  %v687_v37 = vld [vmem:[#allocation2 + $0x330] sm:$0xff] }
 0x1ab   :  { %2867 = vmatpush1.bf16.msra.mxu0 %v9475_v35 }
 0x1ac   :  { %3125 = vmatprep.subr.bf16.mxu0 %v14631_v0 }
 0x1b1   :  { %2692 = vmatmul.mubr.bf16.gmra.mrb[56].mxu0 %v10565_v63 }
 0x1b2   :  { %2699 = vmatprep.mubr.bf16.mxu0 %v704_v14  ;;  %v552_v14 = vld [vmem:[#allocation2 + $0x2c2] sm:$0xff] }
 0x1b9   :  { %2700 = vmatmul.mubr.bf16.gmra.mrb[60].mxu0 %v10584_v48 }
 0x1ba   :  { %2707 = vmatprep.mubr.bf16.mxu0 %v10352_v60  ;;  %v535_v60 = vld [vmem:[#allocation2 + $0x1fa] sm:$0xff] }
 0x1bb   :  { %v10597_v17 = vpack.c.bf16 %v536_v2, %v535_v60  ;;  %v753_v2 = vld [vmem:[#allocation2 + $0x19] sm:$0xff] }
 0x1c1   :  { %2708 = vmatmul.mubr.bf16.gmra.mrb[64].mxu0 %v577_v5  ;;  %v558_v5 = vld [vmem:[#allocation2 + $0x30a] sm:$0xff] }
 0x1c2   :  { %2715 = vmatprep.mubr.bf16.mxu0 %v10358_v52  ;;  %v537_v52 = vld [vmem:[#allocation2 + $0x212] sm:$0xff] }
 0x1c3   :  { %v10601_v47 = vpack.c.bf16 %v538_v26, %v537_v52  ;;  %v9476_v26 = vld [vmem:[%s14623_s1 + $0x180] sm:$0xff]  }
 0x1c9   :  { %2716 = vmatmul.mubr.bf16.gmra.mrb[68].mxu0 %v10589_v42 }
 0x1ca   :  { %2723 = vmatprep.mubr.bf16.mxu0 %v10364_v9  ;;  %v539_v9 = vld [vmem:[#allocation2 + $0x22a] sm:$0xff] }
 0x1cb   :  { %v10605_v20 = vpack.c.bf16 %v540_v31, %v539_v9  ;;  %v755_v9 = vld [vmem:[#allocation2 + $0x31] sm:$0xff]  ;;  %v756_v31 = vld [vmem:[#allocation2 + $0x39] sm:$0xff] }
 0x1d1   :  { %2724 = vmatmul.mubr.bf16.gmra.mrb[72].mxu0 %v10593_v62 }
 0x1d2   :  { %2731 = vmatprep.mubr.bf16.mxu0 %v10370_v41  ;;  %v541_v41 = vld [vmem:[#allocation2 + $0x242] sm:$0xff] }
 0x1d3   :  { %v10609_v36 = vpack.c.bf16 %v542_v21, %v541_v41  ;;  %v9477_v41 = vld [vmem:[%s14623_s1 + $0x188] sm:$0xff]   ;;  %v9478_v21 = vld [vmem:[%s14623_s1 + $0x190] sm:$0xff]  }
 0x1d9   :  { %2732 = vmatmul.mubr.bf16.gmra.mrb[76].mxu0 %v10597_v17 }
 0x1da   :  { %2739 = vmatprep.mubr.bf16.mxu0 %v10376_v15  ;;  %v543_v15 = vld [vmem:[#allocation2 + $0x25a] sm:$0xff] }
 0x1db   :  { %v10613_v38 = vpack.c.bf16 %v544_v22, %v543_v15  ;;  %v758_v15 = vld [vmem:[#allocation2 + $0x51] sm:$0xff] }
 0x1dc   :  { %v9479_v22 = vld [vmem:[%s14623_s1 + $0x198] sm:$0xff]  }
 0x1e1   :  { %2740 = vmatmul.mubr.bf16.gmra.mrb[80].mxu0 %v10601_v47 }
 0x1e2   :  { %2747 = vmatprep.mubr.bf16.mxu0 %v10382_v7  ;;  %v545_v7 = vld [vmem:[#allocation2 + $0x272] sm:$0xff] }
 0x1e3   :  { %v10617_v1 = vpack.c.bf16 %v546_v12, %v545_v7  ;;  %v9480_v12 = vld [vmem:[%s14623_s1 + $0x1a0] sm:$0xff]  }
 0x1e9   :  { %2748 = vmatmul.mubr.bf16.gmra.mrb[84].mxu0 %v10605_v20 }
 0x1ea   :  { %2755 = vmatprep.mubr.bf16.mxu0 %v10388_v24  ;;  %v547_v24 = vld [vmem:[#allocation2 + $0x28a] sm:$0xff] }
 0x1eb   :  { %v10621_v55 = vpack.c.bf16 %v548_v45, %v547_v24  ;;  %v760_v24 = vld [vmem:[#allocation2 + $0x69] sm:$0xff] }
 0x1ec   :  { %v9481_v45 = vld [vmem:[%s14623_s1 + $0x1a8] sm:$0xff]  }
 0x1f1   :  { %2756 = vmatmul.mubr.bf16.gmra.mrb[88].mxu0 %v10609_v36 }
 0x1f2   :  { %2763 = vmatprep.mubr.bf16.mxu0 %v10394_v27  ;;  %v549_v27 = vld [vmem:[#allocation2 + $0x2a2] sm:$0xff] }
 0x1f3   :  { %v10625_v13 = vpack.c.bf16 %v550_v49, %v549_v27  ;;  %v9482_v49 = vld [vmem:[%s14623_s1 + $0x1b0] sm:$0xff]  }
 0x1f9   :  { %2764 = vmatmul.mubr.bf16.gmra.mrb[92].mxu0 %v10613_v38 }
 0x1fa   :  { %2771 = vmatprep.mubr.bf16.mxu0 %v10400_v54  ;;  %v551_v54 = vld [vmem:[#allocation2 + $0x2ba] sm:$0xff] }
 0x1fb   :  { %v10629_v35 = vpack.c.bf16 %v552_v14, %v551_v54  ;;  %v762_v54 = vld [vmem:[#allocation2 + $0x81] sm:$0xff]  ;;  %v9483_v14 = vld [vmem:[%s14623_s1 + $0x1b8] sm:$0xff]  }
 0x201   :  { %2772 = vmatmul.mubr.bf16.gmra.mrb[96].mxu0 %v10617_v1 }
 0x202   :  { %2779 = vmatprep.mubr.bf16.mxu0 %v10406_v51  ;;  %v553_v51 = vld [vmem:[#allocation2 + $0x2d2] sm:$0xff] }
 0x203   :  { %v10633_v28 = vpack.c.bf16 %v554_v16, %v553_v51  ;;  %v9484_v16 = vld [vmem:[%s14623_s1 + $0x1c0] sm:$0xff]  }
 0x209   :  { %2780 = vmatmul.mubr.bf16.gmra.mrb[100].mxu0 %v10621_v55 }
 0x20a   :  { %2787 = vmatprep.mubr.bf16.mxu0 %v10412_v58  ;;  %v555_v58 = vld [vmem:[#allocation2 + $0x2ea] sm:$0xff] }
 0x20b   :  { %v10637_v8 = vpack.c.bf16 %v556_v33, %v555_v58  ;;  %v764_v58 = vld [vmem:[#allocation2 + $0x99] sm:$0xff]  ;;  %v9485_v33 = vld [vmem:[%s14623_s1 + $0x1c8] sm:$0xff]  }
 0x211   :  { %2788 = vmatmul.mubr.bf16.gmra.mrb[104].mxu0 %v10625_v13 }
 0x212   :  { %2795 = vmatprep.mubr.bf16.mxu0 %v10418_v32  ;;  %v557_v32 = vld [vmem:[#allocation2 + $0x302] sm:$0xff] }
 0x213   :  { %v10641_v19 = vpack.c.bf16 %v558_v5, %v557_v32  ;;  %v9486_v5 = vld [vmem:[%s14623_s1 + $0x1d0] sm:$0xff]  }
 0x219   :  { %2796 = vmatmul.mubr.bf16.gmra.mrb[108].mxu0 %v10629_v35 }
 0x21a   :  { %2803 = vmatprep.mubr.bf16.mxu0 %v10424_v6  ;;  %v688_v6 = vld [vmem:[#allocation2 + $0x338] sm:$0xff] }
 0x21b   :  { %v720_v23 = vpack.c.bf16 %v688_v6, %v687_v37  ;;  %v766_v37 = vld [vmem:[#allocation2 + $0xb1] sm:$0xff] }
 0x221   :  { %2804 = vmatmul.mubr.bf16.gmra.mrb[112].mxu0 %v10633_v28 }
 0x222   :  { %2811 = vmatprep.mubr.bf16.mxu0 %v10430_v30  ;;  %v560_v30 = vld [vmem:[#allocation2 + $0x322] sm:$0xff] }
 0x223   :  { %v10644_v60 = vpack.c.bf16 %v560_v30, %v559_v46  ;;  %v767_v46 = vld [vmem:[#allocation2 + $0xc1] sm:$0xff]  ;;  %v768_v30 = vld [vmem:[#allocation2 + $0xc9] sm:$0xff] }
 0x229   :  { %2812 = vmatmul.mubr.bf16.gmra.mrb[116].mxu0 %v10637_v8 }
 0x22a   :  { %2819 = vmatprep.mubr.bf16.mxu0 %v10448_v61  ;;  %v754_v61 = vld [vmem:[#allocation2 + $0x21] sm:$0xff] }
 0x22b   :  { %v817_v52 = vpack.c.bf16 %v754_v61, %v753_v2  ;;  %v769_v2 = vld [vmem:[#allocation2 + $0xd9] sm:$0xff]  ;;  %v770_v61 = vld [vmem:[#allocation2 + $0xe1] sm:$0xff] }
 0x231   :  { %2820 = vmatmul.mubr.bf16.gmra.mrb[120].mxu0 %v10641_v19 }
 0x232   :  { %2827 = vmatprep.mubr.bf16.mxu0 %v720_v23  ;;  %v9487_v23 = vld [vmem:[%s14623_s1 + $0x1d8] sm:$0xff]  }
 0x239   :  { %2828 = vmatmul.mubr.bf16.gmra.mrb[124].mxu0 %v10644_v60 }
 0x23a   :  { %2868 = vmatprep.mubr.bf16.mxu0 %v10460_v10  ;;  %v10656_v10 = vpack.c.bf16 %v756_v31, %v755_v9  ;;  %v772_v9 = vld [vmem:[#allocation2 + $0xf9] sm:$0xff] }
 0x241   :  { %2869 = vmatmul.mubr.bf16.vlgmr.msra.gmra.mrb[0].mxu0 %v817_v52  ;;  %v10725_v52 = vpack.c.bf16 %v770_v61, %v769_v2  ;;  %v9499_v2 = vld [vmem:[%s14623_s1 + $0x238] sm:$0xff]  }
 0x242   :  { %3126 = vmatpush1.bf16.msra.mxu0 %v9476_v26  ;;  %2876 = vmatprep.mubr.bf16.mxu0 %v10472_v11  ;;  %v757_v11 = vld [vmem:[#allocation2 + $0x49] sm:$0xff]  ;;  %v771_v26 = vld [vmem:[#allocation2 + $0xf1] sm:$0xff] }
 0x243   :  { %3127 = vmatprep.subr.bf16.mxu0 %v14631_v0  ;;  %v10668_v7 = vpack.c.bf16 %v758_v15, %v757_v11  ;;  %v10733_v31 = vpack.c.bf16 %v772_v9, %v771_v26  ;;  %v775_v11 = vld [vmem:[#allocation2 + $0x121] sm:$0xff]  ;;  %v776_v15 = vld [vmem:[#allocation2 + $0x129] sm:$0xff]  ;;  %v1266_v61 = vld [vmem:[#allocation2 + $0x32] sm:$0xff] }
 0x244   :  { %v786_v26 = vld [vmem:[#allocation2 + $0x1d1] sm:$0xff] }
 0x246   :  { %3128 = vmatpush1.bf16.msra.mxu0 %v9477_v41  ;;  %v774_v41 = vld [vmem:[#allocation2 + $0x111] sm:$0xff] }
 0x247   :  { %3129 = vmatprep.subr.bf16.mxu0 %v14631_v0 }
 0x249   :  { %2877 = vmatmul.mubr.bf16.gmra.mrb[4].mxu0 %v10656_v10 }
 0x24a   :  { %2884 = vmatprep.mubr.bf16.mxu0 %v10484_v56  ;;  %3130 = vmatpush1.bf16.msra.mxu0 %v9478_v21  ;;  %v759_v56 = vld [vmem:[#allocation2 + $0x61] sm:$0xff] }
 0x24b   :  { %3131 = vmatprep.subr.bf16.mxu0 %v14631_v0  ;;  %v10680_v27 = vpack.c.bf16 %v760_v24, %v759_v56  ;;  %v9490_v56 = vld [vmem:[%s14623_s1 + $0x200] sm:$0xff]  }
 0x24c   :  { %8482 = vmatprep.subr.bf16.mxu1 %v9490_v56 }
 0x24d   :  { %8483 = vmatpush3.bf16.msra.mxu1 %v9490_v56  ;;  %v790_v56 = vld [vmem:[#allocation2 + $0x201] sm:$0xff] }
 0x24e   :  { %3132 = vmatpush1.bf16.msra.mxu0 %v9479_v22  ;;  %v10745_v22 = vpack.c.bf16 %v776_v15, %v775_v11  ;;  %v788_v11 = vld [vmem:[#allocation2 + $0x1e9] sm:$0xff] }
 0x24f   :  { %3133 = vmatprep.subr.bf16.mxu0 %v14631_v0 }
 0x251   :  { %2885 = vmatmul.mubr.bf16.gmra.mrb[8].mxu0 %v10668_v7 }
 0x252   :  { %2892 = vmatprep.mubr.bf16.mxu0 %v10496_v57  ;;  %3134 = vmatpush1.bf16.msra.mxu0 %v9480_v12  ;;  %v761_v57 = vld [vmem:[#allocation2 + $0x79] sm:$0xff]  ;;  %v778_v12 = vld [vmem:[#allocation2 + $0x141] sm:$0xff] }
 0x253   :  { %3135 = vmatprep.subr.bf16.mxu0 %v14631_v0  ;;  %v10692_v51 = vpack.c.bf16 %v762_v54, %v761_v57  ;;  %v9493_v57 = vld [vmem:[%s14623_s1 + $0x210] sm:$0xff]  }
 0x256   :  { %3136 = vmatpush1.bf16.msra.mxu0 %v9481_v45  ;;  %v779_v45 = vld [vmem:[#allocation2 + $0x151] sm:$0xff] }
 0x257   :  { %3137 = vmatprep.subr.bf16.mxu0 %v14631_v0 }
 0x259   :  { %2893 = vmatmul.mubr.bf16.gmra.mrb[12].mxu0 %v10680_v27 }
 0x25a   :  { %2900 = vmatprep.mubr.bf16.mxu0 %v10508_v29  ;;  %3138 = vmatpush1.bf16.msra.mxu0 %v9482_v49  ;;  %v763_v29 = vld [vmem:[#allocation2 + $0x91] sm:$0xff]  ;;  %v780_v49 = vld [vmem:[#allocation2 + $0x159] sm:$0xff] }
 0x25b   :  { %3139 = vmatprep.subr.bf16.mxu0 %v14631_v0  ;;  %v10704_v32 = vpack.c.bf16 %v764_v58, %v763_v29  ;;  %v10766_v54 = vpack.c.bf16 %v780_v49, %v779_v45  ;;  %v9495_v29 = vld [vmem:[%s14623_s1 + $0x220] sm:$0xff]  }
 0x25c   :  { %v911_v58 = vld [vmem:[#allocation2 + $0x182] sm:$0xff] }
 0x25d   :  { %v1273_v45 = vld [vmem:[#allocation2 + $0x82] sm:$0xff] }
 0x25e   :  { %3140 = vmatpush1.bf16.msra.mxu0 %v9483_v14  ;;  %v781_v14 = vld [vmem:[#allocation2 + $0x169] sm:$0xff] }
 0x25f   :  { %3141 = vmatprep.subr.bf16.mxu0 %v14631_v0 }
 0x261   :  { %2901 = vmatmul.mubr.bf16.gmra.mrb[16].mxu0 %v10692_v51 }
 0x262   :  { %2908 = vmatprep.mubr.bf16.mxu0 %v10517_v39  ;;  %3142 = vmatpush1.bf16.msra.mxu0 %v9484_v16  ;;  %v765_v39 = vld [vmem:[#allocation2 + $0xa9] sm:$0xff]  ;;  %v782_v16 = vld [vmem:[#allocation2 + $0x171] sm:$0xff] }
 0x263   :  { %3143 = vmatprep.subr.bf16.mxu0 %v14631_v0  ;;  %v10713_v6 = vpack.c.bf16 %v766_v37, %v765_v39  ;;  %v9497_v37 = vld [vmem:[%s14623_s1 + $0x228] sm:$0xff]  }
 0x266   :  { %3144 = vmatpush1.bf16.msra.mxu0 %v9485_v33  ;;  %v912_v33 = vld [vmem:[#allocation2 + $0x18a] sm:$0xff] }
 0x267   :  { %3145 = vmatprep.subr.bf16.mxu0 %v14631_v0  ;;  %v10778_v39 = vpack.c.bf16 %v912_v33, %v911_v58  ;;  %v794_v58 = vld [vmem:[#allocation2 + $0x231] sm:$0xff] }
 0x269   :  { %2909 = vmatmul.mubr.bf16.gmra.mrb[20].mxu0 %v10704_v32 }
 0x26a   :  { %2916 = vmatprep.mubr.bf16.mxu0 %v10525_v34  ;;  %3146 = vmatpush1.bf16.msra.mxu0 %v9486_v5  ;;  %v10721_v34 = vpack.c.bf16 %v768_v30, %v767_v46  ;;  %v10776_v5 = vpack.c.bf16 %v782_v16, %v781_v14  ;;  %v832_v46 = vpack.c.bf16 %v10440_v40, %v10435_v59  ;;  %v785_v30 = vld [vmem:[#allocation2 + $0x1c9] sm:$0xff]  ;;  %v787_v40 = vld [vmem:[#allocation2 + $0x1e1] sm:$0xff]  ;;  %v1274_v16 = vld [vmem:[#allocation2 + $0x92] sm:$0xff] }
 0x26b   :  { %3147 = vmatprep.subr.bf16.mxu0 %v14631_v0  ;;  %v833_v59 = vpack.c.bf16 %v786_v26, %v785_v30  ;;  %v10799_v15 = vpack.c.bf16 %v788_v11, %v787_v40  ;;  %v796_v30 = vld [vmem:[#allocation2 + $0x249] sm:$0xff]  ;;  %v798_v26 = vld [vmem:[#allocation2 + $0x261] sm:$0xff]  ;;  %v800_v40 = vld [vmem:[#allocation2 + $0x279] sm:$0xff] }
 0x26e   :  { %3148 = vmatpush1.bf16.msra.mxu0 %v9487_v23  ;;  %v9498_v23 = vld [vmem:[%s14623_s1 + $0x230] sm:$0xff]  }
 0x26f   :  { %3149 = vmatprep.subr.bf16.mxu0 %v14631_v0 }
 0x271   :  { %2917 = vmatmul.mubr.bf16.gmra.mrb[24].mxu0 %v10713_v6 }
 0x272   :  { %2924 = vmatprep.mubr.bf16.mxu0 %v10529_v4  ;;  %v9488_v4 = vld [vmem:[%s14623_s1 + $0x1e0] sm:$0xff]  }
 0x273   :  { %3150 = vmatpush1.bf16.msra.mxu0 %v9488_v4  ;;  %v1267_v4 = vld [vmem:[#allocation2 + $0x3a] sm:$0xff] }
 0x274   :  { %3151 = vmatprep.subr.bf16.mxu0 %v14631_v0  ;;  %v1330_v9 = vpack.c.bf16 %v1267_v4, %v1266_v61  ;;  %v1278_v61 = vld [vmem:[#allocation2 + $0xc2] sm:$0xff]  ;;  %v1279_v4 = vld [vmem:[#allocation2 + $0xca] sm:$0xff] }
 0x276   :  { %8498 = vmatprep.mubr.bf16.mxu1 %v1330_v9  ;;  %v1336_v9 = vpack.c.bf16 %v1279_v4, %v1278_v61  ;;  %v1291_v61 = vld [vmem:[#allocation2 + $0x15a] sm:$0xff]  ;;  %v810_v4 = vld [vmem:[#allocation2 + $0x2f1] sm:$0xff] }
 0x279   :  { %2925 = vmatmul.mubr.bf16.gmra.mrb[28].mxu0 %v10721_v34 }
 0x27a   :  { %2932 = vmatprep.mubr.bf16.mxu0 %v10537_v18  ;;  %v773_v18 = vld [vmem:[#allocation2 + $0x109] sm:$0xff] }
 0x27b   :  { %v10737_v21 = vpack.c.bf16 %v774_v41, %v773_v18  ;;  %v1268_v18 = vld [vmem:[#allocation2 + $0x4a] sm:$0xff]  ;;  %v1269_v41 = vld [vmem:[#allocation2 + $0x52] sm:$0xff] }
 0x281   :  { %2933 = vmatmul.mubr.bf16.gmra.mrb[32].mxu0 %v10725_v52 }
 0x282   :  { %2940 = vmatprep.mubr.bf16.mxu0 %v10541_v43  ;;  %v9489_v43 = vld [vmem:[%s14623_s1 + $0x1e8] sm:$0xff]  }
 0x283   :  { %3152 = vmatpush1.bf16.msra.mxu0 %v9489_v43  ;;  %v1331_v43 = vpack.c.bf16 %v1269_v41, %v1268_v18  ;;  %v1280_v18 = vld [vmem:[#allocation2 + $0xda] sm:$0xff]  ;;  %v1281_v41 = vld [vmem:[#allocation2 + $0xe2] sm:$0xff] }
 0x284   :  { %3153 = vmatprep.subr.bf16.mxu0 %v14631_v0 }
 0x289   :  { %2941 = vmatmul.mubr.bf16.gmra.mrb[36].mxu0 %v10733_v31 }
 0x28a   :  { %2948 = vmatprep.mubr.bf16.mxu0 %v10549_v50  ;;  %v777_v50 = vld [vmem:[#allocation2 + $0x139] sm:$0xff] }
 0x28b   :  { %v10752_v24 = vpack.c.bf16 %v778_v12, %v777_v50  ;;  %v1270_v50 = vld [vmem:[#allocation2 + $0x62] sm:$0xff]  ;;  %v1271_v12 = vld [vmem:[#allocation2 + $0x6a] sm:$0xff] }
 0x291   :  { %2949 = vmatmul.mubr.bf16.gmra.mrb[40].mxu0 %v10737_v21 }
 0x292   :  { %2956 = vmatprep.mubr.bf16.mxu0 %v10553_v25  ;;  %v9491_v25 = vld [vmem:[%s14623_s1 + $0x1f0] sm:$0xff]  }
 0x293   :  { %3154 = vmatpush1.bf16.msra.mxu0 %v9491_v25  ;;  %v1332_v25 = vpack.c.bf16 %v1271_v12, %v1270_v50  ;;  %v1283_v50 = vld [vmem:[#allocation2 + $0xfa] sm:$0xff]  ;;  %v802_v12 = vld [vmem:[#allocation2 + $0x291] sm:$0xff] }
 0x294   :  { %3155 = vmatprep.subr.bf16.mxu0 %v14631_v0 }
 0x299   :  { %2957 = vmatmul.mubr.bf16.gmra.mrb[44].mxu0 %v10745_v22 }
 0x29a   :  { %2964 = vmatprep.mubr.bf16.mxu0 %v10561_v53  ;;  %v9492_v53 = vld [vmem:[%s14623_s1 + $0x208] sm:$0xff]  }
 0x29b   :  { %8484 = vmatprep.subr.bf16.mxu1 %v9492_v53 }
 0x29c   :  { %8485 = vmatpush3.bf16.msra.mxu1 %v9492_v53  ;;  %v1272_v53 = vld [vmem:[#allocation2 + $0x7a] sm:$0xff] }
 0x29d   :  { %8486 = vmatprep.subr.bf16.mxu1 %v9493_v57  ;;  %v1333_v49 = vpack.c.bf16 %v1273_v45, %v1272_v53  ;;  %v1285_v53 = vld [vmem:[#allocation2 + $0x112] sm:$0xff] }
 0x2a0   :  { %8487 = vmatpush3.bf16.msra.mxu1 %v9493_v57 }
 0x2a1   :  { %2965 = vmatmul.mubr.bf16.gmra.mrb[48].mxu0 %v10752_v24 }
 0x2a2   :  { %2972 = vmatprep.mubr.bf16.mxu0 %v10565_v63  ;;  %v9494_v63 = vld [vmem:[%s14623_s1 + $0x218] sm:$0xff]  }
 0x2a3   :  { %8488 = vmatprep.subr.bf16.mxu1 %v9494_v63 }
 0x2a4   :  { %8489 = vmatpush3.bf16.msra.mxu1 %v9494_v63  ;;  %v792_v63 = vld [vmem:[#allocation2 + $0x219] sm:$0xff] }
 0x2a5   :  { %8490 = vmatprep.subr.bf16.mxu1 %v9495_v29 }
 0x2a8   :  { %8491 = vmatpush3.bf16.msra.mxu1 %v9495_v29  ;;  %v1275_v29 = vld [vmem:[#allocation2 + $0x9a] sm:$0xff] }
 0x2a9   :  { %2973 = vmatmul.mubr.bf16.gmra.mrb[52].mxu0 %v10766_v54  ;;  %8492 = vmatprep.subr.bf16.mxu1 %v9497_v37  ;;  %v1334_v33 = vpack.c.bf16 %v1275_v29, %v1274_v16  ;;  %v1287_v16 = vld [vmem:[#allocation2 + $0x12a] sm:$0xff]  ;;  %v806_v29 = vld [vmem:[#allocation2 + $0x2c1] sm:$0xff] }
 0x2aa   :  { %2980 = vmatprep.mubr.bf16.mxu0 %v10584_v48  ;;  %v9496_v48 = vld [vmem:[%s14623_s1 + $0x1f8] sm:$0xff]  }
 0x2ab   :  { %3156 = vmatpush1.bf16.msra.mxu0 %v9496_v48  ;;  %v1276_v48 = vld [vmem:[#allocation2 + $0xaa] sm:$0xff] }
 0x2ac   :  { %8493 = vmatpush3.bf16.msra.mxu1 %v9497_v37  ;;  %v1277_v37 = vld [vmem:[#allocation2 + $0xb2] sm:$0xff] }
 0x2ad   :  { %8494 = vmatprep.subr.bf16.mxu1 %v9498_v23 }
 0x2b0   :  { %8495 = vmatpush3.bf16.msra.mxu1 %v9498_v23  ;;  %v1335_v23 = vpack.c.bf16 %v1277_v37, %v1276_v48  ;;  %v1289_v48 = vld [vmem:[#allocation2 + $0x142] sm:$0xff] }
 0x2b1   :  { %2981 = vmatmul.mubr.bf16.gmra.mrb[56].mxu0 %v10776_v5  ;;  %8496 = vmatprep.subr.bf16.mxu1 %v9499_v2 }
 0x2b2   :  { %2988 = vmatprep.mubr.bf16.mxu0 %v10778_v39 }
 0x2b4   :  { %8497 = vmatpush3.bf16.msra.mxu1 %v9499_v2 }
 0x2b5   :  { %6200 = vmatprep.subr.bf16.mxu1 %v14631_v0 }
 0x2b7   :  { %8499 = vmatmul.mubr.bf16.vlgmr.msra.gmra.mrb[0].mxu1 %v1331_v43  ;;  %v1337_v43 = vpack.c.bf16 %v1281_v41, %v1280_v18  ;;  %v1293_v18 = vld [vmem:[#allocation2 + $0x172] sm:$0xff] }
 0x2b8   :  { %8502 = vmatprep.mubr.bf16.mxu1 %v1332_v25  ;;  %v1284_v25 = vld [vmem:[#allocation2 + $0x10a] sm:$0xff] }
 0x2b9   :  { %2989 = vmatmul.mubr.bf16.gmra.mrb[60].mxu0 %v832_v46  ;;  %v1339_v45 = vpack.c.bf16 %v1285_v53, %v1284_v25 }
 0x2ba   :  { %2996 = vmatprep.mubr.bf16.mxu0 %v10589_v42  ;;  %v789_v42 = vld [vmem:[#allocation2 + $0x1f9] sm:$0xff] }
 0x2bb   :  { %v10803_v57 = vpack.c.bf16 %v790_v56, %v789_v42  ;;  %v1282_v42 = vld [vmem:[#allocation2 + $0xf2] sm:$0xff] }
 0x2bc   :  { %v1338_v56 = vpack.c.bf16 %v1283_v50, %v1282_v42  ;;  %v1296_v42 = vld [vmem:[#allocation2 + $0x19a] sm:$0xff]  ;;  %v1297_v50 = vld [vmem:[#allocation2 + $0x1a2] sm:$0xff] }
 0x2bd   :  { %v1345_v25 = vpack.c.bf16 %v1297_v50, %v1296_v42 }
 0x2bf   :  { %8503 = vmatmul.mubr.bf16.gmra.mrb[4].mxu1 %v1333_v49 }
 0x2c0   :  { %8506 = vmatprep.mubr.bf16.mxu1 %v1334_v33  ;;  %v1288_v33 = vld [vmem:[#allocation2 + $0x13a] sm:$0xff] }
 0x2c1   :  { %2997 = vmatmul.mubr.bf16.gmra.mrb[64].mxu0 %v833_v59  ;;  %v1341_v37 = vpack.c.bf16 %v1289_v48, %v1288_v33  ;;  %v1012_v33 = vld [vmem:[#allocation2 + $0x48] sm:$0xff]  ;;  %v1013_v48 = vld [vmem:[#allocation2 + $0x50] sm:$0xff] }
 0x2c2   :  { %3004 = vmatprep.mubr.bf16.mxu0 %v10593_v62  ;;  %v791_v62 = vld [vmem:[#allocation2 + $0x211] sm:$0xff] }
 0x2c3   :  { %v10807_v14 = vpack.c.bf16 %v792_v63, %v791_v62  ;;  %v804_v62 = vld [vmem:[#allocation2 + $0x2a9] sm:$0xff] }
 0x2c7   :  { %8507 = vmatmul.mubr.bf16.gmra.mrb[8].mxu1 %v1335_v23 }
 0x2c8   :  { %8510 = vmatprep.mubr.bf16.mxu1 %v1336_v9  ;;  %v1292_v9 = vld [vmem:[#allocation2 + $0x16a] sm:$0xff] }
 0x2c9   :  { %3005 = vmatmul.mubr.bf16.gmra.mrb[68].mxu0 %v10799_v15  ;;  %v1343_v41 = vpack.c.bf16 %v1293_v18, %v1292_v9  ;;  %v1018_v18 = vld [vmem:[#allocation2 + $0x90] sm:$0xff] }
 0x2ca   :  { %3012 = vmatprep.mubr.bf16.mxu0 %v10597_v17  ;;  %v793_v17 = vld [vmem:[#allocation2 + $0x229] sm:$0xff] }
 0x2cb   :  { %v10811_v46 = vpack.c.bf16 %v794_v58, %v793_v17  ;;  %v1286_v17 = vld [vmem:[#allocation2 + $0x122] sm:$0xff] }
 0x2cc   :  { %v1340_v58 = vpack.c.bf16 %v1287_v16, %v1286_v17  ;;  %v1300_v17 = vld [vmem:[#allocation2 + $0x1fa] sm:$0xff]  ;;  %v1301_v16 = vld [vmem:[#allocation2 + $0x202] sm:$0xff] }
 0x2cf   :  { %8511 = vmatmul.mubr.bf16.gmra.mrb[12].mxu1 %v1337_v43 }
 0x2d0   :  { %8514 = vmatprep.mubr.bf16.mxu1 %v1338_v56  ;;  %v944_v56 = vld [vmem:[#allocation2 + $0x33a] sm:$0xff] }
 0x2d1   :  { %3013 = vmatmul.mubr.bf16.gmra.mrb[72].mxu0 %v10803_v57 }
 0x2d2   :  { %3020 = vmatprep.mubr.bf16.mxu0 %v10601_v47  ;;  %v795_v47 = vld [vmem:[#allocation2 + $0x241] sm:$0xff] }
 0x2d3   :  { %v10815_v2 = vpack.c.bf16 %v796_v30, %v795_v47  ;;  %v808_v47 = vld [vmem:[#allocation2 + $0x2d9] sm:$0xff] }
 0x2d7   :  { %8515 = vmatmul.mubr.bf16.gmra.mrb[16].mxu1 %v1339_v45  ;;  %v1298_v45 = vld [vmem:[#allocation2 + $0x1e2] sm:$0xff] }
 0x2d8   :  { %8518 = vmatprep.mubr.bf16.mxu1 %v1340_v58 }
 0x2d9   :  { %3021 = vmatmul.mubr.bf16.gmra.mrb[76].mxu0 %v10807_v14 }
 0x2da   :  { %3028 = vmatprep.mubr.bf16.mxu0 %v10605_v20  ;;  %v797_v20 = vld [vmem:[#allocation2 + $0x259] sm:$0xff] }
 0x2db   :  { %v10819_v59 = vpack.c.bf16 %v798_v26, %v797_v20  ;;  %v1290_v20 = vld [vmem:[#allocation2 + $0x152] sm:$0xff] }
 0x2dc   :  { %v1342_v26 = vpack.c.bf16 %v1291_v61, %v1290_v20  ;;  %v1305_v20 = vld [vmem:[#allocation2 + $0x232] sm:$0xff] }
 0x2df   :  { %8519 = vmatmul.mubr.bf16.gmra.mrb[20].mxu1 %v1341_v37  ;;  %v1302_v37 = vld [vmem:[#allocation2 + $0x212] sm:$0xff] }
 0x2e0   :  { %8522 = vmatprep.mubr.bf16.mxu1 %v1342_v26  ;;  %v1017_v26 = vld [vmem:[#allocation2 + $0x80] sm:$0xff] }
 0x2e1   :  { %3029 = vmatmul.mubr.bf16.gmra.mrb[80].mxu0 %v10811_v46 }
 0x2e2   :  { %3036 = vmatprep.mubr.bf16.mxu0 %v10609_v36  ;;  %v799_v36 = vld [vmem:[#allocation2 + $0x271] sm:$0xff] }
 0x2e3   :  { %v10823_v11 = vpack.c.bf16 %v800_v40, %v799_v36  ;;  %v812_v36 = vld [vmem:[#allocation2 + $0x309] sm:$0xff] }
 0x2e7   :  { %8523 = vmatmul.mubr.bf16.gmra.mrb[24].mxu1 %v1343_v41  ;;  %v1306_v41 = vld [vmem:[#allocation2 + $0x242] sm:$0xff] }
 0x2e8   :  { %8526 = vmatprep.mubr.bf16.mxu1 %v10778_v39 }
 0x2e9   :  { %3037 = vmatmul.mubr.bf16.gmra.mrb[84].mxu0 %v10815_v2 }
 0x2ea   :  { %3044 = vmatprep.mubr.bf16.mxu0 %v10613_v38  ;;  %v801_v38 = vld [vmem:[#allocation2 + $0x289] sm:$0xff] }
 0x2eb   :  { %v10827_v49 = vpack.c.bf16 %v802_v12, %v801_v38  ;;  %v814_v38 = vld [vmem:[#allocation2 + $0x321] sm:$0xff]  ;;  %v943_v12 = vld [vmem:[#allocation2 + $0x332] sm:$0xff] }
 0x2ec   :  { %v10854_v53 = vpack.c.bf16 %v944_v56, %v943_v12  ;;  %v1021_v12 = vld [vmem:[#allocation2 + $0xb0] sm:$0xff] }
 0x2ef   :  { %8527 = vmatmul.mubr.bf16.gmra.mrb[28].mxu1 %v1345_v25  ;;  %v1022_v25 = vld [vmem:[#allocation2 + $0xc0] sm:$0xff] }
 0x2f1   :  { %3045 = vmatmul.mubr.bf16.gmra.mrb[88].mxu0 %v10819_v59 }
 0x2f2   :  { %3052 = vmatprep.mubr.bf16.mxu0 %v10617_v1  ;;  %v803_v1 = vld [vmem:[#allocation2 + $0x2a1] sm:$0xff] }
 0x2f3   :  { %v10831_v63 = vpack.c.bf16 %v804_v62, %v803_v1  ;;  %v1299_v1 = vld [vmem:[#allocation2 + $0x1ea] sm:$0xff]  ;;  %v1011_v62 = vld [vmem:[#allocation2 + $0x38] sm:$0xff] }
 0x2f9   :  { %3053 = vmatmul.mubr.bf16.gmra.mrb[92].mxu0 %v10823_v11 }
 0x2fa   :  { %3060 = vmatprep.mubr.bf16.mxu0 %v10621_v55  ;;  %v805_v55 = vld [vmem:[#allocation2 + $0x2b9] sm:$0xff] }
 0x2fb   :  { %v10835_v23 = vpack.c.bf16 %v806_v29, %v805_v55  ;;  %v1346_v55 = vpack.c.bf16 %v1299_v1, %v1298_v45  ;;  %v1347_v29 = vpack.c.bf16 %v1301_v16, %v1300_v17  ;;  %v1312_v1 = vld [vmem:[#allocation2 + $0x28a] sm:$0xff]  ;;  %v1025_v16 = vld [vmem:[#allocation2 + $0xe0] sm:$0xff] }
 0x2fd   :  { %8530 = vmatprep.mubr.bf16.mxu1 %v1346_v55 }
 0x2fe   :  { %8531 = vmatmul.mubr.bf16.gmra.mrb[32].mxu1 %v1347_v29 }
 0x301   :  { %3061 = vmatmul.mubr.bf16.gmra.mrb[96].mxu0 %v10827_v49 }
 0x302   :  { %3068 = vmatprep.mubr.bf16.mxu0 %v10625_v13  ;;  %v807_v13 = vld [vmem:[#allocation2 + $0x2d1] sm:$0xff] }
 0x303   :  { %v10839_v30 = vpack.c.bf16 %v808_v47, %v807_v13  ;;  %v1303_v13 = vld [vmem:[#allocation2 + $0x21a] sm:$0xff] }
 0x304   :  { %v1348_v47 = vpack.c.bf16 %v1303_v13, %v1302_v37  ;;  %v1317_v37 = vld [vmem:[#allocation2 + $0x2c2] sm:$0xff] }
 0x306   :  { %8534 = vmatprep.mubr.bf16.mxu1 %v1348_v47  ;;  %v1029_v47 = vld [vmem:[#allocation2 + $0x110] sm:$0xff] }
 0x309   :  { %3069 = vmatmul.mubr.bf16.gmra.mrb[100].mxu0 %v10831_v63 }
 0x30a   :  { %3076 = vmatprep.mubr.bf16.mxu0 %v10629_v35  ;;  %v809_v35 = vld [vmem:[#allocation2 + $0x2e9] sm:$0xff] }
 0x30b   :  { %v10843_v43 = vpack.c.bf16 %v810_v4, %v809_v35  ;;  %v1304_v35 = vld [vmem:[#allocation2 + $0x22a] sm:$0xff] }
 0x30c   :  { %v1349_v61 = vpack.c.bf16 %v1305_v20, %v1304_v35  ;;  %v1030_v20 = vld [vmem:[#allocation2 + $0x120] sm:$0xff] }
 0x30e   :  { %8535 = vmatmul.mubr.bf16.gmra.mrb[36].mxu1 %v1349_v61  ;;  %v1318_v61 = vld [vmem:[#allocation2 + $0x2d2] sm:$0xff] }
 0x311   :  { %3077 = vmatmul.mubr.bf16.gmra.mrb[104].mxu0 %v10835_v23 }
 0x312   :  { %3084 = vmatprep.mubr.bf16.mxu0 %v10633_v28  ;;  %v811_v28 = vld [vmem:[#allocation2 + $0x301] sm:$0xff] }
 0x313   :  { %v10848_v40 = vpack.c.bf16 %v812_v36, %v811_v28  ;;  %v1307_v28 = vld [vmem:[#allocation2 + $0x24a] sm:$0xff] }
 0x314   :  { %v1350_v36 = vpack.c.bf16 %v1307_v28, %v1306_v41  ;;  %v1033_v28 = vld [vmem:[#allocation2 + $0x140] sm:$0xff] }
 0x316   :  { %8538 = vmatprep.mubr.bf16.mxu1 %v1350_v36 }
 0x319   :  { %3085 = vmatmul.mubr.bf16.gmra.mrb[108].mxu0 %v10839_v30 }
 0x31a   :  { %3092 = vmatprep.mubr.bf16.mxu0 %v10637_v8  ;;  %v813_v8 = vld [vmem:[#allocation2 + $0x319] sm:$0xff] }
 0x31b   :  { %v10852_v39 = vpack.c.bf16 %v814_v38, %v813_v8  ;;  %v1308_v8 = vld [vmem:[#allocation2 + $0x25a] sm:$0xff]  ;;  %v1309_v38 = vld [vmem:[#allocation2 + $0x262] sm:$0xff] }
 0x31c   :  { %v1351_v42 = vpack.c.bf16 %v1309_v38, %v1308_v8 }
 0x31e   :  { %8539 = vmatmul.mubr.bf16.gmra.mrb[40].mxu1 %v1351_v42  ;;  %v1034_v42 = vld [vmem:[#allocation2 + $0x150] sm:$0xff] }
 0x321   :  { %3093 = vmatmul.mubr.bf16.gmra.mrb[112].mxu0 %v10843_v43 }
 0x322   :  { %3100 = vmatprep.mubr.bf16.mxu0 %v10641_v19  ;;  %v848_v19 = vpack.c.bf16 %v10575_v3, %v10570_v44  ;;  %v1075_v44 = vpack.c.bf16 %v1013_v48, %v1012_v33  ;;  %v1014_v3 = vld [vmem:[#allocation2 + $0x60] sm:$0xff]  ;;  %v1315_v48 = vld [vmem:[#allocation2 + $0x2aa] sm:$0xff] }
 0x323   :  { %v1314_v33 = vld [vmem:[#allocation2 + $0x2a2] sm:$0xff] }
 0x329   :  { %3101 = vmatmul.mubr.bf16.gmra.mrb[116].mxu0 %v10848_v40 }
 0x32a   :  { %3108 = vmatprep.mubr.bf16.mxu0 %v10644_v60  ;;  %v1010_v60 = vld [vmem:[#allocation2 + $0x30] sm:$0xff] }
 0x32b   :  { %v1074_v58 = vpack.c.bf16 %v1011_v62, %v1010_v60  ;;  %v1311_v60 = vld [vmem:[#allocation2 + $0x27a] sm:$0xff]  ;;  %v1313_v62 = vld [vmem:[#allocation2 + $0x292] sm:$0xff] }
 0x32c   :  { %v1353_v55 = vpack.c.bf16 %v1313_v62, %v1312_v1  ;;  %v1166_v1 = vld [vmem:[#allocation2 + $0x181] sm:$0xff] }
 0x331   :  { %3109 = vmatmul.mubr.bf16.gmra.mrb[120].mxu0 %v10852_v39 }
 0x332   :  { %3116 = vmatprep.mubr.bf16.mxu0 %v10854_v53 }
 0x339   :  { %3117 = vmatmul.mubr.bf16.gmra.mrb[124].mxu0 %v848_v19  ;;  %v1310_v19 = vld [vmem:[#allocation2 + $0x272] sm:$0xff] }
 0x33a   :  { %3157 = vmatprep.mubr.bf16.mxu0 %v10656_v10  ;;  %v1015_v10 = vld [vmem:[#allocation2 + $0x68] sm:$0xff]  ;;  %v1352_v45 = vpack.c.bf16 %v1311_v60, %v1310_v19 }
 0x33b   :  { %v1076_v4 = vpack.c.bf16 %v1015_v10, %v1014_v3  ;;  %v1316_v3 = vld [vmem:[#allocation2 + $0x2ba] sm:$0xff]  ;;  %v1325_v19 = vld [vmem:[#allocation2 + $0x322] sm:$0xff] }
 0x33c   :  { %8542 = vmatprep.mubr.bf16.mxu1 %v1352_v45  ;;  %v1355_v13 = vpack.c.bf16 %v1317_v37, %v1316_v3  ;;  %v1037_v45 = vld [vmem:[#allocation2 + $0x170] sm:$0xff] }
 0x33d   :  { %8543 = vmatmul.mubr.bf16.gmra.mrb[44].mxu1 %v1353_v55  ;;  %v1329_v3 = vld [vmem:[#allocation2 + $0x352] sm:$0xff] }
 0x341   :  { %3158 = vmatmul.mubr.bf16.vlgmr.msra.gmra.mrb[0].mxu0 %v1074_v58  ;;  %v1026_v58 = vld [vmem:[#allocation2 + $0xf0] sm:$0xff] }
 0x342   :  { %3165 = vmatprep.mubr.bf16.mxu0 %v10668_v7  ;;  %v1016_v7 = vld [vmem:[#allocation2 + $0x78] sm:$0xff] }
 0x343   :  { %v1077_v9 = vpack.c.bf16 %v1017_v26, %v1016_v7  ;;  %v1320_v26 = vld [vmem:[#allocation2 + $0x2ea] sm:$0xff] }
 0x349   :  { %3166 = vmatmul.mubr.bf16.gmra.mrb[4].mxu0 %v1075_v44  ;;  %v1354_v44 = vpack.c.bf16 %v1315_v48, %v1314_v33  ;;  %v1168_v33 = vld [vmem:[#allocation2 + $0x199] sm:$0xff] }
 0x34a   :  { %3173 = vmatprep.mubr.bf16.mxu0 %v10680_v27  ;;  %v1019_v27 = vld [vmem:[#allocation2 + $0x98] sm:$0xff] }
 0x34b   :  { %v1078_v50 = vpack.c.bf16 %v1019_v27, %v1018_v18  ;;  %8546 = vmatprep.mubr.bf16.mxu1 %v1354_v44 }
 0x34c   :  { %8547 = vmatmul.mubr.bf16.gmra.mrb[48].mxu1 %v1355_v13  ;;  %v1040_v13 = vld [vmem:[#allocation2 + $0x198] sm:$0xff] }
 0x351   :  { %3174 = vmatmul.mubr.bf16.gmra.mrb[8].mxu0 %v1076_v4  ;;  %v1319_v4 = vld [vmem:[#allocation2 + $0x2da] sm:$0xff] }
 0x352   :  { %3181 = vmatprep.mubr.bf16.mxu0 %v10692_v51  ;;  %v1020_v51 = vld [vmem:[#allocation2 + $0xa8] sm:$0xff]  ;;  %v1356_v7 = vpack.c.bf16 %v1319_v4, %v1318_v61  ;;  %v1042_v4 = vld [vmem:[#allocation2 + $0x1e0] sm:$0xff] }
 0x353   :  { %v1079_v56 = vpack.c.bf16 %v1021_v12, %v1020_v51  ;;  %v1322_v51 = vld [vmem:[#allocation2 + $0x302] sm:$0xff]  ;;  %v1323_v12 = vld [vmem:[#allocation2 + $0x30a] sm:$0xff] }
 0x354   :  { %8550 = vmatprep.mubr.bf16.mxu1 %v1356_v7 }
 0x359   :  { %3182 = vmatmul.mubr.bf16.gmra.mrb[12].mxu0 %v1077_v9  ;;  %v1321_v9 = vld [vmem:[#allocation2 + $0x2f2] sm:$0xff] }
 0x35a   :  { %3189 = vmatprep.mubr.bf16.mxu0 %v10704_v32  ;;  %v1023_v32 = vld [vmem:[#allocation2 + $0xc8] sm:$0xff]  ;;  %v1357_v18 = vpack.c.bf16 %v1321_v9, %v1320_v26  ;;  %v1044_v26 = vld [vmem:[#allocation2 + $0x1f8] sm:$0xff]  ;;  %v1045_v9 = vld [vmem:[#allocation2 + $0x200] sm:$0xff] }
 0x35b   :  { %v1080_v17 = vpack.c.bf16 %v1023_v32, %v1022_v25  ;;  %v1324_v25 = vld [vmem:[#allocation2 + $0x31a] sm:$0xff]  ;;  %v1036_v32 = vld [vmem:[#allocation2 + $0x168] sm:$0xff] }
 0x35c   :  { %8551 = vmatmul.mubr.bf16.gmra.mrb[52].mxu1 %v1357_v18  ;;  %v1359_v60 = vpack.c.bf16 %v1325_v19, %v1324_v25 }
 0x361   :  { %3190 = vmatmul.mubr.bf16.gmra.mrb[16].mxu0 %v1078_v50  ;;  %v1035_v50 = vld [vmem:[#allocation2 + $0x158] sm:$0xff] }
 0x362   :  { %3197 = vmatprep.mubr.bf16.mxu0 %v10713_v6  ;;  %v1024_v6 = vld [vmem:[#allocation2 + $0xd8] sm:$0xff] }
 0x363   :  { %v1081_v29 = vpack.c.bf16 %v1025_v16, %v1024_v6 }
 0x369   :  { %3198 = vmatmul.mubr.bf16.gmra.mrb[20].mxu0 %v1079_v56  ;;  %v1086_v56 = vpack.c.bf16 %v1035_v50, %v1034_v42  ;;  %v1047_v42 = vld [vmem:[#allocation2 + $0x218] sm:$0xff] }
 0x36a   :  { %3205 = vmatprep.mubr.bf16.mxu0 %v10721_v34  ;;  %v1027_v34 = vld [vmem:[#allocation2 + $0xf8] sm:$0xff] }
 0x36b   :  { %v1082_v10 = vpack.c.bf16 %v1027_v34, %v1026_v58  ;;  %v1038_v58 = vld [vmem:[#allocation2 + $0x180] sm:$0xff]  ;;  %v1328_v34 = vld [vmem:[#allocation2 + $0x34a] sm:$0xff] }
 0x36c   :  { %v1361_v37 = vpack.c.bf16 %v1329_v3, %v1328_v34 }
 0x371   :  { %3206 = vmatmul.mubr.bf16.gmra.mrb[24].mxu0 %v1080_v17  ;;  %v1087_v17 = vpack.c.bf16 %v1037_v45, %v1036_v32  ;;  %v1053_v45 = vld [vmem:[#allocation2 + $0x260] sm:$0xff] }
 0x372   :  { %3213 = vmatprep.mubr.bf16.mxu0 %v10725_v52  ;;  %v1028_v52 = vld [vmem:[#allocation2 + $0x108] sm:$0xff] }
 0x373   :  { %v1083_v35 = vpack.c.bf16 %v1029_v47, %v1028_v52  ;;  %v10895_v47 = vld [vmem:[#allocation2 + $0x8] sm:$0xff] }
 0x379   :  { %3214 = vmatmul.mubr.bf16.gmra.mrb[28].mxu0 %v1081_v29 }
 0x37a   :  { %3221 = vmatprep.mubr.bf16.mxu0 %v10733_v31  ;;  %v1031_v31 = vld [vmem:[#allocation2 + $0x128] sm:$0xff] }
 0x37b   :  { %v1084_v41 = vpack.c.bf16 %v1031_v31, %v1030_v20  ;;  %v1043_v31 = vld [vmem:[#allocation2 + $0x1e8] sm:$0xff] }
 0x37c   :  { %v1090_v7 = vpack.c.bf16 %v1043_v31, %v1042_v4  ;;  %v1061_v4 = vld [vmem:[#allocation2 + $0x2c0] sm:$0xff] }
 0x381   :  { %3222 = vmatmul.mubr.bf16.gmra.mrb[32].mxu0 %v1082_v10 }
 0x382   :  { %3229 = vmatprep.mubr.bf16.mxu0 %v10737_v21  ;;  %v1032_v21 = vld [vmem:[#allocation2 + $0x138] sm:$0xff] }
 0x383   :  { %v1085_v8 = vpack.c.bf16 %v1033_v28, %v1032_v21  ;;  %v1091_v21 = vpack.c.bf16 %v1045_v9, %v1044_v26 }
 0x389   :  { %3230 = vmatmul.mubr.bf16.gmra.mrb[36].mxu0 %v1083_v35  ;;  %v1089_v35 = vpack.c.bf16 %v10895_v47, %v1040_v13  ;;  %v1059_v13 = vld [vmem:[#allocation2 + $0x2a8] sm:$0xff] }
 0x38a   :  { %3237 = vmatprep.mubr.bf16.mxu0 %v10745_v22  ;;  %v10872_v27 = vpop.f32.mrb[0].mxu1 }
 0x38b   :  { %v10874_v36 = vpop.f32.mrb[1].mxu1 }
 0x38c   :  { %v10876_v38 = vpop.f32.mrb[2].mxu1 }
 0x38d   :  { %v10878_v22 = vpop.f32.mrb[3].mxu1 }
 0x391   :  { %3238 = vmatmul.mubr.bf16.gmra.mrb[40].mxu0 %v1084_v41 }
 0x392   :  { %3245 = vmatprep.mubr.bf16.mxu0 %v10752_v24  ;;  %v1358_v24 = vpack.c.bf16 %v1323_v12, %v1322_v51  ;;  %v10883_v62 = vpop.f32.mrb[4].mxu1  ;;  %v1049_v51 = vld [vmem:[#allocation2 + $0x230] sm:$0xff] }
 0x393   :  { %v10885_v55 = vpop.f32.mrb[5].mxu1 }
 0x394   :  { %8554 = vmatprep.mubr.bf16.mxu1 %v1358_v24  ;;  %v10887_v6 = vpop.f32.mrb[6].mxu1 }
 0x395   :  { %8555 = vmatmul.mubr.bf16.gmra.mrb[56].mxu1 %v1359_v60  ;;  %v10889_v29 = vpop.f32.mrb[7].mxu1  ;;  %v1051_v60 = vld [vmem:[#allocation2 + $0x248] sm:$0xff] }
 0x396   :  { %8558 = vmatprep.mubr.bf16.mxu1 %v10854_v53  ;;  %v1039_v53 = vld [vmem:[#allocation2 + $0x188] sm:$0xff] }
 0x397   :  { %v1088_v48 = vpack.c.bf16 %v1039_v53, %v1038_v58  ;;  %v1055_v53 = vld [vmem:[#allocation2 + $0x278] sm:$0xff] }
 0x399   :  { %3246 = vmatmul.mubr.bf16.gmra.mrb[44].mxu0 %v1085_v8 }
 0x39a   :  { %3253 = vmatprep.mubr.bf16.mxu0 %v10766_v54  ;;  %v1167_v54 = vld [vmem:[#allocation2 + $0x189] sm:$0xff]  ;;  %v10891_v10 = vpop.f32.mrb[8].mxu1 }
 0x39b   :  { %v1216_v16 = vpack.c.bf16 %v1167_v54, %v1166_v1  ;;  %v10893_v52 = vpop.f32.mrb[9].mxu1 }
 0x39c   :  { %v10898_v20 = vpop.f32.mrb[10].mxu1 }
 0x39d   :  { %8559 = vmatmul.mubr.bf16.gmra.mrb[60].mxu1 %v1361_v37  ;;  %v10900_v61 = vpop.f32.mrb[11].mxu1 }
 0x3a1   :  { %3254 = vmatmul.mubr.bf16.gmra.mrb[48].mxu0 %v1086_v56 }
 0x3a2   :  { %3261 = vmatprep.mubr.bf16.mxu0 %v10776_v5  ;;  %v1169_v5 = vld [vmem:[#allocation2 + $0x1a1] sm:$0xff]  ;;  %v10904_v18 = vpop.f32.mrb[12].mxu1 }
 0x3a3   :  { %v1217_v44 = vpack.c.bf16 %v1169_v5, %v1168_v33  ;;  %v10906_v41 = vpop.f32.mrb[13].mxu1  ;;  %v1057_v5 = vld [vmem:[#allocation2 + $0x290] sm:$0xff] }
 0x3a4   :  { %v10908_v28 = vpop.f32.mrb[14].mxu1 }
 0x3a5   :  { %v10910_v8 = vpop.f32.mrb[15].mxu1 }
 0x3a9   :  { %3262 = vmatmul.mubr.bf16.gmra.mrb[52].mxu0 %v1087_v17 }
 0x3aa   :  { %3269 = vmatprep.mubr.bf16.mxu0 %v1216_v16  ;;  %v10914_v12 = vpop.f32.mrb[16].mxu1 }
 0x3ab   :  { %v10916_v56 = vpop.f32.mrb[17].mxu1 }
 0x3ac   :  { %v10918_v25 = vpop.f32.mrb[18].mxu1 }
 0x3ad   :  { %v10920_v19 = vpop.f32.mrb[19].mxu1 }
 0x3b1   :  { %3270 = vmatmul.mubr.bf16.gmra.mrb[56].mxu0 %v1088_v48 }
 0x3b2   :  { %3277 = vmatprep.mubr.bf16.mxu0 %v1217_v44  ;;  %v10924_v1 = vpop.f32.mrb[20].mxu1 }
 0x3b3   :  { %v10926_v54 = vpop.f32.mrb[21].mxu1 }
 0x3b4   :  { %v10928_v16 = vpop.f32.mrb[22].mxu1 }
 0x3b5   :  { %v10930_v58 = vpop.f32.mrb[23].mxu1 }
 0x3b9   :  { %3278 = vmatmul.mubr.bf16.gmra.mrb[60].mxu0 %v1089_v35 }
 0x3ba   :  { %3285 = vmatprep.mubr.bf16.mxu0 %v10799_v15  ;;  %v1046_v15 = vld [vmem:[#allocation2 + $0x210] sm:$0xff]  ;;  %v10934_v48 = vpop.f32.mrb[24].mxu1 }
 0x3bb   :  { %v1092_v50 = vpack.c.bf16 %v1047_v42, %v1046_v15  ;;  %v10936_v34 = vpop.f32.mrb[25].mxu1  ;;  %v1063_v15 = vld [vmem:[#allocation2 + $0x2d8] sm:$0xff] }
 0x3bc   :  { %v10938_v3 = vpop.f32.mrb[26].mxu1 }
 0x3bd   :  { %v10940_v37 = vpop.f32.mrb[27].mxu1 }
 0x3c1   :  { %3286 = vmatmul.mubr.bf16.gmra.mrb[64].mxu0 %v1090_v7 }
 0x3c2   :  { %3293 = vmatprep.mubr.bf16.mxu0 %v10803_v57  ;;  %v1048_v57 = vld [vmem:[#allocation2 + $0x228] sm:$0xff]  ;;  %v10944_v31 = vpop.f32.mrb[28].mxu1 }
 0x3c3   :  { %v1093_v24 = vpack.c.bf16 %v1049_v51, %v1048_v57  ;;  %v10946_v7 = vpop.f32.mrb[29].mxu1 }
 0x3c4   :  { %v10948_v9 = vpop.f32.mrb[30].mxu1 }
 0x3c9   :  { %3294 = vmatmul.mubr.bf16.gmra.mrb[68].mxu0 %v1091_v21  ;;  %v10950_v21 = vpop.f32.mrb[31].mxu1 }
 0x3ca   :  { %3301 = vmatprep.mubr.bf16.mxu0 %v10807_v14  ;;  %v1050_v14 = vld [vmem:[#allocation2 + $0x240] sm:$0xff] }
 0x3cb   :  { %v1094_v32 = vpack.c.bf16 %v1051_v60, %v1050_v14 }
 0x3d1   :  { %3302 = vmatmul.mubr.bf16.gmra.mrb[72].mxu0 %v1092_v50  ;;  %v1065_v50 = vld [vmem:[#allocation2 + $0x2f0] sm:$0xff]  ;;  %v10954_v57 = vpop.f32.mrb[32].mxu1 }
 0x3d2   :  { %3309 = vmatprep.mubr.bf16.mxu0 %v10811_v46  ;;  %v1052_v46 = vld [vmem:[#allocation2 + $0x258] sm:$0xff] }
 0x3d3   :  { %v1095_v17 = vpack.c.bf16 %v1053_v45, %v1052_v46 }
 0x3d9   :  { %3310 = vmatmul.mubr.bf16.gmra.mrb[76].mxu0 %v1093_v24  ;;  %v10956_v24 = vpop.f32.mrb[33].mxu1 }
 0x3da   :  { %3317 = vmatprep.mubr.bf16.mxu0 %v10815_v2  ;;  %v1054_v2 = vld [vmem:[#allocation2 + $0x270] sm:$0xff]  ;;  %v10961_v46 = vpop.f32.mrb[34].mxu1 }
 0x3db   :  { %v1096_v33 = vpack.c.bf16 %v1055_v53, %v1054_v2  ;;  %v10963_v45 = vpop.f32.mrb[35].mxu1  ;;  %v1066_v2 = vld [vmem:[#allocation2 + $0x300] sm:$0xff]  ;;  %v1067_v53 = vld [vmem:[#allocation2 + $0x308] sm:$0xff] }
 0x3e1   :  { %3318 = vmatmul.mubr.bf16.gmra.mrb[80].mxu0 %v1094_v32 }
 0x3e2   :  { %3325 = vmatprep.mubr.bf16.mxu0 %v10819_v59  ;;  %v1056_v59 = vld [vmem:[#allocation2 + $0x288] sm:$0xff] }
 0x3e3   :  { %v1097_v44 = vpack.c.bf16 %v1057_v5, %v1056_v59  ;;  %v1102_v5 = vpack.c.bf16 %v1067_v53, %v1066_v2  ;;  %v1201_v2 = vld [vmem:[#allocation2 + $0x351] sm:$0xff] }
 0x3e9   :  { %3326 = vmatmul.mubr.bf16.gmra.mrb[84].mxu0 %v1095_v17 }
 0x3ea   :  { %3333 = vmatprep.mubr.bf16.mxu0 %v10823_v11  ;;  %v1058_v11 = vld [vmem:[#allocation2 + $0x2a0] sm:$0xff] }
 0x3eb   :  { %v1098_v35 = vpack.c.bf16 %v1059_v13, %v1058_v11 }
 0x3f1   :  { %3334 = vmatmul.mubr.bf16.gmra.mrb[88].mxu0 %v1096_v33 }
 0x3f2   :  { %3341 = vmatprep.mubr.bf16.mxu0 %v10827_v49  ;;  %v1060_v49 = vld [vmem:[#allocation2 + $0x2b8] sm:$0xff] }
 0x3f3   :  { %v1099_v26 = vpack.c.bf16 %v1061_v4, %v1060_v49  ;;  %v1198_v49 = vld [vmem:[#allocation2 + $0x331] sm:$0xff]  ;;  %v10976_v4 = vpop.f32.mrb[36].mxu1 }
 0x3f9   :  { %3342 = vmatmul.mubr.bf16.gmra.mrb[92].mxu0 %v1097_v44 }
 0x3fa   :  { %3349 = vmatprep.mubr.bf16.mxu0 %v10831_v63  ;;  %v1062_v63 = vld [vmem:[#allocation2 + $0x2d0] sm:$0xff] }
 0x3fb   :  { %v1100_v42 = vpack.c.bf16 %v1063_v15, %v1062_v63  ;;  %v10978_v63 = vpop.f32.mrb[37].mxu1 }
 0x401   :  { %3350 = vmatmul.mubr.bf16.gmra.mrb[96].mxu0 %v1098_v35  ;;  %v1069_v35 = vld [vmem:[#allocation2 + $0x320] sm:$0xff] }
 0x402   :  { %3357 = vmatprep.mubr.bf16.mxu0 %v10835_v23  ;;  %v1064_v23 = vld [vmem:[#allocation2 + $0x2e8] sm:$0xff] }
 0x403   :  { %v1101_v32 = vpack.c.bf16 %v1065_v50, %v1064_v23 }
 0x409   :  { %3358 = vmatmul.mubr.bf16.gmra.mrb[100].mxu0 %v1099_v26 }
 0x40a   :  { %3365 = vmatprep.mubr.bf16.mxu0 %v10839_v30 }
 0x411   :  { %3366 = vmatmul.mubr.bf16.gmra.mrb[104].mxu0 %v1100_v42 }
 0x412   :  { %3373 = vmatprep.mubr.bf16.mxu0 %v10843_v43 }
 0x414   :  { %v3159_v51 = vpop.f32.mrb[0].mxu0 }
 0x415   :  { %v10959_v14 = vadd.f32 %v10874_v36, %v3159_v51  ;;  %v3161_v60 = vpop.f32.mrb[1].mxu0 }
 0x416   :  { %v3162_v30 = vpop.f32.mrb[2].mxu0 }
 0x417   :  { %14733 = vst [vmem:[#allocation4_spill] sm:$0xff] %v10959_v14  ;;  %v10966_v17 = vadd.f32 %v10878_v22, %v3162_v30  ;;  %v3164_v43 = vpop.f32.mrb[3].mxu0  ;;  %v1068_v22 = vld [vmem:[#allocation2 + $0x318] sm:$0xff] }
 0x418   :  { %v1103_v42 = vpack.c.bf16 %v1069_v35, %v1068_v22  ;;  %v1071_v30 = vld [vmem:[#allocation2 + $0x338] sm:$0xff]  ;;  %v1200_v43 = vld [vmem:[#allocation2 + $0x349] sm:$0xff] }
 0x419   :  { %14734 = vst [vmem:[#allocation5_spill] sm:$0xff] %v10966_v17  ;;  %3374 = vmatmul.mubr.bf16.gmra.mrb[108].mxu0 %v1101_v32  ;;  %v1070_v32 = vld [vmem:[#allocation2 + $0x330] sm:$0xff]  ;;  %v1072_v22 = vld [vmem:[#allocation2 + $0x348] sm:$0xff] }
 0x41a   :  { %3381 = vmatprep.mubr.bf16.mxu0 %v10848_v40  ;;  %v1199_v40 = vld [vmem:[#allocation2 + $0x339] sm:$0xff] }
 0x41b   :  { %v1232_v50 = vpack.c.bf16 %v1199_v40, %v1198_v49 }
 0x41c   :  { %v3167_v33 = vpop.f32.mrb[4].mxu0 }
 0x41d   :  { %v10970_v36 = vadd.f32 %v10872_v27, %v3167_v33  ;;  %v3169_v59 = vpop.f32.mrb[5].mxu0 }
 0x41e   :  { %v3170_v44 = vpop.f32.mrb[6].mxu0  ;;  %v1104_v59 = vpack.c.bf16 %v1071_v30, %v1070_v32 }
 0x41f   :  { %14735 = vst [vmem:[#allocation6_spill] sm:$0xff] %v10970_v36  ;;  %v10973_v11 = vadd.f32 %v10876_v38, %v3170_v44  ;;  %v3172_v13 = vpop.f32.mrb[7].mxu0  ;;  %v10983_v38 = vpop.f32.mrb[38].mxu1  ;;  %v1233_v44 = vpack.c.bf16 %v1201_v2, %v1200_v43 }
 0x420   :  { %v10985_v51 = vpop.f32.mrb[39].mxu1 }
 0x421   :  { %14736 = vst [vmem:[#allocation7_spill] sm:$0xff] %v10973_v11  ;;  %3382 = vmatmul.mubr.bf16.gmra.mrb[112].mxu0 %v1102_v5  ;;  %v10996_v35 = vpop.f32.mrb[40].mxu1 }
 0x422   :  { %3389 = vmatprep.mubr.bf16.mxu0 %v10852_v39  ;;  %v10998_v40 = vpop.f32.mrb[41].mxu1 }
 0x424   :  { %v3175_v26 = vpop.f32.mrb[8].mxu0 }
 0x425   :  { %v10981_v27 = vadd.f32 %v10885_v55, %v3175_v26  ;;  %v3177_v15 = vpop.f32.mrb[9].mxu0 }
 0x426   :  { %v3178_v23 = vpop.f32.mrb[10].mxu0  ;;  %v1105_v15 = vpack.c.bf16 %v10895_v47, %v1072_v22 }
 0x427   :  { %v10988_v39 = vadd.f32 %v10889_v29, %v3178_v23  ;;  %v3180_v60 = vpop.f32.mrb[11].mxu0 }
 0x429   :  { %14737 = vst [vmem:[#allocation8_spill] sm:$0xff] %v10988_v39  ;;  %3390 = vmatmul.mubr.bf16.gmra.mrb[116].mxu0 %v1103_v42  ;;  %v11004_v42 = vpop.f32.mrb[42].mxu1 }
 0x42a   :  { %3397 = vmatprep.mubr.bf16.mxu0 %v1232_v50 }
 0x42c   :  { %v3183_v55 = vpop.f32.mrb[12].mxu0 }
 0x42d   :  { %v10991_v53 = vadd.f32 %v10883_v62, %v3183_v55  ;;  %v3185_v33 = vpop.f32.mrb[13].mxu0 }
 0x42e   :  { %v3186_v5 = vpop.f32.mrb[14].mxu0 }
 0x42f   :  { %14738 = vst [vmem:[#allocation9_spill] sm:$0xff] %v10991_v53  ;;  %v10994_v13 = vadd.f32 %v10887_v6, %v3186_v5  ;;  %v3188_v29 = vpop.f32.mrb[15].mxu0  ;;  %v11006_v6 = vpop.f32.mrb[43].mxu1 }
 0x430   :  { %v11017_v55 = vpop.f32.mrb[44].mxu1 }
 0x431   :  { %3398 = vmatmul.mubr.bf16.gmra.mrb[120].mxu0 %v1104_v59 }
 0x432   :  { %3405 = vmatprep.mubr.bf16.mxu0 %v1233_v44  ;;  %v11025_v44 = vpop.f32.mrb[45].mxu1 }
 0x433   :  { %v11027_v29 = vpop.f32.mrb[46].mxu1 }
 0x434   :  { %v3191_v49 = vpop.f32.mrb[16].mxu0 }
 0x435   :  { %v11001_v26 = vadd.f32 %v10893_v52, %v3191_v49  ;;  %v3193_v62 = vpop.f32.mrb[17].mxu0  ;;  %v11032_v49 = vpop.f32.mrb[47].mxu1 }
 0x436   :  { %v3194_v23 = vpop.f32.mrb[18].mxu0 }
 0x437   :  { %14739 = vst [vmem:[#allocation10_spill] sm:$0xff] %v11001_v26  ;;  %v11009_v50 = vadd.f32 %v10900_v61, %v3194_v23  ;;  %v3196_v60 = vpop.f32.mrb[19].mxu0  ;;  %v9500_v61 = vld [vmem:[%s14625_s2] sm:$0xff]  }
 0x438   :  { %6201 = vmatpush1.bf16.msra.mxu1 %v9500_v61 }
 0x439   :  { %14740 = vst [vmem:[#allocation11_spill] sm:$0xff] %v11009_v50  ;;  %3406 = vmatmul.mubr.bf16.gmra.mrb[124].mxu0 %v1105_v15  ;;  %6202 = vmatprep.subr.bf16.mxu1 %v14631_v0 }
 0x43c   :  { %v3199_v32 = vpop.f32.mrb[20].mxu0 }
 0x43d   :  { %v11012_v30 = vadd.f32 %v10891_v10, %v3199_v32  ;;  %v3201_v43 = vpop.f32.mrb[21].mxu0 }
 0x43e   :  { %v3202_v52 = vpop.f32.mrb[22].mxu0  ;;  %v9502_v43 = vld [vmem:[%s14625_s2 + $0x10] sm:$0xff]  }
 0x43f   :  { %14741 = vst [vmem:[#allocation12_spill] sm:$0xff] %v11012_v30  ;;  %v11015_v2 = vadd.f32 %v10898_v20, %v3202_v52  ;;  %v3204_v47 = vpop.f32.mrb[23].mxu0  ;;  %v11048_v52 = vpop.f32.mrb[48].mxu1 }
 0x441   :  { %14742 = vst [vmem:[#allocation13_spill] sm:$0xff] %v11015_v2 }
 0x444   :  { %v3207_v33 = vpop.f32.mrb[24].mxu0 }
 0x445   :  { %v11023_v59 = vadd.f32 %v10906_v41, %v3207_v33  ;;  %v3209_v5 = vpop.f32.mrb[25].mxu0  ;;  %v9501_v41 = vld [vmem:[%s14625_s2 + $0x8] sm:$0xff]   ;;  %v11050_v33 = vpop.f32.mrb[49].mxu1 }
 0x446   :  { %v3210_v10 = vpop.f32.mrb[26].mxu0  ;;  %6203 = vmatpush1.bf16.msra.mxu1 %v9501_v41  ;;  %v3774_v41 = vmul.f32 %v10959_v14, %v10959_v14 }
 0x447   :  { %v11030_v20 = vadd.f32 %v10910_v8, %v3210_v10  ;;  %v3212_v22 = vpop.f32.mrb[27].mxu0  ;;  %6204 = vmatprep.subr.bf16.mxu1 %v14631_v0 }
 0x449   :  { %14743 = vst [vmem:[#allocation14_spill] sm:$0xff] %v11030_v20 }
 0x44a   :  { %6205 = vmatpush1.bf16.msra.mxu1 %v9502_v43 }
 0x44b   :  { %6206 = vmatprep.subr.bf16.mxu1 %v14631_v0  ;;  %v9503_v0 = vld [vmem:[%s14625_s2 + $0x18] sm:$0xff]  }
 0x44c   :  { %v3215_v62 = vpop.f32.mrb[28].mxu0 }
 0x44d   :  { %v11039_v15 = vadd.f32 %v10904_v18, %v3215_v62  ;;  %v3217_v23 = vpop.f32.mrb[29].mxu0  ;;  %v3775_v18 = vmul.f32 %v10966_v17, %v10966_v17  ;;  %v3705_v62 = vadd.f32 %v10966_v17, %v10959_v14  ;;  %v3778_v14 = vmul.f32 %v10981_v27, %v10981_v27 }
 0x44e   :  { %v3218_v60 = vpop.f32.mrb[30].mxu0  ;;  %v3776_v23 = vmul.f32 %v10970_v36, %v10970_v36  ;;  %6207 = vmatpush1.bf16.msra.mxu1 %v9503_v0  ;;  %v9504_v0 = vld [vmem:[%s14625_s2 + $0x20] sm:$0xff]  }
 0x44f   :  { %v11043_v8 = vadd.f32 %v10908_v28, %v3218_v60  ;;  %v3220_v32 = vpop.f32.mrb[31].mxu0  ;;  %v11057_v28 = vpop.f32.mrb[50].mxu1  ;;  %v3706_v43 = vadd.f32 %v3705_v62, %v10970_v36 }
 0x450   :  { %14746 = vst [vmem:[#allocation17_spill] sm:$0xff] %v11057_v28  ;;  %v11059_v22 = vpop.f32.mrb[51].mxu1  ;;  %v3838_v32 = vadd.f32 %v3775_v18, %v3774_v41  ;;  %v14749_v41 = vmov 0  }
 0x451   :  { %14744 = vst [vmem:[#allocation15_spill] sm:$0xff] %v11043_v8  ;;  %v3707_v17 = vadd.f32 %v3706_v43, %v10973_v11  ;;  %6208 = vmatprep.subr.bf16.mxu1 %v14749_v41  ;;  %v3779_v43 = vmul.f32 %v10988_v39, %v10988_v39 }
 0x452   :  { %6209 = vmatpush1.bf16.msra.mxu1 %v9504_v0 }
 0x453   :  { %6210 = vmatprep.subr.bf16.mxu1 %v14749_v41 }
 0x454   :  { %v3223_v47 = vpop.f32.mrb[32].mxu0 }
 0x455   :  { %v11055_v61 = vadd.f32 %v10916_v56, %v3223_v47  ;;  %v3225_v5 = vpop.f32.mrb[33].mxu0  ;;  %v3839_v47 = vadd.f32 %v3838_v32, %v3776_v23  ;;  %v3708_v23 = vadd.f32 %v3707_v17, %v10981_v27 }
 0x456   :  { %v3226_v10 = vpop.f32.mrb[34].mxu0  ;;  %v3777_v5 = vmul.f32 %v10973_v11, %v10973_v11 }
 0x457   :  { %14745 = vst [vmem:[#allocation16_spill] sm:$0xff] %v11055_v61  ;;  %v11069_v56 = vadd.f32 %v10920_v19, %v3226_v10  ;;  %v3228_v60 = vpop.f32.mrb[35].mxu0  ;;  %v3709_v11 = vadd.f32 %v3708_v23, %v10988_v39  ;;  %v3781_v39 = vmul.f32 %v10994_v13, %v10994_v13 }
 0x458   :  { %v3840_v62 = vadd.f32 %v3839_v47, %v3777_v5 }
 0x459   :  { %14747 = vst [vmem:[#allocation18_spill] sm:$0xff] %v11069_v56 }
 0x45a   :  { %v3841_v36 = vadd.f32 %v3840_v62, %v3778_v14  ;;  %v3710_v14 = vadd.f32 %v3709_v11, %v10991_v53 }
 0x45c   :  { %v3231_v28 = vpop.f32.mrb[36].mxu0 }
 0x45d   :  { %v11081_v19 = vadd.f32 %v10914_v12, %v3231_v28  ;;  %v3233_v18 = vpop.f32.mrb[37].mxu0  ;;  %v3780_v12 = vmul.f32 %v10991_v53, %v10991_v53  ;;  %v11096_v28 = vpop.f32.mrb[52].mxu1  ;;  %v3783_v53 = vmul.f32 %v11009_v50, %v11009_v50 }
 0x45e   :  { %v3234_v10 = vpop.f32.mrb[38].mxu0  ;;  %v11098_v47 = vpop.f32.mrb[53].mxu1 }
 0x45f   :  { %14748 = vst [vmem:[#allocation19_spill] sm:$0xff] %v11081_v19  ;;  %v11086_v60 = vadd.f32 %v10918_v25, %v3234_v10  ;;  %v3236_v32 = vpop.f32.mrb[39].mxu0  ;;  %v3842_v25 = vadd.f32 %v3841_v36, %v3779_v43  ;;  %v11104_v10 = vpop.f32.mrb[54].mxu1  ;;  %v3782_v43 = vmul.f32 %v11001_v26, %v11001_v26 }
 0x460   :  { %v11106_v23 = vpop.f32.mrb[55].mxu1 }
 0x461   :  { %14750 = vst [vmem:[#allocation20_spill] sm:$0xff] %v11086_v60  ;;  %v3843_v32 = vadd.f32 %v3842_v25, %v3780_v12 }
 0x463   :  { %v3844_v0 = vadd.f32 %v3843_v32, %v3781_v39  ;;  %v3784_v32 = vmul.f32 %v11012_v30, %v11012_v30 }
 0x464   :  { %v3239_v17 = vpop.f32.mrb[40].mxu0 }
 0x465   :  { %v11102_v5 = vadd.f32 %v10926_v54, %v3239_v17  ;;  %v3241_v18 = vpop.f32.mrb[41].mxu0  ;;  %v3711_v54 = vadd.f32 %v3710_v14, %v10994_v13  ;;  %v3845_v25 = vadd.f32 %v3844_v0, %v3782_v43 }
 0x466   :  { %v3242_v62 = vpop.f32.mrb[42].mxu0  ;;  %v9505_v18 = vld [vmem:[%s14625_s2 + $0x28] sm:$0xff]  }
 0x467   :  { %v11112_v36 = vadd.f32 %v10930_v58, %v3242_v62  ;;  %v3244_v11 = vpop.f32.mrb[43].mxu0  ;;  %v3712_v17 = vadd.f32 %v3711_v54, %v11001_v26  ;;  %6211 = vmatpush1.bf16.msra.mxu1 %v9505_v18  ;;  %v3846_v43 = vadd.f32 %v3845_v25, %v3783_v53  ;;  %v9506_v18 = vld [vmem:[%s14625_s2 + $0x30] sm:$0xff]   ;;  %v3786_v53 = vmul.f32 %v11023_v59, %v11023_v59 }
 0x468   :  { %6212 = vmatprep.subr.bf16.mxu1 %v14749_v41 }
 0x469   :  { %v3713_v39 = vadd.f32 %v3712_v17, %v11009_v50  ;;  %v3847_v26 = vadd.f32 %v3846_v43, %v3784_v32 }
 0x46b   :  { %v3714_v0 = vadd.f32 %v3713_v39, %v11012_v30  ;;  %6213 = vmatpush1.bf16.msra.mxu1 %v9506_v18 }
 0x46c   :  { %v3247_v12 = vpop.f32.mrb[44].mxu0  ;;  %6214 = vmatprep.subr.bf16.mxu1 %v14749_v41 }
 0x46d   :  { %v11124_v58 = vadd.f32 %v10924_v1, %v3247_v12  ;;  %v3249_v62 = vpop.f32.mrb[45].mxu0  ;;  %v3785_v1 = vmul.f32 %v11015_v2, %v11015_v2  ;;  %v11139_v12 = vpop.f32.mrb[56].mxu1 }
 0x46e   :  { %v3250_v14 = vpop.f32.mrb[46].mxu0  ;;  %v11141_v62 = vpop.f32.mrb[57].mxu1 }
 0x46f   :  { %v11131_v11 = vadd.f32 %v10928_v16, %v3250_v14  ;;  %v3252_v54 = vpop.f32.mrb[47].mxu0  ;;  %v3715_v16 = vadd.f32 %v3714_v0, %v11015_v2  ;;  %v11149_v39 = vpop.f32.mrb[58].mxu1  ;;  %v3848_v43 = vadd.f32 %v3847_v26, %v3785_v1 }
 0x470   :  { %v11151_v54 = vpop.f32.mrb[59].mxu1 }
 0x471   :  { %v3716_v30 = vadd.f32 %v3715_v16, %v11023_v59  ;;  %v3849_v50 = vadd.f32 %v3848_v43, %v3786_v53 }
 0x473   :  { %v3717_v18 = vadd.f32 %v3716_v30, %v11030_v20 }
 0x474   :  { %v3255_v17 = vpop.f32.mrb[48].mxu0 }
 0x475   :  { %v11147_v25 = vadd.f32 %v10936_v34, %v3255_v17  ;;  %v3257_v14 = vpop.f32.mrb[49].mxu0  ;;  %v3787_v34 = vmul.f32 %v11030_v20, %v11030_v20  ;;  %v3788_v17 = vmul.f32 %v11039_v15, %v11039_v15  ;;  %v3718_v16 = vadd.f32 %v3717_v18, %v11039_v15 }
 0x476   :  { %v3258_v32 = vpop.f32.mrb[50].mxu0  ;;  %v9507_v14 = vld [vmem:[%s14625_s2 + $0x38] sm:$0xff]  }
 0x477   :  { %v11156_v0 = vadd.f32 %v10940_v37, %v3258_v32  ;;  %v3260_v2 = vpop.f32.mrb[51].mxu0  ;;  %v3850_v1 = vadd.f32 %v3849_v50, %v3787_v34  ;;  %6215 = vmatpush1.bf16.msra.mxu1 %v9507_v14  ;;  %v3789_v32 = vmul.f32 %v11043_v8, %v11043_v8  ;;  %v3719_v50 = vadd.f32 %v3718_v16, %v11043_v8  ;;  %v9508_v14 = vld [vmem:[%s14625_s2 + $0x40] sm:$0xff]  }
 0x478   :  { %6216 = vmatprep.subr.bf16.mxu1 %v14749_v41  ;;  %v3790_v34 = vmul.f32 %v11055_v61, %v11055_v61 }
 0x479   :  { %v3851_v30 = vadd.f32 %v3850_v1, %v3788_v17  ;;  %v3720_v18 = vadd.f32 %v3719_v50, %v11055_v61  ;;  %v3792_v50 = vmul.f32 %v11081_v19, %v11081_v19  ;;  %v3793_v61 = vmul.f32 %v11086_v60, %v11086_v60 }
 0x47b   :  { %6217 = vmatpush1.bf16.msra.mxu1 %v9508_v14 }
 0x47c   :  { %v3263_v26 = vpop.f32.mrb[52].mxu0  ;;  %6218 = vmatprep.subr.bf16.mxu1 %v14749_v41 }
 0x47d   :  { %v11168_v37 = vadd.f32 %v10934_v48, %v3263_v26  ;;  %v3265_v2 = vpop.f32.mrb[53].mxu0  ;;  %v3852_v48 = vadd.f32 %v3851_v30, %v3789_v32  ;;  %v11183_v26 = vpop.f32.mrb[60].mxu1  ;;  %v3721_v32 = vadd.f32 %v3720_v18, %v11069_v56  ;;  %v9509_v18 = vld [vmem:[%s14625_s2 + $0x48] sm:$0xff]  }
 0x47e   :  { %v3266_v53 = vpop.f32.mrb[54].mxu0  ;;  %v11190_v2 = vpop.f32.mrb[61].mxu1 }
 0x47f   :  { %v11174_v43 = vadd.f32 %v10938_v3, %v3266_v53  ;;  %v3268_v20 = vpop.f32.mrb[55].mxu0  ;;  %v3853_v1 = vadd.f32 %v3852_v48, %v3790_v34  ;;  %v3791_v3 = vmul.f32 %v11069_v56, %v11069_v56  ;;  %v11192_v30 = vpop.f32.mrb[62].mxu1  ;;  %v3722_v14 = vadd.f32 %v3721_v32, %v11081_v19  ;;  %6219 = vmatpush1.bf16.msra.mxu1 %v9509_v18 }
 0x480   :  { %6220 = vmatprep.subr.bf16.mxu1 %v14749_v41 }
 0x481   :  { %v3723_v8 = vadd.f32 %v3722_v14, %v11086_v60  ;;  %v3795_v14 = vmul.f32 %v11112_v36, %v11112_v36 }
 0x484   :  { %v3271_v17 = vpop.f32.mrb[56].mxu0 }
 0x485   :  { %v11188_v20 = vadd.f32 %v10946_v7, %v3271_v17  ;;  %v3273_v16 = vpop.f32.mrb[57].mxu0  ;;  %v11201_v7 = vpop.f32.mrb[63].mxu1  ;;  %v3854_v17 = vadd.f32 %v3853_v1, %v3791_v3 }
 0x486   :  { %v3274_v53 = vpop.f32.mrb[58].mxu0 }
 0x487   :  { %v11199_v34 = vadd.f32 %v10950_v21, %v3274_v53  ;;  %v3276_v48 = vpop.f32.mrb[59].mxu0  ;;  %v3855_v16 = vadd.f32 %v3854_v17, %v3792_v50  ;;  %v3794_v21 = vmul.f32 %v11102_v5, %v11102_v5  ;;  %v3724_v50 = vadd.f32 %v3723_v8, %v11102_v5 }
 0x489   :  { %v3856_v32 = vadd.f32 %v3855_v16, %v3793_v61  ;;  %v3725_v60 = vadd.f32 %v3724_v50, %v11112_v36 }
 0x48b   :  { %v3857_v19 = vadd.f32 %v3856_v32, %v3794_v21  ;;  %v3797_v21 = vmul.f32 %v11131_v11, %v11131_v11 }
 0x48c   :  { %v3279_v56 = vpop.f32.mrb[60].mxu0 }
 0x48d   :  { %v11213_v53 = vadd.f32 %v10944_v31, %v3279_v56  ;;  %v3281_v1 = vpop.f32.mrb[61].mxu0  ;;  %v3796_v31 = vmul.f32 %v11124_v58, %v11124_v58  ;;  %v3858_v18 = vadd.f32 %v3857_v19, %v3795_v14  ;;  %v3798_v19 = vmul.f32 %v11147_v25, %v11147_v25 }
 0x48e   :  { %v3282_v3 = vpop.f32.mrb[62].mxu0  ;;  %v3726_v1 = vadd.f32 %v3725_v60, %v11124_v58 }
 0x48f   :  { %v11218_v48 = vadd.f32 %v10948_v9, %v3282_v3  ;;  %v3284_v17 = vpop.f32.mrb[63].mxu0  ;;  %v3859_v16 = vadd.f32 %v3858_v18, %v3796_v31  ;;  %v3799_v31 = vmul.f32 %v11156_v0, %v11156_v0 }
 0x490   :  { %v3727_v50 = vadd.f32 %v3726_v1, %v11131_v11  ;;  %v3800_v1 = vmul.f32 %v11168_v37, %v11168_v37 }
 0x491   :  { %v3860_v17 = vadd.f32 %v3859_v16, %v3797_v21 }
 0x492   :  { %v3728_v60 = vadd.f32 %v3727_v50, %v11147_v25 }
 0x493   :  { %v3861_v14 = vadd.f32 %v3860_v17, %v3798_v19  ;;  %v3801_v19 = vmul.f32 %v11174_v43, %v11174_v43 }
 0x494   :  { %v3287_v56 = vpop.f32.mrb[64].mxu0 }
 0x495   :  { %v11227_v61 = vadd.f32 %v10956_v24, %v3287_v56  ;;  %v3289_v8 = vpop.f32.mrb[65].mxu0  ;;  %v3862_v21 = vadd.f32 %v3861_v14, %v3799_v31 }
 0x496   :  { %v3290_v9 = vpop.f32.mrb[66].mxu0  ;;  %v3729_v8 = vadd.f32 %v3728_v60, %v11156_v0  ;;  %v3802_v60 = vmul.f32 %v11188_v20, %v11188_v20 }
 0x497   :  { %v11232_v3 = vadd.f32 %v10963_v45, %v3290_v9  ;;  %v3292_v32 = vpop.f32.mrb[67].mxu0  ;;  %v3863_v50 = vadd.f32 %v3862_v21, %v3800_v1 }
 0x498   :  { %v3730_v32 = vadd.f32 %v3729_v8, %v11168_v37 }
 0x49a   :  { %v3731_v17 = vadd.f32 %v3730_v32, %v11174_v43  ;;  %v3804_v32 = vmul.f32 %v11213_v53, %v11213_v53 }
 0x49c   :  { %v3295_v24 = vpop.f32.mrb[68].mxu0  ;;  %v3732_v14 = vadd.f32 %v3731_v17, %v11188_v20 }
 0x49d   :  { %v11241_v56 = vadd.f32 %v10954_v57, %v3295_v24  ;;  %v3297_v18 = vpop.f32.mrb[69].mxu0 }
 0x49e   :  { %v3298_v45 = vpop.f32.mrb[70].mxu0  ;;  %v3733_v21 = vadd.f32 %v3732_v14, %v11199_v34 }
 0x49f   :  { %v11247_v9 = vadd.f32 %v10961_v46, %v3298_v45  ;;  %v3300_v16 = vpop.f32.mrb[71].mxu0  ;;  %v3864_v45 = vadd.f32 %v3863_v50, %v3801_v19 }
 0x4a0   :  { %v3803_v16 = vmul.f32 %v11199_v34, %v11199_v34 }
 0x4a1   :  { %v3865_v1 = vadd.f32 %v3864_v45, %v3802_v60  ;;  %v3805_v60 = vmul.f32 %v11218_v48, %v11218_v48 }
 0x4a4   :  { %v3303_v57 = vpop.f32.mrb[72].mxu0 }
 0x4a5   :  { %v11256_v24 = vadd.f32 %v10978_v63, %v3303_v57  ;;  %v3305_v18 = vpop.f32.mrb[73].mxu0  ;;  %v3866_v57 = vadd.f32 %v3865_v1, %v3803_v16 }
 0x4a6   :  { %v3306_v46 = vpop.f32.mrb[74].mxu0  ;;  %v3734_v18 = vadd.f32 %v3733_v21, %v11213_v53 }
 0x4a7   :  { %v11260_v31 = vadd.f32 %v10985_v51, %v3306_v46  ;;  %v3308_v8 = vpop.f32.mrb[75].mxu0  ;;  %v3867_v17 = vadd.f32 %v3866_v57, %v3804_v32  ;;  %v3807_v32 = vmul.f32 %v11232_v3, %v11232_v3 }
 0x4a8   :  { %v3735_v14 = vadd.f32 %v3734_v18, %v11218_v48  ;;  %v3806_v8 = vmul.f32 %v11227_v61, %v11227_v61  ;;  %v3808_v18 = vmul.f32 %v11241_v56, %v11241_v56 }
 0x4a9   :  { %v3868_v1 = vadd.f32 %v3867_v17, %v3805_v60 }
 0x4aa   :  { %v3736_v16 = vadd.f32 %v3735_v14, %v11227_v61 }
 0x4ab   :  { %v3869_v21 = vadd.f32 %v3868_v1, %v3806_v8  ;;  %v3809_v8 = vmul.f32 %v11247_v9, %v11247_v9 }
 0x4ac   :  { %v3311_v63 = vpop.f32.mrb[76].mxu0 }
 0x4ad   :  { %v11269_v50 = vadd.f32 %v10976_v4, %v3311_v63  ;;  %v3313_v19 = vpop.f32.mrb[77].mxu0  ;;  %v3870_v60 = vadd.f32 %v3869_v21, %v3807_v32 }
 0x4ae   :  { %v3314_v51 = vpop.f32.mrb[78].mxu0  ;;  %v3737_v19 = vadd.f32 %v3736_v16, %v11232_v3  ;;  %v3810_v16 = vmul.f32 %v11256_v24, %v11256_v24 }
 0x4af   :  { %v11274_v46 = vadd.f32 %v10983_v38, %v3314_v51  ;;  %v3316_v45 = vpop.f32.mrb[79].mxu0  ;;  %v3871_v14 = vadd.f32 %v3870_v60, %v3808_v18 }
 0x4b0   :  { %v3738_v45 = vadd.f32 %v3737_v19, %v11241_v56 }
 0x4b2   :  { %v3739_v1 = vadd.f32 %v3738_v45, %v11247_v9  ;;  %v3812_v45 = vmul.f32 %v11269_v50, %v11269_v50 }
 0x4b4   :  { %v3319_v4 = vpop.f32.mrb[80].mxu0  ;;  %v3740_v21 = vadd.f32 %v3739_v1, %v11256_v24 }
 0x4b5   :  { %v11283_v63 = vadd.f32 %v10998_v40, %v3319_v4  ;;  %v3321_v57 = vpop.f32.mrb[81].mxu0 }
 0x4b6   :  { %v3322_v38 = vpop.f32.mrb[82].mxu0  ;;  %v3741_v60 = vadd.f32 %v3740_v21, %v11260_v31 }
 0x4b7   :  { %v11289_v51 = vadd.f32 %v11006_v6, %v3322_v38  ;;  %v3324_v17 = vpop.f32.mrb[83].mxu0  ;;  %v3872_v38 = vadd.f32 %v3871_v14, %v3809_v8 }
 0x4b8   :  { %v3811_v17 = vmul.f32 %v11260_v31, %v11260_v31 }
 0x4b9   :  { %v3873_v18 = vadd.f32 %v3872_v38, %v3810_v16  ;;  %v3813_v16 = vmul.f32 %v11274_v46, %v11274_v46 }
 0x4bc   :  { %v3327_v40 = vpop.f32.mrb[84].mxu0 }
 0x4bd   :  { %v11298_v4 = vadd.f32 %v10996_v35, %v3327_v40  ;;  %v3329_v57 = vpop.f32.mrb[85].mxu0  ;;  %v3874_v40 = vadd.f32 %v3873_v18, %v3811_v17 }
 0x4be   :  { %v3330_v6 = vpop.f32.mrb[86].mxu0  ;;  %v3742_v57 = vadd.f32 %v3741_v60, %v11269_v50 }
 0x4bf   :  { %v11302_v32 = vadd.f32 %v11004_v42, %v3330_v6  ;;  %v3332_v19 = vpop.f32.mrb[87].mxu0  ;;  %v3875_v1 = vadd.f32 %v3874_v40, %v3812_v45  ;;  %v3815_v45 = vmul.f32 %v11289_v51, %v11289_v51 }
 0x4c0   :  { %v3743_v21 = vadd.f32 %v3742_v57, %v11274_v46  ;;  %v3814_v19 = vmul.f32 %v11283_v63, %v11283_v63  ;;  %v3816_v57 = vmul.f32 %v11298_v4, %v11298_v4 }
 0x4c1   :  { %v3876_v18 = vadd.f32 %v3875_v1, %v3813_v16  ;;  %v9510_v16 = vld [vmem:[%s14625_s2 + $0x50] sm:$0xff]  }
 0x4c2   :  { %v3744_v17 = vadd.f32 %v3743_v21, %v11283_v63  ;;  %6221 = vmatpush1.bf16.msra.mxu1 %v9510_v16 }
 0x4c3   :  { %v3877_v60 = vadd.f32 %v3876_v18, %v3814_v19  ;;  %v3817_v18 = vmul.f32 %v11302_v32, %v11302_v32  ;;  %6222 = vmatprep.subr.bf16.mxu1 %v14749_v41 }
 0x4c4   :  { %v3335_v35 = vpop.f32.mrb[88].mxu0 }
 0x4c5   :  { %v11311_v14 = vadd.f32 %v11025_v44, %v3335_v35  ;;  %v3337_v8 = vpop.f32.mrb[89].mxu0 }
 0x4c6   :  { %v3338_v42 = vpop.f32.mrb[90].mxu0  ;;  %v3745_v8 = vadd.f32 %v3744_v17, %v11289_v51  ;;  %v9511_v17 = vld [vmem:[%s14625_s2 + $0x58] sm:$0xff]  }
 0x4c7   :  { %v11316_v6 = vadd.f32 %v11032_v49, %v3338_v42  ;;  %v3340_v38 = vpop.f32.mrb[91].mxu0  ;;  %6223 = vmatpush1.bf16.msra.mxu1 %v9511_v17  ;;  %v9514_v17 = vld [vmem:[%s14625_s2 + $0x68] sm:$0xff]  }
 0x4c8   :  { %v3878_v38 = vadd.f32 %v3877_v60, %v3815_v45  ;;  %v3746_v21 = vadd.f32 %v3745_v8, %v11298_v4  ;;  %v3818_v60 = vmul.f32 %v11311_v14, %v11311_v14  ;;  %6224 = vmatprep.subr.bf16.mxu1 %v14749_v41 }
 0x4c9   :  { %14751 = vst [vmem:[#allocation21_spill] sm:$0xff] %v11316_v6 }
 0x4ca   :  { %v3879_v19 = vadd.f32 %v3878_v38, %v3816_v57 }
 0x4cc   :  { %v3343_v44 = vpop.f32.mrb[92].mxu0  ;;  %v3880_v57 = vadd.f32 %v3879_v19, %v3817_v18  ;;  %v9516_v19 = vld [vmem:[%s14625_s2 + $0x210] sm:$0xff]  }
 0x4cd   :  { %v11325_v35 = vadd.f32 %v11017_v55, %v3343_v44  ;;  %v3345_v40 = vpop.f32.mrb[93].mxu0  ;;  %v9513_v55 = vld [vmem:[%s14625_s2 + $0x200] sm:$0xff]   ;;  %v3747_v44 = vadd.f32 %v3746_v21, %v11302_v32 }
 0x4ce   :  { %v3346_v49 = vpop.f32.mrb[94].mxu0  ;;  %8562 = vmatprep.subr.bf16.mxu0 %v9513_v55  ;;  %v3881_v21 = vadd.f32 %v3880_v57, %v3818_v60 }
 0x4cf   :  { %v11331_v42 = vadd.f32 %v11027_v29, %v3346_v49  ;;  %v3348_v1 = vpop.f32.mrb[95].mxu0  ;;  %8563 = vmatpush3.bf16.msra.mxu0 %v9513_v55  ;;  %v9515_v49 = vld [vmem:[%s14625_s2 + $0x208] sm:$0xff]   ;;  %v3819_v55 = vmul.f32 %v11316_v6, %v11316_v6  ;;  %v3820_v18 = vmul.f32 %v11325_v35, %v11325_v35 }
 0x4d0   :  { %v3748_v1 = vadd.f32 %v3747_v44, %v11311_v14  ;;  %8564 = vmatprep.subr.bf16.mxu0 %v9515_v49 }
 0x4d1   :  { %v3882_v44 = vadd.f32 %v3881_v21, %v3819_v55 }
 0x4d3   :  { %8565 = vmatpush3.bf16.msra.mxu0 %v9515_v49 }
 0x4d4   :  { %v3351_v29 = vpop.f32.mrb[96].mxu0  ;;  %8566 = vmatprep.subr.bf16.mxu0 %v9516_v19 }
 0x4d5   :  { %v11350_v45 = vadd.f32 %v11050_v33, %v3351_v29  ;;  %v3353_v40 = vpop.f32.mrb[97].mxu0  ;;  %v9512_v33 = vld [vmem:[%s14625_s2 + $0x60] sm:$0xff]  }
 0x4d6   :  { %v3354_v8 = vpop.f32.mrb[98].mxu0  ;;  %6225 = vmatpush1.bf16.msra.mxu1 %v9512_v33  ;;  %v14752_v33 = vld [vmem:[#allocation17_spill] sm:$0xff] }
 0x4d7   :  { %v11357_v16 = vadd.f32 %v11059_v22, %v3354_v8  ;;  %v3356_v38 = vpop.f32.mrb[99].mxu0  ;;  %v3749_v22 = vadd.f32 %v3748_v1, %v11316_v6  ;;  %6226 = vmatprep.subr.bf16.mxu1 %v14749_v41  ;;  %8567 = vmatpush3.bf16.msra.mxu0 %v9516_v19  ;;  %v9518_v8 = vld [vmem:[%s14625_s2 + $0x218] sm:$0xff]   ;;  %v3883_v1 = vadd.f32 %v3882_v44, %v3820_v18 }
 0x4d8   :  { %v3821_v38 = vmul.f32 %v11331_v42, %v11331_v42  ;;  %8568 = vmatprep.subr.bf16.mxu0 %v9518_v8  ;;  %v3822_v19 = vmul.f32 %v11350_v45, %v11350_v45  ;;  %v9520_v44 = vld [vmem:[%s14625_s2 + $0x78] sm:$0xff]  }
 0x4d9   :  { %v3750_v60 = vadd.f32 %v3749_v22, %v11325_v35  ;;  %v9519_v22 = vld [vmem:[%s14625_s2 + $0x220] sm:$0xff]  }
 0x4da   :  { %6227 = vmatpush1.bf16.msra.mxu1 %v9514_v17  ;;  %v3884_v18 = vadd.f32 %v3883_v1, %v3821_v38  ;;  %v9521_v1 = vld [vmem:[%s14625_s2 + $0x228] sm:$0xff]  }
 0x4db   :  { %6228 = vmatprep.subr.bf16.mxu1 %v14749_v41  ;;  %8569 = vmatpush3.bf16.msra.mxu0 %v9518_v8  ;;  %v3751_v55 = vadd.f32 %v3750_v60, %v11331_v42  ;;  %v4312_v38 = vld [vmem:[#allocation2 + $0x1] sm:$0xff] }
 0x4dc   :  { %v3359_v29 = vpop.f32.mrb[100].mxu0  ;;  %8570 = vmatprep.subr.bf16.mxu0 %v9519_v22  ;;  %v3885_v60 = vadd.f32 %v3884_v18, %v3822_v19 }
 0x4dd   :  { %v11377_v40 = vadd.f32 %v11048_v52, %v3359_v29  ;;  %v3361_v49 = vpop.f32.mrb[101].mxu0  ;;  %v9517_v52 = vld [vmem:[%s14625_s2 + $0x70] sm:$0xff]   ;;  %v3752_v29 = vadd.f32 %v3751_v55, %v11350_v45  ;;  %v4184_v55 = vld [vmem:[#allocation2] sm:$0xff] }
 0x4de   :  { %v3362_v57 = vpop.f32.mrb[102].mxu0  ;;  %6229 = vmatpush1.bf16.msra.mxu1 %v9517_v52  ;;  %v3823_v49 = vmul.f32 %v11357_v16, %v11357_v16 }
 0x4df   :  { %v11385_v6 = vadd.f32 %v14752_v33, %v3362_v57  ;;  %v3364_v21 = vpop.f32.mrb[103].mxu0  ;;  %6230 = vmatprep.subr.bf16.mxu1 %v14749_v41  ;;  %8571 = vmatpush3.bf16.msra.mxu0 %v9519_v22  ;;  %v4313_v33 = vld [vmem:[#allocation2 + $0x9] sm:$0xff]  ;;  %v3753_v22 = vadd.f32 %v3752_v29, %v11357_v16  ;;  %v3824_v19 = vmul.f32 %v11377_v40, %v11377_v40  ;;  %v9523_v29 = vld [vmem:[%s14625_s2 + $0x80] sm:$0xff]  }
 0x4e0   :  { %v4376_v52 = vpack.c.bf16 %v4313_v33, %v4312_v38  ;;  %8572 = vmatprep.subr.bf16.mxu0 %v9521_v1  ;;  %v3886_v38 = vadd.f32 %v3885_v60, %v3823_v49 }
 0x4e1   :  { %v3754_v33 = vadd.f32 %v3753_v22, %v11377_v40 }
 0x4e2   :  { %6231 = vmatpush1.bf16.msra.mxu1 %v9520_v44  ;;  %6232 = vmatprep.mubr.bf16.mxu1 %v4376_v52  ;;  %v9522_v44 = vld [vmem:[%s14625_s2 + $0x230] sm:$0xff]  }
 0x4e3   :  { %8573 = vmatpush3.bf16.msra.mxu0 %v9521_v1  ;;  %6489 = vmatprep.subr.bf16.mxu1 %v14749_v41  ;;  %v3887_v1 = vadd.f32 %v3886_v38, %v3824_v19  ;;  %v3755_v60 = vadd.f32 %v3754_v33, %v11385_v6 }
 0x4e4   :  { %v3367_v17 = vpop.f32.mrb[104].mxu0  ;;  %8574 = vmatprep.subr.bf16.mxu0 %v9522_v44 }
 0x4e5   :  { %v11405_v8 = vadd.f32 %v11098_v47, %v3367_v17  ;;  %v3369_v57 = vpop.f32.mrb[105].mxu0  ;;  %v9578_v17 = vld [vmem:[#allocation2 + $0x8] sm:$0xff] }
 0x4e6   :  { %v3370_v21 = vpop.f32.mrb[106].mxu0  ;;  %v4248_v57 = vpack.c.bf16 %v9578_v17, %v4184_v55 }
 0x4e7   :  { %v11414_v18 = vadd.f32 %v11106_v23, %v3370_v21  ;;  %v3372_v47 = vpop.f32.mrb[107].mxu0  ;;  %v9524_v23 = vld [vmem:[%s14625_s2 + $0x238] sm:$0xff]   ;;  %v3825_v21 = vmul.f32 %v11385_v6, %v11385_v6  ;;  %8575 = vmatpush3.bf16.msra.mxu0 %v9522_v44  ;;  %v3826_v49 = vmul.f32 %v11405_v8, %v11405_v8  ;;  %v3756_v19 = vadd.f32 %v3755_v60, %v11405_v8 }
 0x4e8   :  { %6233 = vmatmul.mubr.bf16.vlgmr.msra.gmra.mrb[64].mxu1 %v4248_v57  ;;  %8576 = vmatprep.subr.bf16.mxu0 %v9524_v23 }
 0x4e9   :  { %6490 = vmatpush1.bf16.msra.mxu1 %v9523_v29  ;;  %v3888_v17 = vadd.f32 %v3887_v1, %v3825_v21  ;;  %v3827_v38 = vmul.f32 %v11414_v18, %v11414_v18  ;;  %v3757_v33 = vadd.f32 %v3756_v19, %v11414_v18 }
 0x4ea   :  { %6491 = vmatprep.subr.bf16.mxu1 %v14749_v41 }
 0x4eb   :  { %8577 = vmatpush3.bf16.msra.mxu0 %v9524_v23  ;;  %v3889_v44 = vadd.f32 %v3888_v17, %v3826_v49 }
 0x4ec   :  { %v3375_v52 = vpop.f32.mrb[108].mxu0 }
 0x4ed   :  { %v11434_v55 = vadd.f32 %v11096_v28, %v3375_v52  ;;  %v3377_v22 = vpop.f32.mrb[109].mxu0  ;;  %v9525_v28 = vld [vmem:[%s14625_s2 + $0x88] sm:$0xff]   ;;  %v3890_v52 = vadd.f32 %v3889_v44, %v3827_v38 }
 0x4ee   :  { %v3378_v47 = vpop.f32.mrb[110].mxu0  ;;  %6492 = vmatpush1.bf16.msra.mxu1 %v9525_v28 }
 0x4ef   :  { %v11438_v57 = vadd.f32 %v11104_v10, %v3378_v47  ;;  %v3380_v29 = vpop.f32.mrb[111].mxu0  ;;  %v3828_v1 = vmul.f32 %v11434_v55, %v11434_v55  ;;  %v3758_v10 = vadd.f32 %v3757_v33, %v11434_v55  ;;  %6493 = vmatprep.subr.bf16.mxu1 %v14749_v41 }
 0x4f1   :  { %v3891_v22 = vadd.f32 %v3890_v52, %v3828_v1  ;;  %v3829_v47 = vmul.f32 %v11438_v57, %v11438_v57  ;;  %v3759_v29 = vadd.f32 %v3758_v10, %v11438_v57 }
 0x4f3   :  { %v3892_v38 = vadd.f32 %v3891_v22, %v3829_v47 }
 0x4f4   :  { %v3383_v21 = vpop.f32.mrb[112].mxu0 }
 0x4f5   :  { %v11450_v23 = vadd.f32 %v11141_v62, %v3383_v21  ;;  %v3385_v60 = vpop.f32.mrb[113].mxu0 }
 0x4f6   :  { %v3386_v49 = vpop.f32.mrb[114].mxu0 }
 0x4f7   :  { %v11456_v17 = vadd.f32 %v11151_v54, %v3386_v49  ;;  %v3388_v19 = vpop.f32.mrb[115].mxu0  ;;  %v3830_v44 = vmul.f32 %v11450_v23, %v11450_v23  ;;  %v3760_v62 = vadd.f32 %v3759_v29, %v11450_v23  ;;  %v9526_v29 = vld [vmem:[%s14625_s2 + $0x90] sm:$0xff]  }
 0x4f8   :  { %6494 = vmatpush1.bf16.msra.mxu1 %v9526_v29 }
 0x4f9   :  { %v3893_v33 = vadd.f32 %v3892_v38, %v3830_v44  ;;  %v3831_v1 = vmul.f32 %v11456_v17, %v11456_v17  ;;  %v3761_v60 = vadd.f32 %v3760_v62, %v11456_v17  ;;  %6495 = vmatprep.subr.bf16.mxu1 %v14749_v41 }
 0x4fb   :  { %v3894_v47 = vadd.f32 %v3893_v33, %v3831_v1 }
 0x4fc   :  { %v3391_v28 = vpop.f32.mrb[116].mxu0 }
 0x4fd   :  { %v11465_v21 = vadd.f32 %v11139_v12, %v3391_v28  ;;  %v3393_v52 = vpop.f32.mrb[117].mxu0 }
 0x4fe   :  { %v3394_v54 = vpop.f32.mrb[118].mxu0 }
 0x4ff   :  { %v3832_v10 = vmul.f32 %v11465_v21, %v11465_v21  ;;  %v11471_v49 = vadd.f32 %v11149_v39, %v3394_v54  ;;  %v3396_v22 = vpop.f32.mrb[119].mxu0  ;;  %v3762_v19 = vadd.f32 %v3761_v60, %v11465_v21 }
 0x501   :  { %14753 = vst [vmem:[#allocation17_spill] sm:$0xff] %v11471_v49  ;;  %v3895_v12 = vadd.f32 %v3894_v47, %v3832_v10  ;;  %v3833_v44 = vmul.f32 %v11471_v49, %v11471_v49  ;;  %v3763_v62 = vadd.f32 %v3762_v19, %v11471_v49 }
 0x503   :  { %v3896_v1 = vadd.f32 %v3895_v12, %v3833_v44 }
 0x504   :  { %v3399_v38 = vpop.f32.mrb[120].mxu0 }
 0x505   :  { %v11481_v28 = vadd.f32 %v11190_v2, %v3399_v38  ;;  %v3401_v39 = vpop.f32.mrb[121].mxu0 }
 0x506   :  { %v3402_v33 = vpop.f32.mrb[122].mxu0 }
 0x507   :  { %14754 = vst [vmem:[#allocation22_spill] sm:$0xff] %v11481_v28  ;;  %v3764_v52 = vadd.f32 %v3763_v62, %v11481_v28  ;;  %v3834_v54 = vmul.f32 %v11481_v28, %v11481_v28  ;;  %v11488_v60 = vadd.f32 %v11201_v7, %v3402_v33  ;;  %v3404_v10 = vpop.f32.mrb[123].mxu0 }
 0x508   :  { %v9527_v10 = vld [vmem:[%s14625_s2 + $0x98] sm:$0xff]  }
 0x509   :  { %14755 = vst [vmem:[#allocation23_spill] sm:$0xff] %v11488_v60  ;;  %v3897_v22 = vadd.f32 %v3896_v1, %v3834_v54  ;;  %v3765_v47 = vadd.f32 %v3764_v52, %v11488_v60  ;;  %v3835_v2 = vmul.f32 %v11488_v60, %v11488_v60  ;;  %6496 = vmatpush1.bf16.msra.mxu1 %v9527_v10  ;;  %v3917_v10 = vlaneseq }
 0x50a   :  { %6497 = vmatprep.subr.bf16.mxu1 %v14749_v41 }
 0x50b   :  { %v3898_v19 = vadd.f32 %v3897_v22, %v3835_v2 }
 0x50c   :  { %v3407_v29 = vpop.f32.mrb[124].mxu0 }
 0x50d   :  { %v11494_v38 = vadd.f32 %v11183_v26, %v3407_v29  ;;  %v3409_v12 = vpop.f32.mrb[125].mxu0 }
 0x50e   :  { %v3410_v44 = vpop.f32.mrb[126].mxu0 }
 0x50f   :  { %14756 = vst [vmem:[#allocation24_spill] sm:$0xff] %v11494_v38  ;;  %v3766_v62 = vadd.f32 %v3765_v47, %v11494_v38  ;;  %v3836_v7 = vmul.f32 %v11494_v38, %v11494_v38  ;;  %v3700_v39 = vadd.f32 %v11192_v30, %v3410_v44  ;;  %v3412_v33 = vpop.f32.mrb[127].mxu0 }
 0x511   :  { %v3899_v1 = vadd.f32 %v3898_v19, %v3836_v7  ;;  %v3767_v52 = vadd.f32 %v3766_v62, %v3700_v39  ;;  %v3837_v54 = vmul.f32 %v3700_v39, %v3700_v39 }
 0x513   :  { %v3768_v22 = vrot.slane %v3767_v52, 4  ;;  %v3900_v26 = vadd.f32 %v3899_v1, %v3837_v54  ;;  %v9528_v1 = vld [vmem:[%s14625_s2 + $0xa0] sm:$0xff]  }
 0x514   :  { %6498 = vmatpush1.bf16.msra.mxu1 %v9528_v1  ;;  %v14760_v1 = vld [vmem:[#allocation6_spill] sm:$0xff] }
 0x515   :  { %v3769_v2 = vadd.f32 %v3768_v22, %v3767_v52  ;;  %v3901_v29 = vrot.slane %v3900_v26, 4  ;;  %6499 = vmatprep.subr.bf16.mxu1 %v14749_v41  ;;  %v3918_v22 = vshrl.u32 %v3917_v10, 7 }
 0x517   :  { %v3770_v47 = vrot.slane %v3769_v2, 2  ;;  %v3902_v12 = vadd.f32 %v3901_v29, %v3900_v26  ;;  %v9529_v29 = vld [vmem:[%s14625_s2 + $0xa8] sm:$0xff]  }
 0x518   :  { %6500 = vmatpush1.bf16.msra.mxu1 %v9529_v29 }
 0x519   :  { %v3771_v38 = vadd.f32 %v3770_v47, %v3769_v2  ;;  %v3903_v60 = vrot.slane %v3902_v12, 2  ;;  %6501 = vmatprep.subr.bf16.mxu1 %v14749_v41 }
 0x51b   :  { %v3772_v30 = vrot.slane %v3771_v38, 1  ;;  %v3904_v44 = vadd.f32 %v3903_v60, %v3902_v12  ;;  %v3703_v60 = vld [vmem:[%s14626_s3] sm:$0x1] }
 0x51d   :  { %v3773_v19 = vadd.f32 %v3772_v30, %v3771_v38  ;;  %v3905_v62 = vrot.slane %v3904_v44, 1  ;;  %v11511_v38 = vsub.s32 0, %v3918_v22 }
 0x51f   :  { %v3906_v7 = vadd.f32 %v3905_v62, %v3904_v44  ;;  %v3907_v33 = vmul.f32 0.001953125, %v3773_v19  ;;  %14757 = vst [vmem:[#allocation25_spill] sm:$0xff] %v11511_v38  ;;  %v14758_v44 = vld [vmem:[#allocation4_spill] sm:$0xff]  ;;  %v14759_v62 = vld [vmem:[#allocation5_spill] sm:$0xff] }
 0x521   :  { %v3908_v28 = vmul.f32 0.001953125, %v3906_v7  ;;  %v3909_v49 = vmul.f32 %v3907_v33, %v3907_v33 }
 0x523   :  { %v3910_v52 = vsub.f32 %v3908_v28, %v3909_v49  ;;  %v3704_v49 = vld [vmem:[%s14627_s4] sm:$0x1] }
 0x525   :  { %v3911_v54 = vadd.f32 1e-05, %v3910_v52  ;;  %v14761_v52 = vld [vmem:[#allocation7_spill] sm:$0xff] }
 0x527   :  { %9572 = vrsqrt.f32 %v3911_v54 }
 0x531   :  { %v9573_v26 = vpop.eup %9572 }
 0x532   :  { %v3913_v2 = vmul.f32 %v9573_v26, %v3703_v60  ;;  %v14763_v26 = vld [vmem:[#allocation9_spill] sm:$0xff] }
 0x534   :  { %v3914_v28 = vmul.f32 %v3913_v2, %v3907_v33  ;;  %v11520_v47 = vrot.slane %v3913_v2, %v11511_v38 }
 0x536   :  { %v3915_v12 = vsub.f32 %v3704_v49, %v3914_v28  ;;  %v3985_v30 = vmul.f32 %v11520_v47, %v3700_v39  ;;  %v11526_v19 = vmul.f32 %v11520_v47, %v14758_v44  ;;  %v11530_v7 = vmul.f32 %v11520_v47, %v14759_v62  ;;  %v14762_v39 = vld [vmem:[#allocation8_spill] sm:$0xff]  ;;  %v14764_v49 = vld [vmem:[#allocation10_spill] sm:$0xff] }
 0x537   :  { %v11534_v33 = vmul.f32 %v11520_v47, %v14760_v1  ;;  %v11538_v54 = vmul.f32 %v11520_v47, %v14761_v52  ;;  %v11542_v10 = vmul.f32 %v11520_v47, %v10981_v27  ;;  %v11546_v22 = vmul.f32 %v11520_v47, %v14762_v39  ;;  %v14765_v27 = vld [vmem:[#allocation11_spill] sm:$0xff]  ;;  %v14766_v62 = vld [vmem:[#allocation12_spill] sm:$0xff]  ;;  %v14767_v1 = vld [vmem:[#allocation13_spill] sm:$0xff] }
 0x538   :  { %v11549_v60 = vrot.slane %v3915_v12, %v11511_v38  ;;  %v11553_v2 = vmul.f32 %v11520_v47, %v14763_v26  ;;  %v11557_v29 = vmul.f32 %v11520_v47, %v10994_v13  ;;  %v11561_v28 = vmul.f32 %v11520_v47, %v14764_v49  ;;  %v14770_v26 = vld [vmem:[#allocation14_spill] sm:$0xff] }
 0x539   :  { %v11565_v44 = vmul.f32 %v11520_v47, %v14765_v27  ;;  %v11569_v12 = vmul.f32 %v11520_v47, %v14766_v62  ;;  %v11573_v52 = vmul.f32 %v11520_v47, %v14767_v1  ;;  %v11577_v13 = vmul.f32 %v11520_v47, %v11023_v59  ;;  %v14773_v62 = vld [vmem:[#allocation15_spill] sm:$0xff]  ;;  %v14774_v1 = vld [vmem:[#allocation16_spill] sm:$0xff]  ;;  %v14775_v59 = vld [vmem:[#allocation18_spill] sm:$0xff] }
 0x53a   :  { %v4055_v39 = vadd.f32 %v11549_v60, %v3985_v30  ;;  %v11582_v49 = vmul.f32 %v11520_v47, %v14770_v26  ;;  %v11586_v27 = vmul.f32 %v11520_v47, %v11039_v15  ;;  %v11590_v38 = vmul.f32 %v11520_v47, %v14773_v62  ;;  %v14776_v30 = vld [vmem:[#allocation19_spill] sm:$0xff] }
 0x53b   :  { %14768 = vst [vmem:[#allocation4_spill] sm:$0xff] %v11573_v52  ;;  %14769 = vst [vmem:[#allocation5_spill] sm:$0xff] %v11577_v13  ;;  %v11594_v52 = vmul.f32 %v11520_v47, %v14774_v1  ;;  %v11598_v13 = vmul.f32 %v11520_v47, %v14775_v59  ;;  %v11602_v26 = vmul.f32 %v11520_v47, %v14776_v30 }
 0x53c   :  { %14771 = vst [vmem:[#allocation6_spill] sm:$0xff] %v11582_v49  ;;  %14772 = vst [vmem:[#allocation7_spill] sm:$0xff] %v11586_v27  ;;  %v14777_v49 = vld [vmem:[#allocation20_spill] sm:$0xff]  ;;  %v4119_v27 = vmax.f32 %v4055_v39, 0.0  ;;  %v11610_v62 = vmul.f32 %v11520_v47, %v11102_v5  ;;  %v11614_v1 = vmul.f32 %v11520_v47, %v11112_v36  ;;  %v11618_v59 = vmul.f32 %v11520_v47, %v11124_v58  ;;  %v14778_v39 = vld [vmem:[#allocation21_spill] sm:$0xff] }
 0x53d   :  { %v11606_v15 = vmul.f32 %v11520_v47, %v14777_v49  ;;  %v11622_v30 = vmul.f32 %v11520_v47, %v11131_v11  ;;  %v11626_v49 = vmul.f32 %v11520_v47, %v11147_v25  ;;  %v11630_v5 = vmul.f32 %v11520_v47, %v11156_v0 }
 0x53e   :  { %v11634_v36 = vmul.f32 %v11520_v47, %v11168_v37  ;;  %v11638_v58 = vmul.f32 %v11520_v47, %v11174_v43  ;;  %v11642_v11 = vmul.f32 %v11520_v47, %v11188_v20  ;;  %v11646_v25 = vmul.f32 %v11520_v47, %v11199_v34  ;;  %4183 = vst [vmem:[#allocation2 + $0x339] sm:$0xff] %v4119_v27 }
 0x53f   :  { %v11650_v0 = vmul.f32 %v11520_v47, %v11213_v53  ;;  %v11654_v37 = vmul.f32 %v11520_v47, %v11218_v48  ;;  %v11658_v43 = vmul.f32 %v11520_v47, %v11227_v61  ;;  %v11662_v20 = vmul.f32 %v11520_v47, %v11232_v3 }
 0x540   :  { %v11666_v34 = vmul.f32 %v11520_v47, %v11241_v56  ;;  %v11670_v53 = vmul.f32 %v11520_v47, %v11247_v9  ;;  %v11674_v48 = vmul.f32 %v11520_v47, %v11256_v24  ;;  %v11678_v61 = vmul.f32 %v11520_v47, %v11260_v31 }
 0x541   :  { %v11682_v3 = vmul.f32 %v11520_v47, %v11269_v50  ;;  %v11686_v56 = vmul.f32 %v11520_v47, %v11274_v46  ;;  %v11690_v9 = vmul.f32 %v11520_v47, %v11283_v63  ;;  %v11694_v24 = vmul.f32 %v11520_v47, %v11289_v51 }
 0x542   :  { %v11698_v31 = vmul.f32 %v11520_v47, %v11298_v4  ;;  %v11702_v50 = vmul.f32 %v11520_v47, %v11302_v32  ;;  %v11706_v46 = vmul.f32 %v11520_v47, %v11311_v14  ;;  %v11710_v63 = vmul.f32 %v11520_v47, %v14778_v39  ;;  %v9530_v4 = vld [vmem:[%s14625_s2 + $0xb0] sm:$0xff]  }
 0x543   :  { %v11714_v51 = vmul.f32 %v11520_v47, %v11325_v35  ;;  %v11721_v32 = vmul.f32 %v11520_v47, %v11331_v42  ;;  %v11725_v14 = vmul.f32 %v11520_v47, %v11350_v45  ;;  %v11729_v27 = vmul.f32 %v11520_v47, %v11357_v16  ;;  %6502 = vmatpush1.bf16.msra.mxu1 %v9530_v4 }
 0x544   :  { %v11733_v35 = vmul.f32 %v11520_v47, %v11377_v40  ;;  %v11737_v39 = vmul.f32 %v11520_v47, %v11385_v6  ;;  %v11741_v42 = vmul.f32 %v11520_v47, %v11405_v8  ;;  %v11745_v45 = vmul.f32 %v11520_v47, %v11414_v18  ;;  %6503 = vmatprep.subr.bf16.mxu1 %v14749_v41 }
 0x545   :  { %v11749_v16 = vmul.f32 %v11520_v47, %v11434_v55  ;;  %v11753_v40 = vmul.f32 %v11520_v47, %v11438_v57  ;;  %v11757_v6 = vmul.f32 %v11520_v47, %v11450_v23  ;;  %v11761_v8 = vmul.f32 %v11520_v47, %v11456_v17  ;;  %v14782_v55 = vld [vmem:[#allocation17_spill] sm:$0xff]  ;;  %v14783_v57 = vld [vmem:[#allocation22_spill] sm:$0xff]  ;;  %v14784_v23 = vld [vmem:[#allocation23_spill] sm:$0xff] }
 0x546   :  { %v11765_v18 = vmul.f32 %v11520_v47, %v11465_v21  ;;  %v11770_v4 = vmul.f32 %v11520_v47, %v14782_v55  ;;  %v14785_v17 = vld [vmem:[#allocation24_spill] sm:$0xff]  ;;  %v11786_v21 = vadd.f32 %v11549_v60, %v11526_v19  ;;  %v11790_v55 = vadd.f32 %v11549_v60, %v11530_v7 }
 0x547   :  { %14779 = vst [vmem:[#allocation8_spill] sm:$0xff] %v11753_v40  ;;  %14780 = vst [vmem:[#allocation9_spill] sm:$0xff] %v11757_v6  ;;  %v11774_v40 = vmul.f32 %v11520_v47, %v14783_v57  ;;  %v11778_v6 = vmul.f32 %v11520_v47, %v14784_v23  ;;  %v11794_v57 = vadd.f32 %v11549_v60, %v11534_v33 }
 0x548   :  { %14781 = vst [vmem:[#allocation10_spill] sm:$0xff] %v11761_v8  ;;  %v11782_v8 = vmul.f32 %v11520_v47, %v14785_v17  ;;  %v11798_v23 = vadd.f32 %v11549_v60, %v11538_v54  ;;  %v11802_v47 = vadd.f32 %v11549_v60, %v11542_v10  ;;  %v11806_v19 = vadd.f32 %v11549_v60, %v11546_v22  ;;  %v14789_v17 = vld [vmem:[#allocation4_spill] sm:$0xff] }
 0x549   :  { %v11810_v7 = vadd.f32 %v11549_v60, %v11553_v2  ;;  %v11814_v33 = vadd.f32 %v11549_v60, %v11557_v29  ;;  %v11818_v54 = vadd.f32 %v11549_v60, %v11561_v28  ;;  %v11822_v10 = vadd.f32 %v11549_v60, %v11565_v44 }
 0x54a   :  { %v11826_v22 = vadd.f32 %v11549_v60, %v11569_v12  ;;  %v11830_v2 = vadd.f32 %v11549_v60, %v14789_v17  ;;  %v11846_v12 = vadd.f32 %v11549_v60, %v11590_v38  ;;  %v11850_v17 = vadd.f32 %v11549_v60, %v11594_v52 }
 0x54b   :  { %14786 = vst [vmem:[#allocation11_spill] sm:$0xff] %v11810_v7  ;;  %14787 = vst [vmem:[#allocation12_spill] sm:$0xff] %v11814_v33  ;;  %v14790_v7 = vld [vmem:[#allocation5_spill] sm:$0xff]  ;;  %v14791_v33 = vld [vmem:[#allocation6_spill] sm:$0xff]  ;;  %v11866_v38 = vadd.f32 %v11549_v60, %v11610_v62  ;;  %v11870_v52 = vadd.f32 %v11549_v60, %v11614_v1  ;;  %v11886_v62 = vadd.f32 %v11549_v60, %v11630_v5 }
 0x54c   :  { %14788 = vst [vmem:[#allocation13_spill] sm:$0xff] %v11818_v54  ;;  %v11834_v29 = vadd.f32 %v11549_v60, %v14790_v7  ;;  %v11838_v28 = vadd.f32 %v11549_v60, %v14791_v33  ;;  %v14792_v54 = vld [vmem:[#allocation7_spill] sm:$0xff]  ;;  %v11854_v7 = vadd.f32 %v11549_v60, %v11598_v13  ;;  %v11858_v33 = vadd.f32 %v11549_v60, %v11602_v26 }
 0x54d   :  { %v11842_v44 = vadd.f32 %v11549_v60, %v14792_v54  ;;  %v11862_v54 = vadd.f32 %v11549_v60, %v11606_v15  ;;  %v11874_v13 = vadd.f32 %v11549_v60, %v11618_v59  ;;  %v11878_v26 = vadd.f32 %v11549_v60, %v11622_v30 }
 0x54e   :  { %v11882_v15 = vadd.f32 %v11549_v60, %v11626_v49  ;;  %v11890_v1 = vadd.f32 %v11549_v60, %v11634_v36  ;;  %v11894_v59 = vadd.f32 %v11549_v60, %v11638_v58  ;;  %v11898_v30 = vadd.f32 %v11549_v60, %v11642_v11 }
 0x54f   :  { %v11902_v49 = vadd.f32 %v11549_v60, %v11646_v25  ;;  %v11906_v5 = vadd.f32 %v11549_v60, %v11650_v0  ;;  %v11910_v36 = vadd.f32 %v11549_v60, %v11654_v37  ;;  %v11914_v58 = vadd.f32 %v11549_v60, %v11658_v43 }
 0x550   :  { %v11918_v11 = vadd.f32 %v11549_v60, %v11662_v20  ;;  %v11922_v25 = vadd.f32 %v11549_v60, %v11666_v34  ;;  %v11926_v0 = vadd.f32 %v11549_v60, %v11670_v53  ;;  %v11930_v37 = vadd.f32 %v11549_v60, %v11674_v48 }
 0x551   :  { %v11934_v43 = vadd.f32 %v11549_v60, %v11678_v61  ;;  %v11938_v20 = vadd.f32 %v11549_v60, %v11682_v3  ;;  %v11942_v34 = vadd.f32 %v11549_v60, %v11686_v56  ;;  %v11946_v53 = vadd.f32 %v11549_v60, %v11690_v9 }
 0x552   :  { %14793 = vst [vmem:[#allocation14_spill] sm:$0xff] %v11930_v37  ;;  %v11950_v48 = vadd.f32 %v11549_v60, %v11694_v24  ;;  %v11954_v61 = vadd.f32 %v11549_v60, %v11698_v31  ;;  %v11958_v3 = vadd.f32 %v11549_v60, %v11702_v50  ;;  %v11962_v56 = vadd.f32 %v11549_v60, %v11706_v46  ;;  %v9531_v50 = vld [vmem:[%s14625_s2 + $0xb8] sm:$0xff]  }
 0x553   :  { %14794 = vst [vmem:[#allocation15_spill] sm:$0xff] %v11934_v43  ;;  %14795 = vst [vmem:[#allocation16_spill] sm:$0xff] %v11938_v20  ;;  %v11966_v9 = vadd.f32 %v11549_v60, %v11710_v63  ;;  %v11970_v24 = vadd.f32 %v11549_v60, %v11714_v51  ;;  %v11974_v31 = vadd.f32 %v11549_v60, %v11721_v32  ;;  %6504 = vmatpush1.bf16.msra.mxu1 %v9531_v50 }
 0x554   :  { %14796 = vst [vmem:[#allocation18_spill] sm:$0xff] %v11942_v34  ;;  %14797 = vst [vmem:[#allocation19_spill] sm:$0xff] %v11946_v53  ;;  %v11981_v46 = vadd.f32 %v11549_v60, %v11725_v14  ;;  %v11985_v63 = vadd.f32 %v11549_v60, %v11729_v27  ;;  %v11989_v51 = vadd.f32 %v11549_v60, %v11733_v35  ;;  %6505 = vmatprep.subr.bf16.mxu1 %v14749_v41 }
 0x555   :  { %14798 = vst [vmem:[#allocation20_spill] sm:$0xff] %v11950_v48  ;;  %14799 = vst [vmem:[#allocation21_spill] sm:$0xff] %v11954_v61  ;;  %v11993_v32 = vadd.f32 %v11549_v60, %v11737_v39  ;;  %v12001_v14 = vadd.f32 %v11549_v60, %v11745_v45  ;;  %v12005_v27 = vadd.f32 %v11549_v60, %v11749_v16  ;;  %v14680_v41 = vmax.f32 %v11914_v58, 0.0 }
 0x556   :  { %14800 = vst [vmem:[#allocation17_spill] sm:$0xff] %v11958_v3  ;;  %14801 = vst [vmem:[#allocation22_spill] sm:$0xff] %v11962_v56  ;;  %v12021_v45 = vadd.f32 %v11549_v60, %v11765_v18  ;;  %v12025_v16 = vadd.f32 %v11549_v60, %v11770_v4  ;;  %v12030_v50 = vadd.f32 %v11549_v60, %v11774_v40  ;;  %v14668_v18 = vmax.f32 %v11786_v21, 0.0 }
 0x557   :  { %14802 = vst [vmem:[#allocation23_spill] sm:$0xff] %v11966_v9  ;;  %14803 = vst [vmem:[#allocation24_spill] sm:$0xff] %v11974_v31  ;;  %v11997_v31 = vadd.f32 %v11549_v60, %v11741_v42  ;;  %v14671_v40 = vmax.f32 %v11806_v19, 0.0  ;;  %v4087_v4 = vmax.f32 %v11910_v36, 0.0  ;;  %v14686_v36 = vmax.f32 %v11942_v34, 0.0 }
 0x558   :  { %14804 = vst [vmem:[#allocation4_spill] sm:$0xff] %v11981_v46  ;;  %14805 = vst [vmem:[#allocation5_spill] sm:$0xff] %v11985_v63  ;;  %v14809_v63 = vld [vmem:[#allocation8_spill] sm:$0xff] }
 0x559   :  { %14806 = vst [vmem:[#allocation6_spill] sm:$0xff] %v11989_v51  ;;  %14807 = vst [vmem:[#allocation7_spill] sm:$0xff] %v11993_v32  ;;  %v12009_v35 = vadd.f32 %v11549_v60, %v14809_v63  ;;  %v14810_v51 = vld [vmem:[#allocation9_spill] sm:$0xff]  ;;  %v14812_v32 = vld [vmem:[#allocation10_spill] sm:$0xff]  ;;  %v12034_v63 = vadd.f32 %v11549_v60, %v11778_v6 }
 0x55a   :  { %14808 = vst [vmem:[#allocation26_spill] sm:$0xff] %v11997_v31  ;;  %v12013_v39 = vadd.f32 %v11549_v60, %v14810_v51  ;;  %v12017_v42 = vadd.f32 %v11549_v60, %v14812_v32  ;;  %14814 = vst [vmem:[#allocation10_spill] sm:$0xff] %v12021_v45  ;;  %v12038_v51 = vadd.f32 %v11549_v60, %v11782_v8  ;;  %v14669_v32 = vmax.f32 %v11790_v55, 0.0  ;;  %v14819_v6 = vld [vmem:[#allocation12_spill] sm:$0xff] }
 0x55b   :  { %14815 = vst [vmem:[#allocation27_spill] sm:$0xff] %v12025_v16  ;;  %14816 = vst [vmem:[#allocation28_spill] sm:$0xff] %v12030_v50  ;;  %v14670_v16 = vmax.f32 %v11802_v47, 0.0  ;;  %v14818_v50 = vld [vmem:[#allocation11_spill] sm:$0xff]  ;;  %v14673_v60 = vmax.f32 %v11822_v10, 0.0  ;;  %v14821_v45 = vmax.f32 %v11794_v57, 0.0 }
 0x55c   :  { %14811 = vst [vmem:[#allocation8_spill] sm:$0xff] %v12013_v39  ;;  %14813 = vst [vmem:[#allocation9_spill] sm:$0xff] %v12017_v42  ;;  %v14820_v42 = vld [vmem:[#allocation13_spill] sm:$0xff]  ;;  %v14675_v8 = vmax.f32 %v11842_v44, 0.0 }
 0x55d   :  { %14817 = vst [vmem:[#allocation29_spill] sm:$0xff] %v12034_v63  ;;  %v14672_v39 = vmax.f32 %v14820_v42, 0.0  ;;  %4120 = vst [vmem:[#allocation2 + $0x19] sm:$0xff] %v14668_v18  ;;  %v14822_v63 = vmax.f32 %v11798_v23, 0.0  ;;  %v14674_v18 = vmax.f32 %v11838_v28, 0.0 }
 0x55e   :  { %4121 = vst [vmem:[#allocation2 + $0x21] sm:$0xff] %v14669_v32  ;;  %4122 = vst [vmem:[#allocation2 + $0x31] sm:$0xff] %v14821_v45  ;;  %v14823_v32 = vmax.f32 %v14818_v50, 0.0  ;;  %v14824_v45 = vmax.f32 %v14819_v6, 0.0 }
 0x55f   :  { %4123 = vst [vmem:[#allocation2 + $0x39] sm:$0xff] %v14822_v63  ;;  %4124 = vst [vmem:[#allocation2 + $0x49] sm:$0xff] %v14670_v16  ;;  %v14676_v63 = vmax.f32 %v11854_v7, 0.0  ;;  %v14678_v16 = vmax.f32 %v11874_v13, 0.0 }
 0x560   :  { %4125 = vst [vmem:[#allocation2 + $0x51] sm:$0xff] %v14671_v40  ;;  %4126 = vst [vmem:[#allocation2 + $0x61] sm:$0xff] %v14823_v32  ;;  %v14825_v40 = vmax.f32 %v11826_v22, 0.0  ;;  %v14826_v32 = vmax.f32 %v11830_v2, 0.0 }
 0x561   :  { %4127 = vst [vmem:[#allocation2 + $0x69] sm:$0xff] %v14824_v45  ;;  %4128 = vst [vmem:[#allocation2 + $0x79] sm:$0xff] %v14672_v39  ;;  %v14827_v45 = vmax.f32 %v11834_v29, 0.0  ;;  %v14677_v39 = vmax.f32 %v11870_v52, 0.0 }
 0x562   :  { %4129 = vst [vmem:[#allocation2 + $0x81] sm:$0xff] %v14673_v60  ;;  %4130 = vst [vmem:[#allocation2 + $0x91] sm:$0xff] %v14825_v40  ;;  %v14828_v40 = vmax.f32 %v11846_v12, 0.0  ;;  %v4086_v60 = vmax.f32 %v11906_v5, 0.0  ;;  %v14685_v5 = vmax.f32 %v11938_v20, 0.0  ;;  %v14857_v20 = vld [vmem:[#allocation27_spill] sm:$0xff] }
 0x563   :  { %4131 = vst [vmem:[#allocation2 + $0x99] sm:$0xff] %v14826_v32  ;;  %4132 = vst [vmem:[#allocation2 + $0xa9] sm:$0xff] %v14827_v45  ;;  %v14829_v32 = vmax.f32 %v11850_v17, 0.0  ;;  %v14679_v45 = vmax.f32 %v11886_v62, 0.0  ;;  %v14850_v34 = vld [vmem:[#allocation8_spill] sm:$0xff] }
 0x564   :  { %4133 = vst [vmem:[#allocation2 + $0xb1] sm:$0xff] %v14674_v18  ;;  %4134 = vst [vmem:[#allocation2 + $0xc1] sm:$0xff] %v14675_v8  ;;  %v14830_v18 = vmax.f32 %v11858_v33, 0.0  ;;  %v14831_v8 = vmax.f32 %v11862_v54, 0.0 }
 0x565   :  { %4135 = vst [vmem:[#allocation2 + $0xc9] sm:$0xff] %v14828_v40  ;;  %4136 = vst [vmem:[#allocation2 + $0xd9] sm:$0xff] %v14829_v32  ;;  %v14832_v40 = vmax.f32 %v11866_v38, 0.0  ;;  %v14681_v32 = vmax.f32 %v11902_v49, 0.0 }
 0x566   :  { %4137 = vst [vmem:[#allocation2 + $0xe1] sm:$0xff] %v14676_v63  ;;  %4138 = vst [vmem:[#allocation2 + $0xf1] sm:$0xff] %v14830_v18  ;;  %v14833_v18 = vmax.f32 %v11878_v26, 0.0  ;;  %v14838_v63 = vmax.f32 %v11922_v25, 0.0 }
 0x567   :  { %4139 = vst [vmem:[#allocation2 + $0xf9] sm:$0xff] %v14831_v8  ;;  %4140 = vst [vmem:[#allocation2 + $0x109] sm:$0xff] %v14832_v40  ;;  %v14834_v8 = vmax.f32 %v11882_v15, 0.0  ;;  %v14682_v40 = vmax.f32 %v11918_v11, 0.0 }
 0x568   :  { %4141 = vst [vmem:[#allocation2 + $0x111] sm:$0xff] %v14677_v39  ;;  %4142 = vst [vmem:[#allocation2 + $0x121] sm:$0xff] %v14678_v16  ;;  %v14835_v39 = vmax.f32 %v11890_v1, 0.0  ;;  %v14836_v16 = vmax.f32 %v11894_v59, 0.0 }
 0x569   :  { %4143 = vst [vmem:[#allocation2 + $0x129] sm:$0xff] %v14833_v18  ;;  %4144 = vst [vmem:[#allocation2 + $0x139] sm:$0xff] %v14834_v8  ;;  %v14837_v18 = vmax.f32 %v11898_v30, 0.0  ;;  %v14684_v8 = vmax.f32 %v11934_v43, 0.0 }
 0x56a   :  { %4145 = vst [vmem:[#allocation2 + $0x141] sm:$0xff] %v14679_v45  ;;  %4146 = vst [vmem:[#allocation2 + $0x151] sm:$0xff] %v14835_v39  ;;  %v14845_v39 = vld [vmem:[#allocation7_spill] sm:$0xff]  ;;  %v5213_v45 = vld [vmem:[#allocation2 + $0x6a] sm:$0xff] }
 0x56b   :  { %4147 = vst [vmem:[#allocation2 + $0x159] sm:$0xff] %v14836_v16  ;;  %4148 = vst [vmem:[#allocation2 + $0x169] sm:$0xff] %v14837_v18  ;;  %v14841_v16 = vld [vmem:[#allocation24_spill] sm:$0xff]  ;;  %v5211_v18 = vld [vmem:[#allocation2 + $0x52] sm:$0xff] }
 0x56c   :  { %4149 = vst [vmem:[#allocation2 + $0x171] sm:$0xff] %v14681_v32  ;;  %4150 = vst [vmem:[#allocation2 + $0x181] sm:$0xff] %v4086_v60  ;;  %v14839_v60 = vmax.f32 %v11926_v0, 0.0  ;;  %v4187_v32 = vld [vmem:[#allocation2 + $0x20] sm:$0xff] }
 0x56d   :  { %4151 = vst [vmem:[#allocation2 + $0x189] sm:$0xff] %v4087_v4  ;;  %4152 = vst [vmem:[#allocation2 + $0x1c9] sm:$0xff] %v14680_v41  ;;  %v14840_v4 = vmax.f32 %v11930_v37, 0.0  ;;  %v14844_v41 = vld [vmem:[#allocation6_spill] sm:$0xff]  ;;  %v14858_v37 = vld [vmem:[#allocation28_spill] sm:$0xff] }
 0x56e   :  { %4153 = vst [vmem:[#allocation2 + $0x1d1] sm:$0xff] %v14682_v40  ;;  %4154 = vst [vmem:[#allocation2 + $0x1e1] sm:$0xff] %v14838_v63  ;;  %v14842_v63 = vmax.f32 %v11946_v53, 0.0  ;;  %v14843_v40 = vld [vmem:[#allocation5_spill] sm:$0xff]  ;;  %v5209_v53 = vld [vmem:[#allocation2 + $0x3a] sm:$0xff] }
 0x56f   :  { %4155 = vst [vmem:[#allocation2 + $0x1e9] sm:$0xff] %v14839_v60  ;;  %4156 = vst [vmem:[#allocation2 + $0x1f9] sm:$0xff] %v14840_v4  ;;  %v5208_v60 = vld [vmem:[#allocation2 + $0x32] sm:$0xff] }
 0x570   :  { %4157 = vst [vmem:[#allocation2 + $0x201] sm:$0xff] %v14684_v8  ;;  %4158 = vst [vmem:[#allocation2 + $0x211] sm:$0xff] %v14685_v5  ;;  %v4186_v4 = vld [vmem:[#allocation2 + $0x18] sm:$0xff]  ;;  %v14846_v8 = vmax.f32 %v11950_v48, 0.0  ;;  %v14847_v5 = vmax.f32 %v11954_v61, 0.0  ;;  %v14856_v61 = vld [vmem:[#allocation10_spill] sm:$0xff] }
 0x571   :  { %4159 = vst [vmem:[#allocation2 + $0x219] sm:$0xff] %v14686_v36  ;;  %4160 = vst [vmem:[#allocation2 + $0x229] sm:$0xff] %v14842_v63  ;;  %v14848_v36 = vmax.f32 %v11958_v3, 0.0  ;;  %v14849_v63 = vmax.f32 %v11962_v56, 0.0  ;;  %v5210_v56 = vld [vmem:[#allocation2 + $0x4a] sm:$0xff]  ;;  %v4118_v48 = vmax.f32 %v12038_v51, 0.0 }
 0x572   :  { %4161 = vst [vmem:[#allocation2 + $0x231] sm:$0xff] %v14846_v8  ;;  %4162 = vst [vmem:[#allocation2 + $0x241] sm:$0xff] %v14847_v5  ;;  %v14851_v8 = vmax.f32 %v11966_v9, 0.0  ;;  %v14852_v5 = vmax.f32 %v11970_v24, 0.0  ;;  %v14855_v3 = vld [vmem:[#allocation9_spill] sm:$0xff]  ;;  %v4116_v9 = vmax.f32 %v14858_v37, 0.0 }
 0x573   :  { %4163 = vst [vmem:[#allocation2 + $0x249] sm:$0xff] %v14848_v36  ;;  %4164 = vst [vmem:[#allocation2 + $0x259] sm:$0xff] %v14849_v63  ;;  %v14853_v36 = vmax.f32 %v14841_v16, 0.0  ;;  %v14854_v63 = vmax.f32 %v11981_v46, 0.0  ;;  %v5212_v46 = vld [vmem:[#allocation2 + $0x62] sm:$0xff]  ;;  %v14864_v37 = vmax.f32 %v12001_v14, 0.0 }
 0x574   :  { %4165 = vst [vmem:[#allocation2 + $0x261] sm:$0xff] %v14851_v8  ;;  %4166 = vst [vmem:[#allocation2 + $0x271] sm:$0xff] %v14852_v5  ;;  %v14859_v8 = vmax.f32 %v14843_v40, 0.0  ;;  %v14860_v5 = vmax.f32 %v14844_v41, 0.0  ;;  %v14863_v16 = vld [vmem:[#allocation29_spill] sm:$0xff]  ;;  %v14870_v51 = vmax.f32 %v14855_v3, 0.0 }
 0x575   :  { %4167 = vst [vmem:[#allocation2 + $0x279] sm:$0xff] %v14853_v36  ;;  %4168 = vst [vmem:[#allocation2 + $0x289] sm:$0xff] %v14854_v63  ;;  %v14861_v36 = vmax.f32 %v14845_v39, 0.0  ;;  %v14862_v63 = vmax.f32 %v11997_v31, 0.0  ;;  %v4117_v43 = vmax.f32 %v14863_v16, 0.0  ;;  %v14869_v31 = vmax.f32 %v11790_v55, 0.0 }
 0x576   :  { %4169 = vst [vmem:[#allocation2 + $0x291] sm:$0xff] %v14859_v8  ;;  %4170 = vst [vmem:[#allocation2 + $0x2a1] sm:$0xff] %v14860_v5  ;;  %v14865_v8 = vmax.f32 %v12005_v27, 0.0  ;;  %v14866_v5 = vmax.f32 %v12009_v35, 0.0  ;;  %v12217_v16 = vpack.c.bf16 %v5209_v53, %v5208_v60  ;;  %v14874_v55 = vmax.f32 %v11798_v23, 0.0 }
 0x577   :  { %4171 = vst [vmem:[#allocation2 + $0x2a9] sm:$0xff] %v14861_v36  ;;  %4172 = vst [vmem:[#allocation2 + $0x2b9] sm:$0xff] %v14862_v63  ;;  %v14867_v36 = vmax.f32 %v14850_v34, 0.0  ;;  %v14868_v63 = vmax.f32 %v11786_v21, 0.0  ;;  %v14873_v21 = vmax.f32 %v11794_v57, 0.0  ;;  %v14875_v60 = vmax.f32 %v11802_v47, 0.0 }
 0x578   :  { %4173 = vst [vmem:[#allocation2 + $0x2c1] sm:$0xff] %v14864_v37  ;;  %4174 = vst [vmem:[#allocation2 + $0x2d1] sm:$0xff] %v14865_v8  ;;  %v14871_v37 = vmax.f32 %v14856_v61, 0.0  ;;  %v14872_v8 = vmax.f32 %v14857_v20, 0.0  ;;  %8578 = vmatprep.mubr.bf16.mxu0 %v12217_v16  ;;  %v14877_v57 = vmax.f32 %v14818_v50, 0.0  ;;  %v14878_v23 = vmax.f32 %v14819_v6, 0.0 }
 0x579   :  { %4175 = vst [vmem:[#allocation2 + $0x2d9] sm:$0xff] %v14866_v5  ;;  %4176 = vst [vmem:[#allocation2 + $0x2e9] sm:$0xff] %v14867_v36  ;;  %v4377_v39 = vpack.c.bf16 %v14869_v31, %v14868_v63  ;;  %v12225_v5 = vpack.c.bf16 %v4187_v32, %v4186_v4  ;;  %v12227_v36 = vpack.c.bf16 %v5211_v18, %v5210_v56  ;;  %v14879_v56 = vmax.f32 %v14820_v42, 0.0 }
 0x57a   :  { %4177 = vst [vmem:[#allocation2 + $0x2f1] sm:$0xff] %v14870_v51  ;;  %4178 = vst [vmem:[#allocation2 + $0x301] sm:$0xff] %v14871_v37  ;;  %v4378_v53 = vpack.c.bf16 %v14874_v55, %v14873_v21  ;;  %v12234_v31 = vpack.c.bf16 %v5213_v45, %v5212_v46  ;;  %v14880_v47 = vmax.f32 %v11822_v10, 0.0  ;;  %v5214_v45 = vld [vmem:[#allocation2 + $0x7a] sm:$0xff]  ;;  %v14881_v18 = vmax.f32 %v11826_v22, 0.0 }
 0x57b   :  { %4179 = vst [vmem:[#allocation2 + $0x309] sm:$0xff] %v14872_v8  ;;  %4180 = vst [vmem:[#allocation2 + $0x319] sm:$0xff] %v4116_v9  ;;  %6240 = vmatprep.mubr.bf16.mxu1 %v4377_v39  ;;  %v14876_v9 = vmax.f32 %v11806_v19, 0.0  ;;  %8579 = vmatmul.mubr.bf16.vlgmr.msra.gmra.mrb[128].mxu0 %v12227_v36  ;;  %v4189_v19 = vld [vmem:[#allocation2 + $0x38] sm:$0xff]  ;;  %v5215_v39 = vld [vmem:[#allocation2 + $0x82] sm:$0xff]  ;;  %v14882_v4 = vmax.f32 %v11830_v2, 0.0 }
 0x57c   :  { %4181 = vst [vmem:[#allocation2 + $0x321] sm:$0xff] %v4117_v43  ;;  %4182 = vst [vmem:[#allocation2 + $0x331] sm:$0xff] %v4118_v48  ;;  %6241 = vmatmul.mubr.bf16.gmra.mrb[68].mxu1 %v12225_v5  ;;  %8582 = vmatprep.mubr.bf16.mxu0 %v12234_v31  ;;  %v4380_v43 = vpack.c.bf16 %v14878_v23, %v14877_v57  ;;  %v4188_v48 = vld [vmem:[#allocation2 + $0x30] sm:$0xff]  ;;  %v12251_v46 = vpack.c.bf16 %v14880_v47, %v14879_v56  ;;  %v14883_v50 = vmax.f32 %v11834_v29, 0.0  ;;  %v5217_v21 = vld [vmem:[#allocation2 + $0x9a] sm:$0xff] }
 0x57d   :  { %v4379_v32 = vpack.c.bf16 %v14876_v9, %v14875_v60  ;;  %6248 = vmatprep.mubr.bf16.mxu1 %v4378_v53  ;;  %v12257_v63 = vpack.c.bf16 %v14882_v4, %v14881_v18  ;;  %v14884_v6 = vmax.f32 %v11838_v28, 0.0  ;;  %v14885_v42 = vmax.f32 %v11842_v44, 0.0  ;;  %v5216_v8 = vld [vmem:[#allocation2 + $0x92] sm:$0xff]  ;;  %v14909_v4 = vld [vmem:[#allocation16_spill] sm:$0xff] }
 0x57e   :  { %v14886_v10 = vmax.f32 %v11846_v12, 0.0  ;;  %v14887_v22 = vmax.f32 %v11850_v17, 0.0  ;;  %v14888_v2 = vmax.f32 %v11854_v7, 0.0  ;;  %v14889_v29 = vmax.f32 %v11858_v33, 0.0 }
 0x57f   :  { %v12263_v51 = vpack.c.bf16 %v14884_v6, %v14883_v50  ;;  %v14890_v28 = vmax.f32 %v11862_v54, 0.0  ;;  %v14891_v44 = vmax.f32 %v11866_v38, 0.0  ;;  %v14892_v12 = vmax.f32 %v11870_v52, 0.0  ;;  %v14911_v6 = vld [vmem:[#allocation18_spill] sm:$0xff] }
 0x580   :  { %v12269_v37 = vpack.c.bf16 %v14886_v10, %v14885_v42  ;;  %v12275_v55 = vpack.c.bf16 %v14888_v2, %v14887_v22  ;;  %v14893_v9 = vmax.f32 %v11874_v13, 0.0  ;;  %v14894_v17 = vmax.f32 %v11878_v26, 0.0  ;;  %v14917_v2 = vld [vmem:[#allocation21_spill] sm:$0xff] }
 0x581   :  { %v12281_v53 = vpack.c.bf16 %v14890_v28, %v14889_v29  ;;  %v12287_v60 = vpack.c.bf16 %v14892_v12, %v14891_v44  ;;  %v14895_v7 = vmax.f32 %v11882_v15, 0.0  ;;  %v14896_v33 = vmax.f32 %v11886_v62, 0.0  ;;  %v14919_v28 = vld [vmem:[#allocation17_spill] sm:$0xff] }
 0x582   :  { %v12293_v57 = vpack.c.bf16 %v14894_v17, %v14893_v9  ;;  %v12301_v54 = vpack.c.bf16 %v4189_v19, %v4188_v48  ;;  %v12303_v56 = vpack.c.bf16 %v5215_v39, %v5214_v45  ;;  %v14897_v38 = vmax.f32 %v11890_v1, 0.0  ;;  %v4191_v9 = vld [vmem:[#allocation2 + $0x50] sm:$0xff] }
 0x583   :  { %v12299_v23 = vpack.c.bf16 %v14896_v33, %v14895_v7  ;;  %v14898_v52 = vmax.f32 %v11894_v59, 0.0  ;;  %v14899_v13 = vmax.f32 %v11898_v30, 0.0  ;;  %v14900_v26 = vmax.f32 %v11902_v49, 0.0  ;;  %v14905_v49 = vld [vmem:[#allocation14_spill] sm:$0xff] }
 0x584   :  { %v12317_v15 = vpack.c.bf16 %v5217_v21, %v5216_v8  ;;  %v14901_v62 = vmax.f32 %v11914_v58, 0.0  ;;  %v14902_v48 = vmax.f32 %v11918_v11, 0.0  ;;  %6249 = vmatmul.mubr.bf16.gmra.mrb[72].mxu1 %v12301_v54  ;;  %8583 = vmatmul.mubr.bf16.gmra.mrb[132].mxu0 %v12303_v56  ;;  %v14903_v1 = vmax.f32 %v11922_v25, 0.0  ;;  %v14907_v58 = vld [vmem:[#allocation15_spill] sm:$0xff]  ;;  %v4190_v25 = vld [vmem:[#allocation2 + $0x48] sm:$0xff]  ;;  %v14915_v21 = vld [vmem:[#allocation20_spill] sm:$0xff] }
 0x585   :  { %v12309_v47 = vpack.c.bf16 %v14898_v52, %v14897_v38  ;;  %v12315_v18 = vpack.c.bf16 %v14900_v26, %v14899_v13  ;;  %v14904_v59 = vmax.f32 %v11926_v0, 0.0  ;;  %6256 = vmatprep.mubr.bf16.mxu1 %v4379_v32  ;;  %v14906_v45 = vmax.f32 %v14905_v49, 0.0  ;;  %v14913_v8 = vld [vmem:[#allocation19_spill] sm:$0xff]  ;;  %v5218_v17 = vld [vmem:[#allocation2 + $0xaa] sm:$0xff]  ;;  %v14928_v49 = vld [vmem:[#allocation4_spill] sm:$0xff] }
 0x586   :  { %v12323_v19 = vpack.c.bf16 %v14902_v48, %v14901_v62  ;;  %8586 = vmatprep.mubr.bf16.mxu0 %v12317_v15  ;;  %v14908_v39 = vmax.f32 %v14907_v58, 0.0  ;;  %v14910_v50 = vmax.f32 %v14909_v4, 0.0  ;;  %v14912_v42 = vmax.f32 %v14911_v6, 0.0  ;;  %v5219_v7 = vld [vmem:[#allocation2 + $0xb2] sm:$0xff]  ;;  %v14926_v48 = vld [vmem:[#allocation24_spill] sm:$0xff] }
 0x587   :  { %v12331_v30 = vpack.c.bf16 %v14904_v59, %v14903_v1  ;;  %v14914_v0 = vmax.f32 %v14913_v8, 0.0  ;;  %v14916_v22 = vmax.f32 %v14915_v21, 0.0  ;;  %v14918_v29 = vmax.f32 %v14917_v2, 0.0  ;;  %v14921_v33 = vld [vmem:[#allocation22_spill] sm:$0xff]  ;;  %v14923_v52 = vld [vmem:[#allocation23_spill] sm:$0xff]  ;;  %v5220_v4 = vld [vmem:[#allocation2 + $0xc2] sm:$0xff] }
 0x588   :  { %v12338_v11 = vpack.c.bf16 %v14908_v39, %v14906_v45  ;;  %v12344_v10 = vpack.c.bf16 %v14912_v42, %v14910_v50  ;;  %v14920_v44 = vmax.f32 %v14919_v28, 0.0  ;;  %v14922_v38 = vmax.f32 %v14921_v33, 0.0  ;;  %v5221_v50 = vld [vmem:[#allocation2 + $0xca] sm:$0xff]  ;;  %v14932_v42 = vld [vmem:[#allocation7_spill] sm:$0xff] }
 0x589   :  { %v12350_v32 = vpack.c.bf16 %v14916_v22, %v14914_v0  ;;  %v14924_v13 = vmax.f32 %v14923_v52, 0.0  ;;  %v14925_v62 = vmax.f32 %v11970_v24, 0.0  ;;  %v14927_v1 = vmax.f32 %v14926_v48, 0.0  ;;  %v14934_v21 = vld [vmem:[#allocation26_spill] sm:$0xff]  ;;  %v5223_v48 = vld [vmem:[#allocation2 + $0xe2] sm:$0xff] }
 0x58a   :  { %v12356_v12 = vpack.c.bf16 %v14920_v44, %v14918_v29  ;;  %v14929_v45 = vmax.f32 %v14928_v49, 0.0  ;;  %v14930_v58 = vmax.f32 %v14843_v40, 0.0  ;;  %v14931_v6 = vmax.f32 %v14844_v41, 0.0  ;;  %v5225_v49 = vld [vmem:[#allocation2 + $0xfa] sm:$0xff] }
 0x58b   :  { %v12362_v26 = vpack.c.bf16 %v14924_v13, %v14922_v38  ;;  %v12368_v59 = vpack.c.bf16 %v14927_v1, %v14925_v62  ;;  %v14933_v8 = vmax.f32 %v14932_v42, 0.0  ;;  %v14935_v24 = vmax.f32 %v14934_v21, 0.0  ;;  %v5224_v1 = vld [vmem:[#allocation2 + $0xf2] sm:$0xff]  ;;  %v5229_v42 = vld [vmem:[#allocation2 + $0x12a] sm:$0xff] }
 0x58c   :  { %v12374_v39 = vpack.c.bf16 %v14930_v58, %v14929_v45  ;;  %v14936_v22 = vmax.f32 %v12001_v14, 0.0  ;;  %v14937_v29 = vmax.f32 %v12005_v27, 0.0  ;;  %v14938_v40 = vmax.f32 %v12009_v35, 0.0  ;;  %v4193_v35 = vld [vmem:[#allocation2 + $0x68] sm:$0xff]  ;;  %v9534_v45 = vld [vmem:[%s14625_s2 + $0xd0] sm:$0xff]   ;;  %v4195_v58 = vld [vmem:[#allocation2 + $0x80] sm:$0xff] }
 0x58d   :  { %v12380_v0 = vpack.c.bf16 %v14933_v8, %v14931_v6  ;;  %v14939_v44 = vmax.f32 %v14850_v34, 0.0  ;;  %v14940_v41 = vmax.f32 %v14855_v3, 0.0  ;;  %v14941_v38 = vmax.f32 %v14856_v61, 0.0  ;;  %v4192_v34 = vld [vmem:[#allocation2 + $0x60] sm:$0xff] }
 0x58e   :  { %v12386_v2 = vpack.c.bf16 %v14936_v22, %v14935_v24  ;;  %v12392_v28 = vpack.c.bf16 %v14938_v40, %v14937_v29  ;;  %v14942_v52 = vmax.f32 %v14857_v20, 0.0  ;;  %v12406_v14 = vpack.c.bf16 %v4191_v9, %v4190_v25  ;;  %v5222_v3 = vld [vmem:[#allocation2 + $0xda] sm:$0xff]  ;;  %v9533_v9 = vld [vmem:[%s14625_s2 + $0xc8] sm:$0xff]  }
 0x58f   :  { %v12398_v33 = vpack.c.bf16 %v14940_v41, %v14939_v44  ;;  %v5277_v62 = vpack.c.bf16 %v5219_v7, %v5218_v17  ;;  %v5278_v27 = vpack.c.bf16 %v5221_v50, %v5220_v4  ;;  %v9532_v20 = vld [vmem:[%s14625_s2 + $0xc0] sm:$0xff]   ;;  %v12412_v61 = vpack.c.bf16 %v4193_v35, %v4192_v34  ;;  %v4194_v7 = vld [vmem:[#allocation2 + $0x78] sm:$0xff]  ;;  %v5226_v4 = vld [vmem:[#allocation2 + $0x10a] sm:$0xff] }
 0x590   :  { %v12404_v13 = vpack.c.bf16 %v14942_v52, %v14941_v38  ;;  %6257 = vmatmul.mubr.bf16.gmra.mrb[76].mxu1 %v12406_v14  ;;  %v5279_v25 = vpack.c.bf16 %v5223_v48, %v5222_v3  ;;  %v14943_v17 = vmov 0   ;;  %v5227_v50 = vld [vmem:[#allocation2 + $0x112] sm:$0xff]  ;;  %v5228_v6 = vld [vmem:[#allocation2 + $0x122] sm:$0xff]  ;;  %v12424_v8 = vpack.c.bf16 %v4195_v58, %v4194_v7  ;;  %v5230_v29 = vld [vmem:[#allocation2 + $0x13a] sm:$0xff] }
 0x591   :  { %8587 = vmatmul.mubr.bf16.gmra.mrb[136].mxu0 %v5277_v62  ;;  %6264 = vmatprep.mubr.bf16.mxu1 %v4380_v43  ;;  %v5280_v43 = vpack.c.bf16 %v5225_v49, %v5224_v1  ;;  %v5281_v21 = vpack.c.bf16 %v5227_v50, %v5226_v4  ;;  %v5282_v24 = vpack.c.bf16 %v5229_v42, %v5228_v6  ;;  %v4197_v22 = vld [vmem:[#allocation2 + $0x98] sm:$0xff]  ;;  %v5231_v40 = vld [vmem:[#allocation2 + $0x142] sm:$0xff]  ;;  %v4199_v34 = vld [vmem:[#allocation2 + $0xb0] sm:$0xff] }
 0x592   :  { %8590 = vmatprep.mubr.bf16.mxu0 %v5278_v27  ;;  %6506 = vmatpush1.bf16.msra.mxu1 %v9532_v20  ;;  %v5232_v44 = vld [vmem:[#allocation2 + $0x152] sm:$0xff]  ;;  %v5233_v41 = vld [vmem:[#allocation2 + $0x15a] sm:$0xff]  ;;  %v5283_v52 = vpack.c.bf16 %v5231_v40, %v5230_v29  ;;  %v4198_v27 = vld [vmem:[#allocation2 + $0xa8] sm:$0xff] }
 0x593   :  { %6507 = vmatprep.subr.bf16.mxu1 %v14943_v17  ;;  %v5284_v62 = vpack.c.bf16 %v5233_v41, %v5232_v44  ;;  %v5234_v35 = vld [vmem:[#allocation2 + $0x16a] sm:$0xff]  ;;  %v5235_v3 = vld [vmem:[#allocation2 + $0x172] sm:$0xff]  ;;  %v5236_v48 = vld [vmem:[#allocation2 + $0x182] sm:$0xff]  ;;  %v12437_v49 = vpack.c.bf16 %v4199_v34, %v4198_v27 }
 0x594   :  { %v5237_v1 = vld [vmem:[#allocation2 + $0x18a] sm:$0xff]  ;;  %v5285_v20 = vpack.c.bf16 %v5235_v3, %v5234_v35  ;;  %v5240_v58 = vld [vmem:[#allocation2 + $0x1e2] sm:$0xff]  ;;  %v4202_v42 = vld [vmem:[#allocation2 + $0xd8] sm:$0xff] }
 0x595   :  { %v4201_v7 = vld [vmem:[#allocation2 + $0xc8] sm:$0xff]  ;;  %v5245_v29 = vld [vmem:[#allocation2 + $0x21a] sm:$0xff] }
 0x596   :  { %6508 = vmatpush1.bf16.msra.mxu1 %v9533_v9  ;;  %v5239_v9 = vld [vmem:[#allocation2 + $0x1a2] sm:$0xff]  ;;  %v5241_v4 = vld [vmem:[#allocation2 + $0x1ea] sm:$0xff] }
 0x597   :  { %6509 = vmatprep.subr.bf16.mxu1 %v14943_v17  ;;  %v5288_v6 = vpack.c.bf16 %v5241_v4, %v5240_v58  ;;  %v5248_v27 = vld [vmem:[#allocation2 + $0x242] sm:$0xff]  ;;  %v5249_v34 = vld [vmem:[#allocation2 + $0x24a] sm:$0xff] }
 0x598   :  { %6265 = vmatmul.mubr.bf16.gmra.mrb[80].mxu1 %v12412_v61  ;;  %v4209_v4 = vld [vmem:[#allocation2 + $0x128] sm:$0xff] }
 0x599   :  { %8591 = vmatmul.mubr.bf16.gmra.mrb[140].mxu0 %v5279_v25  ;;  %6272 = vmatprep.mubr.bf16.mxu1 %v12251_v46  ;;  %v4196_v46 = vld [vmem:[#allocation2 + $0x90] sm:$0xff]  ;;  %v5286_v25 = vpack.c.bf16 %v5237_v1, %v5236_v48  ;;  %v5292_v48 = vpack.c.bf16 %v5249_v34, %v5248_v27  ;;  %v4206_v1 = vld [vmem:[#allocation2 + $0x108] sm:$0xff] }
 0x59a   :  { %8594 = vmatprep.mubr.bf16.mxu0 %v5280_v43  ;;  %6510 = vmatpush1.bf16.msra.mxu1 %v9534_v45  ;;  %v12429_v38 = vpack.c.bf16 %v4197_v22, %v4196_v46  ;;  %v4200_v43 = vld [vmem:[#allocation2 + $0xc0] sm:$0xff]  ;;  %v5244_v22 = vld [vmem:[#allocation2 + $0x212] sm:$0xff] }
 0x59b   :  { %6511 = vmatprep.subr.bf16.mxu1 %v14943_v17  ;;  %v12441_v50 = vpack.c.bf16 %v4201_v7, %v4200_v43  ;;  %v5243_v46 = vld [vmem:[#allocation2 + $0x202] sm:$0xff]  ;;  %v5290_v41 = vpack.c.bf16 %v5245_v29, %v5244_v22  ;;  %v5253_v43 = vld [vmem:[#allocation2 + $0x27a] sm:$0xff] }
 0x59c   :  { %v4210_v29 = vld [vmem:[#allocation2 + $0x138] sm:$0xff] }
 0x5a0   :  { %6273 = vmatmul.mubr.bf16.gmra.mrb[84].mxu1 %v12424_v8 }
 0x5a1   :  { %8595 = vmatmul.mubr.bf16.gmra.mrb[144].mxu0 %v5281_v21  ;;  %6280 = vmatprep.mubr.bf16.mxu1 %v12257_v63  ;;  %v9535_v63 = vld [vmem:[%s14625_s2 + $0xd8] sm:$0xff]   ;;  %v4203_v21 = vld [vmem:[#allocation2 + $0xe0] sm:$0xff] }
 0x5a2   :  { %8598 = vmatprep.mubr.bf16.mxu0 %v5282_v24  ;;  %6512 = vmatpush1.bf16.msra.mxu1 %v9535_v63  ;;  %v5242_v24 = vld [vmem:[#allocation2 + $0x1fa] sm:$0xff]  ;;  %v12449_v40 = vpack.c.bf16 %v4203_v21, %v4202_v42  ;;  %v5247_v63 = vld [vmem:[#allocation2 + $0x232] sm:$0xff]  ;;  %v5256_v42 = vld [vmem:[#allocation2 + $0x2a2] sm:$0xff] }
 0x5a3   :  { %6513 = vmatprep.subr.bf16.mxu1 %v14943_v17  ;;  %v5289_v44 = vpack.c.bf16 %v5243_v46, %v5242_v24  ;;  %v5257_v21 = vld [vmem:[#allocation2 + $0x2aa] sm:$0xff] }
 0x5a4   :  { %v5296_v22 = vpack.c.bf16 %v5257_v21, %v5256_v42  ;;  %v4220_v21 = vld [vmem:[#allocation2 + $0x1e0] sm:$0xff] }
 0x5a8   :  { %6281 = vmatmul.mubr.bf16.gmra.mrb[88].mxu1 %v12429_v38 }
 0x5a9   :  { %8599 = vmatmul.mubr.bf16.gmra.mrb[148].mxu0 %v5283_v52  ;;  %6288 = vmatprep.mubr.bf16.mxu1 %v12263_v51  ;;  %v5238_v51 = vld [vmem:[#allocation2 + $0x19a] sm:$0xff] }
 0x5aa   :  { %8602 = vmatprep.mubr.bf16.mxu0 %v5284_v62  ;;  %v5287_v45 = vpack.c.bf16 %v5239_v9, %v5238_v51  ;;  %v4205_v52 = vld [vmem:[#allocation2 + $0xf8] sm:$0xff]  ;;  %v5246_v62 = vld [vmem:[#allocation2 + $0x22a] sm:$0xff]  ;;  %v5251_v51 = vld [vmem:[#allocation2 + $0x262] sm:$0xff] }
 0x5ab   :  { %v5291_v3 = vpack.c.bf16 %v5247_v63, %v5246_v62  ;;  %v5252_v9 = vld [vmem:[#allocation2 + $0x272] sm:$0xff]  ;;  %v5261_v62 = vld [vmem:[#allocation2 + $0x2da] sm:$0xff] }
 0x5ac   :  { %v5294_v58 = vpack.c.bf16 %v5253_v43, %v5252_v9  ;;  %v4345_v9 = vld [vmem:[#allocation2 + $0x1b9] sm:$0xff]  ;;  %v4215_v43 = vld [vmem:[#allocation2 + $0x170] sm:$0xff] }
 0x5b0   :  { %6289 = vmatmul.mubr.bf16.gmra.mrb[92].mxu1 %v12437_v49 }
 0x5b1   :  { %8603 = vmatmul.mubr.bf16.gmra.mrb[152].mxu0 %v5285_v20  ;;  %6296 = vmatprep.mubr.bf16.mxu1 %v12269_v37  ;;  %v9536_v37 = vld [vmem:[%s14625_s2 + $0xe0] sm:$0xff]   ;;  %v4207_v20 = vld [vmem:[#allocation2 + $0x110] sm:$0xff] }
 0x5b2   :  { %8606 = vmatprep.mubr.bf16.mxu0 %v5286_v25  ;;  %6514 = vmatpush1.bf16.msra.mxu1 %v9536_v37  ;;  %v5250_v25 = vld [vmem:[#allocation2 + $0x25a] sm:$0xff]  ;;  %v12461_v7 = vpack.c.bf16 %v4207_v20, %v4206_v1  ;;  %v5255_v37 = vld [vmem:[#allocation2 + $0x292] sm:$0xff] }
 0x5b3   :  { %6515 = vmatprep.subr.bf16.mxu1 %v14943_v17 }
 0x5b8   :  { %6297 = vmatmul.mubr.bf16.gmra.mrb[96].mxu1 %v12441_v50 }
 0x5b9   :  { %8607 = vmatmul.mubr.bf16.gmra.mrb[156].mxu0 %v5287_v45  ;;  %6304 = vmatprep.mubr.bf16.mxu1 %v12275_v55  ;;  %v4204_v55 = vld [vmem:[#allocation2 + $0xf0] sm:$0xff]  ;;  %v5293_v45 = vpack.c.bf16 %v5251_v51, %v5250_v25  ;;  %v9539_v25 = vld [vmem:[%s14625_s2 + $0xf8] sm:$0xff]  }
 0x5ba   :  { %8610 = vmatprep.mubr.bf16.mxu0 %v5288_v6  ;;  %v12453_v35 = vpack.c.bf16 %v4205_v52, %v4204_v55  ;;  %v5254_v6 = vld [vmem:[#allocation2 + $0x28a] sm:$0xff]  ;;  %v5259_v55 = vld [vmem:[#allocation2 + $0x2c2] sm:$0xff]  ;;  %v5260_v52 = vld [vmem:[#allocation2 + $0x2d2] sm:$0xff] }
 0x5bb   :  { %v5295_v46 = vpack.c.bf16 %v5255_v37, %v5254_v6  ;;  %v5298_v34 = vpack.c.bf16 %v5261_v62, %v5260_v52  ;;  %v4344_v51 = vld [vmem:[#allocation2 + $0x1b1] sm:$0xff]  ;;  %v4218_v6 = vld [vmem:[#allocation2 + $0x1c8] sm:$0xff] }
 0x5bc   :  { %v4219_v37 = vld [vmem:[#allocation2 + $0x1d0] sm:$0xff] }
 0x5bd   :  { %v12489_v42 = vpack.c.bf16 %v4219_v37, %v4218_v6  ;;  %v4227_v52 = vld [vmem:[#allocation2 + $0x230] sm:$0xff]  ;;  %v4242_v37 = vld [vmem:[#allocation2 + $0x2e8] sm:$0xff] }
 0x5c0   :  { %6305 = vmatmul.mubr.bf16.gmra.mrb[100].mxu1 %v12449_v40 }
 0x5c1   :  { %8611 = vmatmul.mubr.bf16.gmra.mrb[160].mxu0 %v5289_v44  ;;  %6312 = vmatprep.mubr.bf16.mxu1 %v12281_v53  ;;  %v9537_v53 = vld [vmem:[%s14625_s2 + $0xe8] sm:$0xff]   ;;  %v4211_v44 = vld [vmem:[#allocation2 + $0x140] sm:$0xff] }
 0x5c2   :  { %8614 = vmatprep.mubr.bf16.mxu0 %v5290_v41  ;;  %6516 = vmatpush1.bf16.msra.mxu1 %v9537_v53  ;;  %v5258_v41 = vld [vmem:[#allocation2 + $0x2ba] sm:$0xff]  ;;  %v12473_v63 = vpack.c.bf16 %v4211_v44, %v4210_v29  ;;  %v5263_v53 = vld [vmem:[#allocation2 + $0x2f2] sm:$0xff] }
 0x5c3   :  { %6517 = vmatprep.subr.bf16.mxu1 %v14943_v17  ;;  %v5297_v27 = vpack.c.bf16 %v5259_v55, %v5258_v41  ;;  %v4223_v29 = vld [vmem:[#allocation2 + $0x200] sm:$0xff]  ;;  %v4225_v41 = vld [vmem:[#allocation2 + $0x218] sm:$0xff] }
 0x5c8   :  { %6313 = vmatmul.mubr.bf16.gmra.mrb[104].mxu1 %v12453_v35 }
 0x5c9   :  { %8615 = vmatmul.mubr.bf16.gmra.mrb[164].mxu0 %v5291_v3  ;;  %6320 = vmatprep.mubr.bf16.mxu1 %v12287_v60  ;;  %v4208_v60 = vld [vmem:[#allocation2 + $0x120] sm:$0xff]  ;;  %v4213_v3 = vld [vmem:[#allocation2 + $0x158] sm:$0xff] }
 0x5ca   :  { %8618 = vmatprep.mubr.bf16.mxu0 %v5292_v48  ;;  %v12465_v24 = vpack.c.bf16 %v4209_v4, %v4208_v60  ;;  %v5262_v48 = vld [vmem:[#allocation2 + $0x2ea] sm:$0xff] }
 0x5cb   :  { %v5299_v20 = vpack.c.bf16 %v5263_v53, %v5262_v48  ;;  %v4216_v60 = vld [vmem:[#allocation2 + $0x1b0] sm:$0xff]  ;;  %v9579_v4 = vld [vmem:[#allocation2 + $0x8] sm:$0xff]  ;;  %v4233_v48 = vld [vmem:[#allocation2 + $0x278] sm:$0xff] }
 0x5d0   :  { %6321 = vmatmul.mubr.bf16.gmra.mrb[108].mxu1 %v12461_v7 }
 0x5d1   :  { %8619 = vmatmul.mubr.bf16.gmra.mrb[168].mxu0 %v5293_v45  ;;  %6328 = vmatprep.mubr.bf16.mxu1 %v12293_v57  ;;  %v9538_v57 = vld [vmem:[%s14625_s2 + $0xf0] sm:$0xff]   ;;  %v4392_v45 = vpack.c.bf16 %v4345_v9, %v4344_v51  ;;  %v4237_v51 = vld [vmem:[#allocation2 + $0x2a8] sm:$0xff] }
 0x5d2   :  { %8622 = vmatprep.mubr.bf16.mxu0 %v5294_v58  ;;  %6518 = vmatpush1.bf16.msra.mxu1 %v9538_v57  ;;  %v4222_v57 = vld [vmem:[#allocation2 + $0x1f8] sm:$0xff] }
 0x5d3   :  { %6519 = vmatprep.subr.bf16.mxu1 %v14943_v17  ;;  %v12497_v44 = vpack.c.bf16 %v4223_v29, %v4222_v57 }
 0x5d6   :  { %6520 = vmatpush1.bf16.msra.mxu1 %v9539_v25 }
 0x5d7   :  { %6778 = vmatprep.subr.bf16.mxu1 %v14943_v17 }
 0x5d8   :  { %6329 = vmatmul.mubr.bf16.gmra.mrb[112].mxu1 %v12465_v24 }
 0x5d9   :  { %8623 = vmatmul.mubr.bf16.gmra.mrb[172].mxu0 %v5295_v46  ;;  %6336 = vmatprep.mubr.bf16.mxu1 %v12299_v23  ;;  %v4212_v23 = vld [vmem:[#allocation2 + $0x150] sm:$0xff]  ;;  %v4221_v46 = vld [vmem:[#allocation2 + $0x1e8] sm:$0xff] }
 0x5da   :  { %8626 = vmatprep.mubr.bf16.mxu0 %v5296_v22  ;;  %v12477_v1 = vpack.c.bf16 %v4213_v3, %v4212_v23  ;;  %v12493_v22 = vpack.c.bf16 %v4221_v46, %v4220_v21  ;;  %v4231_v23 = vld [vmem:[#allocation2 + $0x260] sm:$0xff] }
 0x5e0   :  { %6337 = vmatmul.mubr.bf16.gmra.mrb[116].mxu1 %v12473_v63 }
 0x5e1   :  { %8627 = vmatmul.mubr.bf16.gmra.mrb[176].mxu0 %v5297_v27  ;;  %6344 = vmatprep.mubr.bf16.mxu1 %v12309_v47  ;;  %v4214_v47 = vld [vmem:[#allocation2 + $0x168] sm:$0xff] }
 0x5e2   :  { %8630 = vmatprep.mubr.bf16.mxu0 %v5298_v34  ;;  %v12485_v58 = vpack.c.bf16 %v4215_v43, %v4214_v47  ;;  %v4229_v27 = vld [vmem:[#allocation2 + $0x248] sm:$0xff]  ;;  %v4239_v47 = vld [vmem:[#allocation2 + $0x2c0] sm:$0xff] }
 0x5e8   :  { %6345 = vmatmul.mubr.bf16.gmra.mrb[120].mxu1 %v12477_v1 }
 0x5e9   :  { %8631 = vmatmul.mubr.bf16.gmra.mrb[180].mxu0 %v5299_v20  ;;  %6352 = vmatprep.mubr.bf16.mxu1 %v12315_v18  ;;  %v4264_v18 = vpack.c.bf16 %v9579_v4, %v4216_v60  ;;  %v4235_v20 = vld [vmem:[#allocation2 + $0x290] sm:$0xff] }
 0x5f0   :  { %6353 = vmatmul.mubr.bf16.gmra.mrb[124].mxu1 %v12485_v58 }
 0x5f1   :  { %6360 = vmatprep.mubr.bf16.mxu1 %v4392_v45  ;;  %v4240_v45 = vld [vmem:[#allocation2 + $0x2d0] sm:$0xff] }
 0x5f8   :  { %6361 = vmatmul.mubr.bf16.gmra.mrb[128].mxu1 %v4264_v18 }
 0x5f9   :  { %6368 = vmatprep.mubr.bf16.mxu1 %v12323_v19  ;;  %v4224_v19 = vld [vmem:[#allocation2 + $0x210] sm:$0xff] }
 0x5fa   :  { %v12501_v55 = vpack.c.bf16 %v4225_v41, %v4224_v19  ;;  %v4244_v41 = vld [vmem:[#allocation2 + $0x300] sm:$0xff] }
 0x600   :  { %6369 = vmatmul.mubr.bf16.gmra.mrb[132].mxu1 %v12489_v42 }
 0x601   :  { %6376 = vmatprep.mubr.bf16.mxu1 %v12331_v30  ;;  %v4226_v30 = vld [vmem:[#allocation2 + $0x228] sm:$0xff] }
 0x602   :  { %v12505_v62 = vpack.c.bf16 %v4227_v52, %v4226_v30  ;;  %v4374_v52 = vld [vmem:[#allocation2 + $0x319] sm:$0xff] }
 0x608   :  { %6377 = vmatmul.mubr.bf16.gmra.mrb[136].mxu1 %v12493_v22 }
 0x609   :  { %6384 = vmatprep.mubr.bf16.mxu1 %v12338_v11  ;;  %v4228_v11 = vld [vmem:[#allocation2 + $0x240] sm:$0xff] }
 0x60a   :  { %v12509_v34 = vpack.c.bf16 %v4229_v27, %v4228_v11  ;;  %v4375_v11 = vld [vmem:[#allocation2 + $0x321] sm:$0xff] }
 0x610   :  { %6385 = vmatmul.mubr.bf16.gmra.mrb[140].mxu1 %v12497_v44 }
 0x611   :  { %6392 = vmatprep.mubr.bf16.mxu1 %v12344_v10  ;;  %v4230_v10 = vld [vmem:[#allocation2 + $0x258] sm:$0xff] }
 0x612   :  { %v12513_v3 = vpack.c.bf16 %v4231_v23, %v4230_v10 }
 0x618   :  { %6393 = vmatmul.mubr.bf16.gmra.mrb[144].mxu1 %v12501_v55 }
 0x619   :  { %6400 = vmatprep.mubr.bf16.mxu1 %v12350_v32  ;;  %v4232_v32 = vld [vmem:[#allocation2 + $0x270] sm:$0xff] }
 0x61a   :  { %v12517_v53 = vpack.c.bf16 %v4233_v48, %v4232_v32  ;;  %v4407_v32 = vpack.c.bf16 %v4375_v11, %v4374_v52 }
 0x620   :  { %6401 = vmatmul.mubr.bf16.gmra.mrb[148].mxu1 %v12505_v62 }
 0x621   :  { %6408 = vmatprep.mubr.bf16.mxu1 %v12356_v12  ;;  %v4234_v12 = vld [vmem:[#allocation2 + $0x288] sm:$0xff] }
 0x622   :  { %v12521_v25 = vpack.c.bf16 %v4235_v20, %v4234_v12  ;;  %v4247_v12 = vld [vmem:[#allocation2 + $0x320] sm:$0xff] }
 0x628   :  { %6409 = vmatmul.mubr.bf16.gmra.mrb[152].mxu1 %v12509_v34 }
 0x629   :  { %6416 = vmatprep.mubr.bf16.mxu1 %v12362_v26  ;;  %v4236_v26 = vld [vmem:[#allocation2 + $0x2a0] sm:$0xff] }
 0x62a   :  { %v12525_v9 = vpack.c.bf16 %v4237_v51, %v4236_v26 }
 0x630   :  { %6417 = vmatmul.mubr.bf16.gmra.mrb[156].mxu1 %v12513_v3 }
 0x631   :  { %6424 = vmatprep.mubr.bf16.mxu1 %v12368_v59  ;;  %v4238_v59 = vld [vmem:[#allocation2 + $0x2b8] sm:$0xff] }
 0x632   :  { %v12529_v43 = vpack.c.bf16 %v4239_v47, %v4238_v59  ;;  %v4440_v47 = vld [vmem:[#allocation2 + $0x2] sm:$0xff] }
 0x638   :  { %6425 = vmatmul.mubr.bf16.gmra.mrb[160].mxu1 %v12517_v53 }
 0x639   :  { %6432 = vmatprep.mubr.bf16.mxu1 %v12374_v39 }
 0x640   :  { %6433 = vmatmul.mubr.bf16.gmra.mrb[164].mxu1 %v12521_v25 }
 0x641   :  { %6440 = vmatprep.mubr.bf16.mxu1 %v12380_v0  ;;  %v4241_v0 = vld [vmem:[#allocation2 + $0x2d8] sm:$0xff] }
 0x642   :  { %v12541_v6 = vpack.c.bf16 %v4241_v0, %v4240_v45  ;;  %v4441_v45 = vld [vmem:[#allocation2 + $0xa] sm:$0xff] }
 0x648   :  { %6441 = vmatmul.mubr.bf16.gmra.mrb[168].mxu1 %v12525_v9 }
 0x649   :  { %6448 = vmatprep.mubr.bf16.mxu1 %v12386_v2 }
 0x64e   :  { %v12533_v39 = vpop.f32.mrb[128].mxu0 }
 0x64f   :  { %v12535_v60 = vpop.f32.mrb[129].mxu0 }
 0x650   :  { %6449 = vmatmul.mubr.bf16.gmra.mrb[172].mxu1 %v12529_v43  ;;  %v12537_v4 = vpop.f32.mrb[130].mxu0 }
 0x651   :  { %6456 = vmatprep.mubr.bf16.mxu1 %v12392_v28  ;;  %v12539_v18 = vpop.f32.mrb[131].mxu0  ;;  %v4243_v28 = vld [vmem:[#allocation2 + $0x2f0] sm:$0xff] }
 0x652   :  { %v12553_v29 = vpack.c.bf16 %v4243_v28, %v4242_v37  ;;  %v4504_v28 = vpack.c.bf16 %v4441_v45, %v4440_v47 }
 0x657   :  { %v12545_v2 = vpop.f32.mrb[132].mxu0 }
 0x658   :  { %6457 = vmatmul.mubr.bf16.gmra.mrb[176].mxu1 %v12541_v6  ;;  %v12547_v21 = vpop.f32.mrb[133].mxu0 }
 0x659   :  { %6464 = vmatprep.mubr.bf16.mxu1 %v12398_v33  ;;  %v12549_v46 = vpop.f32.mrb[134].mxu0  ;;  %v4245_v33 = vld [vmem:[#allocation2 + $0x308] sm:$0xff] }
 0x65a   :  { %v12551_v57 = vpop.f32.mrb[135].mxu0  ;;  %v12565_v23 = vpack.c.bf16 %v4245_v33, %v4244_v41  ;;  %v9540_v33 = vld [vmem:[%s14625_s2 + $0x100] sm:$0xff]  }
 0x660   :  { %6465 = vmatmul.mubr.bf16.gmra.mrb[180].mxu1 %v12553_v29 }
 0x661   :  { %6472 = vmatprep.mubr.bf16.mxu1 %v12404_v13  ;;  %v4246_v13 = vld [vmem:[#allocation2 + $0x318] sm:$0xff] }
 0x662   :  { %v12576_v59 = vpack.c.bf16 %v4247_v12, %v4246_v13  ;;  %v4443_v13 = vld [vmem:[#allocation2 + $0x22] sm:$0xff] }
 0x664   :  { %v12557_v19 = vpop.f32.mrb[136].mxu0 }
 0x665   :  { %v12559_v30 = vpop.f32.mrb[137].mxu0 }
 0x666   :  { %v12561_v27 = vpop.f32.mrb[138].mxu0 }
 0x667   :  { %v12563_v10 = vpop.f32.mrb[139].mxu0 }
 0x668   :  { %6473 = vmatmul.mubr.bf16.gmra.mrb[184].mxu1 %v12565_v23 }
 0x669   :  { %6480 = vmatprep.mubr.bf16.mxu1 %v4407_v32  ;;  %v4442_v32 = vld [vmem:[#allocation2 + $0x1a] sm:$0xff] }
 0x66c   :  { %v12568_v48 = vpop.f32.mrb[140].mxu0 }
 0x66d   :  { %v12570_v20 = vpop.f32.mrb[141].mxu0 }
 0x66e   :  { %v12572_v26 = vpop.f32.mrb[142].mxu0 }
 0x66f   :  { %v12574_v51 = vpop.f32.mrb[143].mxu0 }
 0x670   :  { %6481 = vmatmul.mubr.bf16.gmra.mrb[188].mxu1 %v12576_v59 }
 0x671   :  { %6521 = vmatprep.mubr.bf16.mxu1 %v12225_v5  ;;  %v9541_v5 = vld [vmem:[%s14625_s2 + $0x108] sm:$0xff]  }
 0x674   :  { %v12580_v0 = vpop.f32.mrb[144].mxu0 }
 0x675   :  { %v12582_v37 = vpop.f32.mrb[145].mxu0 }
 0x676   :  { %v12584_v41 = vpop.f32.mrb[146].mxu0 }
 0x677   :  { %v12589_v52 = vpop.f32.mrb[147].mxu0 }
 0x678   :  { %6522 = vmatmul.mubr.bf16.vlgmr.msra.gmra.mrb[64].mxu1 %v4504_v28  ;;  %v12607_v28 = vpack.c.bf16 %v4443_v13, %v4442_v32  ;;  %v9544_v32 = vld [vmem:[%s14625_s2 + $0x120] sm:$0xff]  }
 0x679   :  { %6529 = vmatprep.mubr.bf16.mxu1 %v12301_v54  ;;  %6779 = vmatpush1.bf16.msra.mxu1 %v9540_v33  ;;  %v9542_v54 = vld [vmem:[%s14625_s2 + $0x110] sm:$0xff]   ;;  %v9543_v33 = vld [vmem:[%s14625_s2 + $0x118] sm:$0xff]  }
 0x67a   :  { %6780 = vmatprep.subr.bf16.mxu1 %v14943_v17 }
 0x67c   :  { %v12596_v11 = vpop.f32.mrb[148].mxu0 }
 0x67d   :  { %14944 = vst [vmem:[#allocation11_spill] sm:$0xff] %v12596_v11  ;;  %v12598_v12 = vpop.f32.mrb[149].mxu0  ;;  %6781 = vmatpush1.bf16.msra.mxu1 %v9541_v5 }
 0x67e   :  { %v12600_v47 = vpop.f32.mrb[150].mxu0  ;;  %6782 = vmatprep.subr.bf16.mxu1 %v14943_v17 }
 0x67f   :  { %14945 = vst [vmem:[#allocation12_spill] sm:$0xff] %v12600_v47  ;;  %v12605_v45 = vpop.f32.mrb[151].mxu0 }
 0x680   :  { %6530 = vmatmul.mubr.bf16.gmra.mrb[68].mxu1 %v12607_v28 }
 0x681   :  { %6537 = vmatprep.mubr.bf16.mxu1 %v12406_v14  ;;  %6783 = vmatpush1.bf16.msra.mxu1 %v9542_v54  ;;  %v9545_v14 = vld [vmem:[%s14625_s2 + $0x128] sm:$0xff]  }
 0x682   :  { %6784 = vmatprep.subr.bf16.mxu1 %v14943_v17 }
 0x684   :  { %v12616_v5 = vpop.f32.mrb[152].mxu0 }
 0x685   :  { %14946 = vst [vmem:[#allocation13_spill] sm:$0xff] %v12616_v5  ;;  %v12618_v47 = vpop.f32.mrb[153].mxu0  ;;  %6785 = vmatpush1.bf16.msra.mxu1 %v9543_v33 }
 0x686   :  { %v12620_v11 = vpop.f32.mrb[154].mxu0  ;;  %6786 = vmatprep.subr.bf16.mxu1 %v14943_v17 }
 0x687   :  { %14947 = vst [vmem:[#allocation5_spill] sm:$0xff] %v12620_v11  ;;  %v12625_v13 = vpop.f32.mrb[155].mxu0 }
 0x688   :  { %14948 = vst [vmem:[#allocation6_spill] sm:$0xff] %v12625_v13  ;;  %6538 = vmatmul.mubr.bf16.gmra.mrb[72].mxu1 %v12217_v16  ;;  %v9546_v16 = vld [vmem:[%s14625_s2 + $0x130] sm:$0xff]  }
 0x689   :  { %6545 = vmatprep.mubr.bf16.mxu1 %v12412_v61  ;;  %6787 = vmatpush1.bf16.msra.mxu1 %v9544_v32  ;;  %v9547_v61 = vld [vmem:[%s14625_s2 + $0x138] sm:$0xff]  }
 0x68a   :  { %6788 = vmatprep.subr.bf16.mxu1 %v14943_v17 }
 0x68c   :  { %v12634_v54 = vpop.f32.mrb[156].mxu0 }
 0x68d   :  { %14949 = vst [vmem:[#allocation8_spill] sm:$0xff] %v12634_v54  ;;  %v12636_v33 = vpop.f32.mrb[157].mxu0  ;;  %6789 = vmatpush1.bf16.msra.mxu1 %v9545_v14 }
 0x68e   :  { %14950 = vst [vmem:[#allocation9_spill] sm:$0xff] %v12636_v33  ;;  %v12638_v11 = vpop.f32.mrb[158].mxu0  ;;  %6790 = vmatprep.subr.bf16.mxu1 %v14943_v17 }
 0x68f   :  { %14951 = vst [vmem:[#allocation10_spill] sm:$0xff] %v12638_v11  ;;  %v12643_v5 = vpop.f32.mrb[159].mxu0 }
 0x690   :  { %14952 = vst [vmem:[#allocation27_spill] sm:$0xff] %v12643_v5  ;;  %6546 = vmatmul.mubr.bf16.gmra.mrb[76].mxu1 %v12227_v36  ;;  %v9548_v36 = vld [vmem:[%s14625_s2 + $0x140] sm:$0xff]  }
 0x691   :  { %6553 = vmatprep.mubr.bf16.mxu1 %v12424_v8  ;;  %6791 = vmatpush1.bf16.msra.mxu1 %v9546_v16  ;;  %v9549_v8 = vld [vmem:[%s14625_s2 + $0x148] sm:$0xff]   ;;  %v4835_v5 = vld [vmem:[#allocation2 + $0x9a] sm:$0xff] }
 0x692   :  { %6792 = vmatprep.subr.bf16.mxu1 %v14943_v17 }
 0x694   :  { %v12652_v32 = vpop.f32.mrb[160].mxu0 }
 0x695   :  { %14953 = vst [vmem:[#allocation28_spill] sm:$0xff] %v12652_v32  ;;  %v12654_v14 = vpop.f32.mrb[161].mxu0  ;;  %6793 = vmatpush1.bf16.msra.mxu1 %v9547_v61 }
 0x696   :  { %14954 = vst [vmem:[#allocation29_spill] sm:$0xff] %v12654_v14  ;;  %v12656_v11 = vpop.f32.mrb[162].mxu0  ;;  %6794 = vmatprep.subr.bf16.mxu1 %v14943_v17  ;;  %v9558_v14 = vld [vmem:[%s14625_s2 + $0x190] sm:$0xff]  }
 0x697   :  { %14955 = vst [vmem:[#allocation14_spill] sm:$0xff] %v12656_v11  ;;  %v12661_v54 = vpop.f32.mrb[163].mxu0 }
 0x698   :  { %14956 = vst [vmem:[#allocation15_spill] sm:$0xff] %v12661_v54  ;;  %6554 = vmatmul.mubr.bf16.gmra.mrb[80].mxu1 %v12234_v31  ;;  %v9550_v31 = vld [vmem:[%s14625_s2 + $0x150] sm:$0xff]   ;;  %v4827_v54 = vld [vmem:[#allocation2 + $0x3a] sm:$0xff] }
 0x699   :  { %6561 = vmatprep.mubr.bf16.mxu1 %v12429_v38  ;;  %6795 = vmatpush1.bf16.msra.mxu1 %v9548_v36 }
 0x69a   :  { %6796 = vmatprep.subr.bf16.mxu1 %v14943_v17 }
 0x69c   :  { %v12670_v16 = vpop.f32.mrb[164].mxu0 }
 0x69d   :  { %14957 = vst [vmem:[#allocation16_spill] sm:$0xff] %v12670_v16  ;;  %v12672_v61 = vpop.f32.mrb[165].mxu0  ;;  %6797 = vmatpush1.bf16.msra.mxu1 %v9549_v8  ;;  %v4455_v16 = vld [vmem:[#allocation2 + $0xb2] sm:$0xff] }
 0x69e   :  { %14958 = vst [vmem:[#allocation18_spill] sm:$0xff] %v12672_v61  ;;  %v12674_v11 = vpop.f32.mrb[166].mxu0  ;;  %6798 = vmatprep.subr.bf16.mxu1 %v14943_v17 }
 0x69f   :  { %14959 = vst [vmem:[#allocation19_spill] sm:$0xff] %v12674_v11  ;;  %v12679_v32 = vpop.f32.mrb[167].mxu0 }
 0x6a0   :  { %14960 = vst [vmem:[#allocation20_spill] sm:$0xff] %v12679_v32  ;;  %6562 = vmatmul.mubr.bf16.gmra.mrb[84].mxu1 %v12303_v56  ;;  %v9551_v56 = vld [vmem:[%s14625_s2 + $0x158] sm:$0xff]  }
 0x6a1   :  { %6569 = vmatprep.mubr.bf16.mxu1 %v12437_v49  ;;  %6799 = vmatpush1.bf16.msra.mxu1 %v9550_v31  ;;  %v4454_v31 = vld [vmem:[#allocation2 + $0xaa] sm:$0xff] }
 0x6a2   :  { %6800 = vmatprep.subr.bf16.mxu1 %v14943_v17 }
 0x6a4   :  { %v12685_v38 = vpop.f32.mrb[168].mxu0 }
 0x6a5   :  { %14961 = vst [vmem:[#allocation21_spill] sm:$0xff] %v12685_v38  ;;  %v12687_v36 = vpop.f32.mrb[169].mxu0  ;;  %6801 = vmatpush1.bf16.msra.mxu1 %v9551_v56 }
 0x6a6   :  { %14962 = vst [vmem:[#allocation17_spill] sm:$0xff] %v12687_v36  ;;  %v12689_v8 = vpop.f32.mrb[170].mxu0  ;;  %6802 = vmatprep.subr.bf16.mxu1 %v14943_v17  ;;  %v4457_v36 = vld [vmem:[#allocation2 + $0xca] sm:$0xff] }
 0x6a7   :  { %14963 = vst [vmem:[#allocation22_spill] sm:$0xff] %v12689_v8  ;;  %v12691_v11 = vpop.f32.mrb[171].mxu0 }
 0x6a8   :  { %14964 = vst [vmem:[#allocation23_spill] sm:$0xff] %v12691_v11  ;;  %6570 = vmatmul.mubr.bf16.gmra.mrb[88].mxu1 %v12317_v15  ;;  %v12707_v15 = vpack.c.bf16 %v4455_v16, %v4454_v31  ;;  %v4458_v31 = vld [vmem:[#allocation2 + $0xda] sm:$0xff] }
 0x6a9   :  { %6577 = vmatprep.mubr.bf16.mxu1 %v12441_v50 }
 0x6ac   :  { %v12698_v49 = vpop.f32.mrb[172].mxu0 }
 0x6ad   :  { %14965 = vst [vmem:[#allocation24_spill] sm:$0xff] %v12698_v49  ;;  %v12700_v38 = vpop.f32.mrb[173].mxu0  ;;  %v4456_v49 = vld [vmem:[#allocation2 + $0xc2] sm:$0xff] }
 0x6ae   :  { %14966 = vst [vmem:[#allocation4_spill] sm:$0xff] %v12700_v38  ;;  %v12703_v8 = vpop.f32.mrb[174].mxu0  ;;  %v12719_v61 = vpack.c.bf16 %v4457_v36, %v4456_v49 }
 0x6af   :  { %14967 = vst [vmem:[#allocation7_spill] sm:$0xff] %v12703_v8  ;;  %v12705_v11 = vpop.f32.mrb[175].mxu0 }
 0x6b0   :  { %14968 = vst [vmem:[#allocation26_spill] sm:$0xff] %v12705_v11  ;;  %6578 = vmatmul.mubr.bf16.gmra.mrb[92].mxu1 %v12707_v15 }
 0x6b1   :  { %6585 = vmatprep.mubr.bf16.mxu1 %v12449_v40  ;;  %v9552_v40 = vld [vmem:[%s14625_s2 + $0x160] sm:$0xff]  }
 0x6b2   :  { %6803 = vmatpush1.bf16.msra.mxu1 %v9552_v40  ;;  %v9553_v40 = vld [vmem:[%s14625_s2 + $0x168] sm:$0xff]  }
 0x6b3   :  { %6804 = vmatprep.subr.bf16.mxu1 %v14943_v17 }
 0x6b4   :  { %v12711_v50 = vpop.f32.mrb[176].mxu0 }
 0x6b5   :  { %14969 = vst [vmem:[#allocation30_spill] sm:$0xff] %v12711_v50  ;;  %v12713_v32 = vpop.f32.mrb[177].mxu0  ;;  %v4459_v50 = vld [vmem:[#allocation2 + $0xe2] sm:$0xff] }
 0x6b6   :  { %14970 = vst [vmem:[#allocation31_spill] sm:$0xff] %v12713_v32  ;;  %v12715_v56 = vpop.f32.mrb[178].mxu0  ;;  %v12735_v49 = vpack.c.bf16 %v4459_v50, %v4458_v31  ;;  %6805 = vmatpush1.bf16.msra.mxu1 %v9553_v40  ;;  %v4467_v40 = vld [vmem:[#allocation2 + $0x142] sm:$0xff] }
 0x6b7   :  { %14971 = vst [vmem:[#allocation32_spill] sm:$0xff] %v12715_v56  ;;  %v12717_v38 = vpop.f32.mrb[179].mxu0  ;;  %6806 = vmatprep.subr.bf16.mxu1 %v14943_v17 }
 0x6b8   :  { %14972 = vst [vmem:[#allocation33_spill] sm:$0xff] %v12717_v38  ;;  %6586 = vmatmul.mubr.bf16.gmra.mrb[96].mxu1 %v12719_v61  ;;  %v4461_v38 = vld [vmem:[#allocation2 + $0xfa] sm:$0xff] }
 0x6b9   :  { %6593 = vmatprep.mubr.bf16.mxu1 %v12453_v35  ;;  %v4460_v35 = vld [vmem:[#allocation2 + $0xf2] sm:$0xff] }
 0x6bc   :  { %v12726_v16 = vpop.f32.mrb[180].mxu0 }
 0x6bd   :  { %14973 = vst [vmem:[#allocation34_spill] sm:$0xff] %v12726_v16  ;;  %v12728_v32 = vpop.f32.mrb[181].mxu0  ;;  %v12739_v16 = vpack.c.bf16 %v4461_v38, %v4460_v35  ;;  %v4465_v38 = vld [vmem:[#allocation2 + $0x12a] sm:$0xff]  ;;  %v4466_v35 = vld [vmem:[#allocation2 + $0x13a] sm:$0xff] }
 0x6be   :  { %14974 = vst [vmem:[#allocation35_spill] sm:$0xff] %v12728_v32  ;;  %v12731_v56 = vpop.f32.mrb[182].mxu0 }
 0x6bf   :  { %14975 = vst [vmem:[#allocation36_spill] sm:$0xff] %v12731_v56  ;;  %v12733_v36 = vpop.f32.mrb[183].mxu0  ;;  %v4462_v56 = vld [vmem:[#allocation2 + $0x10a] sm:$0xff] }
 0x6c0   :  { %14976 = vst [vmem:[#allocation37_spill] sm:$0xff] %v12733_v36  ;;  %6594 = vmatmul.mubr.bf16.gmra.mrb[100].mxu1 %v12735_v49  ;;  %v4463_v36 = vld [vmem:[#allocation2 + $0x112] sm:$0xff] }
 0x6c1   :  { %6601 = vmatprep.mubr.bf16.mxu1 %v12461_v7  ;;  %v12747_v50 = vpack.c.bf16 %v4463_v36, %v4462_v56  ;;  %v4464_v7 = vld [vmem:[#allocation2 + $0x122] sm:$0xff]  ;;  %v12759_v56 = vpack.c.bf16 %v4467_v40, %v4466_v35  ;;  %v4469_v36 = vld [vmem:[#allocation2 + $0x15a] sm:$0xff]  ;;  %v4470_v35 = vld [vmem:[#allocation2 + $0x16a] sm:$0xff] }
 0x6c2   :  { %v12751_v31 = vpack.c.bf16 %v4465_v38, %v4464_v7  ;;  %v4598_v7 = vld [vmem:[#allocation2 + $0x180] sm:$0xff]  ;;  %v4599_v38 = vld [vmem:[#allocation2 + $0x188] sm:$0xff]  ;;  %v4471_v40 = vld [vmem:[#allocation2 + $0x172] sm:$0xff] }
 0x6c3   :  { %v4647_v32 = vpack.c.bf16 %v4599_v38, %v4598_v7  ;;  %v4475_v38 = vld [vmem:[#allocation2 + $0x1d2] sm:$0xff] }
 0x6c8   :  { %6602 = vmatmul.mubr.bf16.gmra.mrb[104].mxu1 %v12739_v16 }
 0x6c9   :  { %6609 = vmatprep.mubr.bf16.mxu1 %v12465_v24  ;;  %v9554_v24 = vld [vmem:[%s14625_s2 + $0x170] sm:$0xff]  }
 0x6ca   :  { %6807 = vmatpush1.bf16.msra.mxu1 %v9554_v24  ;;  %v9555_v24 = vld [vmem:[%s14625_s2 + $0x178] sm:$0xff]  }
 0x6cb   :  { %6808 = vmatprep.subr.bf16.mxu1 %v14943_v17 }
 0x6ce   :  { %6809 = vmatpush1.bf16.msra.mxu1 %v9555_v24  ;;  %v4476_v24 = vld [vmem:[#allocation2 + $0x1e2] sm:$0xff] }
 0x6cf   :  { %7067 = vmatprep.subr.bf16.mxu1 %v14943_v17 }
 0x6d0   :  { %6610 = vmatmul.mubr.bf16.gmra.mrb[108].mxu1 %v12747_v50 }
 0x6d1   :  { %6617 = vmatprep.mubr.bf16.mxu1 %v12473_v63  ;;  %v4468_v63 = vld [vmem:[#allocation2 + $0x152] sm:$0xff] }
 0x6d8   :  { %6618 = vmatmul.mubr.bf16.gmra.mrb[112].mxu1 %v12751_v31 }
 0x6d9   :  { %6625 = vmatprep.mubr.bf16.mxu1 %v12477_v1  ;;  %v12763_v1 = vpack.c.bf16 %v4469_v36, %v4468_v63  ;;  %v4472_v63 = vld [vmem:[#allocation2 + $0x1b2] sm:$0xff]  ;;  %v4473_v36 = vld [vmem:[#allocation2 + $0x1ba] sm:$0xff] }
 0x6da   :  { %v4520_v7 = vpack.c.bf16 %v4473_v36, %v4472_v63  ;;  %v4479_v63 = vld [vmem:[#allocation2 + $0x202] sm:$0xff] }
 0x6e0   :  { %6626 = vmatmul.mubr.bf16.gmra.mrb[116].mxu1 %v12759_v56 }
 0x6e1   :  { %6633 = vmatprep.mubr.bf16.mxu1 %v12485_v58  ;;  %v12770_v58 = vpack.c.bf16 %v4471_v40, %v4470_v35  ;;  %v4477_v35 = vld [vmem:[#allocation2 + $0x1ea] sm:$0xff] }
 0x6e2   :  { %v12779_v40 = vpack.c.bf16 %v4477_v35, %v4476_v24  ;;  %v4485_v35 = vld [vmem:[#allocation2 + $0x24a] sm:$0xff] }
 0x6e8   :  { %6634 = vmatmul.mubr.bf16.gmra.mrb[120].mxu1 %v12763_v1 }
 0x6e9   :  { %6641 = vmatprep.mubr.bf16.mxu1 %v4647_v32  ;;  %v4474_v32 = vld [vmem:[#allocation2 + $0x1ca] sm:$0xff] }
 0x6ea   :  { %v12775_v8 = vpack.c.bf16 %v4475_v38, %v4474_v32  ;;  %v4483_v38 = vld [vmem:[#allocation2 + $0x232] sm:$0xff] }
 0x6f0   :  { %6642 = vmatmul.mubr.bf16.gmra.mrb[124].mxu1 %v12770_v58 }
 0x6f1   :  { %6649 = vmatprep.mubr.bf16.mxu1 %v12489_v42  ;;  %v4478_v42 = vld [vmem:[#allocation2 + $0x1fa] sm:$0xff] }
 0x6f2   :  { %v12783_v36 = vpack.c.bf16 %v4479_v63, %v4478_v42  ;;  %v4487_v63 = vld [vmem:[#allocation2 + $0x262] sm:$0xff] }
 0x6f8   :  { %6650 = vmatmul.mubr.bf16.gmra.mrb[128].mxu1 %v4520_v7  ;;  %v4481_v7 = vld [vmem:[#allocation2 + $0x21a] sm:$0xff] }
 0x6f9   :  { %6657 = vmatprep.mubr.bf16.mxu1 %v12493_v22  ;;  %v4480_v22 = vld [vmem:[#allocation2 + $0x212] sm:$0xff] }
 0x6fa   :  { %v12787_v32 = vpack.c.bf16 %v4481_v7, %v4480_v22  ;;  %v4489_v7 = vld [vmem:[#allocation2 + $0x27a] sm:$0xff] }
 0x700   :  { %6658 = vmatmul.mubr.bf16.gmra.mrb[132].mxu1 %v12775_v8 }
 0x701   :  { %6665 = vmatprep.mubr.bf16.mxu1 %v12497_v44  ;;  %v4482_v44 = vld [vmem:[#allocation2 + $0x22a] sm:$0xff] }
 0x702   :  { %v12791_v24 = vpack.c.bf16 %v4483_v38, %v4482_v44  ;;  %v4491_v38 = vld [vmem:[#allocation2 + $0x292] sm:$0xff] }
 0x708   :  { %6666 = vmatmul.mubr.bf16.gmra.mrb[136].mxu1 %v12779_v40 }
 0x709   :  { %6673 = vmatprep.mubr.bf16.mxu1 %v12501_v55  ;;  %v4484_v55 = vld [vmem:[#allocation2 + $0x242] sm:$0xff] }
 0x70a   :  { %v12795_v42 = vpack.c.bf16 %v4485_v35, %v4484_v55  ;;  %v4493_v35 = vld [vmem:[#allocation2 + $0x2aa] sm:$0xff] }
 0x710   :  { %6674 = vmatmul.mubr.bf16.gmra.mrb[140].mxu1 %v12783_v36 }
 0x711   :  { %6681 = vmatprep.mubr.bf16.mxu1 %v12505_v62  ;;  %v4486_v62 = vld [vmem:[#allocation2 + $0x25a] sm:$0xff] }
 0x712   :  { %v12799_v22 = vpack.c.bf16 %v4487_v63, %v4486_v62  ;;  %v4495_v63 = vld [vmem:[#allocation2 + $0x2c2] sm:$0xff] }
 0x718   :  { %6682 = vmatmul.mubr.bf16.gmra.mrb[144].mxu1 %v12787_v32 }
 0x719   :  { %6689 = vmatprep.mubr.bf16.mxu1 %v12509_v34  ;;  %v4488_v34 = vld [vmem:[#allocation2 + $0x272] sm:$0xff] }
 0x71a   :  { %v12803_v44 = vpack.c.bf16 %v4489_v7, %v4488_v34  ;;  %v4497_v7 = vld [vmem:[#allocation2 + $0x2da] sm:$0xff] }
 0x720   :  { %6690 = vmatmul.mubr.bf16.gmra.mrb[148].mxu1 %v12791_v24 }
 0x721   :  { %6697 = vmatprep.mubr.bf16.mxu1 %v12513_v3  ;;  %v4490_v3 = vld [vmem:[#allocation2 + $0x28a] sm:$0xff] }
 0x722   :  { %v12807_v55 = vpack.c.bf16 %v4491_v38, %v4490_v3  ;;  %v4499_v38 = vld [vmem:[#allocation2 + $0x2f2] sm:$0xff] }
 0x728   :  { %6698 = vmatmul.mubr.bf16.gmra.mrb[152].mxu1 %v12795_v42 }
 0x729   :  { %6705 = vmatprep.mubr.bf16.mxu1 %v12517_v53  ;;  %v4492_v53 = vld [vmem:[#allocation2 + $0x2a2] sm:$0xff] }
 0x72a   :  { %v12811_v62 = vpack.c.bf16 %v4493_v35, %v4492_v53  ;;  %v4501_v35 = vld [vmem:[#allocation2 + $0x30a] sm:$0xff] }
 0x730   :  { %6706 = vmatmul.mubr.bf16.gmra.mrb[156].mxu1 %v12799_v22 }
 0x731   :  { %6713 = vmatprep.mubr.bf16.mxu1 %v12521_v25  ;;  %v4494_v25 = vld [vmem:[#allocation2 + $0x2ba] sm:$0xff] }
 0x732   :  { %v12815_v34 = vpack.c.bf16 %v4495_v63, %v4494_v25  ;;  %v4630_v25 = vld [vmem:[#allocation2 + $0x330] sm:$0xff] }
 0x738   :  { %6714 = vmatmul.mubr.bf16.gmra.mrb[160].mxu1 %v12803_v44 }
 0x739   :  { %6721 = vmatprep.mubr.bf16.mxu1 %v12525_v9  ;;  %v4496_v9 = vld [vmem:[#allocation2 + $0x2d2] sm:$0xff] }
 0x73a   :  { %v12819_v3 = vpack.c.bf16 %v4497_v7, %v4496_v9  ;;  %v4502_v7 = vld [vmem:[#allocation2 + $0x31a] sm:$0xff] }
 0x740   :  { %6722 = vmatmul.mubr.bf16.gmra.mrb[164].mxu1 %v12807_v55 }
 0x741   :  { %6729 = vmatprep.mubr.bf16.mxu1 %v12529_v43  ;;  %v4498_v43 = vld [vmem:[#allocation2 + $0x2ea] sm:$0xff] }
 0x742   :  { %v12823_v53 = vpack.c.bf16 %v4499_v38, %v4498_v43  ;;  %v4696_v43 = vld [vmem:[#allocation2 + $0x19] sm:$0xff] }
 0x743   :  { %v4826_v38 = vld [vmem:[#allocation2 + $0x32] sm:$0xff] }
 0x748   :  { %6730 = vmatmul.mubr.bf16.gmra.mrb[168].mxu1 %v12811_v62 }
 0x749   :  { %6737 = vmatprep.mubr.bf16.mxu1 %v12541_v6  ;;  %v4500_v6 = vld [vmem:[#allocation2 + $0x302] sm:$0xff] }
 0x74a   :  { %v12827_v63 = vpack.c.bf16 %v4501_v35, %v4500_v6  ;;  %v9556_v6 = vld [vmem:[%s14625_s2 + $0x180] sm:$0xff]  }
 0x750   :  { %6738 = vmatmul.mubr.bf16.gmra.mrb[172].mxu1 %v12815_v34 }
 0x751   :  { %6745 = vmatprep.mubr.bf16.mxu1 %v12553_v29  ;;  %v4631_v29 = vld [vmem:[#allocation2 + $0x338] sm:$0xff] }
 0x752   :  { %v4663_v9 = vpack.c.bf16 %v4631_v29, %v4630_v25  ;;  %v4889_v25 = vpack.c.bf16 %v4827_v54, %v4826_v38  ;;  %v9557_v29 = vld [vmem:[%s14625_s2 + $0x188] sm:$0xff]  }
 0x753   :  { %v4700_v38 = vld [vmem:[#allocation2 + $0x49] sm:$0xff] }
 0x758   :  { %6746 = vmatmul.mubr.bf16.gmra.mrb[176].mxu1 %v12819_v3 }
 0x759   :  { %6753 = vmatprep.mubr.bf16.mxu1 %v12565_v23  ;;  %v4503_v23 = vld [vmem:[#allocation2 + $0x322] sm:$0xff] }
 0x75a   :  { %v12830_v11 = vpack.c.bf16 %v4503_v23, %v4502_v7  ;;  %v4828_v7 = vld [vmem:[#allocation2 + $0x4a] sm:$0xff]  ;;  %v4829_v23 = vld [vmem:[#allocation2 + $0x52] sm:$0xff] }
 0x75b   :  { %v4890_v54 = vpack.c.bf16 %v4829_v23, %v4828_v7  ;;  %v4702_v7 = vld [vmem:[#allocation2 + $0x61] sm:$0xff]  ;;  %v4703_v23 = vld [vmem:[#allocation2 + $0x69] sm:$0xff] }
 0x760   :  { %6754 = vmatmul.mubr.bf16.gmra.mrb[180].mxu1 %v12823_v53 }
 0x761   :  { %6761 = vmatprep.mubr.bf16.mxu1 %v12576_v59  ;;  %v4697_v59 = vld [vmem:[#allocation2 + $0x21] sm:$0xff] }
 0x762   :  { %v4760_v35 = vpack.c.bf16 %v4697_v59, %v4696_v43  ;;  %v9559_v59 = vld [vmem:[%s14625_s2 + $0x198] sm:$0xff]  }
 0x768   :  { %6762 = vmatmul.mubr.bf16.gmra.mrb[184].mxu1 %v12827_v63 }
 0x769   :  { %6769 = vmatprep.mubr.bf16.mxu1 %v4663_v9  ;;  %v4699_v9 = vld [vmem:[#allocation2 + $0x39] sm:$0xff] }
 0x770   :  { %6770 = vmatmul.mubr.bf16.gmra.mrb[188].mxu1 %v12830_v11 }
 0x771   :  { %6810 = vmatprep.mubr.bf16.mxu1 %v12607_v28  ;;  %v4698_v28 = vld [vmem:[#allocation2 + $0x31] sm:$0xff] }
 0x772   :  { %v12844_v43 = vpack.c.bf16 %v4699_v9, %v4698_v28  ;;  %v9561_v9 = vld [vmem:[%s14625_s2 + $0x1a8] sm:$0xff]  }
 0x778   :  { %6811 = vmatmul.mubr.bf16.vlgmr.msra.gmra.mrb[64].mxu1 %v4760_v35  ;;  %v4830_v35 = vld [vmem:[#allocation2 + $0x62] sm:$0xff] }
 0x779   :  { %6818 = vmatprep.mubr.bf16.mxu1 %v4889_v25  ;;  %7068 = vmatpush1.bf16.msra.mxu1 %v9556_v6  ;;  %v4701_v6 = vld [vmem:[#allocation2 + $0x51] sm:$0xff] }
 0x77a   :  { %7069 = vmatprep.subr.bf16.mxu1 %v14943_v17  ;;  %v4831_v25 = vld [vmem:[#allocation2 + $0x6a] sm:$0xff]  ;;  %v12855_v28 = vpack.c.bf16 %v4701_v6, %v4700_v38  ;;  %v12866_v6 = vpack.c.bf16 %v4703_v23, %v4702_v7  ;;  %v9564_v7 = vld [vmem:[%s14625_s2 + $0x1c0] sm:$0xff]  }
 0x77b   :  { %v9562_v38 = vld [vmem:[%s14625_s2 + $0x1b0] sm:$0xff]  }
 0x77d   :  { %7070 = vmatpush1.bf16.msra.mxu1 %v9557_v29  ;;  %v9560_v29 = vld [vmem:[%s14625_s2 + $0x1a0] sm:$0xff]  }
 0x77e   :  { %7071 = vmatprep.subr.bf16.mxu1 %v14943_v17 }
 0x780   :  { %6819 = vmatmul.mubr.bf16.gmra.mrb[68].mxu1 %v12844_v43 }
 0x781   :  { %6826 = vmatprep.mubr.bf16.mxu1 %v4890_v54  ;;  %7072 = vmatpush1.bf16.msra.mxu1 %v9558_v14  ;;  %v4891_v14 = vpack.c.bf16 %v4831_v25, %v4830_v35  ;;  %v4832_v54 = vld [vmem:[#allocation2 + $0x7a] sm:$0xff] }
 0x782   :  { %7073 = vmatprep.subr.bf16.mxu1 %v14943_v17  ;;  %v9563_v25 = vld [vmem:[%s14625_s2 + $0x1b8] sm:$0xff]  }
 0x785   :  { %7074 = vmatpush1.bf16.msra.mxu1 %v9559_v59  ;;  %v4833_v59 = vld [vmem:[#allocation2 + $0x82] sm:$0xff] }
 0x786   :  { %7075 = vmatprep.subr.bf16.mxu1 %v14943_v17  ;;  %v4892_v35 = vpack.c.bf16 %v4833_v59, %v4832_v54  ;;  %v9565_v59 = vld [vmem:[%s14625_s2 + $0x1c8] sm:$0xff]  }
 0x788   :  { %6827 = vmatmul.mubr.bf16.gmra.mrb[72].mxu1 %v12855_v28 }
 0x789   :  { %6834 = vmatprep.mubr.bf16.mxu1 %v4891_v14  ;;  %7076 = vmatpush1.bf16.msra.mxu1 %v9560_v29  ;;  %v4704_v29 = vld [vmem:[#allocation2 + $0x79] sm:$0xff]  ;;  %v4705_v14 = vld [vmem:[#allocation2 + $0x81] sm:$0xff] }
 0x78a   :  { %7077 = vmatprep.subr.bf16.mxu1 %v14943_v17  ;;  %v12877_v23 = vpack.c.bf16 %v4705_v14, %v4704_v29  ;;  %v4709_v14 = vld [vmem:[#allocation2 + $0xb1] sm:$0xff] }
 0x78d   :  { %7078 = vmatpush1.bf16.msra.mxu1 %v9561_v9  ;;  %v4834_v9 = vld [vmem:[#allocation2 + $0x92] sm:$0xff] }
 0x78e   :  { %7079 = vmatprep.subr.bf16.mxu1 %v14943_v17  ;;  %v4893_v54 = vpack.c.bf16 %v4835_v5, %v4834_v9  ;;  %v4708_v5 = vld [vmem:[#allocation2 + $0xa9] sm:$0xff] }
 0x78f   :  { %v12894_v9 = vpack.c.bf16 %v4709_v14, %v4708_v5  ;;  %v4714_v5 = vld [vmem:[#allocation2 + $0xf1] sm:$0xff]  ;;  %v4715_v14 = vld [vmem:[#allocation2 + $0xf9] sm:$0xff] }
 0x790   :  { %6835 = vmatmul.mubr.bf16.gmra.mrb[76].mxu1 %v12866_v6 }
 0x791   :  { %6842 = vmatprep.mubr.bf16.mxu1 %v4892_v35  ;;  %7080 = vmatpush1.bf16.msra.mxu1 %v9562_v38  ;;  %v4706_v38 = vld [vmem:[#allocation2 + $0x91] sm:$0xff]  ;;  %v4707_v35 = vld [vmem:[#allocation2 + $0x99] sm:$0xff] }
 0x792   :  { %7081 = vmatprep.subr.bf16.mxu1 %v14943_v17  ;;  %v12888_v29 = vpack.c.bf16 %v4707_v35, %v4706_v38  ;;  %v4712_v38 = vld [vmem:[#allocation2 + $0xd9] sm:$0xff]  ;;  %v4713_v35 = vld [vmem:[#allocation2 + $0xe1] sm:$0xff] }
 0x795   :  { %7082 = vmatpush1.bf16.msra.mxu1 %v9563_v25  ;;  %v9566_v25 = vld [vmem:[%s14625_s2 + $0x1d0] sm:$0xff]  }
 0x796   :  { %7083 = vmatprep.subr.bf16.mxu1 %v14943_v17 }
 0x798   :  { %6843 = vmatmul.mubr.bf16.gmra.mrb[80].mxu1 %v12877_v23 }
 0x799   :  { %6850 = vmatprep.mubr.bf16.mxu1 %v4893_v54  ;;  %7084 = vmatpush1.bf16.msra.mxu1 %v9564_v7  ;;  %v9567_v7 = vld [vmem:[%s14625_s2 + $0x1d8] sm:$0xff]   ;;  %v4710_v54 = vld [vmem:[#allocation2 + $0xc1] sm:$0xff] }
 0x79a   :  { %7085 = vmatprep.subr.bf16.mxu1 %v14943_v17 }
 0x79d   :  { %7086 = vmatpush1.bf16.msra.mxu1 %v9565_v59  ;;  %v4711_v59 = vld [vmem:[#allocation2 + $0xc9] sm:$0xff] }
 0x79e   :  { %7087 = vmatprep.subr.bf16.mxu1 %v14943_v17 }
 0x7a0   :  { %6851 = vmatmul.mubr.bf16.gmra.mrb[84].mxu1 %v12888_v29 }
 0x7a1   :  { %6858 = vmatprep.mubr.bf16.mxu1 %v12707_v15  ;;  %7088 = vmatpush1.bf16.msra.mxu1 %v9566_v25  ;;  %v12902_v15 = vpack.c.bf16 %v4711_v59, %v4710_v54  ;;  %v12906_v25 = vpack.c.bf16 %v4713_v35, %v4712_v38  ;;  %v4717_v54 = vld [vmem:[#allocation2 + $0x111] sm:$0xff]  ;;  %v4718_v38 = vld [vmem:[#allocation2 + $0x121] sm:$0xff]  ;;  %v4719_v35 = vld [vmem:[#allocation2 + $0x129] sm:$0xff] }
 0x7a2   :  { %7089 = vmatprep.subr.bf16.mxu1 %v14943_v17 }
 0x7a5   :  { %7090 = vmatpush1.bf16.msra.mxu1 %v9567_v7  ;;  %v12914_v7 = vpack.c.bf16 %v4715_v14, %v4714_v5  ;;  %v4721_v5 = vld [vmem:[#allocation2 + $0x141] sm:$0xff] }
 0x7a6   :  { %7091 = vmatprep.subr.bf16.mxu1 %v14943_v17 }
 0x7a8   :  { %6859 = vmatmul.mubr.bf16.gmra.mrb[88].mxu1 %v12894_v9 }
 0x7a9   :  { %6866 = vmatprep.mubr.bf16.mxu1 %v12719_v61  ;;  %v9568_v61 = vld [vmem:[%s14625_s2 + $0x1e0] sm:$0xff]  }
 0x7aa   :  { %7092 = vmatpush1.bf16.msra.mxu1 %v9568_v61  ;;  %v12926_v61 = vpack.c.bf16 %v4719_v35, %v4718_v38  ;;  %v4725_v38 = vld [vmem:[#allocation2 + $0x171] sm:$0xff]  ;;  %v4854_v35 = vld [vmem:[#allocation2 + $0x182] sm:$0xff] }
 0x7ab   :  { %7093 = vmatprep.subr.bf16.mxu1 %v14943_v17 }
 0x7b0   :  { %6867 = vmatmul.mubr.bf16.gmra.mrb[92].mxu1 %v12902_v15 }
 0x7b1   :  { %6874 = vmatprep.mubr.bf16.mxu1 %v12735_v49  ;;  %v4716_v49 = vld [vmem:[#allocation2 + $0x109] sm:$0xff] }
 0x7b2   :  { %v12918_v59 = vpack.c.bf16 %v4717_v54, %v4716_v49  ;;  %v4722_v49 = vld [vmem:[#allocation2 + $0x151] sm:$0xff]  ;;  %v4723_v54 = vld [vmem:[#allocation2 + $0x159] sm:$0xff] }
 0x7b8   :  { %6875 = vmatmul.mubr.bf16.gmra.mrb[96].mxu1 %v12906_v25 }
 0x7b9   :  { %6882 = vmatprep.mubr.bf16.mxu1 %v12739_v16  ;;  %v9569_v16 = vld [vmem:[%s14625_s2 + $0x1e8] sm:$0xff]  }
 0x7ba   :  { %7094 = vmatpush1.bf16.msra.mxu1 %v9569_v16  ;;  %v12938_v16 = vpack.c.bf16 %v4723_v54, %v4722_v49  ;;  %v4727_v49 = vld [vmem:[#allocation2 + $0x189] sm:$0xff] }
 0x7bb   :  { %7095 = vmatprep.subr.bf16.mxu1 %v14943_v17 }
 0x7c0   :  { %6883 = vmatmul.mubr.bf16.gmra.mrb[100].mxu1 %v12914_v7 }
 0x7c1   :  { %6890 = vmatprep.mubr.bf16.mxu1 %v12747_v50  ;;  %v4720_v50 = vld [vmem:[#allocation2 + $0x139] sm:$0xff] }
 0x7c2   :  { %v12930_v14 = vpack.c.bf16 %v4721_v5, %v4720_v50  ;;  %v4855_v50 = vld [vmem:[#allocation2 + $0x18a] sm:$0xff] }
 0x7c3   :  { %v4903_v5 = vpack.c.bf16 %v4855_v50, %v4854_v35  ;;  %v4730_v50 = vld [vmem:[#allocation2 + $0x1e1] sm:$0xff] }
 0x7c8   :  { %6891 = vmatmul.mubr.bf16.gmra.mrb[104].mxu1 %v12918_v59 }
 0x7c9   :  { %6898 = vmatprep.mubr.bf16.mxu1 %v12751_v31  ;;  %v9570_v31 = vld [vmem:[%s14625_s2 + $0x1f0] sm:$0xff]  }
 0x7ca   :  { %7096 = vmatpush1.bf16.msra.mxu1 %v9570_v31  ;;  %v4726_v31 = vld [vmem:[#allocation2 + $0x181] sm:$0xff] }
 0x7cb   :  { %7097 = vmatprep.subr.bf16.mxu1 %v14943_v17  ;;  %v9571_v17 = vld [vmem:[%s14625_s2 + $0x1f8] sm:$0xff]   ;;  %v12954_v54 = vpack.c.bf16 %v4727_v49, %v4726_v31  ;;  %v4733_v49 = vld [vmem:[#allocation2 + $0x201] sm:$0xff] }
 0x7cc   :  { %v4732_v31 = vld [vmem:[#allocation2 + $0x1f9] sm:$0xff] }
 0x7cd   :  { %v12963_v33 = vpack.c.bf16 %v4733_v49, %v4732_v31  ;;  %v4741_v49 = vld [vmem:[#allocation2 + $0x261] sm:$0xff] }
 0x7ce   :  { %7098 = vmatpush1.bf16.msra.mxu1 %v9571_v17 }
 0x7d0   :  { %6899 = vmatmul.mubr.bf16.gmra.mrb[108].mxu1 %v12926_v61 }
 0x7d1   :  { %6906 = vmatprep.mubr.bf16.mxu1 %v12759_v56  ;;  %v4724_v56 = vld [vmem:[#allocation2 + $0x169] sm:$0xff] }
 0x7d8   :  { %6907 = vmatmul.mubr.bf16.gmra.mrb[112].mxu1 %v12930_v14 }
 0x7d9   :  { %6914 = vmatprep.mubr.bf16.mxu1 %v12763_v1  ;;  %v12942_v1 = vpack.c.bf16 %v4725_v38, %v4724_v56  ;;  %v4728_v56 = vld [vmem:[#allocation2 + $0x1c9] sm:$0xff]  ;;  %v4729_v38 = vld [vmem:[#allocation2 + $0x1d1] sm:$0xff] }
 0x7da   :  { %v4776_v35 = vpack.c.bf16 %v4729_v38, %v4728_v56  ;;  %v4735_v56 = vld [vmem:[#allocation2 + $0x219] sm:$0xff] }
 0x7e0   :  { %6915 = vmatmul.mubr.bf16.gmra.mrb[116].mxu1 %v12938_v16 }
 0x7e1   :  { %6922 = vmatprep.mubr.bf16.mxu1 %v12770_v58  ;;  %v12951_v58 = vld [vmem:[%s14625_s2 + $0x200] sm:$0xff]  }
 0x7e2   :  { %8642 = vmatprep.subr.bf16.mxu1 %v12951_v58 }
 0x7e8   :  { %6923 = vmatmul.mubr.bf16.gmra.mrb[120].mxu1 %v12942_v1 }
 0x7e9   :  { %6930 = vmatprep.mubr.bf16.mxu1 %v4903_v5  ;;  %v4731_v5 = vld [vmem:[#allocation2 + $0x1e9] sm:$0xff] }
 0x7ea   :  { %v12959_v17 = vpack.c.bf16 %v4731_v5, %v4730_v50  ;;  %v4739_v5 = vld [vmem:[#allocation2 + $0x249] sm:$0xff] }
 0x7f0   :  { %6931 = vmatmul.mubr.bf16.gmra.mrb[124].mxu1 %v12954_v54 }
 0x7f1   :  { %6938 = vmatprep.mubr.bf16.mxu1 %v12775_v8  ;;  %v4734_v8 = vld [vmem:[#allocation2 + $0x211] sm:$0xff] }
 0x7f2   :  { %v12967_v38 = vpack.c.bf16 %v4735_v56, %v4734_v8  ;;  %v4743_v56 = vld [vmem:[#allocation2 + $0x279] sm:$0xff] }
 0x7f8   :  { %6939 = vmatmul.mubr.bf16.gmra.mrb[128].mxu1 %v4776_v35  ;;  %v4737_v35 = vld [vmem:[#allocation2 + $0x231] sm:$0xff] }
 0x7f9   :  { %6946 = vmatprep.mubr.bf16.mxu1 %v12779_v40  ;;  %v4736_v40 = vld [vmem:[#allocation2 + $0x229] sm:$0xff] }
 0x7fa   :  { %v12971_v50 = vpack.c.bf16 %v4737_v35, %v4736_v40  ;;  %v4745_v35 = vld [vmem:[#allocation2 + $0x291] sm:$0xff] }
 0x800   :  { %6947 = vmatmul.mubr.bf16.gmra.mrb[132].mxu1 %v12959_v17 }
 0x801   :  { %6954 = vmatprep.mubr.bf16.mxu1 %v12783_v36  ;;  %v4738_v36 = vld [vmem:[#allocation2 + $0x241] sm:$0xff] }
 0x802   :  { %v12975_v31 = vpack.c.bf16 %v4739_v5, %v4738_v36  ;;  %v4747_v5 = vld [vmem:[#allocation2 + $0x2a9] sm:$0xff] }
 0x808   :  { %6955 = vmatmul.mubr.bf16.gmra.mrb[136].mxu1 %v12963_v33 }
 0x809   :  { %6962 = vmatprep.mubr.bf16.mxu1 %v12787_v32  ;;  %v4740_v32 = vld [vmem:[#allocation2 + $0x259] sm:$0xff] }
 0x80a   :  { %v12979_v8 = vpack.c.bf16 %v4741_v49, %v4740_v32  ;;  %v4749_v49 = vld [vmem:[#allocation2 + $0x2c1] sm:$0xff] }
 0x810   :  { %6963 = vmatmul.mubr.bf16.gmra.mrb[140].mxu1 %v12967_v38 }
 0x811   :  { %6970 = vmatprep.mubr.bf16.mxu1 %v12791_v24  ;;  %v4742_v24 = vld [vmem:[#allocation2 + $0x271] sm:$0xff] }
 0x812   :  { %v12983_v40 = vpack.c.bf16 %v4743_v56, %v4742_v24  ;;  %v4751_v56 = vld [vmem:[#allocation2 + $0x2d9] sm:$0xff] }
 0x818   :  { %6971 = vmatmul.mubr.bf16.gmra.mrb[144].mxu1 %v12971_v50 }
 0x819   :  { %6978 = vmatprep.mubr.bf16.mxu1 %v12795_v42  ;;  %v4744_v42 = vld [vmem:[#allocation2 + $0x289] sm:$0xff] }
 0x81a   :  { %v12987_v36 = vpack.c.bf16 %v4745_v35, %v4744_v42  ;;  %v4753_v35 = vld [vmem:[#allocation2 + $0x2f1] sm:$0xff] }
 0x820   :  { %6979 = vmatmul.mubr.bf16.gmra.mrb[148].mxu1 %v12975_v31 }
 0x821   :  { %6986 = vmatprep.mubr.bf16.mxu1 %v12799_v22  ;;  %v4746_v22 = vld [vmem:[#allocation2 + $0x2a1] sm:$0xff] }
 0x822   :  { %v12991_v32 = vpack.c.bf16 %v4747_v5, %v4746_v22  ;;  %v4755_v5 = vld [vmem:[#allocation2 + $0x309] sm:$0xff] }
 0x828   :  { %6987 = vmatmul.mubr.bf16.gmra.mrb[152].mxu1 %v12979_v8 }
 0x829   :  { %6994 = vmatprep.mubr.bf16.mxu1 %v12803_v44  ;;  %v4748_v44 = vld [vmem:[#allocation2 + $0x2b9] sm:$0xff] }
 0x82a   :  { %v12995_v24 = vpack.c.bf16 %v4749_v49, %v4748_v44  ;;  %v4757_v49 = vld [vmem:[#allocation2 + $0x321] sm:$0xff] }
 0x830   :  { %6995 = vmatmul.mubr.bf16.gmra.mrb[156].mxu1 %v12983_v40 }
 0x831   :  { %7002 = vmatprep.mubr.bf16.mxu1 %v12807_v55  ;;  %v4750_v55 = vld [vmem:[#allocation2 + $0x2d1] sm:$0xff] }
 0x832   :  { %v12999_v42 = vpack.c.bf16 %v4751_v56, %v4750_v55  ;;  %v4886_v55 = vld [vmem:[#allocation2 + $0x332] sm:$0xff] }
 0x838   :  { %7003 = vmatmul.mubr.bf16.gmra.mrb[160].mxu1 %v12987_v36 }
 0x839   :  { %7010 = vmatprep.mubr.bf16.mxu1 %v12811_v62  ;;  %v4752_v62 = vld [vmem:[#allocation2 + $0x2e9] sm:$0xff] }
 0x83a   :  { %v13003_v22 = vpack.c.bf16 %v4753_v35, %v4752_v62  ;;  %v4759_v35 = vld [vmem:[#allocation2 + $0x339] sm:$0xff] }
 0x840   :  { %7011 = vmatmul.mubr.bf16.gmra.mrb[164].mxu1 %v12991_v32 }
 0x841   :  { %7018 = vmatprep.mubr.bf16.mxu1 %v12815_v34  ;;  %v4754_v34 = vld [vmem:[#allocation2 + $0x301] sm:$0xff] }
 0x842   :  { %v13007_v44 = vpack.c.bf16 %v4755_v5, %v4754_v34  ;;  %v4953_v5 = vld [vmem:[#allocation2 + $0x38] sm:$0xff] }
 0x848   :  { %7019 = vmatmul.mubr.bf16.gmra.mrb[168].mxu1 %v12995_v24 }
 0x849   :  { %7026 = vmatprep.mubr.bf16.mxu1 %v12819_v3  ;;  %v4756_v3 = vld [vmem:[#allocation2 + $0x319] sm:$0xff] }
 0x84a   :  { %v13011_v56 = vpack.c.bf16 %v4757_v49, %v4756_v3  ;;  %v9581_v3 = vld [vmem:[%s14625_s2 + $0x208] sm:$0xff]  }
 0x84b   :  { %v4954_v49 = vld [vmem:[#allocation2 + $0x48] sm:$0xff] }
 0x850   :  { %7027 = vmatmul.mubr.bf16.gmra.mrb[172].mxu1 %v12999_v42 }
 0x851   :  { %7034 = vmatprep.mubr.bf16.mxu1 %v12823_v53  ;;  %v4887_v53 = vld [vmem:[#allocation2 + $0x33a] sm:$0xff] }
 0x852   :  { %v13013_v62 = vpack.c.bf16 %v4887_v53, %v4886_v55  ;;  %v4955_v55 = vld [vmem:[#allocation2 + $0x50] sm:$0xff] }
 0x853   :  { %v5017_v53 = vpack.c.bf16 %v4955_v55, %v4954_v49  ;;  %v9586_v49 = vld [vmem:[%s14625_s2 + $0x230] sm:$0xff]  }
 0x854   :  { %v4960_v55 = vld [vmem:[#allocation2 + $0x90] sm:$0xff] }
 0x858   :  { %7035 = vmatmul.mubr.bf16.gmra.mrb[176].mxu1 %v13003_v22 }
 0x859   :  { %7042 = vmatprep.mubr.bf16.mxu1 %v12827_v63  ;;  %v4758_v63 = vld [vmem:[#allocation2 + $0x331] sm:$0xff] }
 0x85a   :  { %v13017_v34 = vpack.c.bf16 %v4759_v35, %v4758_v63  ;;  %v9584_v35 = vld [vmem:[%s14625_s2 + $0x220] sm:$0xff]  }
 0x860   :  { %7043 = vmatmul.mubr.bf16.gmra.mrb[180].mxu1 %v13007_v44 }
 0x861   :  { %7050 = vmatprep.mubr.bf16.mxu1 %v12830_v11  ;;  %v4952_v11 = vld [vmem:[#allocation2 + $0x30] sm:$0xff] }
 0x862   :  { %v5016_v13 = vpack.c.bf16 %v4953_v5, %v4952_v11  ;;  %v4958_v11 = vld [vmem:[#allocation2 + $0x78] sm:$0xff]  ;;  %v4959_v5 = vld [vmem:[#allocation2 + $0x80] sm:$0xff] }
 0x868   :  { %7051 = vmatmul.mubr.bf16.gmra.mrb[184].mxu1 %v13011_v56 }
 0x869   :  { %7058 = vmatprep.mubr.bf16.mxu1 %v13013_v62 }
 0x870   :  { %7059 = vmatmul.mubr.bf16.gmra.mrb[188].mxu1 %v13017_v34 }
 0x871   :  { %7099 = vmatprep.mubr.bf16.mxu1 %v12844_v43  ;;  %v9582_v43 = vld [vmem:[%s14625_s2 + $0x210] sm:$0xff]  }
 0x878   :  { %7100 = vmatmul.mubr.bf16.vlgmr.msra.gmra.mrb[64].mxu1 %v5016_v13  ;;  %v9583_v13 = vld [vmem:[%s14625_s2 + $0x218] sm:$0xff]  }
 0x879   :  { %7107 = vmatprep.mubr.bf16.mxu1 %v12855_v28  ;;  %8650 = vmatpush3.bf16.msra.mxu1 %v12951_v58  ;;  %v4956_v28 = vld [vmem:[#allocation2 + $0x60] sm:$0xff]  ;;  %v4957_v58 = vld [vmem:[#allocation2 + $0x68] sm:$0xff] }
 0x87a   :  { %8643 = vmatprep.subr.bf16.mxu1 %v9581_v3  ;;  %v5018_v63 = vpack.c.bf16 %v4957_v58, %v4956_v28  ;;  %v4963_v28 = vld [vmem:[#allocation2 + $0xb0] sm:$0xff] }
 0x87d   :  { %8651 = vmatpush3.bf16.msra.mxu1 %v9581_v3  ;;  %v5019_v3 = vpack.c.bf16 %v4959_v5, %v4958_v11  ;;  %v4967_v11 = vld [vmem:[#allocation2 + $0xe0] sm:$0xff] }
 0x87e   :  { %8644 = vmatprep.subr.bf16.mxu1 %v9582_v43 }
 0x880   :  { %7108 = vmatmul.mubr.bf16.gmra.mrb[68].mxu1 %v5017_v53  ;;  %v4961_v53 = vld [vmem:[#allocation2 + $0x98] sm:$0xff] }
 0x881   :  { %7115 = vmatprep.mubr.bf16.mxu1 %v12866_v6  ;;  %8652 = vmatpush3.bf16.msra.mxu1 %v9582_v43  ;;  %v9585_v6 = vld [vmem:[%s14625_s2 + $0x228] sm:$0xff]   ;;  %v5020_v43 = vpack.c.bf16 %v4961_v53, %v4960_v55  ;;  %v4972_v53 = vld [vmem:[#allocation2 + $0x120] sm:$0xff] }
 0x882   :  { %8645 = vmatprep.subr.bf16.mxu1 %v9583_v13 }
 0x885   :  { %8653 = vmatpush3.bf16.msra.mxu1 %v9583_v13  ;;  %v4962_v13 = vld [vmem:[#allocation2 + $0xa8] sm:$0xff] }
 0x886   :  { %8646 = vmatprep.subr.bf16.mxu1 %v9584_v35  ;;  %v5021_v58 = vpack.c.bf16 %v4963_v28, %v4962_v13  ;;  %v4974_v13 = vld [vmem:[#allocation2 + $0x138] sm:$0xff] }
 0x888   :  { %7116 = vmatmul.mubr.bf16.gmra.mrb[72].mxu1 %v5018_v63  ;;  %v4965_v63 = vld [vmem:[#allocation2 + $0xc8] sm:$0xff] }
 0x889   :  { %7123 = vmatprep.mubr.bf16.mxu1 %v12877_v23  ;;  %8654 = vmatpush3.bf16.msra.mxu1 %v9584_v35  ;;  %v9587_v23 = vld [vmem:[%s14625_s2 + $0x238] sm:$0xff]  }
 0x88a   :  { %8647 = vmatprep.subr.bf16.mxu1 %v9585_v6 }
 0x88d   :  { %8655 = vmatpush3.bf16.msra.mxu1 %v9585_v6  ;;  %v4966_v6 = vld [vmem:[#allocation2 + $0xd8] sm:$0xff] }
 0x88e   :  { %8648 = vmatprep.subr.bf16.mxu1 %v9586_v49  ;;  %v5023_v5 = vpack.c.bf16 %v4967_v11, %v4966_v6  ;;  %v5110_v6 = vld [vmem:[#allocation2 + $0x199] sm:$0xff] }
 0x88f   :  { %v4980_v11 = vld [vmem:[#allocation2 + $0x180] sm:$0xff] }
 0x890   :  { %7124 = vmatmul.mubr.bf16.gmra.mrb[76].mxu1 %v5019_v3  ;;  %v4968_v3 = vld [vmem:[#allocation2 + $0xf0] sm:$0xff] }
 0x891   :  { %7131 = vmatprep.mubr.bf16.mxu1 %v12888_v29  ;;  %8656 = vmatpush3.bf16.msra.mxu1 %v9586_v49  ;;  %v4964_v29 = vld [vmem:[#allocation2 + $0xc0] sm:$0xff] }
 0x892   :  { %8649 = vmatprep.subr.bf16.mxu1 %v9587_v23  ;;  %v5022_v35 = vpack.c.bf16 %v4965_v63, %v4964_v29  ;;  %v4978_v63 = vld [vmem:[#allocation2 + $0x168] sm:$0xff] }
 0x895   :  { %8657 = vmatpush3.bf16.msra.mxu1 %v9587_v23  ;;  %v4970_v23 = vld [vmem:[#allocation2 + $0x108] sm:$0xff] }
 0x898   :  { %7132 = vmatmul.mubr.bf16.gmra.mrb[80].mxu1 %v5020_v43 }
 0x899   :  { %7139 = vmatprep.mubr.bf16.mxu1 %v12894_v9  ;;  %v4969_v9 = vld [vmem:[#allocation2 + $0xf8] sm:$0xff] }
 0x89a   :  { %v5024_v49 = vpack.c.bf16 %v4969_v9, %v4968_v3 }
 0x8a0   :  { %7140 = vmatmul.mubr.bf16.gmra.mrb[84].mxu1 %v5021_v58  ;;  %v4976_v58 = vld [vmem:[#allocation2 + $0x150] sm:$0xff] }
 0x8a1   :  { %7147 = vmatprep.mubr.bf16.mxu1 %v12902_v15  ;;  %v4971_v15 = vld [vmem:[#allocation2 + $0x110] sm:$0xff] }
 0x8a2   :  { %v5025_v55 = vpack.c.bf16 %v4971_v15, %v4970_v23  ;;  %v4985_v15 = vld [vmem:[#allocation2 + $0x1e8] sm:$0xff] }
 0x8a8   :  { %7148 = vmatmul.mubr.bf16.gmra.mrb[88].mxu1 %v5022_v35 }
 0x8a9   :  { %7155 = vmatprep.mubr.bf16.mxu1 %v12906_v25  ;;  %v4973_v25 = vld [vmem:[#allocation2 + $0x128] sm:$0xff] }
 0x8aa   :  { %v5026_v43 = vpack.c.bf16 %v4973_v25, %v4972_v53  ;;  %v4987_v53 = vld [vmem:[#allocation2 + $0x200] sm:$0xff] }
 0x8b0   :  { %7156 = vmatmul.mubr.bf16.gmra.mrb[92].mxu1 %v5023_v5  ;;  %v4981_v5 = vld [vmem:[#allocation2 + $0x188] sm:$0xff] }
 0x8b1   :  { %7163 = vmatprep.mubr.bf16.mxu1 %v12914_v7  ;;  %v4975_v7 = vld [vmem:[#allocation2 + $0x140] sm:$0xff]  ;;  %v5030_v9 = vpack.c.bf16 %v4981_v5, %v4980_v11 }
 0x8b2   :  { %v5027_v28 = vpack.c.bf16 %v4975_v7, %v4974_v13  ;;  %v4989_v13 = vld [vmem:[#allocation2 + $0x218] sm:$0xff]  ;;  %v5000_v5 = vld [vmem:[#allocation2 + $0x2a0] sm:$0xff] }
 0x8b8   :  { %7164 = vmatmul.mubr.bf16.gmra.mrb[96].mxu1 %v5024_v49  ;;  %v13057_v49 = vld [vmem:[#allocation2 + $0x8] sm:$0xff] }
 0x8b9   :  { %7171 = vmatprep.mubr.bf16.mxu1 %v12918_v59  ;;  %v4977_v59 = vld [vmem:[#allocation2 + $0x158] sm:$0xff] }
 0x8ba   :  { %v5028_v29 = vpack.c.bf16 %v4977_v59, %v4976_v58  ;;  %v4992_v59 = vld [vmem:[#allocation2 + $0x240] sm:$0xff] }
 0x8c0   :  { %7172 = vmatmul.mubr.bf16.gmra.mrb[100].mxu1 %v5025_v55 }
 0x8c1   :  { %7179 = vmatprep.mubr.bf16.mxu1 %v12926_v61  ;;  %v4979_v61 = vld [vmem:[#allocation2 + $0x170] sm:$0xff] }
 0x8c2   :  { %v5029_v35 = vpack.c.bf16 %v4979_v61, %v4978_v63  ;;  %v4994_v63 = vld [vmem:[#allocation2 + $0x258] sm:$0xff] }
 0x8c8   :  { %7180 = vmatmul.mubr.bf16.gmra.mrb[104].mxu1 %v5026_v43  ;;  %v4988_v43 = vld [vmem:[#allocation2 + $0x210] sm:$0xff] }
 0x8c9   :  { %7187 = vmatprep.mubr.bf16.mxu1 %v12930_v14  ;;  %v5111_v14 = vld [vmem:[#allocation2 + $0x1a1] sm:$0xff]  ;;  %v5034_v7 = vpack.c.bf16 %v4989_v13, %v4988_v43 }
 0x8ca   :  { %v5159_v3 = vpack.c.bf16 %v5111_v14, %v5110_v6  ;;  %v4998_v14 = vld [vmem:[#allocation2 + $0x288] sm:$0xff] }
 0x8d0   :  { %7188 = vmatmul.mubr.bf16.gmra.mrb[108].mxu1 %v5027_v28  ;;  %v4990_v28 = vld [vmem:[#allocation2 + $0x228] sm:$0xff] }
 0x8d1   :  { %7195 = vmatprep.mubr.bf16.mxu1 %v12938_v16  ;;  %v4982_v16 = vld [vmem:[#allocation2 + $0x198] sm:$0xff] }
 0x8d2   :  { %v5031_v23 = vpack.c.bf16 %v13057_v49, %v4982_v16 }
 0x8d8   :  { %7196 = vmatmul.mubr.bf16.gmra.mrb[112].mxu1 %v5028_v29 }
 0x8d9   :  { %7203 = vmatprep.mubr.bf16.mxu1 %v12942_v1  ;;  %v4984_v1 = vld [vmem:[#allocation2 + $0x1e0] sm:$0xff] }
 0x8da   :  { %v5032_v55 = vpack.c.bf16 %v4985_v15, %v4984_v1 }
 0x8e0   :  { %7204 = vmatmul.mubr.bf16.gmra.mrb[116].mxu1 %v5029_v35  ;;  %v4996_v35 = vld [vmem:[#allocation2 + $0x270] sm:$0xff] }
 0x8e1   :  { %7211 = vmatprep.mubr.bf16.mxu1 %v12954_v54  ;;  %v4986_v54 = vld [vmem:[#allocation2 + $0x1f8] sm:$0xff] }
 0x8e2   :  { %v5033_v25 = vpack.c.bf16 %v4987_v53, %v4986_v54 }
 0x8e8   :  { %7212 = vmatmul.mubr.bf16.gmra.mrb[120].mxu1 %v5030_v9  ;;  %v5002_v9 = vld [vmem:[#allocation2 + $0x2b8] sm:$0xff] }
 0x8e9   :  { %7219 = vmatprep.mubr.bf16.mxu1 %v5159_v3 }
 0x8f0   :  { %7220 = vmatmul.mubr.bf16.gmra.mrb[124].mxu1 %v5031_v23  ;;  %v5004_v23 = vld [vmem:[#allocation2 + $0x2d0] sm:$0xff] }
 0x8f1   :  { %7227 = vmatprep.mubr.bf16.mxu1 %v12959_v17  ;;  %v4991_v17 = vld [vmem:[#allocation2 + $0x230] sm:$0xff] }
 0x8f2   :  { %v5035_v58 = vpack.c.bf16 %v4991_v17, %v4990_v28  ;;  %v5009_v28 = vld [vmem:[#allocation2 + $0x308] sm:$0xff] }
 0x8f8   :  { %7228 = vmatmul.mubr.bf16.gmra.mrb[128].mxu1 %v5032_v55  ;;  %v5007_v55 = vld [vmem:[#allocation2 + $0x2f0] sm:$0xff] }
 0x8f9   :  { %7235 = vmatprep.mubr.bf16.mxu1 %v12963_v33  ;;  %v4993_v33 = vld [vmem:[#allocation2 + $0x248] sm:$0xff] }
 0x8fa   :  { %v5036_v29 = vpack.c.bf16 %v4993_v33, %v4992_v59 }
 0x900   :  { %7236 = vmatmul.mubr.bf16.gmra.mrb[132].mxu1 %v5033_v25 }
 0x901   :  { %7243 = vmatprep.mubr.bf16.mxu1 %v12967_v38  ;;  %v4995_v38 = vld [vmem:[#allocation2 + $0x260] sm:$0xff] }
 0x902   :  { %v5037_v61 = vpack.c.bf16 %v4995_v38, %v4994_v63  ;;  %v5011_v63 = vld [vmem:[#allocation2 + $0x320] sm:$0xff] }
 0x908   :  { %7244 = vmatmul.mubr.bf16.gmra.mrb[136].mxu1 %v5034_v7  ;;  %v5008_v7 = vld [vmem:[#allocation2 + $0x300] sm:$0xff] }
 0x909   :  { %7251 = vmatprep.mubr.bf16.mxu1 %v12971_v50  ;;  %v4997_v50 = vld [vmem:[#allocation2 + $0x278] sm:$0xff]  ;;  %v5044_v33 = vpack.c.bf16 %v5009_v28, %v5008_v7 }
 0x90a   :  { %v5038_v6 = vpack.c.bf16 %v4997_v50, %v4996_v35 }
 0x910   :  { %7252 = vmatmul.mubr.bf16.gmra.mrb[140].mxu1 %v5035_v58 }
 0x911   :  { %7259 = vmatprep.mubr.bf16.mxu1 %v12975_v31  ;;  %v4999_v31 = vld [vmem:[#allocation2 + $0x290] sm:$0xff] }
 0x912   :  { %v5039_v11 = vpack.c.bf16 %v4999_v31, %v4998_v14  ;;  %v5013_v31 = vld [vmem:[#allocation2 + $0x338] sm:$0xff] }
 0x918   :  { %7260 = vmatmul.mubr.bf16.gmra.mrb[144].mxu1 %v5036_v29  ;;  %v5010_v29 = vld [vmem:[#allocation2 + $0x318] sm:$0xff] }
 0x919   :  { %7267 = vmatprep.mubr.bf16.mxu1 %v12979_v8  ;;  %v5001_v8 = vld [vmem:[#allocation2 + $0x2a8] sm:$0xff]  ;;  %v5045_v50 = vpack.c.bf16 %v5011_v63, %v5010_v29 }
 0x91a   :  { %v5040_v3 = vpack.c.bf16 %v5001_v8, %v5000_v5 }
 0x920   :  { %7268 = vmatmul.mubr.bf16.gmra.mrb[148].mxu1 %v5037_v61 }
 0x921   :  { %7275 = vmatprep.mubr.bf16.mxu1 %v12983_v40  ;;  %v5003_v40 = vld [vmem:[#allocation2 + $0x2c0] sm:$0xff] }
 0x922   :  { %v5041_v16 = vpack.c.bf16 %v5003_v40, %v5002_v9  ;;  %v5014_v40 = vld [vmem:[#allocation2 + $0x348] sm:$0xff] }
 0x928   :  { %7276 = vmatmul.mubr.bf16.gmra.mrb[152].mxu1 %v5038_v6  ;;  %v5143_v6 = vld [vmem:[#allocation2 + $0x351] sm:$0xff] }
 0x929   :  { %7283 = vmatprep.mubr.bf16.mxu1 %v12987_v36  ;;  %v5005_v36 = vld [vmem:[#allocation2 + $0x2d8] sm:$0xff] }
 0x92a   :  { %v5042_v1 = vpack.c.bf16 %v5005_v36, %v5004_v23  ;;  %v5047_v36 = vpack.c.bf16 %v13057_v49, %v5014_v40 }
 0x930   :  { %7284 = vmatmul.mubr.bf16.gmra.mrb[156].mxu1 %v5039_v11 }
 0x931   :  { %7291 = vmatprep.mubr.bf16.mxu1 %v12991_v32  ;;  %v5006_v32 = vld [vmem:[#allocation2 + $0x2e8] sm:$0xff] }
 0x932   :  { %v5043_v13 = vpack.c.bf16 %v5007_v55, %v5006_v32 }
 0x938   :  { %7292 = vmatmul.mubr.bf16.gmra.mrb[160].mxu1 %v5040_v3 }
 0x939   :  { %7299 = vmatprep.mubr.bf16.mxu1 %v12995_v24 }
 0x940   :  { %7300 = vmatmul.mubr.bf16.gmra.mrb[164].mxu1 %v5041_v16 }
 0x941   :  { %7307 = vmatprep.mubr.bf16.mxu1 %v12999_v42 }
 0x948   :  { %7308 = vmatmul.mubr.bf16.gmra.mrb[168].mxu1 %v5042_v1  ;;  %v5265_v1 = vld [vmem:[#allocation2 + $0x30a] sm:$0xff] }
 0x949   :  { %7315 = vmatprep.mubr.bf16.mxu1 %v13003_v22 }
 0x94b   :  { %v7101_v15 = vpop.f32.mrb[64].mxu1 }
 0x94c   :  { %v13073_v54 = vadd.f32 %v12535_v60, %v7101_v15  ;;  %v7103_v53 = vpop.f32.mrb[65].mxu1 }
 0x94d   :  { %v7104_v24 = vpop.f32.mrb[66].mxu1 }
 0x94e   :  { %v13076_v25 = vadd.f32 %v12539_v18, %v7104_v24  ;;  %v7106_v43 = vpop.f32.mrb[67].mxu1  ;;  %v5266_v24 = vld [vmem:[#allocation2 + $0x31a] sm:$0xff] }
 0x94f   :  { %v5267_v43 = vld [vmem:[#allocation2 + $0x322] sm:$0xff] }
 0x950   :  { %7316 = vmatmul.mubr.bf16.gmra.mrb[172].mxu1 %v5043_v13  ;;  %v5301_v28 = vpack.c.bf16 %v5267_v43, %v5266_v24 }
 0x951   :  { %7323 = vmatprep.mubr.bf16.mxu1 %v13007_v44 }
 0x953   :  { %v7109_v42 = vpop.f32.mrb[68].mxu1 }
 0x954   :  { %v13080_v22 = vadd.f32 %v12533_v39, %v7109_v42  ;;  %v7111_v17 = vpop.f32.mrb[69].mxu1 }
 0x955   :  { %v7112_v58 = vpop.f32.mrb[70].mxu1  ;;  %v5271_v17 = vld [vmem:[#allocation2 + $0x352] sm:$0xff] }
 0x956   :  { %v13083_v60 = vadd.f32 %v12537_v4, %v7112_v58  ;;  %v7114_v59 = vpop.f32.mrb[71].mxu1  ;;  %v5142_v4 = vld [vmem:[#allocation2 + $0x349] sm:$0xff] }
 0x957   :  { %v5175_v8 = vpack.c.bf16 %v5143_v6, %v5142_v4 }
 0x958   :  { %7324 = vmatmul.mubr.bf16.gmra.mrb[176].mxu1 %v5044_v33 }
 0x959   :  { %7331 = vmatprep.mubr.bf16.mxu1 %v13011_v56  ;;  %v5012_v56 = vld [vmem:[#allocation2 + $0x330] sm:$0xff] }
 0x95a   :  { %v5046_v9 = vpack.c.bf16 %v5013_v31, %v5012_v56 }
 0x95b   :  { %v7117_v18 = vpop.f32.mrb[72].mxu1 }
 0x95c   :  { %v13087_v44 = vadd.f32 %v12547_v21, %v7117_v18  ;;  %v7119_v38 = vpop.f32.mrb[73].mxu1 }
 0x95d   :  { %v7120_v61 = vpop.f32.mrb[74].mxu1 }
 0x95e   :  { %v13090_v39 = vadd.f32 %v12551_v57, %v7120_v61  ;;  %v7122_v35 = vpop.f32.mrb[75].mxu1 }
 0x960   :  { %7332 = vmatmul.mubr.bf16.gmra.mrb[180].mxu1 %v5045_v50 }
 0x961   :  { %7339 = vmatprep.mubr.bf16.mxu1 %v13017_v34 }
 0x963   :  { %v7125_v14 = vpop.f32.mrb[76].mxu1 }
 0x964   :  { %v13094_v11 = vadd.f32 %v12545_v2, %v7125_v14  ;;  %v7127_v21 = vpop.f32.mrb[77].mxu1  ;;  %v5264_v2 = vld [vmem:[#allocation2 + $0x302] sm:$0xff] }
 0x965   :  { %v7128_v5 = vpop.f32.mrb[78].mxu1  ;;  %v5300_v55 = vpack.c.bf16 %v5265_v1, %v5264_v2 }
 0x966   :  { %v13097_v3 = vadd.f32 %v12549_v46, %v7128_v5  ;;  %v7130_v57 = vpop.f32.mrb[79].mxu1 }
 0x968   :  { %7340 = vmatmul.mubr.bf16.gmra.mrb[184].mxu1 %v5046_v9 }
 0x969   :  { %7347 = vmatprep.mubr.bf16.mxu1 %v5175_v8 }
 0x96b   :  { %v7133_v34 = vpop.f32.mrb[80].mxu1 }
 0x96c   :  { %v13100_v16 = vadd.f32 %v12559_v30, %v7133_v34  ;;  %v7135_v23 = vpop.f32.mrb[81].mxu1 }
 0x96d   :  { %v7136_v15 = vpop.f32.mrb[82].mxu1 }
 0x96e   :  { %v13104_v32 = vadd.f32 %v12563_v10, %v7136_v15  ;;  %v7138_v46 = vpop.f32.mrb[83].mxu1  ;;  %v5270_v10 = vld [vmem:[#allocation2 + $0x34a] sm:$0xff]  ;;  %v14978_v15 = vld [vmem:[#allocation12_spill] sm:$0xff] }
 0x96f   :  { %v5303_v18 = vpack.c.bf16 %v5271_v17, %v5270_v10  ;;  %v14979_v10 = vld [vmem:[#allocation6_spill] sm:$0xff] }
 0x970   :  { %7348 = vmatmul.mubr.bf16.gmra.mrb[188].mxu1 %v5047_v36  ;;  %v14977_v36 = vld [vmem:[#allocation11_spill] sm:$0xff] }
 0x971   :  { %8634 = vmatprep.mubr.bf16.mxu1 %v5300_v55  ;;  %v7716_v55 = vmul.f32 %v13073_v54, %v13073_v54 }
 0x973   :  { %v7141_v53 = vpop.f32.mrb[84].mxu1 }
 0x974   :  { %v13107_v13 = vadd.f32 %v12557_v19, %v7141_v53  ;;  %v7143_v30 = vpop.f32.mrb[85].mxu1  ;;  %v7718_v53 = vmul.f32 %v13080_v22, %v13080_v22 }
 0x975   :  { %v7144_v42 = vpop.f32.mrb[86].mxu1 }
 0x976   :  { %v13110_v49 = vadd.f32 %v12561_v27, %v7144_v42  ;;  %v7146_v7 = vpop.f32.mrb[87].mxu1 }
 0x978   :  { %8635 = vmatmul.mubr.bf16.vlgmr.msra.gmra.mrb[192].mxu1 %v5301_v28 }
 0x979   :  { %8638 = vmatprep.mubr.bf16.mxu1 %v13013_v62 }
 0x97b   :  { %v7149_v58 = vpop.f32.mrb[88].mxu1 }
 0x97c   :  { %v13114_v59 = vadd.f32 %v12570_v20, %v7149_v58  ;;  %v7151_v33 = vpop.f32.mrb[89].mxu1 }
 0x97d   :  { %v7152_v19 = vpop.f32.mrb[90].mxu1 }
 0x97e   :  { %v13117_v29 = vadd.f32 %v12574_v51, %v7152_v19  ;;  %v7154_v63 = vpop.f32.mrb[91].mxu1 }
 0x97f   :  { %v7720_v63 = vmul.f32 %v13087_v44, %v13087_v44 }
 0x980   :  { %8639 = vmatmul.mubr.bf16.gmra.mrb[196].mxu1 %v5303_v18  ;;  %v7719_v18 = vmul.f32 %v13083_v60, %v13083_v60 }
 0x983   :  { %v7157_v27 = vpop.f32.mrb[92].mxu1 }
 0x984   :  { %v13120_v38 = vadd.f32 %v12568_v48, %v7157_v27  ;;  %v7159_v61 = vpop.f32.mrb[93].mxu1 }
 0x985   :  { %v7160_v62 = vpop.f32.mrb[94].mxu1 }
 0x986   :  { %v13123_v35 = vadd.f32 %v12572_v26, %v7160_v62  ;;  %v7162_v50 = vpop.f32.mrb[95].mxu1  ;;  %v14980_v62 = vld [vmem:[#allocation13_spill] sm:$0xff] }
 0x98b   :  { %v7165_v20 = vpop.f32.mrb[96].mxu1 }
 0x98c   :  { %v13126_v4 = vadd.f32 %v12582_v37, %v7165_v20  ;;  %v7167_v6 = vpop.f32.mrb[97].mxu1 }
 0x98d   :  { %v7168_v14 = vpop.f32.mrb[98].mxu1 }
 0x98e   :  { %v13129_v51 = vadd.f32 %v12589_v52, %v7168_v14  ;;  %v7170_v56 = vpop.f32.mrb[99].mxu1  ;;  %v7721_v14 = vmul.f32 %v13090_v39, %v13090_v39 }
 0x993   :  { %v7173_v31 = vpop.f32.mrb[100].mxu1 }
 0x994   :  { %v13132_v48 = vadd.f32 %v12580_v0, %v7173_v31  ;;  %v7175_v21 = vpop.f32.mrb[101].mxu1  ;;  %v14981_v31 = vld [vmem:[#allocation5_spill] sm:$0xff] }
 0x995   :  { %v7176_v5 = vpop.f32.mrb[102].mxu1 }
 0x996   :  { %v13135_v26 = vadd.f32 %v12584_v41, %v7176_v5  ;;  %v7178_v8 = vpop.f32.mrb[103].mxu1 }
 0x99b   :  { %v7181_v57 = vpop.f32.mrb[104].mxu1 }
 0x99c   :  { %v13138_v37 = vadd.f32 %v12598_v12, %v7181_v57  ;;  %v7183_v9 = vpop.f32.mrb[105].mxu1  ;;  %v7717_v12 = vmul.f32 %v13076_v25, %v13076_v25  ;;  %v7722_v57 = vmul.f32 %v13094_v11, %v13094_v11 }
 0x99d   :  { %v7184_v40 = vpop.f32.mrb[106].mxu1 }
 0x99e   :  { %v13141_v52 = vadd.f32 %v12605_v45, %v7184_v40  ;;  %v7186_v34 = vpop.f32.mrb[107].mxu1  ;;  %v7647_v45 = vadd.f32 %v13076_v25, %v13073_v54  ;;  %v7780_v42 = vadd.f32 %v7717_v12, %v7716_v55  ;;  %v7724_v12 = vmul.f32 %v13100_v16, %v13100_v16 }
 0x9a0   :  { %v7648_v7 = vadd.f32 %v7647_v45, %v13080_v22  ;;  %v7781_v33 = vadd.f32 %v7780_v42, %v7718_v53  ;;  %v14983_v45 = vld [vmem:[#allocation27_spill] sm:$0xff] }
 0x9a2   :  { %v7649_v19 = vadd.f32 %v7648_v7, %v13083_v60 }
 0x9a3   :  { %v7189_v23 = vpop.f32.mrb[108].mxu1 }
 0x9a4   :  { %v13144_v0 = vadd.f32 %v14977_v36, %v7189_v23  ;;  %v7191_v2 = vpop.f32.mrb[109].mxu1  ;;  %v7650_v27 = vadd.f32 %v7649_v19, %v13087_v44  ;;  %v7723_v23 = vmul.f32 %v13097_v3, %v13097_v3 }
 0x9a5   :  { %v7192_v1 = vpop.f32.mrb[110].mxu1  ;;  %v14982_v2 = vld [vmem:[#allocation9_spill] sm:$0xff] }
 0x9a6   :  { %v13147_v41 = vadd.f32 %v14978_v15, %v7192_v1  ;;  %v7194_v46 = vpop.f32.mrb[111].mxu1  ;;  %v7651_v8 = vadd.f32 %v7650_v27, %v13090_v39 }
 0x9a8   :  { %v7652_v40 = vadd.f32 %v7651_v8, %v13094_v11 }
 0x9aa   :  { %v7653_v46 = vadd.f32 %v7652_v40, %v13097_v3  ;;  %v14987_v40 = vld [vmem:[#allocation29_spill] sm:$0xff] }
 0x9ab   :  { %v7197_v24 = vpop.f32.mrb[112].mxu1 }
 0x9ac   :  { %v13158_v43 = vadd.f32 %v12618_v47, %v7197_v24  ;;  %v7199_v30 = vpop.f32.mrb[113].mxu1  ;;  %v7782_v47 = vadd.f32 %v7781_v33, %v7719_v18  ;;  %v7654_v42 = vadd.f32 %v7653_v46, %v13100_v16  ;;  %v14984_v18 = vld [vmem:[#allocation8_spill] sm:$0xff]  ;;  %v14988_v46 = vld [vmem:[#allocation15_spill] sm:$0xff] }
 0x9ad   :  { %v7200_v28 = vpop.f32.mrb[114].mxu1 }
 0x9ae   :  { %v13162_v17 = vadd.f32 %v14979_v10, %v7200_v28  ;;  %v7202_v58 = vpop.f32.mrb[115].mxu1  ;;  %v7783_v6 = vadd.f32 %v7782_v47, %v7720_v63  ;;  %v7725_v28 = vmul.f32 %v13104_v32, %v13104_v32  ;;  %v7655_v10 = vadd.f32 %v7654_v42, %v13104_v32 }
 0x9af   :  { %v7726_v58 = vmul.f32 %v13107_v13, %v13107_v13 }
 0x9b0   :  { %v7784_v9 = vadd.f32 %v7783_v6, %v7721_v14  ;;  %v7656_v27 = vadd.f32 %v7655_v10, %v13107_v13 }
 0x9b2   :  { %v7785_v34 = vadd.f32 %v7784_v9, %v7722_v57 }
 0x9b3   :  { %v7205_v61 = vpop.f32.mrb[116].mxu1 }
 0x9b4   :  { %v13171_v50 = vadd.f32 %v14980_v62, %v7205_v61  ;;  %v7207_v20 = vpop.f32.mrb[117].mxu1  ;;  %v7786_v30 = vadd.f32 %v7785_v34, %v7723_v23  ;;  %v14985_v62 = vld [vmem:[#allocation10_spill] sm:$0xff] }
 0x9b5   :  { %v7208_v56 = vpop.f32.mrb[118].mxu1 }
 0x9b6   :  { %v13176_v21 = vadd.f32 %v14981_v31, %v7208_v56  ;;  %v7210_v5 = vpop.f32.mrb[119].mxu1  ;;  %v7787_v7 = vadd.f32 %v7786_v30, %v7724_v12  ;;  %v7727_v56 = vmul.f32 %v13110_v49, %v13110_v49  ;;  %v7657_v31 = vadd.f32 %v7656_v27, %v13110_v49 }
 0x9b7   :  { %v7728_v5 = vmul.f32 %v13114_v59, %v13114_v59 }
 0x9b8   :  { %v7788_v47 = vadd.f32 %v7787_v7, %v7725_v28  ;;  %v7658_v57 = vadd.f32 %v7657_v31, %v13114_v59  ;;  %v7731_v28 = vmul.f32 %v13123_v35, %v13123_v35 }
 0x9ba   :  { %v7789_v14 = vadd.f32 %v7788_v47, %v7726_v58  ;;  %v14990_v58 = vld [vmem:[#allocation28_spill] sm:$0xff]  ;;  %v7732_v47 = vmul.f32 %v13126_v4, %v13126_v4 }
 0x9bb   :  { %v7213_v36 = vpop.f32.mrb[120].mxu1 }
 0x9bc   :  { %v13185_v1 = vadd.f32 %v14982_v2, %v7213_v36  ;;  %v7215_v15 = vpop.f32.mrb[121].mxu1  ;;  %v7790_v8 = vadd.f32 %v7789_v14, %v7727_v56  ;;  %v7729_v2 = vmul.f32 %v13117_v29, %v13117_v29 }
 0x9bd   :  { %v7216_v55 = vpop.f32.mrb[122].mxu1 }
 0x9be   :  { %v13191_v53 = vadd.f32 %v14983_v45, %v7216_v55  ;;  %v7218_v24 = vpop.f32.mrb[123].mxu1  ;;  %v7791_v36 = vadd.f32 %v7790_v8, %v7728_v5  ;;  %v7659_v45 = vadd.f32 %v7658_v57, %v13117_v29  ;;  %v7733_v5 = vmul.f32 %v13129_v51, %v13129_v51 }
 0x9bf   :  { %v7730_v24 = vmul.f32 %v13120_v38, %v13120_v38  ;;  %v7734_v57 = vmul.f32 %v13132_v48, %v13132_v48 }
 0x9c0   :  { %v7792_v30 = vadd.f32 %v7791_v36, %v7729_v2  ;;  %v7660_v42 = vadd.f32 %v7659_v45, %v13120_v38 }
 0x9c2   :  { %v7793_v7 = vadd.f32 %v7792_v30, %v7730_v24 }
 0x9c3   :  { %v7221_v33 = vpop.f32.mrb[124].mxu1 }
 0x9c4   :  { %v13200_v19 = vadd.f32 %v14984_v18, %v7221_v33  ;;  %v7223_v63 = vpop.f32.mrb[125].mxu1  ;;  %v7794_v14 = vadd.f32 %v7793_v7, %v7731_v28  ;;  %v7736_v28 = vmul.f32 %v13138_v37, %v13138_v37 }
 0x9c5   :  { %v7224_v61 = vpop.f32.mrb[126].mxu1  ;;  %v7661_v63 = vadd.f32 %v7660_v42, %v13123_v35  ;;  %v7735_v42 = vmul.f32 %v13135_v26, %v13135_v26 }
 0x9c6   :  { %v13204_v20 = vadd.f32 %v14985_v62, %v7224_v61  ;;  %v7226_v6 = vpop.f32.mrb[127].mxu1  ;;  %v14991_v61 = vld [vmem:[#allocation14_spill] sm:$0xff]  ;;  %v7795_v31 = vadd.f32 %v7794_v14, %v7732_v47 }
 0x9c7   :  { %v7662_v56 = vadd.f32 %v7661_v63, %v13126_v4  ;;  %v14997_v63 = vld [vmem:[#allocation16_spill] sm:$0xff] }
 0x9c8   :  { %14986 = vst [vmem:[#allocation11_spill] sm:$0xff] %v13204_v20  ;;  %v7796_v2 = vadd.f32 %v7795_v31, %v7733_v5 }
 0x9c9   :  { %v7663_v8 = vadd.f32 %v7662_v56, %v13129_v51  ;;  %v14999_v56 = vld [vmem:[#allocation19_spill] sm:$0xff] }
 0x9ca   :  { %v7797_v30 = vadd.f32 %v7796_v2, %v7734_v57  ;;  %v7738_v57 = vmul.f32 %v13144_v0, %v13144_v0  ;;  %v7739_v2 = vmul.f32 %v13147_v41, %v13147_v41 }
 0x9cb   :  { %v7229_v9 = vpop.f32.mrb[128].mxu1 }
 0x9cc   :  { %v13213_v34 = vadd.f32 %v14987_v40, %v7229_v9  ;;  %v7231_v23 = vpop.f32.mrb[129].mxu1  ;;  %v14993_v40 = vld [vmem:[#allocation18_spill] sm:$0xff] }
 0x9cd   :  { %v7232_v15 = vpop.f32.mrb[130].mxu1 }
 0x9ce   :  { %v13218_v12 = vadd.f32 %v14988_v46, %v7232_v15  ;;  %v7234_v55 = vpop.f32.mrb[131].mxu1  ;;  %v7664_v15 = vadd.f32 %v7663_v8, %v13132_v48 }
 0x9cf   :  { %v14995_v55 = vld [vmem:[#allocation20_spill] sm:$0xff] }
 0x9d0   :  { %14989 = vst [vmem:[#allocation12_spill] sm:$0xff] %v13218_v12  ;;  %v7665_v7 = vadd.f32 %v7664_v15, %v13135_v26 }
 0x9d3   :  { %v7237_v10 = vpop.f32.mrb[132].mxu1 }
 0x9d4   :  { %v13227_v33 = vadd.f32 %v14990_v58, %v7237_v10  ;;  %v7239_v18 = vpop.f32.mrb[133].mxu1  ;;  %v7798_v10 = vadd.f32 %v7797_v30, %v7735_v42  ;;  %v7666_v58 = vadd.f32 %v7665_v7, %v13138_v37  ;;  %v7740_v42 = vmul.f32 %v13158_v43, %v13158_v43 }
 0x9d5   :  { %v7240_v27 = vpop.f32.mrb[134].mxu1 }
 0x9d6   :  { %v13233_v62 = vadd.f32 %v14991_v61, %v7240_v27  ;;  %v7242_v6 = vpop.f32.mrb[135].mxu1  ;;  %v7799_v61 = vadd.f32 %v7798_v10, %v7736_v28  ;;  %v7667_v8 = vadd.f32 %v7666_v58, %v13141_v52  ;;  %v15002_v28 = vld [vmem:[#allocation23_spill] sm:$0xff] }
 0x9d7   :  { %v7737_v6 = vmul.f32 %v13141_v52, %v13141_v52 }
 0x9d8   :  { %14992 = vst [vmem:[#allocation6_spill] sm:$0xff] %v13233_v62 }
 0x9db   :  { %v7245_v9 = vpop.f32.mrb[136].mxu1 }
 0x9dc   :  { %v13242_v23 = vadd.f32 %v14993_v40, %v7245_v9  ;;  %v7247_v36 = vpop.f32.mrb[137].mxu1  ;;  %v7800_v9 = vadd.f32 %v7799_v61, %v7737_v6  ;;  %v7668_v40 = vadd.f32 %v7667_v8, %v13144_v0  ;;  %v7741_v61 = vmul.f32 %v13162_v17, %v13162_v17 }
 0x9dd   :  { %v7248_v46 = vpop.f32.mrb[138].mxu1 }
 0x9de   :  { %14994 = vst [vmem:[#allocation13_spill] sm:$0xff] %v13242_v23  ;;  %v13246_v45 = vadd.f32 %v14995_v55, %v7248_v46  ;;  %v7250_v24 = vpop.f32.mrb[139].mxu1  ;;  %v7801_v36 = vadd.f32 %v7800_v9, %v7738_v57  ;;  %v15001_v46 = vld [vmem:[#allocation17_spill] sm:$0xff]  ;;  %v7669_v30 = vadd.f32 %v7668_v40, %v13147_v41 }
 0x9e0   :  { %14996 = vst [vmem:[#allocation5_spill] sm:$0xff] %v13246_v45 }
 0x9e3   :  { %v7253_v18 = vpop.f32.mrb[140].mxu1 }
 0x9e4   :  { %v13255_v47 = vadd.f32 %v14997_v63, %v7253_v18  ;;  %v7255_v27 = vpop.f32.mrb[141].mxu1  ;;  %v7802_v18 = vadd.f32 %v7801_v36, %v7739_v2  ;;  %v7670_v63 = vadd.f32 %v7669_v30, %v13158_v43  ;;  %v15005_v2 = vld [vmem:[#allocation22_spill] sm:$0xff]  ;;  %v7743_v30 = vmul.f32 %v13176_v21, %v13176_v21 }
 0x9e5   :  { %v7256_v14 = vpop.f32.mrb[142].mxu1 }
 0x9e6   :  { %14998 = vst [vmem:[#allocation9_spill] sm:$0xff] %v13255_v47  ;;  %v13260_v31 = vadd.f32 %v14999_v56, %v7256_v14  ;;  %v7258_v5 = vpop.f32.mrb[143].mxu1  ;;  %v7803_v27 = vadd.f32 %v7802_v18, %v7740_v42  ;;  %v7671_v6 = vadd.f32 %v7670_v63, %v13162_v17  ;;  %v7742_v14 = vmul.f32 %v13171_v50, %v13171_v50  ;;  %v15007_v63 = vld [vmem:[#allocation4_spill] sm:$0xff] }
 0x9e7   :  { %v15004_v5 = vld [vmem:[#allocation21_spill] sm:$0xff] }
 0x9e8   :  { %15000 = vst [vmem:[#allocation27_spill] sm:$0xff] %v13260_v31  ;;  %v7804_v9 = vadd.f32 %v7803_v27, %v7741_v61  ;;  %v7672_v40 = vadd.f32 %v7671_v6, %v13171_v50 }
 0x9ea   :  { %v7673_v42 = vadd.f32 %v7672_v40, %v13176_v21 }
 0x9eb   :  { %v7261_v15 = vpop.f32.mrb[144].mxu1 }
 0x9ec   :  { %v13269_v55 = vadd.f32 %v15001_v46, %v7261_v15  ;;  %v7263_v24 = vpop.f32.mrb[145].mxu1 }
 0x9ed   :  { %v7264_v7 = vpop.f32.mrb[146].mxu1  ;;  %v7805_v24 = vadd.f32 %v7804_v9, %v7742_v14  ;;  %v7745_v14 = vmul.f32 %v13191_v53, %v13191_v53 }
 0x9ee   :  { %v13275_v10 = vadd.f32 %v15002_v28, %v7264_v7  ;;  %v7266_v58 = vpop.f32.mrb[147].mxu1  ;;  %v7744_v7 = vmul.f32 %v13185_v1, %v13185_v1 }
 0x9ef   :  { %v7806_v28 = vadd.f32 %v7805_v24, %v7743_v30  ;;  %v7674_v58 = vadd.f32 %v7673_v42, %v13185_v1  ;;  %v7747_v30 = vmul.f32 %v13204_v20, %v13204_v20 }
 0x9f0   :  { %15003 = vst [vmem:[#allocation8_spill] sm:$0xff] %v13275_v10 }
 0x9f1   :  { %v7807_v6 = vadd.f32 %v7806_v28, %v7744_v7  ;;  %v7675_v40 = vadd.f32 %v7674_v58, %v13191_v53  ;;  %v15011_v7 = vld [vmem:[#allocation24_spill] sm:$0xff]  ;;  %v7748_v58 = vmul.f32 %v13213_v34, %v13213_v34 }
 0x9f3   :  { %v7269_v56 = vpop.f32.mrb[148].mxu1 }
 0x9f4   :  { %v13284_v8 = vadd.f32 %v15004_v5, %v7269_v56  ;;  %v7271_v57 = vpop.f32.mrb[149].mxu1  ;;  %v15009_v5 = vld [vmem:[#allocation26_spill] sm:$0xff] }
 0x9f5   :  { %v7272_v36 = vpop.f32.mrb[150].mxu1 }
 0x9f6   :  { %v13288_v15 = vadd.f32 %v15005_v2, %v7272_v36  ;;  %v7274_v46 = vpop.f32.mrb[151].mxu1  ;;  %v7746_v36 = vmul.f32 %v13200_v19, %v13200_v19  ;;  %v7808_v2 = vadd.f32 %v7807_v6, %v7745_v14 }
 0x9f7   :  { %v7676_v46 = vadd.f32 %v7675_v40, %v13200_v19 }
 0x9f8   :  { %15006 = vst [vmem:[#allocation10_spill] sm:$0xff] %v13288_v15  ;;  %v7809_v24 = vadd.f32 %v7808_v2, %v7746_v36  ;;  %v7749_v36 = vmul.f32 %v13218_v12, %v13218_v12 }
 0x9fa   :  { %v7810_v14 = vadd.f32 %v7809_v24, %v7747_v30  ;;  %v15016_v30 = vld [vmem:[#allocation33_spill] sm:$0xff] }
 0x9fb   :  { %v7277_v18 = vpop.f32.mrb[152].mxu1 }
 0x9fc   :  { %v13297_v27 = vadd.f32 %v15007_v63, %v7277_v18  ;;  %v7279_v61 = vpop.f32.mrb[153].mxu1  ;;  %v7677_v63 = vadd.f32 %v7676_v46, %v13204_v20  ;;  %v7811_v40 = vadd.f32 %v7810_v14, %v7748_v58  ;;  %v7750_v46 = vmul.f32 %v13227_v33, %v13227_v33 }
 0x9fd   :  { %v7280_v56 = vpop.f32.mrb[154].mxu1  ;;  %v7751_v14 = vmul.f32 %v13233_v62, %v13233_v62 }
 0x9fe   :  { %15008 = vst [vmem:[#allocation29_spill] sm:$0xff] %v13297_v27  ;;  %v13302_v57 = vadd.f32 %v15009_v5, %v7280_v56  ;;  %v7282_v9 = vpop.f32.mrb[155].mxu1  ;;  %v15013_v56 = vld [vmem:[#allocation7_spill] sm:$0xff] }
 0x9ff   :  { %v7678_v9 = vadd.f32 %v7677_v63, %v13213_v34 }
 0xa00   :  { %15010 = vst [vmem:[#allocation15_spill] sm:$0xff] %v13302_v57 }
 0xa01   :  { %v7679_v2 = vadd.f32 %v7678_v9, %v13218_v12  ;;  %v7752_v12 = vmul.f32 %v13242_v23, %v13242_v23 }
 0xa03   :  { %v7285_v42 = vpop.f32.mrb[156].mxu1 }
 0xa04   :  { %v13311_v28 = vadd.f32 %v15011_v7, %v7285_v42  ;;  %v7287_v18 = vpop.f32.mrb[157].mxu1  ;;  %v15015_v7 = vld [vmem:[#allocation31_spill] sm:$0xff] }
 0xa05   :  { %v7288_v61 = vpop.f32.mrb[158].mxu1 }
 0xa06   :  { %15012 = vst [vmem:[#allocation28_spill] sm:$0xff] %v13311_v28  ;;  %v13317_v5 = vadd.f32 %v15013_v56, %v7288_v61  ;;  %v7290_v6 = vpop.f32.mrb[159].mxu1  ;;  %v7812_v61 = vadd.f32 %v7811_v40, %v7749_v36  ;;  %v7680_v56 = vadd.f32 %v7679_v2, %v13227_v33  ;;  %v15018_v36 = vld [vmem:[#allocation30_spill] sm:$0xff] }
 0xa08   :  { %15014 = vst [vmem:[#allocation14_spill] sm:$0xff] %v13317_v5  ;;  %v7813_v6 = vadd.f32 %v7812_v61, %v7750_v46  ;;  %v7681_v9 = vadd.f32 %v7680_v56, %v13233_v62  ;;  %v7753_v46 = vmul.f32 %v13246_v45, %v13246_v45 }
 0xa0b   :  { %v7293_v42 = vpop.f32.mrb[160].mxu1 }
 0xa0c   :  { %v13326_v18 = vadd.f32 %v15015_v7, %v7293_v42  ;;  %v7295_v20 = vpop.f32.mrb[161].mxu1  ;;  %v7814_v42 = vadd.f32 %v7813_v6, %v7751_v14  ;;  %v7754_v6 = vmul.f32 %v13255_v47, %v13255_v47 }
 0xa0d   :  { %v7296_v24 = vpop.f32.mrb[162].mxu1  ;;  %v7682_v20 = vadd.f32 %v7681_v9, %v13242_v23 }
 0xa0e   :  { %v13330_v63 = vadd.f32 %v15016_v30, %v7296_v24  ;;  %v7298_v58 = vpop.f32.mrb[163].mxu1  ;;  %v7815_v24 = vadd.f32 %v7814_v42, %v7752_v12  ;;  %v15019_v30 = vld [vmem:[#allocation32_spill] sm:$0xff]  ;;  %v7755_v12 = vmul.f32 %v13260_v31, %v13260_v31 }
 0xa0f   :  { %v7683_v62 = vadd.f32 %v7682_v20, %v13246_v45  ;;  %v7756_v20 = vmul.f32 %v13269_v55, %v13269_v55 }
 0xa10   :  { %15017 = vst [vmem:[#allocation18_spill] sm:$0xff] %v13330_v63  ;;  %v7816_v14 = vadd.f32 %v7815_v24, %v7753_v46 }
 0xa11   :  { %v7684_v9 = vadd.f32 %v7683_v62, %v13255_v47 }
 0xa13   :  { %v7301_v40 = vpop.f32.mrb[164].mxu1 }
 0xa14   :  { %v13339_v2 = vadd.f32 %v15018_v36, %v7301_v40  ;;  %v7303_v7 = vpop.f32.mrb[165].mxu1  ;;  %v7817_v40 = vadd.f32 %v7816_v14, %v7754_v6  ;;  %v15021_v36 = vld [vmem:[#allocation35_spill] sm:$0xff]  ;;  %v7757_v14 = vmul.f32 %v13275_v10, %v13275_v10 }
 0xa15   :  { %v7304_v61 = vpop.f32.mrb[166].mxu1 }
 0xa16   :  { %v13344_v58 = vadd.f32 %v15019_v30, %v7304_v61  ;;  %v7306_v56 = vpop.f32.mrb[167].mxu1  ;;  %v7685_v61 = vadd.f32 %v7684_v9, %v13260_v31  ;;  %v7818_v62 = vadd.f32 %v7817_v40, %v7755_v12  ;;  %v15027_v12 = vld [vmem:[#allocation36_spill] sm:$0xff] }
 0xa17   :  { %v15023_v56 = vld [vmem:[#allocation37_spill] sm:$0xff] }
 0xa18   :  { %15020 = vst [vmem:[#allocation20_spill] sm:$0xff] %v13344_v58  ;;  %v7686_v46 = vadd.f32 %v7685_v61, %v13269_v55  ;;  %v7819_v6 = vadd.f32 %v7818_v62, %v7756_v20  ;;  %v7759_v62 = vmul.f32 %v13288_v15, %v13288_v15 }
 0xa1b   :  { %v7309_v42 = vpop.f32.mrb[168].mxu1 }
 0xa1c   :  { %v13353_v7 = vadd.f32 %v15021_v36, %v7309_v42  ;;  %v7311_v23 = vpop.f32.mrb[169].mxu1  ;;  %v7687_v42 = vadd.f32 %v7686_v46, %v13275_v10  ;;  %v15025_v36 = vld [vmem:[#allocation34_spill] sm:$0xff]  ;;  %v7760_v10 = vmul.f32 %v13297_v27, %v13297_v27 }
 0xa1d   :  { %v7312_v30 = vpop.f32.mrb[170].mxu1  ;;  %v7758_v23 = vmul.f32 %v13284_v8, %v13284_v8 }
 0xa1e   :  { %15022 = vst [vmem:[#allocation16_spill] sm:$0xff] %v13353_v7  ;;  %v13359_v45 = vadd.f32 %v15023_v56, %v7312_v30  ;;  %v7314_v24 = vpop.f32.mrb[171].mxu1  ;;  %v7820_v30 = vadd.f32 %v7819_v6, %v7757_v14  ;;  %v7688_v56 = vadd.f32 %v7687_v42, %v13284_v8 }
 0xa20   :  { %15024 = vst [vmem:[#allocation19_spill] sm:$0xff] %v13359_v45  ;;  %v7821_v24 = vadd.f32 %v7820_v30, %v7758_v23  ;;  %v7689_v46 = vadd.f32 %v7688_v56, %v13288_v15  ;;  %v7762_v30 = vmul.f32 %v13311_v28, %v13311_v28 }
 0xa23   :  { %v7317_v9 = vpop.f32.mrb[172].mxu1 }
 0xa24   :  { %v13368_v31 = vadd.f32 %v15025_v36, %v7317_v9  ;;  %v7319_v47 = vpop.f32.mrb[173].mxu1  ;;  %v7822_v9 = vadd.f32 %v7821_v24, %v7759_v62  ;;  %v7761_v36 = vmul.f32 %v13302_v57, %v13302_v57  ;;  %v7763_v24 = vmul.f32 %v13317_v5, %v13317_v5 }
 0xa25   :  { %v7320_v40 = vpop.f32.mrb[174].mxu1  ;;  %v7690_v47 = vadd.f32 %v7689_v46, %v13297_v27 }
 0xa26   :  { %15026 = vst [vmem:[#allocation17_spill] sm:$0xff] %v13368_v31  ;;  %v13372_v61 = vadd.f32 %v15027_v12, %v7320_v40  ;;  %v7322_v20 = vpop.f32.mrb[175].mxu1  ;;  %v7823_v42 = vadd.f32 %v7822_v9, %v7760_v10  ;;  %v7764_v9 = vmul.f32 %v13326_v18, %v13326_v18 }
 0xa27   :  { %v7691_v23 = vadd.f32 %v7690_v47, %v13302_v57 }
 0xa28   :  { %15028 = vst [vmem:[#allocation23_spill] sm:$0xff] %v13372_v61  ;;  %v7824_v56 = vadd.f32 %v7823_v42, %v7761_v36  ;;  %v7765_v42 = vmul.f32 %v13330_v63, %v13330_v63 }
 0xa29   :  { %v7692_v20 = vadd.f32 %v7691_v23, %v13311_v28  ;;  %v7766_v23 = vmul.f32 %v13339_v2, %v13339_v2 }
 0xa2a   :  { %v7825_v15 = vadd.f32 %v7824_v56, %v7762_v30 }
 0xa2b   :  { %v7325_v6 = vpop.f32.mrb[176].mxu1  ;;  %v7693_v10 = vadd.f32 %v7692_v20, %v13317_v5 }
 0xa2c   :  { %v7327_v14 = vpop.f32.mrb[177].mxu1  ;;  %v7826_v47 = vadd.f32 %v7825_v15, %v7763_v24  ;;  %v7767_v15 = vmul.f32 %v13344_v58, %v13344_v58 }
 0xa2d   :  { %v7328_v40 = vpop.f32.mrb[178].mxu1  ;;  %v7694_v57 = vadd.f32 %v7693_v10, %v13326_v18  ;;  %v7768_v10 = vmul.f32 %v13353_v7, %v13353_v7 }
 0xa2e   :  { %v7330_v12 = vpop.f32.mrb[179].mxu1  ;;  %v7827_v27 = vadd.f32 %v7826_v47, %v7764_v9 }
 0xa2f   :  { %v7695_v36 = vadd.f32 %v7694_v57, %v13330_v63 }
 0xa30   :  { %v7828_v20 = vadd.f32 %v7827_v27, %v7765_v42  ;;  %v7769_v27 = vmul.f32 %v13359_v45, %v13359_v45 }
 0xa33   :  { %v7333_v62 = vpop.f32.mrb[180].mxu1 }
 0xa34   :  { %v7335_v46 = vpop.f32.mrb[181].mxu1 }
 0xa35   :  { %v7336_v14 = vpop.f32.mrb[182].mxu1  ;;  %v7696_v46 = vadd.f32 %v7695_v36, %v13339_v2 }
 0xa36   :  { %v7338_v12 = vpop.f32.mrb[183].mxu1 }
 0xa37   :  { %v7829_v12 = vadd.f32 %v7828_v20, %v7766_v23  ;;  %v7697_v24 = vadd.f32 %v7696_v46, %v13344_v58  ;;  %v7770_v23 = vmul.f32 %v13368_v31, %v13368_v31 }
 0xa39   :  { %v7830_v57 = vadd.f32 %v7829_v12, %v7767_v15  ;;  %v7698_v9 = vadd.f32 %v7697_v24, %v13353_v7  ;;  %v7771_v12 = vmul.f32 %v13372_v61, %v13372_v61 }
 0xa3b   :  { %v7341_v30 = vpop.f32.mrb[184].mxu1  ;;  %v7699_v36 = vadd.f32 %v7698_v9, %v13359_v45 }
 0xa3c   :  { %v7343_v56 = vpop.f32.mrb[185].mxu1 }
 0xa3d   :  { %v7344_v5 = vpop.f32.mrb[186].mxu1  ;;  %v7831_v56 = vadd.f32 %v7830_v57, %v7768_v10  ;;  %v7700_v46 = vadd.f32 %v7699_v36, %v13368_v31 }
 0xa3e   :  { %v7346_v28 = vpop.f32.mrb[187].mxu1 }
 0xa3f   :  { %v7832_v20 = vadd.f32 %v7831_v56, %v7769_v27  ;;  %v7701_v10 = vadd.f32 %v7700_v46, %v13372_v61 }
 0xa41   :  { %v7833_v58 = vadd.f32 %v7832_v20, %v7770_v23 }
 0xa43   :  { %v7349_v47 = vpop.f32.mrb[188].mxu1  ;;  %v7834_v7 = vadd.f32 %v7833_v58, %v7771_v12 }
 0xa44   :  { %v7351_v63 = vpop.f32.mrb[189].mxu1 }
 0xa45   :  { %v7352_v42 = vpop.f32.mrb[190].mxu1 }
 0xa46   :  { %v7354_v28 = vpop.f32.mrb[191].mxu1 }
 0xa4b   :  { %v8636_v15 = vpop.f32.mrb[192].mxu1 }
 0xa4c   :  { %v13412_v63 = vadd.f32 %v8636_v15, %v7333_v62  ;;  %v7614_v24 = vpop.f32.mrb[193].mxu1 }
 0xa4d   :  { %v13415_v57 = vadd.f32 %v7614_v24, %v7325_v6  ;;  %v8637_v28 = vpop.f32.mrb[194].mxu1 }
 0xa4e   :  { %v13417_v9 = vadd.f32 %v8637_v28, %v7336_v14  ;;  %v7617_v45 = vpop.f32.mrb[195].mxu1  ;;  %v7774_v6 = vmul.f32 %v13412_v63, %v13412_v63 }
 0xa4f   :  { %15029 = vst [vmem:[#allocation21_spill] sm:$0xff] %v13415_v57  ;;  %v7702_v56 = vadd.f32 %v7701_v10, %v13415_v57  ;;  %v7772_v27 = vmul.f32 %v13415_v57, %v13415_v57  ;;  %v13422_v36 = vadd.f32 %v7617_v45, %v7328_v40 }
 0xa50   :  { %15030 = vst [vmem:[#allocation22_spill] sm:$0xff] %v13417_v9  ;;  %v7775_v45 = vmul.f32 %v13417_v9, %v13417_v9 }
 0xa51   :  { %v7835_v23 = vadd.f32 %v7834_v7, %v7772_v27  ;;  %v7703_v62 = vadd.f32 %v7702_v56, %v13422_v36  ;;  %v7773_v20 = vmul.f32 %v13422_v36, %v13422_v36 }
 0xa53   :  { %v7704_v14 = vadd.f32 %v7703_v62, %v13412_v63  ;;  %v7836_v46 = vadd.f32 %v7835_v23, %v7773_v20  ;;  %v8640_v58 = vpop.f32.mrb[196].mxu1 }
 0xa54   :  { %v13430_v12 = vadd.f32 %v8640_v58, %v7349_v47  ;;  %v7630_v15 = vpop.f32.mrb[197].mxu1 }
 0xa55   :  { %v7837_v40 = vadd.f32 %v7836_v46, %v7774_v6  ;;  %v13434_v7 = vadd.f32 %v7630_v15, %v7341_v30  ;;  %v7705_v24 = vadd.f32 %v7704_v14, %v13417_v9  ;;  %v8641_v10 = vpop.f32.mrb[198].mxu1 }
 0xa56   :  { %15031 = vst [vmem:[#allocation4_spill] sm:$0xff] %v13430_v12  ;;  %v13437_v28 = vadd.f32 %v8641_v10, %v7352_v42  ;;  %v7633_v56 = vpop.f32.mrb[199].mxu1  ;;  %v7778_v6 = vmul.f32 %v13430_v12, %v13430_v12 }
 0xa57   :  { %15032 = vst [vmem:[#allocation26_spill] sm:$0xff] %v13434_v7  ;;  %v7706_v27 = vadd.f32 %v7705_v24, %v13434_v7  ;;  %v7776_v23 = vmul.f32 %v13434_v7, %v13434_v7  ;;  %v7838_v47 = vadd.f32 %v7837_v40, %v7775_v45  ;;  %v13442_v62 = vadd.f32 %v7633_v56, %v7344_v5 }
 0xa58   :  { %v7779_v46 = vmul.f32 %v13437_v28, %v13437_v28 }
 0xa59   :  { %15033 = vst [vmem:[#allocation24_spill] sm:$0xff] %v13442_v62  ;;  %v7839_v20 = vadd.f32 %v7838_v47, %v7776_v23  ;;  %v7707_v58 = vadd.f32 %v7706_v27, %v13442_v62  ;;  %v7777_v30 = vmul.f32 %v13442_v62, %v13442_v62 }
 0xa5b   :  { %v7708_v42 = vadd.f32 %v7707_v58, %v13430_v12  ;;  %v7840_v14 = vadd.f32 %v7839_v20, %v7777_v30 }
 0xa5d   :  { %v7709_v15 = vadd.f32 %v7708_v42, %v13437_v28  ;;  %v7841_v45 = vadd.f32 %v7840_v14, %v7778_v6  ;;  %v7645_v6 = vld [vmem:[%s14628_s5] sm:$0x1] }
 0xa5f   :  { %v7710_v5 = vrot.slane %v7709_v15, 4  ;;  %v7842_v40 = vadd.f32 %v7841_v45, %v7779_v46  ;;  %v13459_v46 = vld [vmem:[%s14629_s6] sm:$0x1] }
 0xa61   :  { %v7711_v24 = vadd.f32 %v7710_v5, %v7709_v15  ;;  %v7843_v10 = vrot.slane %v7842_v40, 4  ;;  %v15035_v5 = vld [vmem:[#allocation11_spill] sm:$0xff] }
 0xa63   :  { %v7712_v56 = vrot.slane %v7711_v24, 2  ;;  %v7844_v27 = vadd.f32 %v7843_v10, %v7842_v40  ;;  %v15036_v40 = vld [vmem:[#allocation12_spill] sm:$0xff]  ;;  %v15038_v10 = vld [vmem:[#allocation13_spill] sm:$0xff] }
 0xa65   :  { %v7713_v23 = vadd.f32 %v7712_v56, %v7711_v24  ;;  %v7845_v47 = vrot.slane %v7844_v27, 2  ;;  %v15037_v24 = vld [vmem:[#allocation6_spill] sm:$0xff] }
 0xa67   :  { %v7714_v57 = vrot.slane %v7713_v23, 1  ;;  %v7846_v61 = vadd.f32 %v7845_v47, %v7844_v27  ;;  %v15039_v27 = vld [vmem:[#allocation5_spill] sm:$0xff] }
 0xa69   :  { %v7715_v31 = vadd.f32 %v7714_v57, %v7713_v23  ;;  %v7847_v62 = vrot.slane %v7846_v61, 1  ;;  %v15040_v23 = vld [vmem:[#allocation9_spill] sm:$0xff] }
 0xa6b   :  { %v7848_v58 = vadd.f32 %v7847_v62, %v7846_v61  ;;  %v7849_v20 = vmul.f32 0.001953125, %v7715_v31  ;;  %v15034_v61 = vld [vmem:[#allocation25_spill] sm:$0xff] }
 0xa6d   :  { %v7850_v30 = vmul.f32 0.001953125, %v7848_v58  ;;  %v7851_v12 = vmul.f32 %v7849_v20, %v7849_v20  ;;  %v15041_v58 = vld [vmem:[#allocation27_spill] sm:$0xff] }
 0xa6f   :  { %v7852_v7 = vsub.f32 %v7850_v30, %v7851_v12  ;;  %v15042_v30 = vld [vmem:[#allocation8_spill] sm:$0xff] }
 0xa71   :  { %v7853_v9 = vadd.f32 1e-05, %v7852_v7 }
 0xa73   :  { %9574 = vrsqrt.f32 %v7853_v9 }
 0xa7d   :  { %v9575_v42 = vpop.eup %9574 }
 0xa7e   :  { %v7855_v14 = vmul.f32 %v9575_v42, %v7645_v6 }
 0xa80   :  { %v13461_v57 = vmul.f32 %v7855_v14, %v7849_v20  ;;  %v13464_v31 = vrot.slane %v7855_v14, %v15034_v61  ;;  %v15043_v14 = vld [vmem:[#allocation10_spill] sm:$0xff] }
 0xa82   :  { %v7857_v12 = vsub.f32 %v13459_v46, %v13461_v57  ;;  %v13470_v9 = vmul.f32 %v13464_v31, %v13073_v54  ;;  %v13474_v7 = vmul.f32 %v13464_v31, %v13076_v25  ;;  %v13478_v62 = vmul.f32 %v13464_v31, %v13080_v22  ;;  %v15044_v57 = vld [vmem:[#allocation29_spill] sm:$0xff] }
 0xa83   :  { %v13482_v15 = vmul.f32 %v13464_v31, %v13083_v60  ;;  %v13486_v45 = vmul.f32 %v13464_v31, %v13087_v44  ;;  %v13490_v54 = vmul.f32 %v13464_v31, %v13090_v39  ;;  %v13494_v25 = vmul.f32 %v13464_v31, %v13094_v11 }
 0xa84   :  { %v13498_v22 = vmul.f32 %v13464_v31, %v13097_v3  ;;  %v13502_v60 = vmul.f32 %v13464_v31, %v13100_v16  ;;  %v13506_v44 = vmul.f32 %v13464_v31, %v13104_v32  ;;  %v13510_v39 = vmul.f32 %v13464_v31, %v13107_v13 }
 0xa85   :  { %v13514_v11 = vmul.f32 %v13464_v31, %v13110_v49  ;;  %v13518_v3 = vmul.f32 %v13464_v31, %v13114_v59  ;;  %v13522_v16 = vmul.f32 %v13464_v31, %v13117_v29  ;;  %v13526_v32 = vmul.f32 %v13464_v31, %v13120_v38 }
 0xa86   :  { %v13530_v13 = vmul.f32 %v13464_v31, %v13123_v35  ;;  %v13534_v49 = vmul.f32 %v13464_v31, %v13126_v4  ;;  %v13538_v59 = vmul.f32 %v13464_v31, %v13129_v51  ;;  %v13542_v29 = vmul.f32 %v13464_v31, %v13132_v48 }
 0xa87   :  { %v13546_v38 = vmul.f32 %v13464_v31, %v13135_v26  ;;  %v13550_v35 = vmul.f32 %v13464_v31, %v13138_v37  ;;  %v13554_v4 = vmul.f32 %v13464_v31, %v13141_v52  ;;  %v13558_v51 = vmul.f32 %v13464_v31, %v13144_v0 }
 0xa88   :  { %v13562_v48 = vmul.f32 %v13464_v31, %v13147_v41  ;;  %v13566_v26 = vmul.f32 %v13464_v31, %v13158_v43  ;;  %v13570_v37 = vmul.f32 %v13464_v31, %v13162_v17  ;;  %v13574_v52 = vmul.f32 %v13464_v31, %v13171_v50 }
 0xa89   :  { %v13578_v0 = vmul.f32 %v13464_v31, %v13176_v21  ;;  %v13582_v41 = vmul.f32 %v13464_v31, %v13185_v1  ;;  %v13586_v43 = vmul.f32 %v13464_v31, %v13191_v53  ;;  %v13590_v17 = vmul.f32 %v13464_v31, %v13200_v19 }
 0xa8a   :  { %v13594_v50 = vmul.f32 %v13464_v31, %v15035_v5  ;;  %v13598_v21 = vmul.f32 %v13464_v31, %v13213_v34  ;;  %v13602_v1 = vmul.f32 %v13464_v31, %v15036_v40  ;;  %v13606_v53 = vmul.f32 %v13464_v31, %v13227_v33  ;;  %v15045_v40 = vld [vmem:[#allocation15_spill] sm:$0xff] }
 0xa8b   :  { %v13610_v19 = vmul.f32 %v13464_v31, %v15037_v24  ;;  %v13614_v56 = vmul.f32 %v13464_v31, %v15038_v10  ;;  %v13618_v34 = vmul.f32 %v13464_v31, %v15039_v27  ;;  %v13622_v47 = vmul.f32 %v13464_v31, %v15040_v23  ;;  %v15046_v24 = vld [vmem:[#allocation28_spill] sm:$0xff]  ;;  %v15047_v27 = vld [vmem:[#allocation14_spill] sm:$0xff] }
 0xa8c   :  { %v13626_v33 = vmul.f32 %v13464_v31, %v15041_v58  ;;  %v13630_v20 = vmul.f32 %v13464_v31, %v13269_v55  ;;  %v13634_v6 = vmul.f32 %v13464_v31, %v15042_v30  ;;  %v13638_v42 = vmul.f32 %v13464_v31, %v13284_v8  ;;  %v15048_v58 = vld [vmem:[#allocation18_spill] sm:$0xff] }
 0xa8d   :  { %v13642_v46 = vmul.f32 %v13464_v31, %v15043_v14  ;;  %v13646_v5 = vmul.f32 %v13464_v31, %v15044_v57  ;;  %v13650_v55 = vmul.f32 %v13464_v31, %v15045_v40  ;;  %v13654_v10 = vmul.f32 %v13464_v31, %v15046_v24  ;;  %v15053_v24 = vld [vmem:[#allocation22_spill] sm:$0xff] }
 0xa8e   :  { %v13658_v8 = vmul.f32 %v13464_v31, %v15047_v27  ;;  %v13662_v23 = vmul.f32 %v13464_v31, %v13326_v18  ;;  %v13666_v30 = vmul.f32 %v13464_v31, %v15048_v58  ;;  %v13670_v14 = vmul.f32 %v13464_v31, %v13339_v2  ;;  %v15055_v27 = vld [vmem:[#allocation26_spill] sm:$0xff] }
 0xa8f   :  { %v13674_v57 = vmul.f32 %v13464_v31, %v13422_v36  ;;  %v13678_v40 = vmul.f32 %v13464_v31, %v13412_v63  ;;  %v13682_v18 = vmul.f32 %v13464_v31, %v15053_v24  ;;  %v13686_v58 = vmul.f32 %v13464_v31, %v15055_v27 }
 0xa90   :  { %15049 = vst [vmem:[#allocation7_spill] sm:$0xff] %v13666_v30  ;;  %15050 = vst [vmem:[#allocation31_spill] sm:$0xff] %v13670_v14  ;;  %v15057_v30 = vld [vmem:[#allocation24_spill] sm:$0xff]  ;;  %v13706_v27 = vmul.f32 %v13464_v31, %v13437_v28 }
 0xa91   :  { %15051 = vst [vmem:[#allocation33_spill] sm:$0xff] %v13674_v57  ;;  %15052 = vst [vmem:[#allocation30_spill] sm:$0xff] %v13678_v40  ;;  %v13690_v2 = vmul.f32 %v13464_v31, %v15057_v30  ;;  %v15059_v14 = vld [vmem:[#allocation4_spill] sm:$0xff]  ;;  %v15064_v30 = vld [vmem:[#allocation19_spill] sm:$0xff] }
 0xa92   :  { %15054 = vst [vmem:[#allocation32_spill] sm:$0xff] %v13682_v18  ;;  %15056 = vst [vmem:[#allocation35_spill] sm:$0xff] %v13686_v58  ;;  %v13694_v36 = vmul.f32 %v13464_v31, %v15059_v14  ;;  %v15061_v57 = vld [vmem:[#allocation20_spill] sm:$0xff]  ;;  %v13709_v58 = vrot.slane %v7857_v12, %v15034_v61  ;;  %v15065_v14 = vld [vmem:[#allocation17_spill] sm:$0xff] }
 0xa93   :  { %15058 = vst [vmem:[#allocation37_spill] sm:$0xff] %v13690_v2  ;;  %v13698_v63 = vmul.f32 %v13464_v31, %v15061_v57  ;;  %v15062_v40 = vld [vmem:[#allocation16_spill] sm:$0xff]  ;;  %v13713_v2 = vmul.f32 %v13464_v31, %v15064_v30  ;;  %v15066_v57 = vld [vmem:[#allocation23_spill] sm:$0xff] }
 0xa94   :  { %15060 = vst [vmem:[#allocation34_spill] sm:$0xff] %v13694_v36  ;;  %v13702_v24 = vmul.f32 %v13464_v31, %v15062_v40  ;;  %v13717_v36 = vmul.f32 %v13464_v31, %v15065_v14  ;;  %v13721_v18 = vmul.f32 %v13464_v31, %v15066_v57  ;;  %v15067_v40 = vld [vmem:[#allocation21_spill] sm:$0xff]  ;;  %v13729_v28 = vadd.f32 %v13709_v58, %v13470_v9 }
 0xa95   :  { %v13733_v61 = vadd.f32 %v13709_v58, %v13474_v7  ;;  %v13737_v12 = vadd.f32 %v13709_v58, %v13478_v62  ;;  %v13741_v30 = vadd.f32 %v13709_v58, %v13482_v15  ;;  %v13749_v9 = vadd.f32 %v13709_v58, %v13490_v54 }
 0xa96   :  { %15063 = vst [vmem:[#allocation36_spill] sm:$0xff] %v13702_v24  ;;  %v13725_v24 = vmul.f32 %v13464_v31, %v15067_v40  ;;  %v13745_v31 = vadd.f32 %v13709_v58, %v13486_v45  ;;  %v13753_v7 = vadd.f32 %v13709_v58, %v13494_v25  ;;  %v13757_v62 = vadd.f32 %v13709_v58, %v13498_v22 }
 0xa97   :  { %v13761_v15 = vadd.f32 %v13709_v58, %v13502_v60  ;;  %v13765_v45 = vadd.f32 %v13709_v58, %v13506_v44  ;;  %v13769_v54 = vadd.f32 %v13709_v58, %v13510_v39  ;;  %v13773_v25 = vadd.f32 %v13709_v58, %v13514_v11  ;;  %v15083_v14 = vld [vmem:[#allocation7_spill] sm:$0xff] }
 0xa98   :  { %v13777_v22 = vadd.f32 %v13709_v58, %v13518_v3  ;;  %v13781_v60 = vadd.f32 %v13709_v58, %v13522_v16  ;;  %v13785_v44 = vadd.f32 %v13709_v58, %v13526_v32  ;;  %v13789_v39 = vadd.f32 %v13709_v58, %v13530_v13  ;;  %v15085_v40 = vld [vmem:[#allocation31_spill] sm:$0xff] }
 0xa99   :  { %v13793_v11 = vadd.f32 %v13709_v58, %v13534_v49  ;;  %v13797_v3 = vadd.f32 %v13709_v58, %v13538_v59  ;;  %v13801_v16 = vadd.f32 %v13709_v58, %v13542_v29  ;;  %v13805_v32 = vadd.f32 %v13709_v58, %v13546_v38 }
 0xa9a   :  { %v13809_v13 = vadd.f32 %v13709_v58, %v13550_v35  ;;  %v13813_v49 = vadd.f32 %v13709_v58, %v13554_v4  ;;  %v13817_v59 = vadd.f32 %v13709_v58, %v13558_v51  ;;  %v13821_v29 = vadd.f32 %v13709_v58, %v13562_v48 }
 0xa9b   :  { %v13825_v38 = vadd.f32 %v13709_v58, %v13566_v26  ;;  %v13829_v35 = vadd.f32 %v13709_v58, %v13570_v37  ;;  %v13833_v4 = vadd.f32 %v13709_v58, %v13574_v52  ;;  %v13837_v51 = vadd.f32 %v13709_v58, %v13578_v0 }
 0xa9c   :  { %v13841_v48 = vadd.f32 %v13709_v58, %v13582_v41  ;;  %v13845_v26 = vadd.f32 %v13709_v58, %v13586_v43  ;;  %v13849_v37 = vadd.f32 %v13709_v58, %v13590_v17  ;;  %v13853_v52 = vadd.f32 %v13709_v58, %v13594_v50 }
 0xa9d   :  { %v13857_v0 = vadd.f32 %v13709_v58, %v13598_v21  ;;  %v13861_v41 = vadd.f32 %v13709_v58, %v13602_v1  ;;  %v13865_v43 = vadd.f32 %v13709_v58, %v13606_v53  ;;  %v13869_v17 = vadd.f32 %v13709_v58, %v13610_v19 }
 0xa9e   :  { %v13873_v50 = vadd.f32 %v13709_v58, %v13614_v56  ;;  %v13877_v21 = vadd.f32 %v13709_v58, %v13618_v34  ;;  %v13881_v1 = vadd.f32 %v13709_v58, %v13622_v47  ;;  %v13885_v53 = vadd.f32 %v13709_v58, %v13626_v33 }
 0xa9f   :  { %15068 = vst [vmem:[#allocation25_spill] sm:$0xff] %v13865_v43  ;;  %15069 = vst [vmem:[#allocation11_spill] sm:$0xff] %v13869_v17  ;;  %v13889_v19 = vadd.f32 %v13709_v58, %v13630_v20  ;;  %v13893_v56 = vadd.f32 %v13709_v58, %v13634_v6  ;;  %v13897_v34 = vadd.f32 %v13709_v58, %v13638_v42  ;;  %v8022_v17 = vld [vmem:[%s14624_s0 + $0xc0] sm:$0xff]  ;;  %v8023_v43 = vld [vmem:[%s14624_s0 + $0xc8] sm:$0xff] }
 0xaa0   :  { %15070 = vst [vmem:[#allocation12_spill] sm:$0xff] %v13873_v50  ;;  %15071 = vst [vmem:[#allocation6_spill] sm:$0xff] %v13877_v21  ;;  %v13901_v47 = vadd.f32 %v13709_v58, %v13642_v46  ;;  %v13905_v33 = vadd.f32 %v13709_v58, %v13646_v5  ;;  %v13909_v20 = vadd.f32 %v13709_v58, %v13650_v55  ;;  %v7998_v46 = vld [vmem:[%s14624_s0] sm:$0xff]  ;;  %v7999_v5 = vld [vmem:[%s14624_s0 + $0x8] sm:$0xff] }
 0xaa1   :  { %15072 = vst [vmem:[#allocation13_spill] sm:$0xff] %v13881_v1  ;;  %15073 = vst [vmem:[#allocation5_spill] sm:$0xff] %v13885_v53  ;;  %v13913_v6 = vadd.f32 %v13709_v58, %v13654_v10  ;;  %v13917_v42 = vadd.f32 %v13709_v58, %v13658_v8  ;;  %v8000_v55 = vld [vmem:[%s14624_s0 + $0x10] sm:$0xff]  ;;  %v8001_v10 = vld [vmem:[%s14624_s0 + $0x18] sm:$0xff]  ;;  %v13933_v8 = vadd.f32 %v13709_v58, %v13662_v23 }
 0xaa2   :  { %15074 = vst [vmem:[#allocation9_spill] sm:$0xff] %v13889_v19  ;;  %15075 = vst [vmem:[#allocation27_spill] sm:$0xff] %v13893_v56  ;;  %v13937_v57 = vadd.f32 %v13709_v58, %v15083_v14  ;;  %v8003_v23 = vld [vmem:[%s14624_s0 + $0x28] sm:$0xff]  ;;  %v8004_v14 = vld [vmem:[%s14624_s0 + $0x30] sm:$0xff]  ;;  %v14029_v53 = vadd.f32 %v13709_v58, %v13706_v27  ;;  %v14062_v21 = vadd.f32 %v8000_v55, %v13737_v12 }
 0xaa3   :  { %15076 = vst [vmem:[#allocation8_spill] sm:$0xff] %v13897_v34  ;;  %15077 = vst [vmem:[#allocation10_spill] sm:$0xff] %v13901_v47  ;;  %v15098_v47 = vld [vmem:[#allocation32_spill] sm:$0xff]  ;;  %v8019_v27 = vld [vmem:[%s14624_s0 + $0xa8] sm:$0xff]  ;;  %v14065_v50 = vadd.f32 %v8001_v10, %v13741_v30  ;;  %v14083_v30 = vadd.f32 %v8003_v23, %v13749_v9 }
 0xaa4   :  { %15078 = vst [vmem:[#allocation29_spill] sm:$0xff] %v13905_v33  ;;  %15079 = vst [vmem:[#allocation15_spill] sm:$0xff] %v13909_v20  ;;  %v8002_v20 = vld [vmem:[%s14624_s0 + $0x20] sm:$0xff]  ;;  %v14001_v34 = vadd.f32 %v13709_v58, %v15098_v47  ;;  %v8027_v10 = vld [vmem:[%s14624_s0 + $0xe8] sm:$0xff] }
 0xaa5   :  { %15080 = vst [vmem:[#allocation28_spill] sm:$0xff] %v13913_v6  ;;  %15081 = vst [vmem:[#allocation14_spill] sm:$0xff] %v13917_v42  ;;  %v13941_v42 = vadd.f32 %v13709_v58, %v15085_v40  ;;  %v13945_v6 = vadd.f32 %v13709_v58, %v13698_v63  ;;  %v8005_v40 = vld [vmem:[%s14624_s0 + $0x38] sm:$0xff]  ;;  %v8006_v33 = vld [vmem:[%s14624_s0 + $0x40] sm:$0xff]  ;;  %v14080_v12 = vadd.f32 %v8002_v20, %v13745_v31 }
 0xaa6   :  { %15082 = vst [vmem:[#allocation18_spill] sm:$0xff] %v13933_v8  ;;  %15084 = vst [vmem:[#allocation22_spill] sm:$0xff] %v13937_v57  ;;  %v13969_v57 = vadd.f32 %v13709_v58, %v13717_v36  ;;  %v13973_v8 = vadd.f32 %v13709_v58, %v13721_v18  ;;  %v8009_v36 = vld [vmem:[%s14624_s0 + $0x58] sm:$0xff]  ;;  %v13989_v18 = vadd.f32 %v13709_v58, %v13725_v24  ;;  %v8010_v56 = vld [vmem:[%s14624_s0 + $0x60] sm:$0xff] }
 0xaa7   :  { %15086 = vst [vmem:[#allocation26_spill] sm:$0xff] %v13941_v42  ;;  %15087 = vst [vmem:[#allocation24_spill] sm:$0xff] %v13945_v6  ;;  %v15088_v42 = vld [vmem:[#allocation36_spill] sm:$0xff]  ;;  %v13965_v6 = vadd.f32 %v13709_v58, %v13713_v2  ;;  %v8008_v2 = vld [vmem:[%s14624_s0 + $0x50] sm:$0xff]  ;;  %v14113_v23 = vadd.f32 %v8009_v36, %v13773_v25 }
 0xaa8   :  { %v13961_v63 = vadd.f32 %v13709_v58, %v15088_v42  ;;  %15091 = vst [vmem:[#allocation16_spill] sm:$0xff] %v13969_v57  ;;  %15092 = vst [vmem:[#allocation19_spill] sm:$0xff] %v13973_v8  ;;  %v8007_v42 = vld [vmem:[%s14624_s0 + $0x48] sm:$0xff]  ;;  %v8014_v1 = vld [vmem:[%s14624_s0 + $0x80] sm:$0xff]  ;;  %v14110_v20 = vadd.f32 %v8008_v2, %v13769_v54  ;;  %v14128_v54 = vadd.f32 %v8010_v56, %v13777_v22 }
 0xaa9   :  { %15090 = vst [vmem:[#allocation20_spill] sm:$0xff] %v13965_v6  ;;  %15093 = vst [vmem:[#allocation17_spill] sm:$0xff] %v13989_v18  ;;  %v15094_v8 = vld [vmem:[#allocation33_spill] sm:$0xff]  ;;  %v15096_v6 = vld [vmem:[#allocation30_spill] sm:$0xff] }
 0xaaa   :  { %15089 = vst [vmem:[#allocation4_spill] sm:$0xff] %v13961_v63  ;;  %v13993_v57 = vadd.f32 %v13709_v58, %v15094_v8  ;;  %v13997_v63 = vadd.f32 %v13709_v58, %v15096_v6  ;;  %15099 = vst [vmem:[#allocation7_spill] sm:$0xff] %v14001_v34  ;;  %v8011_v24 = vld [vmem:[%s14624_s0 + $0x68] sm:$0xff]  ;;  %v8012_v8 = vld [vmem:[%s14624_s0 + $0x70] sm:$0xff] }
 0xaab   :  { %v8013_v6 = vld [vmem:[%s14624_s0 + $0x78] sm:$0xff]  ;;  %v15102_v34 = vld [vmem:[#allocation37_spill] sm:$0xff]  ;;  %v15104_v18 = vld [vmem:[#allocation34_spill] sm:$0xff]  ;;  %15106 = vst [vmem:[#allocation30_spill] sm:$0xff] %v14029_v53  ;;  %v14131_v25 = vadd.f32 %v8011_v24, %v13781_v60 }
 0xaac   :  { %15095 = vst [vmem:[#allocation23_spill] sm:$0xff] %v13993_v57  ;;  %15097 = vst [vmem:[#allocation21_spill] sm:$0xff] %v13997_v63  ;;  %v15100_v63 = vld [vmem:[#allocation35_spill] sm:$0xff]  ;;  %v14021_v57 = vadd.f32 %v13709_v58, %v15102_v34  ;;  %v14025_v19 = vadd.f32 %v13709_v58, %v15104_v18  ;;  %v8016_v34 = vld [vmem:[%s14624_s0 + $0x90] sm:$0xff] }
 0xaad   :  { %v14017_v47 = vadd.f32 %v13709_v58, %v15100_v63  ;;  %v8015_v63 = vld [vmem:[%s14624_s0 + $0x88] sm:$0xff]  ;;  %v8017_v18 = vld [vmem:[%s14624_s0 + $0x98] sm:$0xff]  ;;  %v8018_v58 = vld [vmem:[%s14624_s0 + $0xa0] sm:$0xff]  ;;  %v14158_v56 = vadd.f32 %v8016_v34, %v13801_v16  ;;  %v14176_v16 = vadd.f32 %v8019_v27, %v13813_v49  ;;  %v14194_v49 = vadd.f32 %v8022_v17, %v13825_v38 }
 0xaae   :  { %15103 = vst [vmem:[#allocation36_spill] sm:$0xff] %v14021_v57  ;;  %15105 = vst [vmem:[#allocation33_spill] sm:$0xff] %v14025_v19  ;;  %v8020_v53 = vld [vmem:[%s14624_s0 + $0xb0] sm:$0xff]  ;;  %v8021_v19 = vld [vmem:[%s14624_s0 + $0xb8] sm:$0xff]  ;;  %v14056_v57 = vadd.f32 %v7998_v46, %v13729_v28  ;;  %v14086_v46 = vadd.f32 %v8004_v14, %v13753_v7  ;;  %v14104_v7 = vadd.f32 %v8006_v33, %v13761_v15 }
 0xaaf   :  { %15101 = vst [vmem:[#allocation31_spill] sm:$0xff] %v14017_v47  ;;  %v14059_v47 = vadd.f32 %v7999_v5, %v13733_v61  ;;  %v8024_v28 = vld [vmem:[%s14624_s0 + $0xd0] sm:$0xff]  ;;  %v8025_v61 = vld [vmem:[%s14624_s0 + $0xd8] sm:$0xff]  ;;  %v14089_v5 = vadd.f32 %v8005_v40, %v13757_v62  ;;  %v8026_v55 = vld [vmem:[%s14624_s0 + $0xe0] sm:$0xff]  ;;  %v14107_v62 = vadd.f32 %v8007_v42, %v13765_v45  ;;  %v14134_v33 = vadd.f32 %v8012_v8, %v13785_v44 }
 0xab0   :  { %v8028_v31 = vld [vmem:[%s14624_s0 + $0xf0] sm:$0xff]  ;;  %v8029_v9 = vld [vmem:[%s14624_s0 + $0xf8] sm:$0xff]  ;;  %v8030_v14 = vld [vmem:[%s14624_s0 + $0x100] sm:$0xff]  ;;  %v14137_v42 = vadd.f32 %v8013_v6, %v13789_v39  ;;  %v14152_v44 = vadd.f32 %v8014_v1, %v13793_v11  ;;  %v14155_v39 = vadd.f32 %v8015_v63, %v13797_v3  ;;  %v14161_v24 = vadd.f32 %v8017_v18, %v13805_v32 }
 0xab1   :  { %v8031_v40 = vld [vmem:[%s14624_s0 + $0x108] sm:$0xff]  ;;  %v8032_v15 = vld [vmem:[%s14624_s0 + $0x110] sm:$0xff]  ;;  %v8033_v45 = vld [vmem:[%s14624_s0 + $0x118] sm:$0xff]  ;;  %v14173_v3 = vadd.f32 %v8018_v58, %v13809_v13  ;;  %v14179_v32 = vadd.f32 %v8020_v53, %v13817_v59  ;;  %v14182_v1 = vadd.f32 %v8021_v19, %v13821_v29  ;;  %v14197_v59 = vadd.f32 %v8023_v43, %v13829_v35 }
 0xab2   :  { %v8034_v2 = vld [vmem:[%s14624_s0 + $0x120] sm:$0xff]  ;;  %v8035_v36 = vld [vmem:[%s14624_s0 + $0x128] sm:$0xff]  ;;  %v8036_v22 = vld [vmem:[%s14624_s0 + $0x130] sm:$0xff]  ;;  %v14200_v29 = vadd.f32 %v8024_v28, %v13833_v4  ;;  %v14203_v53 = vadd.f32 %v8025_v61, %v13837_v51  ;;  %v14215_v35 = vadd.f32 %v8026_v55, %v13841_v48  ;;  %v14218_v4 = vadd.f32 %v8027_v10, %v13845_v26 }
 0xab3   :  { %v8037_v60 = vld [vmem:[%s14624_s0 + $0x138] sm:$0xff]  ;;  %v8038_v8 = vld [vmem:[%s14624_s0 + $0x140] sm:$0xff]  ;;  %v8039_v6 = vld [vmem:[%s14624_s0 + $0x148] sm:$0xff]  ;;  %v14221_v51 = vadd.f32 %v8028_v31, %v13849_v37  ;;  %v14224_v43 = vadd.f32 %v8029_v9, %v13853_v52  ;;  %v14236_v26 = vadd.f32 %v8030_v14, %v13857_v0  ;;  %v14239_v37 = vadd.f32 %v8031_v40, %v13861_v41 }
 0xab4   :  { %v8040_v11 = vld [vmem:[%s14624_s0 + $0x150] sm:$0xff]  ;;  %v8041_v63 = vld [vmem:[%s14624_s0 + $0x158] sm:$0xff]  ;;  %v8042_v34 = vld [vmem:[%s14624_s0 + $0x160] sm:$0xff] }
 0xab5   :  { %v8043_v13 = vld [vmem:[%s14624_s0 + $0x168] sm:$0xff]  ;;  %v8044_v19 = vld [vmem:[%s14624_s0 + $0x170] sm:$0xff]  ;;  %v8045_v18 = vld [vmem:[%s14624_s0 + $0x178] sm:$0xff] }
 0xab6   :  { %v8046_v38 = vld [vmem:[%s14624_s0 + $0x180] sm:$0xff]  ;;  %v8047_v17 = vld [vmem:[%s14624_s0 + $0x188] sm:$0xff]  ;;  %v8048_v58 = vld [vmem:[%s14624_s0 + $0x190] sm:$0xff] }
 0xab7   :  { %v8049_v48 = vld [vmem:[%s14624_s0 + $0x198] sm:$0xff]  ;;  %v15107_v52 = vld [vmem:[#allocation25_spill] sm:$0xff]  ;;  %v8050_v55 = vld [vmem:[%s14624_s0 + $0x1a0] sm:$0xff] }
 0xab8   :  { %v14242_v27 = vadd.f32 %v8032_v15, %v15107_v52  ;;  %v15109_v28 = vld [vmem:[#allocation11_spill] sm:$0xff]  ;;  %v8051_v10 = vld [vmem:[%s14624_s0 + $0x1a8] sm:$0xff]  ;;  %v8052_v0 = vld [vmem:[%s14624_s0 + $0x1b0] sm:$0xff] }
 0xab9   :  { %v14245_v61 = vadd.f32 %v8033_v45, %v15109_v28  ;;  %v15111_v41 = vld [vmem:[#allocation12_spill] sm:$0xff]  ;;  %v15113_v9 = vld [vmem:[#allocation6_spill] sm:$0xff]  ;;  %v15115_v40 = vld [vmem:[#allocation13_spill] sm:$0xff] }
 0xaba   :  { %15108 = vst [vmem:[#allocation32_spill] sm:$0xff] %v14242_v27  ;;  %v14257_v31 = vadd.f32 %v8034_v2, %v15111_v41  ;;  %v14260_v14 = vadd.f32 %v8035_v36, %v15113_v9  ;;  %v14263_v15 = vadd.f32 %v8036_v22, %v15115_v40  ;;  %v15117_v45 = vld [vmem:[#allocation5_spill] sm:$0xff]  ;;  %v8053_v28 = vld [vmem:[%s14624_s0 + $0x1b8] sm:$0xff] }
 0xabb   :  { %15110 = vst [vmem:[#allocation35_spill] sm:$0xff] %v14245_v61  ;;  %v14266_v52 = vadd.f32 %v8037_v60, %v15117_v45  ;;  %v8054_v61 = vld [vmem:[%s14624_s0 + $0x1c0] sm:$0xff]  ;;  %v8055_v2 = vld [vmem:[%s14624_s0 + $0x1c8] sm:$0xff]  ;;  %v15121_v22 = vld [vmem:[#allocation27_spill] sm:$0xff] }
 0xabc   :  { %15112 = vst [vmem:[#allocation37_spill] sm:$0xff] %v14257_v31  ;;  %15114 = vst [vmem:[#allocation34_spill] sm:$0xff] %v14260_v14  ;;  %v15119_v36 = vld [vmem:[#allocation9_spill] sm:$0xff]  ;;  %v14281_v9 = vadd.f32 %v8039_v6, %v15121_v22  ;;  %v15123_v60 = vld [vmem:[#allocation8_spill] sm:$0xff] }
 0xabd   :  { %15116 = vst [vmem:[#allocation25_spill] sm:$0xff] %v14263_v15  ;;  %15118 = vst [vmem:[#allocation11_spill] sm:$0xff] %v14266_v52  ;;  %v14278_v41 = vadd.f32 %v8038_v8, %v15119_v36  ;;  %v14284_v40 = vadd.f32 %v8040_v11, %v15123_v60  ;;  %v15125_v45 = vld [vmem:[#allocation10_spill] sm:$0xff]  ;;  %v8057_v14 = vld [vmem:[%s14624_s0 + $0x1d8] sm:$0xff] }
 0xabe   :  { %15122 = vst [vmem:[#allocation6_spill] sm:$0xff] %v14281_v9  ;;  %v14287_v52 = vadd.f32 %v8041_v63, %v15125_v45  ;;  %v8056_v15 = vld [vmem:[%s14624_s0 + $0x1d0] sm:$0xff]  ;;  %v8058_v8 = vld [vmem:[%s14624_s0 + $0x1e0] sm:$0xff]  ;;  %v15127_v6 = vld [vmem:[#allocation29_spill] sm:$0xff] }
 0xabf   :  { %15120 = vst [vmem:[#allocation12_spill] sm:$0xff] %v14278_v41  ;;  %15124 = vst [vmem:[#allocation13_spill] sm:$0xff] %v14284_v40  ;;  %v14299_v36 = vadd.f32 %v8042_v34, %v15127_v6  ;;  %v15129_v11 = vld [vmem:[#allocation15_spill] sm:$0xff]  ;;  %v15131_v63 = vld [vmem:[#allocation28_spill] sm:$0xff] }
 0xac0   :  { %15126 = vst [vmem:[#allocation5_spill] sm:$0xff] %v14287_v52  ;;  %v14302_v22 = vadd.f32 %v8043_v13, %v15129_v11  ;;  %v14305_v60 = vadd.f32 %v8044_v19, %v15131_v63  ;;  %v15133_v45 = vld [vmem:[#allocation14_spill] sm:$0xff]  ;;  %v8059_v40 = vld [vmem:[%s14624_s0 + $0x1e8] sm:$0xff]  ;;  %v8061_v34 = vld [vmem:[%s14624_s0 + $0x1f8] sm:$0xff] }
 0xac1   :  { %15128 = vst [vmem:[#allocation9_spill] sm:$0xff] %v14299_v36  ;;  %v14308_v52 = vadd.f32 %v8045_v18, %v15133_v45  ;;  %v8060_v9 = vld [vmem:[%s14624_s0 + $0x1f0] sm:$0xff]  ;;  %v15138_v45 = vld [vmem:[#allocation24_spill] sm:$0xff] }
 0xac2   :  { %15130 = vst [vmem:[#allocation27_spill] sm:$0xff] %v14302_v22  ;;  %15132 = vst [vmem:[#allocation8_spill] sm:$0xff] %v14305_v60  ;;  %v15135_v13 = vld [vmem:[#allocation18_spill] sm:$0xff]  ;;  %v15139_v60 = vld [vmem:[#allocation4_spill] sm:$0xff] }
 0xac3   :  { %15134 = vst [vmem:[#allocation10_spill] sm:$0xff] %v14308_v52  ;;  %v14320_v6 = vadd.f32 %v8046_v38, %v15135_v13  ;;  %v15136_v19 = vld [vmem:[#allocation22_spill] sm:$0xff]  ;;  %v14329_v52 = vadd.f32 %v8049_v48, %v15138_v45  ;;  %v14332_v22 = vadd.f32 %v8050_v55, %v15139_v60  ;;  %v15140_v36 = vld [vmem:[#allocation20_spill] sm:$0xff]  ;;  %v15142_v38 = vld [vmem:[#allocation19_spill] sm:$0xff] }
 0xac4   :  { %v14323_v11 = vadd.f32 %v8047_v17, %v15136_v19  ;;  %v15137_v18 = vld [vmem:[#allocation26_spill] sm:$0xff]  ;;  %v14335_v41 = vadd.f32 %v8051_v10, %v15140_v36  ;;  %v15141_v31 = vld [vmem:[#allocation16_spill] sm:$0xff]  ;;  %v14341_v13 = vadd.f32 %v8053_v28, %v15142_v38  ;;  %v15143_v17 = vld [vmem:[#allocation17_spill] sm:$0xff] }
 0xac5   :  { %v14326_v63 = vadd.f32 %v8048_v58, %v15137_v18  ;;  %v14338_v27 = vadd.f32 %v8052_v0, %v15141_v31  ;;  %v14344_v19 = vadd.f32 %v8054_v61, %v15143_v17  ;;  %v15144_v58 = vld [vmem:[#allocation23_spill] sm:$0xff]  ;;  %v15145_v48 = vld [vmem:[#allocation21_spill] sm:$0xff]  ;;  %v15148_v0 = vld [vmem:[#allocation36_spill] sm:$0xff] }
 0xac6   :  { %v14347_v18 = vadd.f32 %v8055_v2, %v15144_v58  ;;  %v14350_v45 = vadd.f32 %v8056_v15, %v15145_v48  ;;  %v15146_v55 = vld [vmem:[#allocation7_spill] sm:$0xff]  ;;  %v14359_v31 = vadd.f32 %v8059_v40, %v15148_v0  ;;  %v15149_v28 = vld [vmem:[#allocation33_spill] sm:$0xff]  ;;  %v15150_v61 = vld [vmem:[#allocation30_spill] sm:$0xff]  ;;  %v8126_v2 = vmax.f32 %v14056_v57, 0.0 }
 0xac7   :  { %v14353_v60 = vadd.f32 %v8057_v14, %v15146_v55  ;;  %v15147_v10 = vld [vmem:[#allocation31_spill] sm:$0xff]  ;;  %v14362_v38 = vadd.f32 %v8060_v9, %v15149_v28  ;;  %v14365_v17 = vadd.f32 %v8061_v34, %v15150_v61  ;;  %v8127_v15 = vmax.f32 %v14059_v47, 0.0  ;;  %v15157_v28 = vld [vmem:[#allocation12_spill] sm:$0xff] }
 0xac8   :  { %v14356_v36 = vadd.f32 %v8058_v8, %v15147_v10  ;;  %v8128_v58 = vmax.f32 %v14062_v21, 0.0  ;;  %v8129_v14 = vmax.f32 %v14065_v50, 0.0  ;;  %v8130_v8 = vmax.f32 %v14080_v12, 0.0  ;;  %8190 = vst [vmem:[%s14630_s7] sm:$0xff] %v8126_v2  ;;  %v15156_v10 = vld [vmem:[#allocation11_spill] sm:$0xff]  ;;  %v15158_v2 = vld [vmem:[#allocation6_spill] sm:$0xff] }
 0xac9   :  { %v8131_v48 = vmax.f32 %v14083_v30, 0.0  ;;  %v8132_v40 = vmax.f32 %v14086_v46, 0.0  ;;  %v8133_v9 = vmax.f32 %v14089_v5, 0.0  ;;  %v8134_v55 = vmax.f32 %v14104_v7, 0.0  ;;  %8191 = vst [vmem:[%s14630_s7 + $0x8] sm:$0xff] %v8127_v15 }
 0xaca   :  { %v8135_v34 = vmax.f32 %v14107_v62, 0.0  ;;  %v8136_v57 = vmax.f32 %v14110_v20, 0.0  ;;  %v8137_v47 = vmax.f32 %v14113_v23, 0.0  ;;  %8192 = vst [vmem:[%s14630_s7 + $0x10] sm:$0xff] %v8128_v58  ;;  %8193 = vst [vmem:[%s14630_s7 + $0x18] sm:$0xff] %v8129_v14  ;;  %v8138_v50 = vmax.f32 %v14128_v54, 0.0 }
 0xacb   :  { %v8139_v21 = vmax.f32 %v14131_v25, 0.0  ;;  %v8140_v12 = vmax.f32 %v14134_v33, 0.0  ;;  %v8141_v30 = vmax.f32 %v14137_v42, 0.0  ;;  %8194 = vst [vmem:[%s14630_s7 + $0x20] sm:$0xff] %v8130_v8  ;;  %8195 = vst [vmem:[%s14630_s7 + $0x28] sm:$0xff] %v8131_v48  ;;  %v8142_v46 = vmax.f32 %v14152_v44, 0.0 }
 0xacc   :  { %8196 = vst [vmem:[%s14630_s7 + $0x30] sm:$0xff] %v8132_v40  ;;  %8197 = vst [vmem:[%s14630_s7 + $0x38] sm:$0xff] %v8133_v9  ;;  %v8143_v5 = vmax.f32 %v14155_v39, 0.0  ;;  %v8144_v7 = vmax.f32 %v14158_v56, 0.0  ;;  %v8145_v62 = vmax.f32 %v14161_v24, 0.0  ;;  %v8146_v20 = vmax.f32 %v14173_v3, 0.0 }
 0xacd   :  { %8198 = vst [vmem:[%s14630_s7 + $0x40] sm:$0xff] %v8134_v55  ;;  %8199 = vst [vmem:[%s14630_s7 + $0x48] sm:$0xff] %v8135_v34  ;;  %v8147_v23 = vmax.f32 %v14176_v16, 0.0  ;;  %v8148_v54 = vmax.f32 %v14179_v32, 0.0  ;;  %v8149_v25 = vmax.f32 %v14182_v1, 0.0  ;;  %v8150_v33 = vmax.f32 %v14194_v49, 0.0 }
 0xace   :  { %8200 = vst [vmem:[%s14630_s7 + $0x50] sm:$0xff] %v8136_v57  ;;  %8201 = vst [vmem:[%s14630_s7 + $0x58] sm:$0xff] %v8137_v47  ;;  %v8151_v42 = vmax.f32 %v14197_v59, 0.0  ;;  %v8152_v44 = vmax.f32 %v14200_v29, 0.0  ;;  %v8153_v39 = vmax.f32 %v14203_v53, 0.0  ;;  %v8154_v56 = vmax.f32 %v14215_v35, 0.0 }
 0xacf   :  { %8202 = vst [vmem:[%s14630_s7 + $0x60] sm:$0xff] %v8138_v50  ;;  %8203 = vst [vmem:[%s14630_s7 + $0x68] sm:$0xff] %v8139_v21  ;;  %v8155_v24 = vmax.f32 %v14218_v4, 0.0  ;;  %v8156_v3 = vmax.f32 %v14221_v51, 0.0  ;;  %v8157_v16 = vmax.f32 %v14224_v43, 0.0  ;;  %v8158_v32 = vmax.f32 %v14236_v26, 0.0 }
 0xad0   :  { %8204 = vst [vmem:[%s14630_s7 + $0x70] sm:$0xff] %v8140_v12  ;;  %8205 = vst [vmem:[%s14630_s7 + $0x78] sm:$0xff] %v8141_v30  ;;  %v8159_v1 = vmax.f32 %v14239_v37, 0.0  ;;  %v15151_v49 = vld [vmem:[#allocation32_spill] sm:$0xff]  ;;  %v15152_v29 = vld [vmem:[#allocation35_spill] sm:$0xff]  ;;  %v8165_v0 = vmax.f32 %v15156_v10, 0.0 }
 0xad1   :  { %8206 = vst [vmem:[%s14630_s7 + $0x80] sm:$0xff] %v8142_v46  ;;  %8207 = vst [vmem:[%s14630_s7 + $0x88] sm:$0xff] %v8143_v5  ;;  %v8160_v59 = vmax.f32 %v15151_v49, 0.0  ;;  %v8161_v53 = vmax.f32 %v15152_v29, 0.0  ;;  %v15153_v35 = vld [vmem:[#allocation37_spill] sm:$0xff]  ;;  %v15154_v51 = vld [vmem:[#allocation34_spill] sm:$0xff] }
 0xad2   :  { %8208 = vst [vmem:[%s14630_s7 + $0x90] sm:$0xff] %v8144_v7  ;;  %8209 = vst [vmem:[%s14630_s7 + $0x98] sm:$0xff] %v8145_v62  ;;  %v8162_v4 = vmax.f32 %v15153_v35, 0.0  ;;  %v8163_v43 = vmax.f32 %v15154_v51, 0.0  ;;  %v15155_v26 = vld [vmem:[#allocation25_spill] sm:$0xff]  ;;  %v8166_v61 = vmax.f32 %v15157_v28, 0.0 }
 0xad3   :  { %8210 = vst [vmem:[%s14630_s7 + $0xa0] sm:$0xff] %v8146_v20  ;;  %8211 = vst [vmem:[%s14630_s7 + $0xa8] sm:$0xff] %v8147_v23  ;;  %v8164_v37 = vmax.f32 %v15155_v26, 0.0  ;;  %v8167_v15 = vmax.f32 %v15158_v2, 0.0  ;;  %v15159_v58 = vld [vmem:[#allocation13_spill] sm:$0xff]  ;;  %v15162_v55 = vld [vmem:[#allocation27_spill] sm:$0xff] }
 0xad4   :  { %8212 = vst [vmem:[%s14630_s7 + $0xb0] sm:$0xff] %v8148_v54  ;;  %8213 = vst [vmem:[%s14630_s7 + $0xb8] sm:$0xff] %v8149_v25  ;;  %v8168_v14 = vmax.f32 %v15159_v58, 0.0  ;;  %v15160_v8 = vld [vmem:[#allocation5_spill] sm:$0xff]  ;;  %v8171_v34 = vmax.f32 %v15162_v55, 0.0  ;;  %v15163_v57 = vld [vmem:[#allocation8_spill] sm:$0xff] }
 0xad5   :  { %8214 = vst [vmem:[%s14630_s7 + $0xc0] sm:$0xff] %v8150_v33  ;;  %8215 = vst [vmem:[%s14630_s7 + $0xc8] sm:$0xff] %v8151_v42  ;;  %v8169_v48 = vmax.f32 %v15160_v8, 0.0  ;;  %v15161_v40 = vld [vmem:[#allocation9_spill] sm:$0xff]  ;;  %v8172_v47 = vmax.f32 %v15163_v57, 0.0  ;;  %v15164_v50 = vld [vmem:[#allocation10_spill] sm:$0xff] }
 0xad6   :  { %8216 = vst [vmem:[%s14630_s7 + $0xd0] sm:$0xff] %v8152_v44  ;;  %8217 = vst [vmem:[%s14630_s7 + $0xd8] sm:$0xff] %v8153_v39  ;;  %v8170_v9 = vmax.f32 %v15161_v40, 0.0  ;;  %v8173_v21 = vmax.f32 %v15164_v50, 0.0  ;;  %v8174_v12 = vmax.f32 %v14320_v6, 0.0  ;;  %v8175_v30 = vmax.f32 %v14323_v11, 0.0 }
 0xad7   :  { %8218 = vst [vmem:[%s14630_s7 + $0xe0] sm:$0xff] %v8154_v56  ;;  %8219 = vst [vmem:[%s14630_s7 + $0xe8] sm:$0xff] %v8155_v24  ;;  %v8176_v46 = vmax.f32 %v14326_v63, 0.0  ;;  %v8177_v5 = vmax.f32 %v14329_v52, 0.0  ;;  %v8178_v6 = vmax.f32 %v14332_v22, 0.0  ;;  %v8179_v52 = vmax.f32 %v14335_v41, 0.0 }
 0xad8   :  { %8220 = vst [vmem:[%s14630_s7 + $0xf0] sm:$0xff] %v8156_v3  ;;  %8221 = vst [vmem:[%s14630_s7 + $0xf8] sm:$0xff] %v8157_v16  ;;  %v8180_v11 = vmax.f32 %v14338_v27, 0.0  ;;  %v8181_v63 = vmax.f32 %v14341_v13, 0.0  ;;  %v8182_v27 = vmax.f32 %v14344_v19, 0.0  ;;  %v8183_v41 = vmax.f32 %v14347_v18, 0.0 }
 0xad9   :  { %8222 = vst [vmem:[%s14630_s7 + $0x100] sm:$0xff] %v8158_v32  ;;  %8223 = vst [vmem:[%s14630_s7 + $0x108] sm:$0xff] %v8159_v1  ;;  %v8184_v22 = vmax.f32 %v14350_v45, 0.0  ;;  %v8185_v13 = vmax.f32 %v14353_v60, 0.0  ;;  %v8186_v19 = vmax.f32 %v14356_v36, 0.0  ;;  %v8187_v18 = vmax.f32 %v14359_v31, 0.0 }
 0xada   :  { %8224 = vst [vmem:[%s14630_s7 + $0x110] sm:$0xff] %v8160_v59  ;;  %8225 = vst [vmem:[%s14630_s7 + $0x118] sm:$0xff] %v8161_v53  ;;  %v8188_v45 = vmax.f32 %v14362_v38, 0.0  ;;  %v8189_v60 = vmax.f32 %v14365_v17, 0.0 }
 0xadb   :  { %8226 = vst [vmem:[%s14630_s7 + $0x120] sm:$0xff] %v8162_v4  ;;  %8227 = vst [vmem:[%s14630_s7 + $0x128] sm:$0xff] %v8163_v43 }
 0xadc   :  { %8228 = vst [vmem:[%s14630_s7 + $0x130] sm:$0xff] %v8164_v37  ;;  %8229 = vst [vmem:[%s14630_s7 + $0x138] sm:$0xff] %v8165_v0 }
 0xadd   :  { %8230 = vst [vmem:[%s14630_s7 + $0x140] sm:$0xff] %v8166_v61  ;;  %8231 = vst [vmem:[%s14630_s7 + $0x148] sm:$0xff] %v8167_v15 }
 0xade   :  { %8232 = vst [vmem:[%s14630_s7 + $0x150] sm:$0xff] %v8168_v14  ;;  %8233 = vst [vmem:[%s14630_s7 + $0x158] sm:$0xff] %v8169_v48 }
 0xadf   :  { %8234 = vst [vmem:[%s14630_s7 + $0x160] sm:$0xff] %v8170_v9  ;;  %8235 = vst [vmem:[%s14630_s7 + $0x168] sm:$0xff] %v8171_v34 }
 0xae0   :  { %8236 = vst [vmem:[%s14630_s7 + $0x170] sm:$0xff] %v8172_v47  ;;  %8237 = vst [vmem:[%s14630_s7 + $0x178] sm:$0xff] %v8173_v21 }
 0xae1   :  { %8238 = vst [vmem:[%s14630_s7 + $0x180] sm:$0xff] %v8174_v12  ;;  %8239 = vst [vmem:[%s14630_s7 + $0x188] sm:$0xff] %v8175_v30 }
 0xae2   :  { %8240 = vst [vmem:[%s14630_s7 + $0x190] sm:$0xff] %v8176_v46  ;;  %8241 = vst [vmem:[%s14630_s7 + $0x198] sm:$0xff] %v8177_v5 }
 0xae3   :  { %8242 = vst [vmem:[%s14630_s7 + $0x1a0] sm:$0xff] %v8178_v6  ;;  %8243 = vst [vmem:[%s14630_s7 + $0x1a8] sm:$0xff] %v8179_v52 }
 0xae4   :  { %8244 = vst [vmem:[%s14630_s7 + $0x1b0] sm:$0xff] %v8180_v11  ;;  %8245 = vst [vmem:[%s14630_s7 + $0x1b8] sm:$0xff] %v8181_v63 }
 0xae5   :  { %8246 = vst [vmem:[%s14630_s7 + $0x1c0] sm:$0xff] %v8182_v27  ;;  %8247 = vst [vmem:[%s14630_s7 + $0x1c8] sm:$0xff] %v8183_v41 }
 0xae6   :  { %8248 = vst [vmem:[%s14630_s7 + $0x1d0] sm:$0xff] %v8184_v22  ;;  %8249 = vst [vmem:[%s14630_s7 + $0x1d8] sm:$0xff] %v8185_v13 }
 0xae7   :  { %8250 = vst [vmem:[%s14630_s7 + $0x1e0] sm:$0xff] %v8186_v19  ;;  %8251 = vst [vmem:[%s14630_s7 + $0x1e8] sm:$0xff] %v8187_v18 }
 0xae8   :  { %8252 = vst [vmem:[%s14630_s7 + $0x1f0] sm:$0xff] %v8188_v45  ;;  %8253 = vst [vmem:[%s14630_s7 + $0x1f8] sm:$0xff] %v8189_v60 }

</bundles_post_ra>
